<compile_context>
chip_gen: v5e
topology: v5e:2x2
jax: 0.10.0
libtpu: 0.0.40
codegen_flags: <defaults>
</compile_context>

<pallas_src>
import functools

import jax
import jax.numpy as jnp
from jax import lax
from jax.experimental import pallas as pl
from jax.experimental.pallas import tpu as pltpu

INPUT_DIM = 32
H1, H2, H3, OUT = 1024, 512, 256, 1
LEAKY_SLOPE = 0.2


def _leaky_relu(x, slope=LEAKY_SLOPE):
    # Exactly LeakyReLU(slope) for 0 < slope < 1; 2 VPU ops (f32).
    return jnp.maximum(x, slope * x)


def mlp_kernel(x_ref,
               w1_ref, b1_ref,
               w2_ref, b2_ref,
               w3_ref, b3_ref,
               w4_ref, b4_ref,
               o_ref):
    # x_ref: (BT, INPUT_DIM) f32 rows of the batch.
    # w1..w3: bf16 in PyTorch (out, in) layout; biases f32 (out, 1).
    # w4: f32 (in, 1); b4: f32 (1, 1).
    x = x_ref[...].astype(jnp.bfloat16)

    # Layer 1: contract the shared K=32 axis of (H1, K) and (BT, K)
    # ('ok,bk->ob'); batch lands on the lane axis. bf16 MXU, f32 accumulate.
    h = lax.dot_general(
        w1_ref[...], x,
        dimension_numbers=(((1,), (1,)), ((), ())),
        preferred_element_type=jnp.float32)
    h = _leaky_relu(h + b1_ref[...])

    h = jnp.dot(w2_ref[...], h.astype(jnp.bfloat16),
                preferred_element_type=jnp.float32)
    h = _leaky_relu(h + b2_ref[...])

    h = jnp.dot(w3_ref[...], h.astype(jnp.bfloat16),
                preferred_element_type=jnp.float32)
    h = _leaky_relu(h + b3_ref[...])

    # Final layer (out_features = 1): VPU multiply + sublane reduce instead
    # of an N=1 MXU matmul; result is already a lane-dense (1, BT) row.
    out = jnp.sum(h * w4_ref[...], axis=0, keepdims=True) + b4_ref[...]

    o_ref[...] = out.astype(o_ref.dtype)


def _choose_batch_tile(batch):
    # Fill the 256-wide MXU on v6e/v7x and amortize per-step pipeline
    # overhead, while keeping >= 2 grid steps whenever possible so both v7x
    # TensorCores get work via the "parallel" grid axis.
    for bt in (512, 256):
        if batch >= 2 * bt:
            return bt
    return 128


@jax.jit
def discriminator_forward(x, params):
    """x: (B, INPUT_DIM) float32. Returns (B, 1) float32 == Discriminator(x)."""
    B, D = x.shape
    assert D == INPUT_DIM

    # Weights cast to bf16 at the boundary (no-op if already stored bf16).
    w1 = params["w1"].astype(jnp.bfloat16)   # (1024, 32)
    w2 = params["w2"].astype(jnp.bfloat16)   # (512, 1024)
    w3 = params["w3"].astype(jnp.bfloat16)   # (256, 512)
    w4 = params["w4"].astype(jnp.float32)    # (256, 1)  -- VPU path, keep f32
    b1 = params["b1"].astype(jnp.float32)    # (1024, 1)
    b2 = params["b2"].astype(jnp.float32)    # (512, 1)
    b3 = params["b3"].astype(jnp.float32)    # (256, 1)
    b4 = params["b4"].astype(jnp.float32)    # (1, 1)

    bt = _choose_batch_tile(B)
    b_pad = pl.cdiv(B, bt) * bt
    if b_pad != B:
        x = jnp.pad(x, ((0, b_pad - B), (0, 0)))   # cheap row pad, no transpose

    # Weights/biases: full block, constant index -> resident in VMEM.
    resident = lambda arr: pl.BlockSpec(arr.shape, lambda i: (0, 0))

    out_row = pl.pallas_call(
        mlp_kernel,
        out_shape=jax.ShapeDtypeStruct((1, b_pad), jnp.float32),
        grid_spec=pltpu.PrefetchScalarGridSpec(
            num_scalar_prefetch=0,
            grid=(b_pad // bt,),
            in_specs=[
                pl.BlockSpec((bt, INPUT_DIM), lambda i: (i, 0)),
                resident(w1), resident(b1),
                resident(w2), resident(b2),
                resident(w3), resident(b3),
                resident(w4), resident(b4),
            ],
            out_specs=pl.BlockSpec((1, bt), lambda i: (0, i)),
        ),
        compiler_params=pltpu.CompilerParams(
            dimension_semantics=("parallel",),
            vmem_limit_bytes=32 * 1024 * 1024,
        ),
    )(x, w1, b1, w2, b2, w3, b3, w4, b4)

    return out_row[0, :B].reshape(B, OUT)


def init_params(key):
    """PyTorch-style uniform init. w1..w3 stored bf16 in (out, in) layout;
    biases f32 (out, 1). w4 is stored pre-transposed as (in_features, 1) f32
    so the kernel's VPU reduction needs no transpose (note: PyTorch's
    checkpoint layout for that layer is (1, 256))."""
    layer_dims = [(H1, INPUT_DIM), (H2, H1), (H3, H2), (OUT, H3)]
    params = {}
    for idx, (fan_out, fan_in) in enumerate(layer_dims, start=1):
        key, kw, kb = jax.random.split(key, 3)
        bound = 1.0 / jnp.sqrt(fan_in)
        w = jax.random.uniform(kw, (fan_out, fan_in), jnp.float32,
                               minval=-bound, maxval=bound)
        b = jax.random.uniform(kb, (fan_out, 1), jnp.float32,
                               minval=-bound, maxval=bound)
        if idx == 4:
            params[f"w{idx}"] = w.T                      # (256, 1) f32
        else:
            params[f"w{idx}"] = w.astype(jnp.bfloat16)   # bf16 MXU operand
        params[f"b{idx}"] = b
    return params


def reference_forward(x, params):
    """Pure-JAX reference matching the kernel's numerics: bf16 matmul
    operands, f32 accumulation, f32 bias add + LeakyReLU."""
    def mm(a_f32, w):
        return jnp.matmul(a_f32.astype(jnp.bfloat16),
                          w.astype(jnp.bfloat16).T,
                          preferred_element_type=jnp.float32)
    h = mm(x, params["w1"]) + params["b1"].T
    h = jnp.where(h > 0, h, LEAKY_SLOPE * h)
    h = mm(h, params["w2"]) + params["b2"].T
    h = jnp.where(h > 0, h, LEAKY_SLOPE * h)
    h = mm(h, params["w3"]) + params["b3"].T
    h = jnp.where(h > 0, h, LEAKY_SLOPE * h)
    return jnp.matmul(h, params["w4"].astype(jnp.float32)) + params["b4"]


if __name__ == "__main__":
    key = jax.random.PRNGKey(0)
    key, kx = jax.random.split(key)
    params = init_params(key)

    B = 16
    x = jax.random.normal(kx, (B, INPUT_DIM), jnp.float32)

    out = jax.block_until_ready(discriminator_forward(x, params))
    ref = reference_forward(x, params)

    assert out.shape == (B, OUT)
    max_err = float(jnp.max(jnp.abs(out - ref)))
    assert jnp.allclose(out, ref, atol=1e-2, rtol=1e-2), max_err

    print("KERNEL_OK")
</pallas_src>

<mosaic_0001>
module attributes {stable_mosaic.version = 11 : i64} {
  func.func @mlp_kernel(%arg0: i32, %arg1: memref<128x32xf32, #tpu.memory_space<vmem>>, %arg2: memref<1024x32xbf16, #tpu.memory_space<vmem>>, %arg3: memref<1024x1xf32, #tpu.memory_space<vmem>>, %arg4: memref<512x1024xbf16, #tpu.memory_space<vmem>>, %arg5: memref<512x1xf32, #tpu.memory_space<vmem>>, %arg6: memref<256x512xbf16, #tpu.memory_space<vmem>>, %arg7: memref<256x1xf32, #tpu.memory_space<vmem>>, %arg8: memref<256x1xf32, #tpu.memory_space<vmem>>, %arg9: memref<1x1xf32, #tpu.memory_space<vmem>>, %arg10: memref<1x128xf32, #tpu.memory_space<vmem>>) attributes {dimension_semantics = [#tpu.dimension_semantics<parallel>], iteration_bounds = array<i64: 1>, scalar_prefetch = 0 : i64, scratch_operands = 0 : i64, tpu.core_type = #tpu.core_type<tc>, window_params = [{transform_indices = @transform_0, window_bounds = array<i64: 128, 32>}, {pipeline_mode = #tpu.pipeline_mode<synchronous>, transform_indices = @transform_1, window_bounds = array<i64: 1024, 32>}, {pipeline_mode = #tpu.pipeline_mode<synchronous>, transform_indices = @transform_2, window_bounds = array<i64: 1024, 1>}, {pipeline_mode = #tpu.pipeline_mode<synchronous>, transform_indices = @transform_3, window_bounds = array<i64: 512, 1024>}, {pipeline_mode = #tpu.pipeline_mode<synchronous>, transform_indices = @transform_4, window_bounds = array<i64: 512, 1>}, {pipeline_mode = #tpu.pipeline_mode<synchronous>, transform_indices = @transform_5, window_bounds = array<i64: 256, 512>}, {pipeline_mode = #tpu.pipeline_mode<synchronous>, transform_indices = @transform_6, window_bounds = array<i64: 256, 1>}, {pipeline_mode = #tpu.pipeline_mode<synchronous>, transform_indices = @transform_7, window_bounds = array<i64: 256, 1>}, {pipeline_mode = #tpu.pipeline_mode<synchronous>, transform_indices = @transform_8, window_bounds = array<i64: 1, 1>}, {transform_indices = @transform_9, window_bounds = array<i64: 1, 128>}]} {
    %c0 = arith.constant 0 : index
    %c0_0 = arith.constant 0 : index
    %0 = vector.load %arg1[%c0, %c0_0] : memref<128x32xf32, #tpu.memory_space<vmem>>, vector<128x32xf32>
    %1 = arith.truncf %0 : vector<128x32xf32> to vector<128x32xbf16>
    %c0_1 = arith.constant 0 : index
    %c0_2 = arith.constant 0 : index
    %2 = vector.load %arg2[%c0_1, %c0_2] : memref<1024x32xbf16, #tpu.memory_space<vmem>>, vector<1024x32xbf16>
    %cst = arith.constant dense<0.000000e+00> : vector<1024x128xf32>
    %3 = tpu.matmul %2, %1, %cst {dimension_numbers = #tpu.dot_dimension_numbers<[1], [1], [0], [0], [0, 0, 1, 0], [], []>} : vector<1024x32xbf16>, vector<128x32xbf16>, vector<1024x128xf32> -> vector<1024x128xf32>
    %c0_3 = arith.constant 0 : index
    %c0_4 = arith.constant 0 : index
    %4 = vector.load %arg3[%c0_3, %c0_4] : memref<1024x1xf32, #tpu.memory_space<vmem>>, vector<1024x1xf32>
    %5 = vector.broadcast %4 : vector<1024x1xf32> to vector<1024x128xf32>
    %6 = arith.addf %3, %5 : vector<1024x128xf32>
    %cst_5 = arith.constant 2.000000e-01 : f32
    %7 = vector.broadcast %cst_5 : f32 to vector<1024x128xf32>
    %8 = arith.mulf %7, %6 : vector<1024x128xf32>
    %9 = arith.maximumf %6, %8 : vector<1024x128xf32>
    %c0_6 = arith.constant 0 : index
    %c0_7 = arith.constant 0 : index
    %10 = vector.load %arg4[%c0_6, %c0_7] : memref<512x1024xbf16, #tpu.memory_space<vmem>>, vector<512x1024xbf16>
    %11 = arith.truncf %9 : vector<1024x128xf32> to vector<1024x128xbf16>
    %cst_8 = arith.constant dense<0.000000e+00> : vector<512x128xf32>
    %12 = tpu.matmul %10, %11, %cst_8 {dimension_numbers = #tpu.dot_dimension_numbers<[1], [0], [0], [1], [0, 0, 1, 1], [], []>} : vector<512x1024xbf16>, vector<1024x128xbf16>, vector<512x128xf32> -> vector<512x128xf32>
    %c0_9 = arith.constant 0 : index
    %c0_10 = arith.constant 0 : index
    %13 = vector.load %arg5[%c0_9, %c0_10] : memref<512x1xf32, #tpu.memory_space<vmem>>, vector<512x1xf32>
    %14 = vector.broadcast %13 : vector<512x1xf32> to vector<512x128xf32>
    %15 = arith.addf %12, %14 : vector<512x128xf32>
    %cst_11 = arith.constant 2.000000e-01 : f32
    %16 = vector.broadcast %cst_11 : f32 to vector<512x128xf32>
    %17 = arith.mulf %16, %15 : vector<512x128xf32>
    %18 = arith.maximumf %15, %17 : vector<512x128xf32>
    %c0_12 = arith.constant 0 : index
    %c0_13 = arith.constant 0 : index
    %19 = vector.load %arg6[%c0_12, %c0_13] : memref<256x512xbf16, #tpu.memory_space<vmem>>, vector<256x512xbf16>
    %20 = arith.truncf %18 : vector<512x128xf32> to vector<512x128xbf16>
    %cst_14 = arith.constant dense<0.000000e+00> : vector<256x128xf32>
    %21 = tpu.matmul %19, %20, %cst_14 {dimension_numbers = #tpu.dot_dimension_numbers<[1], [0], [0], [1], [0, 0, 1, 1], [], []>} : vector<256x512xbf16>, vector<512x128xbf16>, vector<256x128xf32> -> vector<256x128xf32>
    %c0_15 = arith.constant 0 : index
    %c0_16 = arith.constant 0 : index
    %22 = vector.load %arg7[%c0_15, %c0_16] : memref<256x1xf32, #tpu.memory_space<vmem>>, vector<256x1xf32>
    %23 = vector.broadcast %22 : vector<256x1xf32> to vector<256x128xf32>
    %24 = arith.addf %21, %23 : vector<256x128xf32>
    %cst_17 = arith.constant 2.000000e-01 : f32
    %25 = vector.broadcast %cst_17 : f32 to vector<256x128xf32>
    %26 = arith.mulf %25, %24 : vector<256x128xf32>
    %27 = arith.maximumf %24, %26 : vector<256x128xf32>
    %c0_18 = arith.constant 0 : index
    %c0_19 = arith.constant 0 : index
    %28 = vector.load %arg8[%c0_18, %c0_19] : memref<256x1xf32, #tpu.memory_space<vmem>>, vector<256x1xf32>
    %29 = vector.broadcast %28 : vector<256x1xf32> to vector<256x128xf32>
    %30 = arith.mulf %27, %29 : vector<256x128xf32>
    %cst_20 = arith.constant dense<0.000000e+00> : vector<128xf32>
    %31 = vector.multi_reduction <add>, %30, %cst_20 [0] : vector<256x128xf32> to vector<128xf32>
    %32 = vector.shape_cast %31 : vector<128xf32> to vector<1x128xf32>
    %c0_21 = arith.constant 0 : index
    %c0_22 = arith.constant 0 : index
    %33 = vector.load %arg9[%c0_21, %c0_22] : memref<1x1xf32, #tpu.memory_space<vmem>>, vector<1x1xf32>
    %34 = vector.broadcast %33 : vector<1x1xf32> to vector<1x128xf32>
    %35 = arith.addf %32, %34 : vector<1x128xf32>
    %c0_23 = arith.constant 0 : index
    %c0_24 = arith.constant 0 : index
    %36 = vector.load %arg10[%c0_23, %c0_24] : memref<1x128xf32, #tpu.memory_space<vmem>>, vector<1x128xf32>
    tpu.vector_store %arg10[%c0_23, %c0_24], %35 {strides = array<i32>} : memref<1x128xf32, #tpu.memory_space<vmem>>, vector<1x128xf32>,
    return
  }
  func.func @transform_0(%arg0: i32) -> (i32, i32) {
    %c0_i32 = arith.constant 0 : i32
    %c0_i32_0 = arith.constant 0 : i32
    return %arg0, %c0_i32 : i32, i32
  }
  func.func @transform_1(%arg0: i32) -> (i32, i32) {
    %c0_i32 = arith.constant 0 : i32
    %c0_i32_0 = arith.constant 0 : i32
    %c0_i32_1 = arith.constant 0 : i32
    return %c0_i32, %c0_i32_0 : i32, i32
  }
  func.func @transform_2(%arg0: i32) -> (i32, i32) {
    %c0_i32 = arith.constant 0 : i32
    %c0_i32_0 = arith.constant 0 : i32
    %c0_i32_1 = arith.constant 0 : i32
    return %c0_i32, %c0_i32_0 : i32, i32
  }
  func.func @transform_3(%arg0: i32) -> (i32, i32) {
    %c0_i32 = arith.constant 0 : i32
    %c0_i32_0 = arith.constant 0 : i32
    %c0_i32_1 = arith.constant 0 : i32
    return %c0_i32, %c0_i32_0 : i32, i32
  }
  func.func @transform_4(%arg0: i32) -> (i32, i32) {
    %c0_i32 = arith.constant 0 : i32
    %c0_i32_0 = arith.constant 0 : i32
    %c0_i32_1 = arith.constant 0 : i32
    return %c0_i32, %c0_i32_0 : i32, i32
  }
  func.func @transform_5(%arg0: i32) -> (i32, i32) {
    %c0_i32 = arith.constant 0 : i32
    %c0_i32_0 = arith.constant 0 : i32
    %c0_i32_1 = arith.constant 0 : i32
    return %c0_i32, %c0_i32_0 : i32, i32
  }
  func.func @transform_6(%arg0: i32) -> (i32, i32) {
    %c0_i32 = arith.constant 0 : i32
    %c0_i32_0 = arith.constant 0 : i32
    %c0_i32_1 = arith.constant 0 : i32
    return %c0_i32, %c0_i32_0 : i32, i32
  }
  func.func @transform_7(%arg0: i32) -> (i32, i32) {
    %c0_i32 = arith.constant 0 : i32
    %c0_i32_0 = arith.constant 0 : i32
    %c0_i32_1 = arith.constant 0 : i32
    return %c0_i32, %c0_i32_0 : i32, i32
  }
  func.func @transform_8(%arg0: i32) -> (i32, i32) {
    %c0_i32 = arith.constant 0 : i32
    %c0_i32_0 = arith.constant 0 : i32
    %c0_i32_1 = arith.constant 0 : i32
    return %c0_i32, %c0_i32_0 : i32, i32
  }
  func.func @transform_9(%arg0: i32) -> (i32, i32) {
    %c0_i32 = arith.constant 0 : i32
    %c0_i32_0 = arith.constant 0 : i32
    return %c0_i32, %arg0 : i32, i32
  }
}

</mosaic_0001>

<bundles_post_ra>
// kernel: discriminator_forward.1
= control target key start
LH: loop header
LB: loop body
LE: loop exit
PB: predicated region body
PF: predicated region fallthrough
CT: control target
= control target key end

     0   :  { %s12774_s0 = inlined_call_operand.vmem [shape: f32[128,32], index: 0, kind: input, shape index: {}]   ;;  %s12775_s1 = inlined_call_operand.vmem [shape: bf16[1024,32], index: 1, kind: input, shape index: {}]   ;;  %s12776_s2 = inlined_call_operand.vmem [shape: f32[1024,1], index: 2, kind: input, shape index: {}]   ;;  %s12777_s3 = inlined_call_operand.hbm [shape: bf16[512,1024], index: 3, kind: input, shape index: {}]   ;;  %s12778_s4 = inlined_call_operand.vmem [shape: f32[512,1], index: 4, kind: input, shape index: {}]   ;;  %s12779_s5 = inlined_call_operand.vmem [shape: bf16[256,512], index: 5, kind: input, shape index: {}]   ;;  %s12780_s6 = inlined_call_operand.vmem [shape: f32[256,1], index: 6, kind: input, shape index: {}]   ;;  %s12781_s7 = inlined_call_operand.vmem [shape: f32[256,1], index: 7, kind: input, shape index: {}]   ;;  %s12782_s8 = inlined_call_operand.<no memory space> [shape: f32[1,1], index: 8, kind: input, shape index: {}]   ;;  %s12783_s9 = inlined_call_operand.vmem [shape: f32[1,128], index: 9, kind: output, shape index: {}]  }
   0x1   :  { %v14_v0 = vstv %s12782_s8 }
   0x2   :  { %15 = vst [vmem:[#allocation2] sm:$0x1] %v14_v0 }
   0x3   :  { %16 = vsyncpa [#allocation4], 0  ;;  %s27_s13 = sshll.u32 %s12777_s3, 4  ;;  %s8884_s14 = smov [#allocation3]   ;;  %s28_s13 = int_to_ptr.hbm [resolvable:$true] %s27_s13 }
   0x4   :  { %s29_s15 = sshll.u32 %s8884_s14, 4  ;;  %s8885_s16 = smov 512   ;;  %s30_s15 = int_to_ptr.vmem [resolvable:$true] %s29_s15 }
   0x5   :  { %s8886_s17 = smov 32  }
   0x6   :  { %35 = dma.hbm_to_vmem [thread:$0]  %s28_s13, 32768, %s30_s15, [#allocation4], %s8885_s16, %s8885_s16, %s8886_s17  }
   0x7   :  { %8882 = dma.done.wait [#allocation4], 32768  }
   0x8   :  { %8883 = vsyncadd [#allocation4], 4294934528  ;;  %v8887_v1 = vmov 0   ;;  %v232_v2 = vld [vmem:[%s12776_s2 + $0xf0] sm:$0xff]  ;;  %v230_v3 = vld [vmem:[%s12776_s2 + $0xe0] sm:$0xff]  ;;  %vm1290_vm0 = vcmask 261120  }
   0x9   :  { %8857 = vset.pattern.permute.xlu2 %v8887_v1  ;;  %8856 = vset.pattern.permute.xlu1 %v8887_v1  ;;  %v216_v4 = vld [vmem:[%s12776_s2 + $0x70] sm:$0xff]  ;;  %v65_v6 = vld [vmem:[%s12774_s0 + $0x78] sm:$0xff]  ;;  %v62_v8 = vld [vmem:[%s12774_s0 + $0x60] sm:$0xff] }
   0xa   :  { %8855 = vset.pattern.permute.xlu0 %v8887_v1  ;;  %472 = vperm.xlu2 %8857, %v230_v3   ;;  %v64_v5 = vld [vmem:[%s12774_s0 + $0x70] sm:$0xff]  ;;  %v63_v9 = vld [vmem:[%s12774_s0 + $0x68] sm:$0xff]  ;;  %v233_v11 = vld [vmem:[%s12776_s2 + $0xf8] sm:$0xff] }
   0xb   :  { %482 = vperm.xlu0 %8855, %v232_v2   ;;  %402 = vperm.xlu1 %8856, %v216_v4   ;;  %v73_v7 = vpack.c.bf16 %v65_v6, %v64_v5  ;;  %v231_v12 = vld [vmem:[%s12776_s2 + $0xe8] sm:$0xff]  ;;  %v72_v13 = vpack.c.bf16 %v63_v9, %v62_v8  ;;  %v217_v14 = vld [vmem:[%s12776_s2 + $0x78] sm:$0xff]  ;;  %v60_v16 = vld [vmem:[%s12774_s0 + $0x50] sm:$0xff] }
   0xc   :  { %v61_v17 = vld [vmem:[%s12774_s0 + $0x58] sm:$0xff]  ;;  %v228_v18 = vld [vmem:[%s12776_s2 + $0xd0] sm:$0xff]  ;;  %v214_v19 = vld [vmem:[%s12776_s2 + $0x60] sm:$0xff] }
   0xd   :  { %v1505_v10 = vsel %vm1290_vm0, %v73_v7, 0  ;;  %v1502_v15 = vsel %vm1290_vm0, %v72_v13, 0  ;;  %v71_v20 = vpack.c.bf16 %v61_v17, %v60_v16  ;;  %v215_v21 = vld [vmem:[%s12776_s2 + $0x68] sm:$0xff]  ;;  %v58_v23 = vld [vmem:[%s12774_s0 + $0x40] sm:$0xff]  ;;  %v229_v25 = vld [vmem:[%s12776_s2 + $0xd8] sm:$0xff] }
   0xe   :  { %1507 = vmatpush.bf16.xpose.msra.mxu0 %v1505_v10  ;;  %v59_v24 = vld [vmem:[%s12774_s0 + $0x48] sm:$0xff]  ;;  %v213_v26 = vld [vmem:[%s12776_s2 + $0x58] sm:$0xff]  ;;  %v212_v28 = vld [vmem:[%s12776_s2 + $0x50] sm:$0xff] }
   0xf   :  { %v1499_v22 = vsel %vm1290_vm0, %v71_v20, 0  ;;  %v70_v27 = vpack.c.bf16 %v59_v24, %v58_v23  ;;  %v56_v30 = vld [vmem:[%s12774_s0 + $0x30] sm:$0xff]  ;;  %v57_v31 = vld [vmem:[%s12774_s0 + $0x38] sm:$0xff]  ;;  %v226_v32 = vld [vmem:[%s12776_s2 + $0xc0] sm:$0xff] }
  0x10   :  { %v210_v33 = vld [vmem:[%s12776_s2 + $0x40] sm:$0xff]  ;;  %v69_v34 = vpack.c.bf16 %v57_v31, %v56_v30  ;;  %v227_v35 = vld [vmem:[%s12776_s2 + $0xc8] sm:$0xff]  ;;  %v225_v40 = vld [vmem:[%s12776_s2 + $0xb8] sm:$0xff] }
  0x11   :  { %v1496_v29 = vsel %vm1290_vm0, %v70_v27, 0  ;;  %v54_v37 = vld [vmem:[%s12774_s0 + $0x20] sm:$0xff]  ;;  %v55_v38 = vld [vmem:[%s12774_s0 + $0x28] sm:$0xff]  ;;  %v224_v42 = vld [vmem:[%s12776_s2 + $0xb0] sm:$0xff] }
  0x12   :  { %477 = vperm.xlu2 %8857, %v231_v12   ;;  %v1493_v36 = vsel %vm1290_vm0, %v69_v34, 0  ;;  %v211_v39 = vld [vmem:[%s12776_s2 + $0x48] sm:$0xff]  ;;  %v68_v41 = vpack.c.bf16 %v55_v38, %v54_v37  ;;  %v52_v44 = vld [vmem:[%s12774_s0 + $0x10] sm:$0xff]  ;;  %v53_v45 = vld [vmem:[%s12774_s0 + $0x18] sm:$0xff] }
  0x13   :  { %487 = vperm.xlu0 %8855, %v233_v11   ;;  %407 = vperm.xlu1 %8856, %v217_v14   ;;  %v222_v46 = vld [vmem:[%s12776_s2 + $0xa0] sm:$0xff]  ;;  %v208_v47 = vld [vmem:[%s12776_s2 + $0x30] sm:$0xff]  ;;  %v67_v48 = vpack.c.bf16 %v53_v45, %v52_v44  ;;  %v209_v49 = vld [vmem:[%s12776_s2 + $0x38] sm:$0xff] }
  0x14   :  { %v1490_v43 = vsel %vm1290_vm0, %v68_v41, 0  ;;  %v50_v51 = vld [vmem:[%s12774_s0] sm:$0xff]  ;;  %v51_v52 = vld [vmem:[%s12774_s0 + $0x8] sm:$0xff]  ;;  %v220_v58 = vld [vmem:[%s12776_s2 + $0x90] sm:$0xff] }
  0x15   :  { %v1487_v50 = vsel %vm1290_vm0, %v67_v48, 0  ;;  %v223_v53 = vld [vmem:[%s12776_s2 + $0xa8] sm:$0xff]  ;;  %v66_v55 = vpack.c.bf16 %v51_v52, %v50_v51  ;;  %v206_v56 = vld [vmem:[%s12776_s2 + $0x20] sm:$0xff]  ;;  %v204_v59 = vld [vmem:[%s12776_s2 + $0x10] sm:$0xff] }
  0x16   :  { %1508 = vmatpush.bf16.xpose.msra.mxu0 %v1502_v15  ;;  %v207_v54 = vld [vmem:[%s12776_s2 + $0x28] sm:$0xff]  ;;  %v221_v60 = vld [vmem:[%s12776_s2 + $0x98] sm:$0xff]  ;;  %v8459_v61 = vld [vmem:[%s12775_s1] sm:$0xff] }
  0x17   :  { %v1484_v57 = vsel %vm1290_vm0, %v66_v55, 0  ;;  %v205_v62 = vld [vmem:[%s12776_s2 + $0x18] sm:$0xff]  ;;  %v219_v63 = vld [vmem:[%s12776_s2 + $0x88] sm:$0xff]  ;;  %v218_v0 = vld [vmem:[%s12776_s2 + $0x80] sm:$0xff] }
  0x18   :  { %v248_v1 = vld [vmem:[%s12776_s2 + $0x170] sm:$0xff]  ;;  %v202_v2 = vld [vmem:[%s12776_s2] sm:$0xff]  ;;  %v203_v3 = vld [vmem:[%s12776_s2 + $0x8] sm:$0xff] }
  0x19   :  { %v8460_v4 = vld [vmem:[%s12775_s1 + $0x8] sm:$0xff]  ;;  %v249_v6 = vld [vmem:[%s12776_s2 + $0x178] sm:$0xff]  ;;  %v246_v7 = vld [vmem:[%s12776_s2 + $0x160] sm:$0xff] }
  0x1a   :  { %462 = vperm.xlu2 %8857, %v228_v18   ;;  %v247_v5 = vld [vmem:[%s12776_s2 + $0x168] sm:$0xff]  ;;  %v242_v8 = vld [vmem:[%s12776_s2 + $0x140] sm:$0xff]  ;;  %v244_v9 = vld [vmem:[%s12776_s2 + $0x150] sm:$0xff] }
  0x1b   :  { %392 = vperm.xlu0 %8855, %v214_v19   ;;  %397 = vperm.xlu1 %8856, %v215_v21   ;;  %v245_v10 = vld [vmem:[%s12776_s2 + $0x158] sm:$0xff]  ;;  %v8461_v11 = vld [vmem:[%s12775_s1 + $0x10] sm:$0xff]  ;;  %v243_v13 = vld [vmem:[%s12776_s2 + $0x148] sm:$0xff] }
  0x1c   :  { %v241_v12 = vld [vmem:[%s12776_s2 + $0x138] sm:$0xff]  ;;  %v240_v14 = vld [vmem:[%s12776_s2 + $0x130] sm:$0xff]  ;;  %v238_v16 = vld [vmem:[%s12776_s2 + $0x120] sm:$0xff] }
  0x1d   :  { %v236_v15 = vld [vmem:[%s12776_s2 + $0x110] sm:$0xff]  ;;  %v239_v17 = vld [vmem:[%s12776_s2 + $0x128] sm:$0xff]  ;;  %v8462_v18 = vld [vmem:[%s12775_s1 + $0x18] sm:$0xff] }
  0x1e   :  { %1509 = vmatpush.bf16.xpose.msra.mxu0 %v1499_v22  ;;  %v235_v21 = vld [vmem:[%s12776_s2 + $0x108] sm:$0xff]  ;;  %v237_v22 = vld [vmem:[%s12776_s2 + $0x118] sm:$0xff]  ;;  %v234_v23 = vld [vmem:[%s12776_s2 + $0x100] sm:$0xff] }
  0x1f   :  { %v280_v27 = vld [vmem:[%s12776_s2 + $0x270] sm:$0xff]  ;;  %v265_v34 = vld [vmem:[%s12776_s2 + $0x1f8] sm:$0xff]  ;;  %v263_v41 = vld [vmem:[%s12776_s2 + $0x1e8] sm:$0xff] }
  0x20   :  { %v276_v38 = vld [vmem:[%s12776_s2 + $0x250] sm:$0xff]  ;;  %v261_v45 = vld [vmem:[%s12776_s2 + $0x1d8] sm:$0xff]  ;;  %v258_v51 = vld [vmem:[%s12776_s2 + $0x1c0] sm:$0xff] }
  0x21   :  { %v274_v52 = vld [vmem:[%s12776_s2 + $0x240] sm:$0xff] }
  0x22   :  { %387 = vperm.xlu2 %8857, %v213_v26   ;;  %v264_v26 = vld [vmem:[%s12776_s2 + $0x1f0] sm:$0xff] }
  0x23   :  { %467 = vperm.xlu0 %8855, %v229_v25   ;;  %382 = vperm.xlu1 %8856, %v212_v28   ;;  %v281_v28 = vld [vmem:[%s12776_s2 + $0x278] sm:$0xff] }
  0x26   :  { %1510 = vmatpush.bf16.xpose.msra.mxu0 %v1496_v29  ;;  %v8463_v29 = vld [vmem:[%s12775_s1 + $0x20] sm:$0xff] }
  0x2a   :  { %372 = vperm.xlu2 %8857, %v210_v33   ;;  %v279_v33 = vld [vmem:[%s12776_s2 + $0x268] sm:$0xff] }
  0x2b   :  { %452 = vperm.xlu0 %8855, %v226_v32   ;;  %457 = vperm.xlu1 %8856, %v227_v35   ;;  %v278_v35 = vld [vmem:[%s12776_s2 + $0x260] sm:$0xff] }
  0x2e   :  { %1511 = vmatpush.bf16.xpose.msra.mxu0 %v1493_v36 }
  0x32   :  { %447 = vperm.xlu2 %8857, %v225_v40  }
  0x33   :  { %377 = vperm.xlu0 %8855, %v211_v39   ;;  %442 = vperm.xlu1 %8856, %v224_v42   ;;  %v262_v39 = vld [vmem:[%s12776_s2 + $0x1e0] sm:$0xff]  ;;  %v8464_v42 = vld [vmem:[%s12775_s1 + $0x28] sm:$0xff] }
  0x36   :  { %1512 = vmatpush.bf16.xpose.msra.mxu0 %v1490_v43 }
  0x3a   :  { %432 = vperm.xlu2 %8857, %v222_v46   ;;  %v277_v46 = vld [vmem:[%s12776_s2 + $0x258] sm:$0xff] }
  0x3b   :  { %362 = vperm.xlu0 %8855, %v208_v47   ;;  %367 = vperm.xlu1 %8856, %v209_v49   ;;  %v260_v47 = vld [vmem:[%s12776_s2 + $0x1d0] sm:$0xff] }
  0x3e   :  { %1513 = vmatpush.bf16.xpose.msra.mxu0 %v1487_v50 }
  0x42   :  { %357 = vperm.xlu2 %8857, %v207_v54   ;;  %v8465_v54 = vld [vmem:[%s12775_s1 + $0x30] sm:$0xff] }
  0x43   :  { %437 = vperm.xlu0 %8855, %v223_v53   ;;  %352 = vperm.xlu1 %8856, %v206_v56   ;;  %v275_v53 = vld [vmem:[%s12776_s2 + $0x248] sm:$0xff] }
  0x46   :  { %1514 = vmatpush.bf16.xpose.msra.mxu0 %v1484_v57 }
  0x4a   :  { %342 = vperm.xlu2 %8857, %v204_v59   ;;  %v259_v59 = vld [vmem:[%s12776_s2 + $0x1c8] sm:$0xff] }
  0x4b   :  { %422 = vperm.xlu0 %8855, %v220_v58   ;;  %427 = vperm.xlu1 %8856, %v221_v60   ;;  %v273_v58 = vld [vmem:[%s12776_s2 + $0x238] sm:$0xff]  ;;  %v272_v60 = vld [vmem:[%s12776_s2 + $0x230] sm:$0xff] }
  0x4d   :  { %7115 = vmatmul.msk.bf16.vlgmr.msra.gmra.mxu0 %vm1290_vm0, %v8459_v61 }
  0x52   :  { %417 = vperm.xlu2 %8857, %v219_v63  }
  0x53   :  { %347 = vperm.xlu0 %8855, %v205_v62   ;;  %412 = vperm.xlu1 %8856, %v218_v0   ;;  %v270_v0 = vld [vmem:[%s12776_s2 + $0x220] sm:$0xff] }
  0x5a   :  { %562 = vperm.xlu2 %8857, %v248_v1   ;;  %v256_v1 = vld [vmem:[%s12776_s2 + $0x1b0] sm:$0xff] }
  0x5b   :  { %332 = vperm.xlu0 %8855, %v202_v2   ;;  %337 = vperm.xlu1 %8856, %v203_v3   ;;  %v257_v2 = vld [vmem:[%s12776_s2 + $0x1b8] sm:$0xff] }
  0x5c   :  { %v8466_v3 = vld [vmem:[%s12775_s1 + $0x38] sm:$0xff] }
  0x5d   :  { %7116 = vmatmul.msk.bf16.gmra.mxu0 %vm1290_vm0, %v8460_v4 }
  0x62   :  { %557 = vperm.xlu2 %8857, %v247_v5  }
  0x63   :  { %567 = vperm.xlu0 %8855, %v249_v6   ;;  %552 = vperm.xlu1 %8856, %v246_v7   ;;  %v255_v6 = vld [vmem:[%s12776_s2 + $0x1a8] sm:$0xff] }
  0x64   :  { %v9185_v32 = vpop.permute.xlu2 %472  ;;  %v271_v7 = vld [vmem:[%s12776_s2 + $0x228] sm:$0xff] }
  0x6a   :  { %532 = vperm.xlu2 %8857, %v242_v8  }
  0x6b   :  { %542 = vperm.xlu0 %8855, %v244_v9   ;;  %547 = vperm.xlu1 %8856, %v245_v10   ;;  %v254_v9 = vld [vmem:[%s12776_s2 + $0x1a0] sm:$0xff] }
  0x6c   :  { %v9206_v40 = vpop.permute.xlu2 %477 }
  0x6d   :  { %7117 = vmatmul.msk.bf16.gmra.mxu0 %vm1290_vm0, %v8461_v11  ;;  %v252_v11 = vld [vmem:[%s12776_s2 + $0x190] sm:$0xff] }
  0x72   :  { %527 = vperm.xlu2 %8857, %v241_v12   ;;  %v268_v12 = vld [vmem:[%s12776_s2 + $0x210] sm:$0xff] }
  0x73   :  { %537 = vperm.xlu0 %8855, %v243_v13   ;;  %522 = vperm.xlu1 %8856, %v240_v14   ;;  %v269_v14 = vld [vmem:[%s12776_s2 + $0x218] sm:$0xff] }
  0x74   :  { %v9228_v48 = vpop.permute.xlu2 %462 }
  0x7a   :  { %502 = vperm.xlu2 %8857, %v236_v15   ;;  %v8467_v15 = vld [vmem:[%s12775_s1 + $0x40] sm:$0xff] }
  0x7b   :  { %512 = vperm.xlu0 %8855, %v238_v16   ;;  %517 = vperm.xlu1 %8856, %v239_v17  }
  0x7c   :  { %v9246_v55 = vpop.permute.xlu2 %387 }
  0x7d   :  { %v9150_v19 = vpop.permute.xlu0 %482  ;;  %v9152_v20 = vpop.permute.xlu1 %402  ;;  %7118 = vmatmul.msk.bf16.gmra.mxu0 %vm1290_vm0, %v8462_v18 }
  0x82   :  { %497 = vperm.xlu2 %8857, %v235_v21  }
  0x83   :  { %507 = vperm.xlu0 %8855, %v237_v22   ;;  %492 = vperm.xlu1 %8856, %v234_v23   ;;  %v267_v22 = vld [vmem:[%s12776_s2 + $0x208] sm:$0xff]  ;;  %v253_v23 = vld [vmem:[%s12776_s2 + $0x198] sm:$0xff] }
  0x84   :  { %v9266_v63 = vpop.permute.xlu2 %372 }
  0x85   :  { %v9164_v24 = vpop.permute.xlu0 %487  ;;  %v9166_v25 = vpop.permute.xlu1 %407 }
  0x8a   :  { %642 = vperm.xlu2 %8857, %v264_v26   ;;  %v266_v26 = vld [vmem:[%s12776_s2 + $0x200] sm:$0xff] }
  0x8b   :  { %722 = vperm.xlu0 %8855, %v280_v27   ;;  %727 = vperm.xlu1 %8856, %v281_v28  }
  0x8c   :  { %v9291_v8 = vpop.permute.xlu2 %447 }
  0x8d   :  { %v9180_v30 = vpop.permute.xlu0 %392  ;;  %v9182_v31 = vpop.permute.xlu1 %397  ;;  %7119 = vmatmul.msk.bf16.gmra.mxu0 %vm1290_vm0, %v8463_v29 }
  0x92   :  { %717 = vperm.xlu2 %8857, %v279_v33  }
  0x93   :  { %647 = vperm.xlu0 %8855, %v265_v34   ;;  %712 = vperm.xlu1 %8856, %v278_v35  }
  0x94   :  { %v9310_v16 = vpop.permute.xlu2 %432 }
  0x95   :  { %v9196_v36 = vpop.permute.xlu0 %467  ;;  %v9198_v37 = vpop.permute.xlu1 %382 }
  0x9a   :  { %702 = vperm.xlu2 %8857, %v276_v38   ;;  %v296_v38 = vld [vmem:[%s12776_s2 + $0x2f0] sm:$0xff] }
  0x9b   :  { %632 = vperm.xlu0 %8855, %v262_v39   ;;  %637 = vperm.xlu1 %8856, %v263_v41   ;;  %v250_v39 = vld [vmem:[%s12776_s2 + $0x180] sm:$0xff] }
  0x9c   :  { %v358_v34 = vpop.permute.xlu2 %357 }
  0x9d   :  { %v9214_v43 = vpop.permute.xlu0 %452  ;;  %v9216_v44 = vpop.permute.xlu1 %457  ;;  %7120 = vmatmul.msk.bf16.gmra.mxu0 %vm1290_vm0, %v8464_v42 }
  0xa2   :  { %627 = vperm.xlu2 %8857, %v261_v45   ;;  %v251_v45 = vld [vmem:[%s12776_s2 + $0x188] sm:$0xff] }
  0xa3   :  { %707 = vperm.xlu0 %8855, %v277_v46   ;;  %622 = vperm.xlu1 %8856, %v260_v47   ;;  %v8468_v46 = vld [vmem:[%s12775_s1 + $0x48] sm:$0xff] }
  0xa5   :  { %v9230_v49 = vpop.permute.xlu0 %377  ;;  %v9232_v50 = vpop.permute.xlu1 %442 }
  0xaa   :  { %612 = vperm.xlu2 %8857, %v258_v51  }
  0xab   :  { %692 = vperm.xlu0 %8855, %v274_v52   ;;  %697 = vperm.xlu1 %8856, %v275_v53   ;;  %v343_v52 = vpop.permute.xlu2 %342 }
  0xad   :  { %v9248_v56 = vpop.permute.xlu0 %362  ;;  %v9250_v57 = vpop.permute.xlu1 %367  ;;  %7121 = vmatmul.msk.bf16.gmra.mxu0 %vm1290_vm0, %v8465_v54  ;;  %v295_v54 = vld [vmem:[%s12776_s2 + $0x2e8] sm:$0xff] }
  0xb2   :  { %687 = vperm.xlu2 %8857, %v273_v58   ;;  %v297_v58 = vld [vmem:[%s12776_s2 + $0x2f8] sm:$0xff] }
  0xb3   :  { %617 = vperm.xlu0 %8855, %v259_v59   ;;  %682 = vperm.xlu1 %8856, %v272_v60   ;;  %v294_v59 = vld [vmem:[%s12776_s2 + $0x2e0] sm:$0xff] }
  0xb5   :  { %v9262_v61 = vpop.permute.xlu0 %437  ;;  %v9264_v62 = vpop.permute.xlu1 %352 }
  0xba   :  { %672 = vperm.xlu2 %8857, %v270_v0  }
  0xbb   :  { %602 = vperm.xlu0 %8855, %v256_v1   ;;  %607 = vperm.xlu1 %8856, %v257_v2  }
  0xbd   :  { %v9280_v4 = vpop.permute.xlu0 %422  ;;  %7122 = vmatmul.msk.bf16.gmra.mxu0 %vm1290_vm0, %v8466_v3  ;;  %v9283_v5 = vpop.permute.xlu1 %427 }
  0xc2   :  { %597 = vperm.xlu2 %8857, %v255_v6   ;;  %v290_v6 = vld [vmem:[%s12776_s2 + $0x2c0] sm:$0xff] }
  0xc3   :  { %677 = vperm.xlu0 %8855, %v271_v7   ;;  %592 = vperm.xlu1 %8856, %v254_v9   ;;  %v292_v7 = vld [vmem:[%s12776_s2 + $0x2d0] sm:$0xff] }
  0xc5   :  { %v348_v10 = vpop.permute.xlu0 %347  ;;  %v9302_v13 = vpop.permute.xlu1 %412 }
  0xca   :  { %v1516_v17 = vpop.f32.mrf.mxu0  ;;  %582 = vperm.xlu2 %8857, %v252_v11   ;;  %v293_v11 = vld [vmem:[%s12776_s2 + $0x2d8] sm:$0xff] }
  0xcb   :  { %662 = vperm.xlu0 %8855, %v268_v12   ;;  %667 = vperm.xlu1 %8856, %v269_v14  }
  0xcd   :  { %v333_v18 = vpop.permute.xlu0 %332  ;;  %7123 = vmatmul.msk.bf16.gmra.mxu0 %vm1290_vm0, %v8467_v15  ;;  %v338_v27 = vpop.permute.xlu1 %337 }
  0xce   :  { %v1517_v21 = vadd.f32 %v1516_v17, %v333_v18  ;;  %v289_v17 = vld [vmem:[%s12776_s2 + $0x2b8] sm:$0xff]  ;;  %v291_v18 = vld [vmem:[%s12776_s2 + $0x2c8] sm:$0xff] }
  0xd0   :  { %v1836_v29 = vmul.f32 0.2, %v1517_v21 }
  0xd2   :  { %v1518_v28 = vpop.f32.mrf.mxu0  ;;  %657 = vperm.xlu2 %8857, %v267_v22   ;;  %v1964_v41 = vmax.f32 %v1517_v21, %v1836_v29  ;;  %v288_v21 = vld [vmem:[%s12776_s2 + $0x2b0] sm:$0xff]  ;;  %v286_v29 = vld [vmem:[%s12776_s2 + $0x2a0] sm:$0xff] }
  0xd3   :  { %587 = vperm.xlu0 %8855, %v253_v23   ;;  %v1519_v33 = vadd.f32 %v1518_v28, %v338_v27  ;;  %652 = vperm.xlu1 %8856, %v266_v26   ;;  %v284_v28 = vld [vmem:[%s12776_s2 + $0x290] sm:$0xff] }
  0xd5   :  { %v1837_v35 = vmul.f32 0.2, %v1519_v33 }
  0xd7   :  { %v1965_v42 = vmax.f32 %v1519_v33, %v1837_v35  ;;  %v287_v35 = vld [vmem:[%s12776_s2 + $0x2a8] sm:$0xff] }
  0xd9   :  { %v9334_v47 = vpack.c.bf16 %v1965_v42, %v1964_v41  ;;  %v283_v42 = vld [vmem:[%s12776_s2 + $0x288] sm:$0xff] }
  0xda   :  { %v1521_v51 = vpop.f32.mrf.mxu0  ;;  %802 = vperm.xlu2 %8857, %v296_v38  }
  0xdb   :  { %572 = vperm.xlu0 %8855, %v250_v39   ;;  %577 = vperm.xlu1 %8856, %v251_v45   ;;  %v1522_v53 = vadd.f32 %v1521_v51, %v343_v52  ;;  %v285_v45 = vld [vmem:[%s12776_s2 + $0x298] sm:$0xff] }
  0xdd   :  { %7124 = vmatmul.msk.bf16.gmra.mxu0 %vm1290_vm0, %v8468_v46  ;;  %v1838_v0 = vmul.f32 0.2, %v1522_v53  ;;  %v282_v46 = vld [vmem:[%s12776_s2 + $0x280] sm:$0xff] }
  0xdf   :  { %v1966_v3 = vmax.f32 %v1522_v53, %v1838_v0  ;;  %v329_v0 = vld [vmem:[%s12776_s2 + $0x3f8] sm:$0xff] }
  0xe2   :  { %v1523_v60 = vpop.f32.mrf.mxu0  ;;  %797 = vperm.xlu2 %8857, %v295_v54  }
  0xe3   :  { %807 = vperm.xlu0 %8855, %v297_v58   ;;  %v1524_v1 = vadd.f32 %v1523_v60, %v348_v10  ;;  %792 = vperm.xlu1 %8856, %v294_v59   ;;  %v8469_v10 = vld [vmem:[%s12775_s1 + $0x50] sm:$0xff] }
  0xe4   :  { %v312_v58 = vld [vmem:[%s12776_s2 + $0x370] sm:$0xff] }
  0xe5   :  { %v1839_v2 = vmul.f32 0.2, %v1524_v1  ;;  %v328_v59 = vld [vmem:[%s12776_s2 + $0x3f0] sm:$0xff] }
  0xe7   :  { %v1967_v9 = vmax.f32 %v1524_v1, %v1839_v2 }
  0xe9   :  { %v9358_v12 = vpack.c.bf16 %v1967_v9, %v1966_v3  ;;  %v327_v3 = vld [vmem:[%s12776_s2 + $0x3e8] sm:$0xff] }
  0xea   :  { %v1526_v14 = vpop.f32.mrf.mxu0  ;;  %772 = vperm.xlu2 %8857, %v290_v6   ;;  %v313_v6 = vld [vmem:[%s12776_s2 + $0x378] sm:$0xff] }
  0xeb   :  { %782 = vperm.xlu0 %8855, %v292_v7   ;;  %787 = vperm.xlu1 %8856, %v293_v11   ;;  %v1527_v15 = vadd.f32 %v1526_v14, %v9264_v62  ;;  %v326_v7 = vld [vmem:[%s12776_s2 + $0x3e0] sm:$0xff]  ;;  %v324_v11 = vld [vmem:[%s12776_s2 + $0x3d0] sm:$0xff]  ;;  %v9431_v14 = vpop.permute.xlu2 %417 }
  0xed   :  { %7125 = vmatmul.msk.bf16.gmra.mxu0 %vm1290_vm0, %v8469_v10  ;;  %v1840_v23 = vmul.f32 0.2, %v1527_v15  ;;  %v310_v10 = vld [vmem:[%s12776_s2 + $0x360] sm:$0xff] }
  0xef   :  { %v1968_v62 = vmax.f32 %v1527_v15, %v1840_v23  ;;  %v311_v15 = vld [vmem:[%s12776_s2 + $0x368] sm:$0xff]  ;;  %v308_v23 = vld [vmem:[%s12776_s2 + $0x350] sm:$0xff] }
  0xf2   :  { %v1528_v22 = vpop.f32.mrf.mxu0  ;;  %767 = vperm.xlu2 %8857, %v289_v17   ;;  %v8472_v17 = vld [vmem:[%s12775_s1 + $0x68] sm:$0xff] }
  0xf3   :  { %777 = vperm.xlu0 %8855, %v291_v18   ;;  %v1529_v26 = vadd.f32 %v1528_v22, %v358_v34  ;;  %762 = vperm.xlu1 %8856, %v288_v21   ;;  %v8470_v34 = vld [vmem:[%s12775_s1 + $0x58] sm:$0xff] }
  0xf4   :  { %v309_v21 = vld [vmem:[%s12776_s2 + $0x358] sm:$0xff] }
  0xf5   :  { %v1841_v27 = vmul.f32 0.2, %v1529_v26  ;;  %v325_v22 = vld [vmem:[%s12776_s2 + $0x3d8] sm:$0xff] }
  0xf7   :  { %v1969_v33 = vmax.f32 %v1529_v26, %v1841_v27  ;;  %v9449_v26 = vpop.permute.xlu2 %562 }
  0xf9   :  { %v9383_v38 = vpack.c.bf16 %v1969_v33, %v1968_v62  ;;  %v9451_v62 = vpop.permute.xlu1 %552  ;;  %v323_v33 = vld [vmem:[%s12776_s2 + $0x3c8] sm:$0xff] }
  0xfa   :  { %v1531_v39 = vpop.f32.mrf.mxu0  ;;  %742 = vperm.xlu2 %8857, %v284_v28   ;;  %v306_v28 = vld [vmem:[%s12776_s2 + $0x340] sm:$0xff] }
  0xfb   :  { %752 = vperm.xlu0 %8855, %v286_v29   ;;  %757 = vperm.xlu1 %8856, %v287_v35   ;;  %v1532_v41 = vadd.f32 %v1531_v39, %v9248_v56  ;;  %v322_v29 = vld [vmem:[%s12776_s2 + $0x3c0] sm:$0xff]  ;;  %v8473_v35 = vld [vmem:[%s12775_s1 + $0x70] sm:$0xff] }
  0xfd   :  { %7126 = vmatmul.msk.bf16.gmra.mxu0 %vm1290_vm0, %v8470_v34  ;;  %v1842_v52 = vmul.f32 0.2, %v1532_v41 }
  0xff   :  { %v1970_v54 = vmax.f32 %v1532_v41, %v1842_v52  ;;  %v9465_v39 = vpop.permute.xlu2 %557  ;;  %v9479_v52 = vpop.permute.xlu0 %567 }
 0x101   :  { %v9468_v41 = vpop.permute.xlu1 %547 }
 0x102   :  { %v1533_v51 = vpop.f32.mrf.mxu0  ;;  %737 = vperm.xlu2 %8857, %v283_v42   ;;  %v321_v42 = vld [vmem:[%s12776_s2 + $0x3b8] sm:$0xff] }
 0x103   :  { %747 = vperm.xlu0 %8855, %v285_v45   ;;  %v1534_v53 = vadd.f32 %v1533_v51, %v9250_v57  ;;  %732 = vperm.xlu1 %8856, %v282_v46   ;;  %v8471_v57 = vld [vmem:[%s12775_s1 + $0x60] sm:$0xff]  ;;  %v307_v45 = vld [vmem:[%s12776_s2 + $0x348] sm:$0xff]  ;;  %v320_v46 = vld [vmem:[%s12776_s2 + $0x3b0] sm:$0xff] }
 0x105   :  { %v1843_v56 = vmul.f32 0.2, %v1534_v53 }
 0x107   :  { %v1971_v60 = vmax.f32 %v1534_v53, %v1843_v56  ;;  %v9481_v53 = vpop.permute.xlu2 %532  ;;  %v318_v56 = vld [vmem:[%s12776_s2 + $0x3a0] sm:$0xff] }
 0x109   :  { %v9409_v1 = vpack.c.bf16 %v1971_v60, %v1970_v54  ;;  %v304_v54 = vld [vmem:[%s12776_s2 + $0x330] sm:$0xff]  ;;  %v8474_v60 = vld [vmem:[%s12775_s1 + $0x78] sm:$0xff] }
 0x10a   :  { %v9411_v2 = vpop.f32.mrf.mxu0  ;;  %882 = vperm.xlu2 %8857, %v312_v58   ;;  %v9489_v58 = vpop.permute.xlu1 %522 }
 0x10b   :  { %962 = vperm.xlu0 %8855, %v328_v59   ;;  %967 = vperm.xlu1 %8856, %v329_v0   ;;  %v305_v59 = vld [vmem:[%s12776_s2 + $0x338] sm:$0xff] }
 0x10d   :  { %7127 = vmatmul.msk.bf16.gmra.mxu0 %vm1290_vm0, %v8471_v57  ;;  %v9498_v57 = vpop.permute.xlu0 %542 }
 0x112   :  { %v9423_v9 = vpop.f32.mrf.mxu0  ;;  %957 = vperm.xlu2 %8857, %v327_v3  }
 0x113   :  { %887 = vperm.xlu0 %8855, %v313_v6   ;;  %952 = vperm.xlu1 %8856, %v326_v7   ;;  %v303_v6 = vld [vmem:[%s12776_s2 + $0x328] sm:$0xff] }
 0x114   :  { %v319_v7 = vld [vmem:[%s12776_s2 + $0x3a8] sm:$0xff] }
 0x11a   :  { %v1541_v18 = vpop.f32.mrf.mxu0  ;;  %942 = vperm.xlu2 %8857, %v324_v11   ;;  %v9507_v11 = vpop.permute.xlu2 %527 }
 0x11b   :  { %872 = vperm.xlu0 %8855, %v310_v10   ;;  %877 = vperm.xlu1 %8856, %v311_v15   ;;  %v302_v10 = vld [vmem:[%s12776_s2 + $0x320] sm:$0xff] }
 0x11d   :  { %7128 = vmatmul.msk.bf16.gmra.mxu0 %vm1290_vm0, %v8472_v17  ;;  %v9513_v17 = vpop.permute.xlu1 %517 }
 0x122   :  { %v1543_v27 = vpop.f32.mrf.mxu0  ;;  %867 = vperm.xlu2 %8857, %v309_v21  }
 0x123   :  { %947 = vperm.xlu0 %8855, %v325_v22   ;;  %862 = vperm.xlu1 %8856, %v308_v23  }
 0x12a   :  { %v1546_v34 = vpop.f32.mrf.mxu0  ;;  %852 = vperm.xlu2 %8857, %v306_v28   ;;  %v1544_v28 = vadd.f32 %v1543_v27, %v9246_v55  ;;  %v8475_v27 = vld [vmem:[%s12775_s1 + $0x80] sm:$0xff] }
 0x12b   :  { %932 = vperm.xlu0 %8855, %v322_v29   ;;  %937 = vperm.xlu1 %8856, %v323_v33  }
 0x12c   :  { %v1847_v55 = vmul.f32 0.2, %v1544_v28 }
 0x12d   :  { %7129 = vmatmul.msk.bf16.gmra.mxu0 %vm1290_vm0, %v8473_v35  ;;  %v1542_v35 = vadd.f32 %v1541_v18, %v9198_v37  ;;  %v1539_v37 = vadd.f32 %v9423_v9, %v9230_v49  ;;  %v9539_v49 = vpop.permute.xlu1 %492 }
 0x12f   :  { %v1845_v9 = vmul.f32 0.2, %v1539_v37 }
 0x132   :  { %v1548_v51 = vpop.f32.mrf.mxu0  ;;  %927 = vperm.xlu2 %8857, %v321_v42  }
 0x133   :  { %857 = vperm.xlu0 %8855, %v307_v45   ;;  %922 = vperm.xlu1 %8856, %v320_v46   ;;  %v1549_v15 = vadd.f32 %v1548_v51, %v9182_v31  ;;  %v300_v31 = vld [vmem:[%s12776_s2 + $0x310] sm:$0xff]  ;;  %v9525_v46 = vpop.permute.xlu0 %537 }
 0x134   :  { %v316_v45 = vld [vmem:[%s12776_s2 + $0x390] sm:$0xff] }
 0x135   :  { %v1849_v29 = vmul.f32 0.2, %v1549_v15 }
 0x137   :  { %v1977_v51 = vmax.f32 %v1549_v15, %v1849_v29 }
 0x13a   :  { %v1551_v0 = vpop.f32.mrf.mxu0  ;;  %912 = vperm.xlu2 %8857, %v318_v56   ;;  %v9535_v56 = vpop.permute.xlu2 %502 }
 0x13b   :  { %842 = vperm.xlu0 %8855, %v304_v54   ;;  %847 = vperm.xlu1 %8856, %v305_v59   ;;  %v1552_v3 = vadd.f32 %v1551_v0, %v9152_v20  ;;  %v1547_v20 = vadd.f32 %v1546_v34, %v9180_v30  ;;  %v1537_v59 = vadd.f32 %v9411_v2, %v9266_v63  ;;  %v315_v63 = vld [vmem:[%s12776_s2 + $0x388] sm:$0xff]  ;;  %v301_v2 = vld [vmem:[%s12776_s2 + $0x318] sm:$0xff] }
 0x13d   :  { %7130 = vmatmul.msk.bf16.gmra.mxu0 %vm1290_vm0, %v8474_v60  ;;  %v1850_v22 = vmul.f32 0.2, %v1552_v3  ;;  %v1848_v42 = vmul.f32 0.2, %v1547_v20  ;;  %v1846_v60 = vmul.f32 0.2, %v1542_v35 }
 0x13f   :  { %v1978_v30 = vmax.f32 %v1552_v3, %v1850_v22  ;;  %v1976_v0 = vmax.f32 %v1547_v20, %v1848_v42  ;;  %v1973_v22 = vmax.f32 %v1539_v37, %v1845_v9 }
 0x141   :  { %v2354_v3 = vpack.c.bf16 %v1977_v51, %v1976_v0  ;;  %v2413_v0 = vld [vmem:[%s12778_s4 + $0x8] sm:$0xff] }
 0x142   :  { %v1553_v21 = vpop.f32.mrf.mxu0  ;;  %837 = vperm.xlu2 %8857, %v303_v6   ;;  %v1975_v6 = vmax.f32 %v1544_v28, %v1847_v55  ;;  %v8476_v55 = vld [vmem:[%s12775_s1 + $0x88] sm:$0xff] }
 0x143   :  { %917 = vperm.xlu0 %8855, %v319_v7   ;;  %v1554_v23 = vadd.f32 %v1553_v21, %v9166_v25  ;;  %832 = vperm.xlu1 %8856, %v302_v10   ;;  %v317_v25 = vld [vmem:[%s12776_s2 + $0x398] sm:$0xff]  ;;  %v1844_v7 = vmul.f32 0.2, %v1537_v59  ;;  %v1974_v10 = vmax.f32 %v1542_v35, %v1846_v60  ;;  %v314_v21 = vld [vmem:[%s12776_s2 + $0x380] sm:$0xff]  ;;  %v9555_v35 = vpop.permute.xlu2 %497 }
 0x144   :  { %v2415_v60 = vld [vmem:[%s12778_s4 + $0x18] sm:$0xff] }
 0x145   :  { %v1851_v33 = vmul.f32 0.2, %v1554_v23  ;;  %v2353_v20 = vpack.c.bf16 %v1975_v6, %v1974_v10  ;;  %v7181_v6 = vld [vmem:[#allocation3] sm:$0xf] }
 0x147   :  { %v1979_v34 = vmax.f32 %v1554_v23, %v1851_v33  ;;  %v9552_v23 = vpop.permute.xlu0 %512 }
 0x149   :  { %v2355_v18 = vpack.c.bf16 %v1979_v34, %v1978_v30  ;;  %v2412_v34 = vld [vmem:[%s12778_s4] sm:$0xff] }
 0x14a   :  { %v1556_v54 = vpop.f32.mrf.mxu0  ;;  %822 = vperm.xlu2 %8857, %v300_v31  }
 0x14b   :  { %902 = vperm.xlu0 %8855, %v316_v45   ;;  %907 = vperm.xlu1 %8856, %v317_v25   ;;  %v1557_v15 = vadd.f32 %v1556_v54, %v9302_v13  ;;  %v1972_v13 = vmax.f32 %v1537_v59, %v1844_v7  ;;  %v9557_v45 = vpop.permute.xlu1 %727  ;;  %v298_v25 = vld [vmem:[%s12776_s2 + $0x300] sm:$0xff]  ;;  %v9577_v54 = vpop.permute.xlu2 %642 }
 0x14c   :  { %4076 = vmatpush.bf16.msra.mxu1 %v2355_v18  ;;  %12784 = vst [vmem:[#allocation6_spill] sm:$0xff] %v9557_v45  ;;  %v8527_v7 = vld [vmem:[#allocation3 + $0x1c] sm:$0xf0] }
 0x14d   :  { %7131 = vmatmul.msk.bf16.gmra.mxu0 %vm1290_vm0, %v8475_v27  ;;  %v1852_v29 = vmul.f32 0.2, %v1557_v15  ;;  %v2352_v31 = vpack.c.bf16 %v1973_v22, %v1972_v13 }
 0x14f   :  { %v1980_v30 = vmax.f32 %v1557_v15, %v1852_v29  ;;  %v9574_v51 = vpop.permute.xlu0 %507 }
 0x150   :  { %4077 = vmatpush.bf16.msra.mxu1 %v2354_v3 }
 0x152   :  { %v1558_v28 = vpop.f32.mrf.mxu0  ;;  %897 = vperm.xlu2 %8857, %v315_v63   ;;  %v7182_v63 = vor.u32 %v8527_v7, %v7181_v6  ;;  %v8478_v6 = vld [vmem:[%s12775_s1 + $0x98] sm:$0xff] }
 0x153   :  { %827 = vperm.xlu0 %8855, %v301_v2   ;;  %v1559_v33 = vadd.f32 %v1558_v28, %v9431_v14  ;;  %892 = vperm.xlu1 %8856, %v314_v21   ;;  %v299_v14 = vld [vmem:[%s12776_s2 + $0x308] sm:$0xff]  ;;  %v9587_v9 = vpop.permute.xlu1 %712  ;;  %v2424_v21 = vld [vmem:[%s12778_s4 + $0x60] sm:$0xff]  ;;  %v9600_v22 = vpop.permute.xlu2 %717  ;;  %v8477_v28 = vld [vmem:[%s12775_s1 + $0x90] sm:$0xff] }
 0x154   :  { %4078 = vmatpush.bf16.msra.mxu1 %v2353_v20  ;;  %12785 = vst [vmem:[#allocation7_spill] sm:$0xff] %v9587_v9  ;;  %v2448_v9 = vld [vmem:[%s12778_s4 + $0x120] sm:$0xff] }
 0x155   :  { %v1853_v42 = vmul.f32 0.2, %v1559_v33  ;;  %12787 = vst [vmem:[#allocation9_spill] sm:$0xff] %v9600_v22  ;;  %v2447_v22 = vld [vmem:[%s12778_s4 + $0x118] sm:$0xff] }
 0x157   :  { %v1981_v37 = vmax.f32 %v1559_v33, %v1853_v42  ;;  %v9594_v15 = vpop.permute.xlu0 %722  ;;  %v2423_v42 = vld [vmem:[%s12778_s4 + $0x58] sm:$0xff] }
 0x158   :  { %4079 = vmatpush.bf16.msra.mxu1 %v2352_v31  ;;  %12786 = vst [vmem:[#allocation8_spill] sm:$0xff] %v9594_v15  ;;  %v2451_v15 = vld [vmem:[%s12778_s4 + $0x138] sm:$0xff] }
 0x159   :  { %v9571_v18 = vpack.c.bf16 %v1981_v37, %v1980_v30  ;;  %v2422_v30 = vld [vmem:[%s12778_s4 + $0x50] sm:$0xff] }
 0x15a   :  { %v1561_v27 = vpop.f32.mrf.mxu0  ;;  %2478 = vperm.xlu2 %8857, %v2412_v34   ;;  %v2425_v34 = vld [vmem:[%s12778_s4 + $0x68] sm:$0xff] }
 0x15b   :  { %812 = vperm.xlu0 %8855, %v298_v25   ;;  %817 = vperm.xlu1 %8856, %v299_v14   ;;  %v1562_v59 = vadd.f32 %v1561_v27, %v9280_v4  ;;  %v9613_v13 = vpop.permute.xlu1 %637  ;;  %v9628_v25 = vpop.permute.xlu2 %702  ;;  %v8535_v27 = vld [vmem:[#allocation3 + $0x5c] sm:$0xf0] }
 0x15c   :  { %4080 = vmatpush.bf16.msra.mxu1 %v9409_v1  ;;  %v2414_v1 = vld [vmem:[%s12778_s4 + $0x10] sm:$0xff]  ;;  %12788 = vst [vmem:[#allocation10_spill] sm:$0xff] %v9628_v25  ;;  %v2444_v25 = vld [vmem:[%s12778_s4 + $0x100] sm:$0xff] }
 0x15d   :  { %7132 = vmatmul.msk.bf16.gmra.mxu0 %vm1290_vm0, %v8476_v55  ;;  %v1854_v4 = vmul.f32 0.2, %v1562_v59  ;;  %v7213_v55 = vld [vmem:[#allocation3 + $0x40] sm:$0xf] }
 0x15f   :  { %v1982_v2 = vmax.f32 %v1562_v59, %v1854_v4  ;;  %v9620_v31 = vpop.permute.xlu0 %647 }
 0x160   :  { %4081 = vmatpush.bf16.msra.mxu1 %v9383_v38 }
 0x162   :  { %v1563_v3 = vpop.f32.mrf.mxu0  ;;  %2493 = vperm.xlu2 %8857, %v2415_v60  }
 0x163   :  { %2483 = vperm.xlu0 %8855, %v2413_v0   ;;  %v1564_v38 = vadd.f32 %v1563_v3, %v9283_v5  ;;  %2488 = vperm.xlu1 %8856, %v2414_v1   ;;  %v2427_v5 = vld [vmem:[%s12778_s4 + $0x78] sm:$0xff]  ;;  %v9631_v59 = vpop.permute.xlu1 %622  ;;  %v7214_v0 = vor.u32 %v8535_v27, %v7213_v55  ;;  %v2418_v3 = vld [vmem:[%s12778_s4 + $0x30] sm:$0xff]  ;;  %v2440_v27 = vld [vmem:[%s12778_s4 + $0xe0] sm:$0xff] }
 0x164   :  { %4082 = vmatpush.bf16.msra.mxu1 %v9358_v12  ;;  %v2426_v12 = vld [vmem:[%s12778_s4 + $0x70] sm:$0xff] }
 0x165   :  { %v1855_v10 = vmul.f32 0.2, %v1564_v38 }
 0x167   :  { %v1983_v20 = vmax.f32 %v1564_v38, %v1855_v10  ;;  %v2421_v38 = vld [vmem:[%s12778_s4 + $0x48] sm:$0xff]  ;;  %v9647_v10 = vpop.permute.xlu0 %632 }
 0x168   :  { %4083 = vmatpush.bf16.msra.mxu1 %v9334_v47 }
 0x169   :  { %v9611_v47 = vpack.c.bf16 %v1983_v20, %v1982_v2  ;;  %v9649_v2 = vpop.permute.xlu2 %627 }
 0x16a   :  { %v1566_v29 = vpop.f32.mrf.mxu0  ;;  %2538 = vperm.xlu2 %8857, %v2424_v21  }
 0x16b   :  { %4084 = vmatmul.bf16.vlgmr.msra.gmra.mxu1 %v7182_v63  ;;  %2553 = vperm.xlu1 %8856, %v2427_v5   ;;  %v1567_v33 = vadd.f32 %v1566_v29, %v9310_v16  ;;  %v9652_v21 = vpop.permute.xlu1 %697  ;;  %v2417_v5 = vld [vmem:[%s12778_s4 + $0x28] sm:$0xff] }
 0x16c   :  { %2548 = vperm.xlu0 %8855, %v2426_v12   ;;  %12789 = vst [vmem:[#allocation11_spill] sm:$0xff] %v9652_v21  ;;  %v2416_v12 = vld [vmem:[%s12778_s4 + $0x20] sm:$0xff] }
 0x16d   :  { %7133 = vmatmul.msk.bf16.gmra.mxu0 %vm1290_vm0, %v8477_v28  ;;  %v1856_v14 = vmul.f32 0.2, %v1567_v33  ;;  %v2419_v28 = vld [vmem:[%s12778_s4 + $0x38] sm:$0xff] }
 0x16f   :  { %v1984_v1 = vmax.f32 %v1567_v33, %v1856_v14 }
 0x171   :  { %v9667_v14 = vpop.permute.xlu2 %612 }
 0x172   :  { %v1568_v37 = vpop.f32.mrf.mxu0  ;;  %2533 = vperm.xlu2 %8857, %v2423_v42  }
 0x173   :  { %v1569_v16 = vadd.f32 %v1568_v37, %v9262_v61  ;;  %2528 = vperm.xlu1 %8856, %v2422_v30   ;;  %v2420_v61 = vld [vmem:[%s12778_s4 + $0x40] sm:$0xff] }
 0x174   :  { %2543 = vperm.xlu0 %8855, %v2425_v34   ;;  %v8543_v30 = vld [vmem:[#allocation3 + $0x9c] sm:$0xf0]  ;;  %v9665_v34 = vpop.permute.xlu0 %707 }
 0x175   :  { %v1857_v60 = vmul.f32 0.2, %v1569_v16  ;;  %12790 = vst [vmem:[#allocation12_spill] sm:$0xff] %v9665_v34 }
 0x177   :  { %v1985_v4 = vmax.f32 %v1569_v16, %v1857_v60 }
 0x179   :  { %v9645_v7 = vpack.c.bf16 %v1985_v4, %v1984_v1  ;;  %v2442_v1 = vld [vmem:[%s12778_s4 + $0xf0] sm:$0xff] }
 0x17a   :  { %v1571_v63 = vpop.f32.mrf.mxu0  ;;  %2508 = vperm.xlu2 %8857, %v2418_v3   ;;  %v8479_v3 = vld [vmem:[%s12775_s1 + $0xa0] sm:$0xff] }
 0x17b   :  { %4089 = vmatmul.bf16.gmra.mxu1 %v7214_v0  ;;  %2523 = vperm.xlu1 %8856, %v2421_v38   ;;  %v1572_v20 = vadd.f32 %v1571_v63, %v9232_v50  ;;  %v7245_v50 = vld [vmem:[#allocation3 + $0x80] sm:$0xf]  ;;  %v9672_v0 = vpop.permute.xlu1 %682  ;;  %v9693_v63 = vpop.permute.xlu2 %687 }
 0x17c   :  { %2518 = vperm.xlu0 %8855, %v2420_v61   ;;  %v7246_v16 = vor.u32 %v8543_v30, %v7245_v50  ;;  %12791 = vst [vmem:[#allocation13_spill] sm:$0xff] %v9672_v0  ;;  %v9688_v61 = vpop.permute.xlu0 %692  ;;  %v2434_v50 = vld [vmem:[%s12778_s4 + $0xb0] sm:$0xff] }
 0x17d   :  { %7134 = vmatmul.msk.bf16.gmra.mxu0 %vm1290_vm0, %v8478_v6  ;;  %v1858_v33 = vmul.f32 0.2, %v1572_v20  ;;  %12792 = vst [vmem:[#allocation14_spill] sm:$0xff] %v9688_v61  ;;  %v2439_v6 = vld [vmem:[%s12778_s4 + $0xd8] sm:$0xff]  ;;  %v2445_v61 = vld [vmem:[%s12778_s4 + $0x108] sm:$0xff]  ;;  %v2450_v0 = vld [vmem:[%s12778_s4 + $0x130] sm:$0xff] }
 0x17e   :  { %12793 = vst [vmem:[#allocation15_spill] sm:$0xff] %v9693_v63 }
 0x17f   :  { %v1986_v55 = vmax.f32 %v1572_v20, %v1858_v33  ;;  %v2438_v20 = vld [vmem:[%s12778_s4 + $0xd0] sm:$0xff]  ;;  %v8551_v33 = vld [vmem:[#allocation3 + $0xdc] sm:$0xf0] }
 0x182   :  { %v1573_v29 = vpop.f32.mrf.mxu0  ;;  %2503 = vperm.xlu2 %8857, %v2417_v5   ;;  %v2441_v5 = vld [vmem:[%s12778_s4 + $0xe8] sm:$0xff] }
 0x183   :  { %v1574_v42 = vadd.f32 %v1573_v29, %v9291_v8  ;;  %2498 = vperm.xlu1 %8856, %v2416_v12   ;;  %v2443_v8 = vld [vmem:[%s12778_s4 + $0xf8] sm:$0xff]  ;;  %v9701_v12 = vpop.permute.xlu1 %607  ;;  %v7277_v29 = vld [vmem:[#allocation3 + $0xc0] sm:$0xf] }
 0x184   :  { %2513 = vperm.xlu0 %8855, %v2419_v28   ;;  %v9708_v30 = vpop.permute.xlu0 %617 }
 0x185   :  { %v1859_v37 = vmul.f32 0.2, %v1574_v42 }
 0x187   :  { %v1987_v60 = vmax.f32 %v1574_v42, %v1859_v37  ;;  %v7278_v42 = vor.u32 %v8551_v33, %v7277_v29  ;;  %v2437_v37 = vld [vmem:[%s12778_s4 + $0xc8] sm:$0xff]  ;;  %v7309_v29 = vld [vmem:[#allocation3 + $0x100] sm:$0xf] }
 0x188   :  { %v8559_v33 = vld [vmem:[#allocation3 + $0x11c] sm:$0xf0] }
 0x189   :  { %v9683_v4 = vpack.c.bf16 %v1987_v60, %v1986_v55  ;;  %v8480_v55 = vld [vmem:[%s12775_s1 + $0xa8] sm:$0xff] }
 0x18a   :  { %v9685_v38 = vpop.f32.mrf.mxu0  ;;  %2618 = vperm.xlu2 %8857, %v2440_v27   ;;  %v9719_v27 = vpop.permute.xlu2 %672 }
 0x18b   :  { %4094 = vmatmul.bf16.gmra.mxu1 %v7246_v16  ;;  %2633 = vperm.xlu1 %8856, %v2443_v8   ;;  %v2436_v16 = vld [vmem:[%s12778_s4 + $0xc0] sm:$0xff]  ;;  %12794 = vst [vmem:[#allocation16_spill] sm:$0xff] %v9719_v27  ;;  %v9723_v8 = vpop.permute.xlu1 %592 }
 0x18c   :  { %2628 = vperm.xlu0 %8855, %v2442_v1   ;;  %v2433_v1 = vld [vmem:[%s12778_s4 + $0xa8] sm:$0xff] }
 0x18d   :  { %7135 = vmatmul.msk.bf16.gmra.mxu0 %vm1290_vm0, %v8479_v3  ;;  %v2432_v3 = vld [vmem:[%s12778_s4 + $0xa0] sm:$0xff] }
 0x192   :  { %v9703_v28 = vpop.f32.mrf.mxu0  ;;  %2613 = vperm.xlu2 %8857, %v2439_v6   ;;  %v2435_v6 = vld [vmem:[%s12778_s4 + $0xb8] sm:$0xff] }
 0x193   :  { %2608 = vperm.xlu1 %8856, %v2438_v20   ;;  %v9735_v20 = vpop.permute.xlu0 %602 }
 0x194   :  { %2623 = vperm.xlu0 %8855, %v2441_v5  }
 0x19a   :  { %v9721_v60 = vpop.f32.mrf.mxu0  ;;  %2588 = vperm.xlu2 %8857, %v2434_v50   ;;  %v9741_v50 = vpop.permute.xlu1 %667 }
 0x19b   :  { %4099 = vmatmul.bf16.gmra.mxu1 %v7278_v42  ;;  %2603 = vperm.xlu1 %8856, %v2437_v37   ;;  %v9739_v42 = vpop.permute.xlu2 %597  ;;  %12795 = vst [vmem:[#allocation17_spill] sm:$0xff] %v9741_v50  ;;  %v7310_v37 = vor.u32 %v8559_v33, %v7309_v29  ;;  %v9755_v29 = vpop.permute.xlu0 %677 }
 0x19c   :  { %2598 = vperm.xlu0 %8855, %v2436_v16   ;;  %v2428_v16 = vld [vmem:[%s12778_s4 + $0x80] sm:$0xff]  ;;  %12796 = vst [vmem:[#allocation18_spill] sm:$0xff] %v9755_v29 }
 0x19d   :  { %7136 = vmatmul.msk.bf16.gmra.mxu0 %vm1290_vm0, %v8480_v55  ;;  %v2431_v55 = vld [vmem:[%s12778_s4 + $0x98] sm:$0xff]  ;;  %v8575_v29 = vld [vmem:[#allocation3 + $0x19c] sm:$0xf0] }
 0x1a2   :  { %v9737_v5 = vpop.f32.mrf.mxu0  ;;  %2583 = vperm.xlu2 %8857, %v2433_v1   ;;  %v2430_v1 = vld [vmem:[%s12778_s4 + $0x90] sm:$0xff]  ;;  %v9763_v21 = vpop.permute.xlu1 %652 }
 0x1a3   :  { %2578 = vperm.xlu1 %8856, %v2432_v3   ;;  %v8481_v3 = vld [vmem:[%s12775_s1 + $0xb0] sm:$0xff]  ;;  %v9758_v33 = vpop.permute.xlu2 %582  ;;  %12797 = vst [vmem:[#allocation19_spill] sm:$0xff] %v9763_v21 }
 0x1a4   :  { %2593 = vperm.xlu0 %8855, %v2435_v6  }
 0x1aa   :  { %v1586_v6 = vpop.f32.mrf.mxu0  ;;  %2558 = vperm.xlu2 %8857, %v2428_v16  }
 0x1ab   :  { %4104 = vmatmul.bf16.gmra.mxu1 %v7310_v37  ;;  %2573 = vperm.xlu1 %8856, %v2431_v55   ;;  %v2429_v37 = vld [vmem:[%s12778_s4 + $0x88] sm:$0xff]  ;;  %v7341_v55 = vld [vmem:[#allocation3 + $0x140] sm:$0xf]  ;;  %v9776_v45 = vpop.permute.xlu2 %657  ;;  %v1587_v50 = vadd.f32 %v1586_v6, %v9185_v32 }
 0x1ac   :  { %2568 = vperm.xlu0 %8855, %v2430_v1   ;;  %v8567_v1 = vld [vmem:[#allocation3 + $0x15c] sm:$0xf0]  ;;  %12799 = vst [vmem:[#allocation21_spill] sm:$0xff] %v9776_v45  ;;  %v1584_v45 = vadd.f32 %v9737_v5, %v9196_v36  ;;  %v2453_v32 = vld [vmem:[%s12778_s4 + $0x148] sm:$0xff] }
 0x1ad   :  { %7137 = vmatmul.msk.bf16.gmra.mxu0 %vm1290_vm0, %v8481_v3  ;;  %v9771_v3 = vpop.permute.xlu0 %662  ;;  %v7342_v34 = vor.u32 %v8567_v1, %v7341_v55  ;;  %v2452_v36 = vld [vmem:[%s12778_s4 + $0x140] sm:$0xff] }
 0x1ae   :  { %12798 = vst [vmem:[#allocation20_spill] sm:$0xff] %v9771_v3  ;;  %v8483_v6 = vld [vmem:[%s12775_s1 + $0xc0] sm:$0xff] }
 0x1b2   :  { %v1588_v16 = vpop.f32.mrf.mxu0  ;;  %2643 = vperm.xlu2 %8857, %v2445_v61   ;;  %v8482_v61 = vld [vmem:[%s12775_s1 + $0xb8] sm:$0xff] }
 0x1b3   :  { %2638 = vperm.xlu1 %8856, %v2444_v25   ;;  %v2446_v25 = vld [vmem:[%s12778_s4 + $0x110] sm:$0xff] }
 0x1b4   :  { %2563 = vperm.xlu0 %8855, %v2429_v37   ;;  %v9787_v37 = vpop.permute.xlu1 %577 }
 0x1b5   :  { %v9794_v63 = vpop.permute.xlu0 %587 }
 0x1ba   :  { %v1591_v55 = vpop.f32.mrf.mxu0  ;;  %2658 = vperm.xlu2 %8857, %v2448_v9   ;;  %v2449_v9 = vld [vmem:[%s12778_s4 + $0x128] sm:$0xff] }
 0x1bb   :  { %4109 = vmatmul.bf16.gmra.mxu1 %v7342_v34  ;;  %2653 = vperm.xlu1 %8856, %v2447_v22   ;;  %v1592_v1 = vadd.f32 %v1591_v55, %v9150_v19  ;;  %v9802_v22 = vpop.permute.xlu2 %802  ;;  %v1589_v34 = vadd.f32 %v1588_v16, %v9206_v40  ;;  %v7373_v55 = vld [vmem:[#allocation3 + $0x180] sm:$0xf]  ;;  %v2454_v40 = vld [vmem:[%s12778_s4 + $0x150] sm:$0xff]  ;;  %v1864_v16 = vmul.f32 0.2, %v1587_v50 }
 0x1bc   :  { %2648 = vperm.xlu0 %8855, %v2446_v25   ;;  %12800 = vst [vmem:[#allocation22_spill] sm:$0xff] %v9802_v22  ;;  %v9806_v27 = vpop.permute.xlu1 %792  ;;  %v7374_v21 = vor.u32 %v8575_v29, %v7373_v55 }
 0x1bd   :  { %7138 = vmatmul.msk.bf16.gmra.mxu0 %vm1290_vm0, %v8482_v61  ;;  %v1866_v19 = vmul.f32 0.2, %v1592_v1  ;;  %12801 = vst [vmem:[#allocation23_spill] sm:$0xff] %v9806_v27  ;;  %v1865_v22 = vmul.f32 0.2, %v1589_v34  ;;  %v9825_v29 = vpop.permute.xlu0 %572 }
 0x1c2   :  { %v1593_v25 = vpop.f32.mrf.mxu0  ;;  %2673 = vperm.xlu2 %8857, %v2451_v15   ;;  %v1994_v15 = vmax.f32 %v1592_v1, %v1866_v19  ;;  %v1993_v1 = vmax.f32 %v1589_v34, %v1865_v22  ;;  %v2457_v22 = vld [vmem:[%s12778_s4 + $0x168] sm:$0xff] }
 0x1c3   :  { %v1594_v61 = vadd.f32 %v1593_v25, %v9164_v24  ;;  %2668 = vperm.xlu1 %8856, %v2450_v0   ;;  %v1582_v0 = vadd.f32 %v9721_v60, %v9228_v48  ;;  %v1863_v48 = vmul.f32 0.2, %v1584_v45  ;;  %v1577_v25 = vadd.f32 %v9685_v38, %v9214_v43  ;;  %v2456_v43 = vld [vmem:[%s12778_s4 + $0x160] sm:$0xff]  ;;  %v2455_v38 = vld [vmem:[%s12778_s4 + $0x158] sm:$0xff] }
 0x1c4   :  { %2663 = vperm.xlu0 %8855, %v2449_v9   ;;  %v9829_v9 = vpop.permute.xlu2 %797  ;;  %v9834_v55 = vpop.permute.xlu1 %787 }
 0x1c5   :  { %v1867_v3 = vmul.f32 0.2, %v1594_v61  ;;  %12802 = vst [vmem:[#allocation24_spill] sm:$0xff] %v9829_v9  ;;  %v1862_v19 = vmul.f32 0.2, %v1582_v0  ;;  %v5672_v9 = vld [vmem:[%s12780_s6 + $0xa0] sm:$0xff] }
 0x1c6   :  { %12803 = vst [vmem:[#allocation25_spill] sm:$0xff] %v9834_v55  ;;  %v1860_v34 = vmul.f32 0.2, %v1577_v25  ;;  %v5666_v55 = vld [vmem:[%s12780_s6 + $0x70] sm:$0xff] }
 0x1c7   :  { %v1995_v24 = vmax.f32 %v1594_v61, %v1867_v3  ;;  %v1579_v3 = vadd.f32 %v9703_v28, %v9216_v44  ;;  %v1992_v61 = vmax.f32 %v1587_v50, %v1864_v16 }
 0x1c9   :  { %v2363_v5 = vpack.c.bf16 %v1995_v24, %v1994_v15  ;;  %v1861_v44 = vmul.f32 0.2, %v1579_v3  ;;  %v2362_v28 = vpack.c.bf16 %v1993_v1, %v1992_v61  ;;  %v1991_v15 = vmax.f32 %v1584_v45, %v1863_v48 }
 0x1ca   :  { %v1596_v60 = vpop.f32.mrf.mxu0  ;;  %2688 = vperm.xlu2 %8857, %v2454_v40   ;;  %v1990_v40 = vmax.f32 %v1582_v0, %v1862_v19  ;;  %v8583_v0 = vld [vmem:[#allocation3 + $0x1dc] sm:$0xf0] }
 0x1cb   :  { %4114 = vmatmul.bf16.gmra.mxu1 %v7374_v21  ;;  %2683 = vperm.xlu1 %8856, %v2453_v32   ;;  %v1597_v21 = vadd.f32 %v1596_v60, %v9539_v49  ;;  %v1989_v24 = vmax.f32 %v1579_v3, %v1861_v44  ;;  %v7405_v32 = vld [vmem:[#allocation3 + $0x1c0] sm:$0xf]  ;;  %v2474_v3 = vld [vmem:[%s12778_s4 + $0x1f0] sm:$0xff]  ;;  %v2459_v44 = vld [vmem:[%s12778_s4 + $0x178] sm:$0xff] }
 0x1cc   :  { %2678 = vperm.xlu0 %8855, %v2452_v36   ;;  %4245 = vmatpush.bf16.msra.mxu2 %v2363_v5  ;;  %v2361_v45 = vpack.c.bf16 %v1991_v15, %v1990_v40  ;;  %v9847_v36 = vpop.permute.xlu0 %807  ;;  %v1988_v5 = vmax.f32 %v1577_v25, %v1860_v34  ;;  %v9849_v48 = vpop.permute.xlu2 %772  ;;  %v7406_v1 = vor.u32 %v8583_v0, %v7405_v32  ;;  %v2458_v25 = vld [vmem:[%s12778_s4 + $0x170] sm:$0xff]  ;;  %v2473_v40 = vld [vmem:[%s12778_s4 + $0x1e8] sm:$0xff] }
 0x1cd   :  { %7139 = vmatmul.msk.bf16.gmra.mxu0 %vm1290_vm0, %v8483_v6  ;;  %v1868_v49 = vmul.f32 0.2, %v1597_v21  ;;  %12804 = vst [vmem:[#allocation26_spill] sm:$0xff] %v9847_v36  ;;  %v7183_v32 = vld [vmem:[#allocation3 + $0x20] sm:$0xf0] }
 0x1ce   :  { %12805 = vst [vmem:[#allocation27_spill] sm:$0xff] %v9849_v48  ;;  %v2360_v60 = vpack.c.bf16 %v1989_v24, %v1988_v5 }
 0x1cf   :  { %v1996_v19 = vmax.f32 %v1597_v21, %v1868_v49  ;;  %v7437_v49 = vld [vmem:[#allocation3 + $0x200] sm:$0xf] }
 0x1d0   :  { %4246 = vmatpush.bf16.msra.mxu2 %v2362_v28  ;;  %v8484_v28 = vld [vmem:[%s12775_s1 + $0xc8] sm:$0xff] }
 0x1d2   :  { %v1598_v50 = vpop.f32.mrf.mxu0  ;;  %2703 = vperm.xlu2 %8857, %v2457_v22  }
 0x1d3   :  { %v1599_v16 = vadd.f32 %v1598_v50, %v9555_v35  ;;  %2698 = vperm.xlu1 %8856, %v2456_v43   ;;  %v9854_v35 = vpop.permute.xlu1 %762 }
 0x1d4   :  { %2693 = vperm.xlu0 %8855, %v2455_v38   ;;  %4247 = vmatpush.bf16.msra.mxu2 %v2361_v45  ;;  %12806 = vst [vmem:[#allocation28_spill] sm:$0xff] %v9854_v35  ;;  %v9869_v22 = vpop.permute.xlu0 %782  ;;  %v9875_v43 = vpop.permute.xlu2 %767  ;;  %v2472_v38 = vld [vmem:[%s12778_s4 + $0x1e0] sm:$0xff] }
 0x1d5   :  { %v1869_v6 = vmul.f32 0.2, %v1599_v16  ;;  %12807 = vst [vmem:[#allocation29_spill] sm:$0xff] %v9869_v22 }
 0x1d6   :  { %12808 = vst [vmem:[#allocation30_spill] sm:$0xff] %v9875_v43 }
 0x1d7   :  { %v1997_v61 = vmax.f32 %v1599_v16, %v1869_v6  ;;  %v8591_v16 = vld [vmem:[#allocation3 + $0x21c] sm:$0xf0] }
 0x1d8   :  { %4248 = vmatpush.bf16.msra.mxu2 %v2360_v60  ;;  %v7438_v5 = vor.u32 %v8591_v16, %v7437_v49  ;;  %v7469_v16 = vld [vmem:[#allocation3 + $0x240] sm:$0xf] }
 0x1d9   :  { %v9865_v15 = vpack.c.bf16 %v1997_v61, %v1996_v19  ;;  %v2468_v19 = vld [vmem:[%s12778_s4 + $0x1c0] sm:$0xff]  ;;  %v2470_v61 = vld [vmem:[%s12778_s4 + $0x1d0] sm:$0xff] }
 0x1da   :  { %v1601_v21 = vpop.f32.mrf.mxu0  ;;  %2788 = vperm.xlu2 %8857, %v2474_v3  }
 0x1db   :  { %4119 = vmatmul.bf16.gmra.mxu1 %v7406_v1  ;;  %2713 = vperm.xlu1 %8856, %v2459_v44   ;;  %v1602_v34 = vadd.f32 %v1601_v21, %v9535_v56  ;;  %v9884_v50 = vpop.permute.xlu1 %757  ;;  %v8485_v44 = vld [vmem:[%s12775_s1 + $0xd0] sm:$0xff] }
 0x1dc   :  { %2708 = vperm.xlu0 %8855, %v2458_v25   ;;  %4249 = vmatpush.bf16.msra.mxu2 %v9683_v4  ;;  %v2475_v4 = vld [vmem:[%s12778_s4 + $0x1f8] sm:$0xff]  ;;  %12809 = vst [vmem:[#allocation31_spill] sm:$0xff] %v9884_v50  ;;  %v8571_v50 = vld [vmem:[#allocation3 + $0x184] sm:$0xf] }
 0x1dd   :  { %7140 = vmatmul.msk.bf16.gmra.mxu0 %vm1290_vm0, %v8484_v28  ;;  %v1870_v56 = vmul.f32 0.2, %v1602_v34  ;;  %v9907_v28 = vpop.permute.xlu2 %742 }
 0x1de   :  { %12811 = vst [vmem:[#allocation33_spill] sm:$0xff] %v9907_v28 }
 0x1df   :  { %v1998_v6 = vmax.f32 %v1602_v34, %v1870_v56 }
 0x1e0   :  { %4250 = vmatpush.bf16.msra.mxu2 %v9645_v7  ;;  %v8523_v7 = vld [vmem:[#allocation3 + $0x4] sm:$0xf] }
 0x1e1   :  { %v7186_v1 = vor.u32 %v8523_v7, %v7183_v32  ;;  %v8599_v7 = vld [vmem:[#allocation3 + $0x25c] sm:$0xf0] }
 0x1e2   :  { %v1603_v45 = vpop.f32.mrf.mxu0  ;;  %2783 = vperm.xlu2 %8857, %v2473_v40  }
 0x1e3   :  { %v1604_v24 = vadd.f32 %v1603_v45, %v9574_v51  ;;  %2778 = vperm.xlu1 %8856, %v2472_v38   ;;  %v9893_v51 = vpop.permute.xlu0 %777  ;;  %v2467_v38 = vld [vmem:[%s12778_s4 + $0x1b8] sm:$0xff]  ;;  %v2469_v45 = vld [vmem:[%s12778_s4 + $0x1c8] sm:$0xff] }
 0x1e4   :  { %2793 = vperm.xlu0 %8855, %v2475_v4   ;;  %4251 = vmatpush.bf16.msra.mxu2 %v9611_v47  ;;  %12810 = vst [vmem:[#allocation32_spill] sm:$0xff] %v9893_v51  ;;  %v2471_v47 = vld [vmem:[%s12778_s4 + $0x1d8] sm:$0xff]  ;;  %v2466_v4 = vld [vmem:[%s12778_s4 + $0x1b0] sm:$0xff] }
 0x1e5   :  { %v1871_v0 = vmul.f32 0.2, %v1604_v24  ;;  %v9927_v32 = vpop.permute.xlu2 %737 }
 0x1e6   :  { %12814 = vst [vmem:[#allocation36_spill] sm:$0xff] %v9927_v32 }
 0x1e7   :  { %v1999_v3 = vmax.f32 %v1604_v24, %v1871_v0  ;;  %v8531_v0 = vld [vmem:[#allocation3 + $0x44] sm:$0xf] }
 0x1e8   :  { %v9888_v60 = vpop.f32.mrf.mxu1  ;;  %4252 = vmatpush.bf16.msra.mxu2 %v9571_v18  ;;  %v9909_v18 = vpop.permute.xlu1 %732 }
 0x1e9   :  { %v9905_v25 = vpack.c.bf16 %v1999_v3, %v1998_v6  ;;  %12812 = vst [vmem:[#allocation34_spill] sm:$0xff] %v9909_v18 }
 0x1ea   :  { %v1606_v21 = vpop.f32.mrf.mxu0  ;;  %2758 = vperm.xlu2 %8857, %v2468_v19   ;;  %v7470_v19 = vor.u32 %v8599_v7, %v7469_v16  ;;  %v2461_v7 = vld [vmem:[%s12778_s4 + $0x188] sm:$0xff] }
 0x1eb   :  { %4124 = vmatmul.bf16.gmra.mxu1 %v7438_v5  ;;  %4253 = vmatmul.bf16.vlgmr.msra.gmra.mxu2 %v7186_v1  ;;  %v1607_v34 = vadd.f32 %v1606_v21, %v9552_v23  ;;  %v9924_v56 = vpop.permute.xlu0 %752  ;;  %v7215_v5 = vld [vmem:[#allocation3 + $0x60] sm:$0xf0] }
 0x1ec   :  { %2773 = vperm.xlu1 %8856, %v2471_v47   ;;  %2768 = vperm.xlu0 %8855, %v2470_v61   ;;  %12813 = vst [vmem:[#allocation35_spill] sm:$0xff] %v9924_v56  ;;  %v7218_v61 = vor.u32 %v8531_v0, %v7215_v5  ;;  %v2465_v21 = vld [vmem:[%s12778_s4 + $0x1a8] sm:$0xff]  ;;  %v2460_v5 = vld [vmem:[%s12778_s4 + $0x180] sm:$0xff] }
 0x1ed   :  { %7141 = vmatmul.msk.bf16.gmra.mxu0 %vm1290_vm0, %v8485_v44  ;;  %v1872_v49 = vmul.f32 0.2, %v1607_v34  ;;  %v7375_v56 = vld [vmem:[#allocation3 + $0x1a0] sm:$0xf0] }
 0x1ef   :  { %v2000_v3 = vmax.f32 %v1607_v34, %v1872_v49  ;;  %v8486_v34 = vld [vmem:[%s12775_s1 + $0xd8] sm:$0xff]  ;;  %v9950_v49 = vpop.permute.xlu2 %882 }
 0x1f0   :  { %v9913_v40 = vpop.f32.mrf.mxu1  ;;  %v9929_v1 = vpop.permute.xlu1 %967  ;;  %12817 = vst [vmem:[#allocation39_spill] sm:$0xff] %v9950_v49 }
 0x1f1   :  { %12815 = vst [vmem:[#allocation37_spill] sm:$0xff] %v9929_v1 }
 0x1f2   :  { %v1608_v24 = vpop.f32.mrf.mxu0  ;;  %2753 = vperm.xlu2 %8857, %v2467_v38   ;;  %v2464_v38 = vld [vmem:[%s12778_s4 + $0x1a0] sm:$0xff] }
 0x1f3   :  { %v1609_v23 = vadd.f32 %v1608_v24, %v9513_v17  ;;  %v2462_v17 = vld [vmem:[%s12778_s4 + $0x190] sm:$0xff]  ;;  %v9947_v24 = vpop.permute.xlu0 %747 }
 0x1f4   :  { %2748 = vperm.xlu1 %8856, %v2466_v4   ;;  %2763 = vperm.xlu0 %8855, %v2469_v45   ;;  %12816 = vst [vmem:[#allocation38_spill] sm:$0xff] %v9947_v24 }
 0x1f5   :  { %v1873_v6 = vmul.f32 0.2, %v1609_v23 }
 0x1f7   :  { %v2001_v44 = vmax.f32 %v1609_v23, %v1873_v6  ;;  %v2463_v6 = vld [vmem:[%s12778_s4 + $0x198] sm:$0xff] }
 0x1f8   :  { %v9931_v47 = vpop.f32.mrf.mxu1  ;;  %v9958_v0 = vpop.permute.xlu1 %952 }
 0x1f9   :  { %v9945_v4 = vpack.c.bf16 %v2001_v44, %v2000_v3  ;;  %12818 = vst [vmem:[#allocation40_spill] sm:$0xff] %v9958_v0  ;;  %v8539_v44 = vld [vmem:[#allocation3 + $0x84] sm:$0xf] }
 0x1fa   :  { %v1611_v45 = vpop.f32.mrf.mxu0  ;;  %2728 = vperm.xlu2 %8857, %v2462_v17   ;;  %v8607_v17 = vld [vmem:[#allocation3 + $0x29c] sm:$0xf0] }
 0x1fb   :  { %4129 = vmatmul.bf16.gmra.mxu1 %v7470_v19  ;;  %4258 = vmatmul.bf16.gmra.mxu2 %v7218_v61  ;;  %v1612_v23 = vadd.f32 %v1611_v45, %v9489_v58  ;;  %v7501_v61 = vld [vmem:[#allocation3 + $0x280] sm:$0xf] }
 0x1fc   :  { %2743 = vperm.xlu1 %8856, %v2465_v21   ;;  %2738 = vperm.xlu0 %8855, %v2464_v38   ;;  %v7247_v21 = vld [vmem:[#allocation3 + $0xa0] sm:$0xf0]  ;;  %v7502_v45 = vor.u32 %v8607_v17, %v7501_v61 }
 0x1fd   :  { %7142 = vmatmul.msk.bf16.gmra.mxu0 %vm1290_vm0, %v8486_v34  ;;  %v1874_v3 = vmul.f32 0.2, %v1612_v23  ;;  %v9967_v34 = vpop.permute.xlu0 %962  ;;  %v7250_v49 = vor.u32 %v8539_v44, %v7247_v21  ;;  %v5657_v17 = vld [vmem:[%s12780_s6 + $0x28] sm:$0xff] }
 0x1fe   :  { %12819 = vst [vmem:[#allocation41_spill] sm:$0xff] %v9967_v34 }
 0x1ff   :  { %v2002_v0 = vmax.f32 %v1612_v23, %v1874_v3  ;;  %v8487_v23 = vld [vmem:[%s12775_s1 + $0xe0] sm:$0xff] }
 0x200   :  { %v9953_v16 = vpop.f32.mrf.mxu1  ;;  %v9987_v3 = vpop.permute.xlu1 %877 }
 0x201   :  { %12821 = vst [vmem:[#allocation43_spill] sm:$0xff] %v9987_v3 }
 0x202   :  { %v1613_v19 = vpop.f32.mrf.mxu0  ;;  %2723 = vperm.xlu2 %8857, %v2461_v7   ;;  %v5654_v7 = vld [vmem:[%s12780_s6 + $0x10] sm:$0xff] }
 0x203   :  { %v1614_v58 = vadd.f32 %v1613_v19, %v9507_v11  ;;  %v9974_v11 = vpop.permute.xlu2 %957 }
 0x204   :  { %2718 = vperm.xlu1 %8856, %v2460_v5   ;;  %2733 = vperm.xlu0 %8855, %v2463_v6   ;;  %12820 = vst [vmem:[#allocation42_spill] sm:$0xff] %v9974_v11  ;;  %v5653_v5 = vld [vmem:[%s12780_s6 + $0x8] sm:$0xff]  ;;  %v5652_v6 = vld [vmem:[%s12780_s6] sm:$0xff] }
 0x205   :  { %v1875_v38 = vmul.f32 0.2, %v1614_v58  ;;  %v9997_v44 = vpop.permute.xlu0 %887 }
 0x206   :  { %12822 = vst [vmem:[#allocation44_spill] sm:$0xff] %v9997_v44  ;;  %v5660_v44 = vld [vmem:[%s12780_s6 + $0x40] sm:$0xff] }
 0x207   :  { %v2003_v48 = vmax.f32 %v1614_v58, %v1875_v38  ;;  %v7533_v38 = vld [vmem:[#allocation3 + $0x2c0] sm:$0xf] }
 0x208   :  { %v9969_v1 = vpop.f32.mrf.mxu1 }
 0x209   :  { %v9985_v19 = vpack.c.bf16 %v2003_v48, %v2002_v0  ;;  %v5656_v48 = vld [vmem:[%s12780_s6 + $0x20] sm:$0xff] }
 0x20a   :  { %v9989_v61 = vpop.f32.mrf.mxu0  ;;  %5696 = vperm.xlu2 %8857, %v5654_v7   ;;  %v10009_v7 = vpop.permute.xlu1 %862 }
 0x20b   :  { %4134 = vmatmul.bf16.gmra.mxu1 %v7502_v45  ;;  %4263 = vmatmul.bf16.gmra.mxu2 %v7250_v49  ;;  %v5655_v49 = vld [vmem:[%s12780_s6 + $0x18] sm:$0xff]  ;;  %v10005_v0 = vpop.permute.xlu2 %942  ;;  %v8615_v45 = vld [vmem:[#allocation3 + $0x2dc] sm:$0xf0]  ;;  %12824 = vst [vmem:[#allocation46_spill] sm:$0xff] %v10009_v7 }
 0x20c   :  { %5691 = vperm.xlu1 %8856, %v5653_v5   ;;  %5686 = vperm.xlu0 %8855, %v5652_v6   ;;  %12823 = vst [vmem:[#allocation45_spill] sm:$0xff] %v10005_v0  ;;  %v8547_v5 = vld [vmem:[#allocation3 + $0xc4] sm:$0xf]  ;;  %v5663_v7 = vld [vmem:[%s12780_s6 + $0x58] sm:$0xff] }
 0x20d   :  { %7143 = vmatmul.msk.bf16.gmra.mxu0 %vm1290_vm0, %v8487_v23  ;;  %v7279_v6 = vld [vmem:[#allocation3 + $0xe0] sm:$0xf0]  ;;  %v7534_v23 = vor.u32 %v8615_v45, %v7533_v38  ;;  %v10025_v38 = vpop.permute.xlu0 %872 }
 0x20e   :  { %v7282_v34 = vor.u32 %v8547_v5, %v7279_v6  ;;  %12825 = vst [vmem:[#allocation47_spill] sm:$0xff] %v10025_v38 }
 0x210   :  { %v9992_v58 = vpop.f32.mrf.mxu1 }
 0x212   :  { %v10007_v21 = vpop.f32.mrf.mxu0  ;;  %5711 = vperm.xlu2 %8857, %v5657_v17   ;;  %v5659_v17 = vld [vmem:[%s12780_s6 + $0x38] sm:$0xff]  ;;  %v10032_v6 = vpop.permute.xlu1 %937 }
 0x213   :  { %v10029_v5 = vpop.permute.xlu2 %867  ;;  %12827 = vst [vmem:[#allocation49_spill] sm:$0xff] %v10032_v6  ;;  %v8555_v6 = vld [vmem:[#allocation3 + $0x104] sm:$0xf] }
 0x214   :  { %5706 = vperm.xlu1 %8856, %v5656_v48   ;;  %5701 = vperm.xlu0 %8855, %v5655_v49   ;;  %v5658_v48 = vld [vmem:[%s12780_s6 + $0x30] sm:$0xff]  ;;  %v8488_v49 = vld [vmem:[%s12775_s1 + $0xe8] sm:$0xff]  ;;  %12826 = vst [vmem:[#allocation48_spill] sm:$0xff] %v10029_v5 }
 0x215   :  { %v7311_v5 = vld [vmem:[#allocation3 + $0x120] sm:$0xf0] }
 0x216   :  { %v7314_v22 = vor.u32 %v8555_v6, %v7311_v5 }
 0x218   :  { %v10011_v11 = vpop.f32.mrf.mxu1 }
 0x21a   :  { %v10027_v45 = vpop.f32.mrf.mxu0  ;;  %5726 = vperm.xlu2 %8857, %v5660_v44   ;;  %v10056_v27 = vpop.permute.xlu1 %922 }
 0x21b   :  { %4139 = vmatmul.bf16.gmra.mxu1 %v7534_v23  ;;  %4268 = vmatmul.bf16.gmra.mxu2 %v7282_v34  ;;  %v5662_v23 = vld [vmem:[%s12780_s6 + $0x50] sm:$0xff]  ;;  %v5661_v34 = vld [vmem:[%s12780_s6 + $0x48] sm:$0xff]  ;;  %v10049_v38 = vpop.permute.xlu2 %852  ;;  %12830 = vst [vmem:[#allocation52_spill] sm:$0xff] %v10056_v27 }
 0x21c   :  { %5721 = vperm.xlu1 %8856, %v5659_v17   ;;  %5716 = vperm.xlu0 %8855, %v5658_v48   ;;  %v7565_v17 = vld [vmem:[#allocation3 + $0x300] sm:$0xf]  ;;  %12829 = vst [vmem:[#allocation51_spill] sm:$0xff] %v10049_v38 }
 0x21d   :  { %7144 = vmatmul.msk.bf16.gmra.mxu0 %vm1290_vm0, %v8488_v49  ;;  %v8623_v48 = vld [vmem:[#allocation3 + $0x31c] sm:$0xf0]  ;;  %v10047_v49 = vpop.permute.xlu0 %947 }
 0x21e   :  { %12828 = vst [vmem:[#allocation50_spill] sm:$0xff] %v10047_v49  ;;  %v7566_v3 = vor.u32 %v8623_v48, %v7565_v17  ;;  %v5669_v48 = vld [vmem:[%s12780_s6 + $0x88] sm:$0xff] }
 0x21f   :  { %v7343_v49 = vld [vmem:[#allocation3 + $0x160] sm:$0xf0] }
 0x220   :  { %v10034_v0 = vpop.f32.mrf.mxu1 }
 0x222   :  { %v10045_v44 = vpop.f32.mrf.mxu0  ;;  %5741 = vperm.xlu2 %8857, %v5663_v7   ;;  %v5665_v7 = vld [vmem:[%s12780_s6 + $0x68] sm:$0xff] }
 0x223   :  { %v10075_v27 = vpop.permute.xlu2 %927 }
 0x224   :  { %5736 = vperm.xlu1 %8856, %v5662_v23   ;;  %5731 = vperm.xlu0 %8855, %v5661_v34   ;;  %v5664_v23 = vld [vmem:[%s12780_s6 + $0x60] sm:$0xff]  ;;  %v8489_v34 = vld [vmem:[%s12775_s1 + $0xf0] sm:$0xff]  ;;  %12832 = vst [vmem:[#allocation54_spill] sm:$0xff] %v10075_v27 }
 0x225   :  { %v10068_v5 = vpop.permute.xlu0 %932 }
 0x226   :  { %12831 = vst [vmem:[#allocation53_spill] sm:$0xff] %v10068_v5  ;;  %v8563_v5 = vld [vmem:[#allocation3 + $0x144] sm:$0xf] }
 0x227   :  { %v7346_v36 = vor.u32 %v8563_v5, %v7343_v49 }
 0x228   :  { %v10051_v51 = vpop.f32.mrf.mxu1 }
 0x22a   :  { %v1626_v17 = vpop.f32.mrf.mxu0  ;;  %5756 = vperm.xlu2 %8857, %v5666_v55   ;;  %v5667_v55 = vld [vmem:[%s12780_s6 + $0x78] sm:$0xff] }
 0x22b   :  { %4144 = vmatmul.bf16.gmra.mxu1 %v7566_v3  ;;  %4273 = vmatmul.bf16.gmra.mxu2 %v7314_v22  ;;  %v5668_v3 = vld [vmem:[%s12780_s6 + $0x80] sm:$0xff]  ;;  %v10083_v22 = vpop.permute.xlu1 %847  ;;  %v1627_v35 = vadd.f32 %v1626_v17, %v9451_v62  ;;  %v1622_v17 = vadd.f32 %v10027_v45, %v9498_v57 }
 0x22c   :  { %5751 = vperm.xlu1 %8856, %v5665_v7   ;;  %5746 = vperm.xlu0 %8855, %v5664_v23   ;;  %12833 = vst [vmem:[#allocation55_spill] sm:$0xff] %v10083_v22  ;;  %v7597_v23 = vld [vmem:[#allocation3 + $0x340] sm:$0xf]  ;;  %v5675_v22 = vld [vmem:[%s12780_s6 + $0xb8] sm:$0xff] }
 0x22d   :  { %7145 = vmatmul.msk.bf16.gmra.mxu0 %vm1290_vm0, %v8489_v34  ;;  %v8631_v34 = vld [vmem:[#allocation3 + $0x35c] sm:$0xf0]  ;;  %v10090_v43 = vpop.permute.xlu0 %857 }
 0x22e   :  { %v7598_v38 = vor.u32 %v8631_v34, %v7597_v23  ;;  %12834 = vst [vmem:[#allocation56_spill] sm:$0xff] %v10090_v43  ;;  %v10101_v23 = vpop.permute.xlu2 %912 }
 0x22f   :  { %12835 = vst [vmem:[#allocation57_spill] sm:$0xff] %v10101_v23  ;;  %v8639_v23 = vld [vmem:[#allocation3 + $0x39c] sm:$0xf0] }
 0x230   :  { %v10070_v6 = vpop.f32.mrf.mxu1 }
 0x232   :  { %v1628_v7 = vpop.f32.mrf.mxu0  ;;  %5771 = vperm.xlu2 %8857, %v5669_v48   ;;  %v5671_v48 = vld [vmem:[%s12780_s6 + $0x98] sm:$0xff] }
 0x233   :  { %v10103_v5 = vpop.permute.xlu1 %832 }
 0x234   :  { %5766 = vperm.xlu1 %8856, %v5668_v3   ;;  %5761 = vperm.xlu0 %8855, %v5667_v55   ;;  %v5670_v3 = vld [vmem:[%s12780_s6 + $0x90] sm:$0xff]  ;;  %v8490_v55 = vld [vmem:[%s12775_s1 + $0xf8] sm:$0xff]  ;;  %12836 = vst [vmem:[#allocation58_spill] sm:$0xff] %v10103_v5 }
 0x236   :  { %v10122_v5 = vpop.permute.xlu2 %837 }
 0x237   :  { %12838 = vst [vmem:[#allocation60_spill] sm:$0xff] %v10122_v5 }
 0x238   :  { %v10085_v27 = vpop.f32.mrf.mxu1 }
 0x23a   :  { %v1631_v49 = vpop.f32.mrf.mxu0  ;;  %5786 = vperm.xlu2 %8857, %v5672_v9   ;;  %v5673_v9 = vld [vmem:[%s12780_s6 + $0xa8] sm:$0xff] }
 0x23b   :  { %4149 = vmatmul.bf16.gmra.mxu1 %v7598_v38  ;;  %4278 = vmatmul.bf16.gmra.mxu2 %v7346_v36  ;;  %v1632_v34 = vadd.f32 %v1631_v49, %v9449_v26  ;;  %v5674_v38 = vld [vmem:[%s12780_s6 + $0xb0] sm:$0xff]  ;;  %v10118_v36 = vpop.permute.xlu0 %842  ;;  %v7629_v49 = vld [vmem:[#allocation3 + $0x380] sm:$0xf]  ;;  %v10125_v28 = vpop.permute.xlu1 %907 }
 0x23c   :  { %5781 = vperm.xlu1 %8856, %v5671_v48   ;;  %5776 = vperm.xlu0 %8855, %v5670_v3   ;;  %12837 = vst [vmem:[#allocation59_spill] sm:$0xff] %v10118_v36  ;;  %v1629_v48 = vadd.f32 %v1628_v7, %v9465_v39  ;;  %v1624_v39 = vadd.f32 %v10045_v44, %v9468_v41  ;;  %v5676_v41 = vld [vmem:[%s12780_s6 + $0xc0] sm:$0xff] }
 0x23d   :  { %7146 = vmatmul.msk.bf16.gmra.mxu0 %vm1290_vm0, %v8490_v55  ;;  %v1882_v26 = vmul.f32 0.2, %v1632_v34  ;;  %12839 = vst [vmem:[#allocation61_spill] sm:$0xff] %v10125_v28  ;;  %v7630_v7 = vor.u32 %v8639_v23, %v7629_v49  ;;  %v5677_v28 = vld [vmem:[%s12780_s6 + $0xc8] sm:$0xff] }
 0x23e   :  { %v10152_v49 = vpop.permute.xlu2 %822 }
 0x23f   :  { %12841 = vst [vmem:[#allocation63_spill] sm:$0xff] %v10152_v49 }
 0x240   :  { %v10107_v43 = vpop.f32.mrf.mxu1 }
 0x242   :  { %v1633_v3 = vpop.f32.mrf.mxu0  ;;  %5801 = vperm.xlu2 %8857, %v5675_v22   ;;  %v1881_v22 = vmul.f32 0.2, %v1629_v48 }
 0x243   :  { %v1634_v55 = vadd.f32 %v1633_v3, %v9479_v52  ;;  %v7378_v52 = vor.u32 %v8571_v50, %v7375_v56  ;;  %v2010_v3 = vmax.f32 %v1632_v34, %v1882_v26  ;;  %v8491_v50 = vld [vmem:[%s12775_s1 + $0x100] sm:$0xff]  ;;  %v1619_v56 = vadd.f32 %v10007_v21, %v9525_v46  ;;  %v10147_v45 = vpop.permute.xlu0 %917 }
 0x244   :  { %5796 = vperm.xlu1 %8856, %v5674_v38   ;;  %5791 = vperm.xlu0 %8855, %v5673_v9   ;;  %v5678_v38 = vld [vmem:[%s12780_s6 + $0xd0] sm:$0xff]  ;;  %v1880_v9 = vmul.f32 0.2, %v1627_v35  ;;  %v2009_v57 = vmax.f32 %v1629_v48, %v1881_v22  ;;  %12840 = vst [vmem:[#allocation62_spill] sm:$0xff] %v10147_v45  ;;  %v1617_v34 = vadd.f32 %v9989_v61, %v9481_v53  ;;  %v1878_v26 = vmul.f32 0.2, %v1622_v17  ;;  %v10160_v53 = vpop.permute.xlu1 %892 }
 0x245   :  { %v1883_v24 = vmul.f32 0.2, %v1634_v55  ;;  %v1877_v46 = vmul.f32 0.2, %v1619_v56  ;;  %12842 = vst [vmem:[#allocation64_spill] sm:$0xff] %v10160_v53 }
 0x246   :  { %v2006_v61 = vmax.f32 %v1622_v17, %v1878_v26 }
 0x247   :  { %v2011_v62 = vmax.f32 %v1634_v55, %v1883_v24  ;;  %v1879_v24 = vmul.f32 0.2, %v1624_v39  ;;  %v2008_v55 = vmax.f32 %v1627_v35, %v1880_v9  ;;  %v1876_v35 = vmul.f32 0.2, %v1617_v34 }
 0x248   :  { %v10129_v36 = vpop.f32.mrf.mxu1 }
 0x249   :  { %v2371_v44 = vpack.c.bf16 %v2011_v62, %v2010_v3  ;;  %v2370_v21 = vpack.c.bf16 %v2009_v57, %v2008_v55  ;;  %v2005_v3 = vmax.f32 %v1619_v56, %v1877_v46  ;;  %v2004_v17 = vmax.f32 %v1617_v34, %v1876_v35  ;;  %v5683_v34 = vld [vmem:[%s12780_s6 + $0xf8] sm:$0xff]  ;;  %v5682_v35 = vld [vmem:[%s12780_s6 + $0xf0] sm:$0xff] }
 0x24a   :  { %v1636_v23 = vpop.f32.mrf.mxu0  ;;  %5816 = vperm.xlu2 %8857, %v5678_v38  }
 0x24b   :  { %4154 = vmatmul.bf16.gmra.mxu1 %v7630_v7  ;;  %4283 = vmatmul.bf16.gmra.mxu2 %v7378_v52  ;;  %v2007_v7 = vmax.f32 %v1624_v39, %v1879_v24  ;;  %v1637_v48 = vadd.f32 %v1636_v23, %v9825_v29  ;;  %v5680_v52 = vld [vmem:[%s12780_s6 + $0xe0] sm:$0xff]  ;;  %v5679_v39 = vld [vmem:[%s12780_s6 + $0xd8] sm:$0xff]  ;;  %v10169_v57 = vpop.permute.xlu0 %902  ;;  %v2368_v26 = vpack.c.bf16 %v2005_v3, %v2004_v17 }
 0x24c   :  { %5811 = vperm.xlu1 %8856, %v5677_v28   ;;  %5806 = vperm.xlu0 %8855, %v5676_v41   ;;  %v5681_v28 = vld [vmem:[%s12780_s6 + $0xe8] sm:$0xff]  ;;  %v7661_v41 = vld [vmem:[#allocation3 + $0x3c0] sm:$0xf]  ;;  %12843 = vst [vmem:[#allocation65_spill] sm:$0xff] %v10169_v57  ;;  %v6587_v3 = vld [vmem:[%s12781_s7 + $0x18] sm:$0xff] }
 0x24d   :  { %4414 = vmatpush.bf16.msra.mxu3 %v2371_v44  ;;  %7147 = vmatmul.msk.bf16.gmra.mxu0 %vm1290_vm0, %v8491_v50  ;;  %v2369_v38 = vpack.c.bf16 %v2007_v7, %v2006_v61  ;;  %v1884_v62 = vmul.f32 0.2, %v1637_v48  ;;  %v8647_v44 = vld [vmem:[#allocation3 + $0x3dc] sm:$0xf0]  ;;  %v8579_v50 = vld [vmem:[#allocation3 + $0x1c4] sm:$0xf]  ;;  %v10176_v7 = vpop.permute.xlu2 %897 }
 0x24e   :  { %v7407_v24 = vld [vmem:[#allocation3 + $0x1e0] sm:$0xf0]  ;;  %v7662_v55 = vor.u32 %v8647_v44, %v7661_v41  ;;  %12844 = vst [vmem:[#allocation66_spill] sm:$0xff] %v10176_v7  ;;  %v7693_v44 = vld [vmem:[#allocation3 + $0x400] sm:$0xf] }
 0x24f   :  { %v7410_v56 = vor.u32 %v8579_v50, %v7407_v24  ;;  %v8655_v24 = vld [vmem:[#allocation3 + $0x41c] sm:$0xf0] }
 0x250   :  { %v10155_v22 = vpop.f32.mrf.mxu1 }
 0x251   :  { %4415 = vmatpush.bf16.msra.mxu3 %v2370_v21  ;;  %v2012_v21 = vmax.f32 %v1637_v48, %v1884_v62  ;;  %v8492_v48 = vld [vmem:[%s12775_s1 + $0x108] sm:$0xff] }
 0x252   :  { %v1638_v29 = vpop.f32.mrf.mxu0  ;;  %5831 = vperm.xlu2 %8857, %v5681_v28  }
 0x253   :  { %v1639_v9 = vadd.f32 %v1638_v29, %v9787_v37  ;;  %v6584_v37 = vld [vmem:[%s12781_s7] sm:$0xff]  ;;  %v10199_v62 = vpop.permute.xlu0 %827 }
 0x254   :  { %5826 = vperm.xlu1 %8856, %v5680_v52   ;;  %5821 = vperm.xlu0 %8855, %v5679_v39   ;;  %v10189_v52 = vpop.permute.xlu1 %817  ;;  %12846 = vst [vmem:[#allocation68_spill] sm:$0xff] %v10199_v62 }
 0x255   :  { %4416 = vmatpush.bf16.msra.mxu3 %v2369_v38  ;;  %v1885_v23 = vmul.f32 0.2, %v1639_v9  ;;  %12845 = vst [vmem:[#allocation67_spill] sm:$0xff] %v10189_v52  ;;  %v2479_v41 = vpop.permute.xlu2 %2478 }
 0x257   :  { %v2013_v46 = vmax.f32 %v1639_v9, %v1885_v23  ;;  %v6586_v9 = vld [vmem:[%s12781_s7 + $0x10] sm:$0xff]  ;;  %v8587_v23 = vld [vmem:[#allocation3 + $0x204] sm:$0xf] }
 0x258   :  { %v10171_v28 = vpop.f32.mrf.mxu1 }
 0x259   :  { %4417 = vmatpush.bf16.msra.mxu3 %v2368_v26  ;;  %v10187_v61 = vpack.c.bf16 %v2013_v46, %v2012_v21  ;;  %v8528_v21 = vld [vmem:[#allocation3 + $0x24] sm:$0xf0] }
 0x25a   :  { %v1641_v39 = vpop.f32.mrf.mxu0  ;;  %6618 = vperm.xlu2 %8857, %v6584_v37   ;;  %v7694_v37 = vor.u32 %v8655_v24, %v7693_v44  ;;  %v4086_v44 = vadd.f32 %v9888_v60, %v2479_v41  ;;  %v6591_v60 = vld [vmem:[%s12781_s7 + $0x38] sm:$0xff] }
 0x25b   :  { %4159 = vmatmul.bf16.gmra.mxu1 %v7662_v55  ;;  %4288 = vmatmul.bf16.gmra.mxu2 %v7410_v56  ;;  %v1642_v29 = vadd.f32 %v1641_v39, %v9758_v33  ;;  %v7189_v55 = vld [vmem:[#allocation3 + $0x8] sm:$0xf] }
 0x25c   :  { %5841 = vperm.xlu1 %8856, %v5683_v34   ;;  %5836 = vperm.xlu0 %8855, %v5682_v35   ;;  %v10209_v26 = vpop.permute.xlu1 %2488 }
 0x25d   :  { %4418 = vmatpush.bf16.msra.mxu3 %v9985_v19  ;;  %7148 = vmatmul.msk.bf16.gmra.mxu0 %vm1290_vm0, %v8492_v48  ;;  %v6585_v19 = vld [vmem:[%s12781_s7 + $0x8] sm:$0xff]  ;;  %v1886_v17 = vmul.f32 0.2, %v1642_v29  ;;  %v7190_v48 = vor.u32 %v8528_v21, %v7189_v55  ;;  %v6592_v21 = vld [vmem:[%s12781_s7 + $0x40] sm:$0xff] }
 0x25e   :  { %v6593_v55 = vld [vmem:[%s12781_s7 + $0x48] sm:$0xff] }
 0x25f   :  { %v2014_v46 = vmax.f32 %v1642_v29, %v1886_v17  ;;  %v8493_v29 = vld [vmem:[%s12775_s1 + $0x110] sm:$0xff] }
 0x260   :  { %v10194_v38 = vpop.f32.mrf.mxu1 }
 0x261   :  { %4419 = vmatpush.bf16.msra.mxu3 %v9945_v4  ;;  %v7439_v4 = vld [vmem:[#allocation3 + $0x220] sm:$0xf0] }
 0x262   :  { %v1643_v33 = vpop.f32.mrf.mxu0  ;;  %6633 = vperm.xlu2 %8857, %v6587_v3   ;;  %v7442_v35 = vor.u32 %v8587_v23, %v7439_v4  ;;  %v6588_v3 = vld [vmem:[%s12781_s7 + $0x20] sm:$0xff] }
 0x263   :  { %v1644_v50 = vadd.f32 %v1643_v33, %v9794_v63  ;;  %v6590_v63 = vld [vmem:[%s12781_s7 + $0x30] sm:$0xff] }
 0x264   :  { %6628 = vperm.xlu1 %8856, %v6586_v9   ;;  %6623 = vperm.xlu0 %8855, %v6585_v19   ;;  %v10229_v19 = vpop.permute.xlu0 %812  ;;  %v10235_v17 = vpop.permute.xlu1 %2553 }
 0x265   :  { %4420 = vmatpush.bf16.msra.mxu3 %v9905_v25  ;;  %v1887_v56 = vmul.f32 0.2, %v1644_v50  ;;  %v6589_v25 = vld [vmem:[%s12781_s7 + $0x28] sm:$0xff]  ;;  %12847 = vst [vmem:[#allocation69_spill] sm:$0xff] %v10229_v19 }
 0x267   :  { %v2015_v39 = vmax.f32 %v1644_v50, %v1887_v56  ;;  %v7725_v56 = vld [vmem:[#allocation3 + $0x440] sm:$0xf] }
 0x268   :  { %v10212_v34 = vpop.f32.mrf.mxu1 }
 0x269   :  { %4421 = vmatpush.bf16.msra.mxu3 %v9865_v15  ;;  %v10227_v9 = vpack.c.bf16 %v2015_v39, %v2014_v46  ;;  %v10231_v15 = vpop.permute.xlu2 %2493  ;;  %v7221_v39 = vld [vmem:[#allocation3 + $0x48] sm:$0xf] }
 0x26a   :  { %v1646_v33 = vpop.f32.mrf.mxu0  ;;  %6648 = vperm.xlu2 %8857, %v6590_v63  }
 0x26b   :  { %4164 = vmatmul.bf16.gmra.mxu1 %v7694_v37  ;;  %4293 = vmatmul.bf16.gmra.mxu2 %v7442_v35  ;;  %v1647_v24 = vadd.f32 %v1646_v33, %v9723_v8  ;;  %v8663_v8 = vld [vmem:[#allocation3 + $0x45c] sm:$0xf0]  ;;  %v8595_v35 = vld [vmem:[#allocation3 + $0x244] sm:$0xf] }
 0x26c   :  { %4422 = vmatmul.bf16.vlgmr.msra.gmra.mxu3 %v7190_v48  ;;  %6643 = vperm.xlu1 %8856, %v6589_v25   ;;  %v7471_v48 = vld [vmem:[#allocation3 + $0x260] sm:$0xf0]  ;;  %v2484_v63 = vpop.permute.xlu0 %2483  ;;  %v8536_v25 = vld [vmem:[#allocation3 + $0x64] sm:$0xf0] }
 0x26d   :  { %6638 = vperm.xlu0 %8855, %v6588_v3   ;;  %7149 = vmatmul.msk.bf16.gmra.mxu0 %vm1290_vm0, %v8493_v29  ;;  %v1888_v37 = vmul.f32 0.2, %v1647_v24  ;;  %v4088_v3 = vadd.f32 %v9913_v40, %v2484_v63  ;;  %v6595_v40 = vld [vmem:[%s12781_s7 + $0x58] sm:$0xff] }
 0x26e   :  { %v4254_v50 = vpop.f32.mrf.mxu2 }
 0x26f   :  { %v10238_v23 = vadd.f32 %v4254_v50, %v4086_v44  ;;  %v7726_v50 = vor.u32 %v8663_v8, %v7725_v56  ;;  %v2016_v53 = vmax.f32 %v1647_v24, %v1888_v37  ;;  %v6594_v24 = vld [vmem:[%s12781_s7 + $0x50] sm:$0xff]  ;;  %v8494_v56 = vld [vmem:[%s12775_s1 + $0x118] sm:$0xff] }
 0x270   :  { %v10240_v4 = vpop.f32.mrf.mxu1 }
 0x271   :  { %v10253_v33 = vpop.permute.xlu2 %2538 }
 0x272   :  { %v1648_v41 = vpop.f32.mrf.mxu0  ;;  %6663 = vperm.xlu2 %8857, %v6593_v55   ;;  %v7474_v55 = vor.u32 %v8595_v35, %v7471_v48 }
 0x273   :  { %v1649_v46 = vadd.f32 %v1648_v41, %v9739_v42  ;;  %v7222_v42 = vor.u32 %v8536_v25, %v7221_v39  ;;  %v10262_v41 = vpop.permute.xlu1 %2528 }
 0x274   :  { %6658 = vperm.xlu1 %8856, %v6592_v21   ;;  %v6596_v21 = vld [vmem:[%s12781_s7 + $0x60] sm:$0xff] }
 0x275   :  { %6653 = vperm.xlu0 %8855, %v6591_v60   ;;  %v1889_v29 = vmul.f32 0.2, %v1649_v46 }
 0x276   :  { %v4256_v44 = vpop.f32.mrf.mxu2 }
 0x277   :  { %v10255_v7 = vadd.f32 %v4256_v44, %v4088_v3  ;;  %v2017_v60 = vmax.f32 %v1649_v46, %v1889_v29  ;;  %v4091_v46 = vadd.f32 %v9931_v47, %v10209_v26  ;;  %v6598_v3 = vld [vmem:[%s12781_s7 + $0x70] sm:$0xff]  ;;  %v6597_v47 = vld [vmem:[%s12781_s7 + $0x68] sm:$0xff]  ;;  %v7757_v29 = vld [vmem:[#allocation3 + $0x480] sm:$0xf] }
 0x278   :  { %v10257_v57 = vpop.f32.mrf.mxu1  ;;  %v8671_v44 = vld [vmem:[#allocation3 + $0x49c] sm:$0xf0] }
 0x279   :  { %v10273_v8 = vpack.c.bf16 %v2017_v60, %v2016_v53  ;;  %v6599_v53 = vld [vmem:[%s12781_s7 + $0x78] sm:$0xff]  ;;  %v10286_v25 = vpop.permute.xlu2 %2533  ;;  %v7253_v60 = vld [vmem:[#allocation3 + $0x88] sm:$0xf] }
 0x27a   :  { %v1651_v37 = vpop.f32.mrf.mxu0  ;;  %6678 = vperm.xlu2 %8857, %v6596_v21   ;;  %v7503_v21 = vld [vmem:[#allocation3 + $0x2a0] sm:$0xf0] }
 0x27b   :  { %4169 = vmatmul.bf16.gmra.mxu1 %v7726_v50  ;;  %4298 = vmatmul.bf16.gmra.mxu2 %v7474_v55  ;;  %v1652_v48 = vadd.f32 %v1651_v37, %v9735_v20  ;;  %v10294_v26 = vpop.permute.xlu1 %2523  ;;  %v10299_v37 = vpop.permute.xlu0 %2548 }
 0x27c   :  { %4427 = vmatmul.bf16.gmra.mxu3 %v7222_v42  ;;  %6673 = vperm.xlu1 %8856, %v6595_v40   ;;  %v8603_v42 = vld [vmem:[#allocation3 + $0x284] sm:$0xf]  ;;  %v8544_v40 = vld [vmem:[#allocation3 + $0xa4] sm:$0xf0] }
 0x27d   :  { %6668 = vperm.xlu0 %8855, %v6594_v24   ;;  %7150 = vmatmul.msk.bf16.gmra.mxu0 %vm1290_vm0, %v8494_v56  ;;  %v1890_v50 = vmul.f32 0.2, %v1652_v48  ;;  %v4093_v24 = vadd.f32 %v9953_v16, %v10231_v15  ;;  %v6601_v16 = vld [vmem:[%s12781_s7 + $0x88] sm:$0xff]  ;;  %v6600_v15 = vld [vmem:[%s12781_s7 + $0x80] sm:$0xff] }
 0x27e   :  { %v4259_v35 = vpop.f32.mrf.mxu2 }
 0x27f   :  { %v10279_v63 = vadd.f32 %v4259_v35, %v4091_v46  ;;  %v7758_v35 = vor.u32 %v8671_v44, %v7757_v29  ;;  %v2018_v45 = vmax.f32 %v1652_v48, %v1890_v50  ;;  %v8495_v48 = vld [vmem:[%s12775_s1 + $0x120] sm:$0xff] }
 0x280   :  { %v10281_v39 = vpop.f32.mrf.mxu1 }
 0x281   :  { %v2509_v29 = vpop.permute.xlu2 %2508 }
 0x282   :  { %v1653_v20 = vpop.f32.mrf.mxu0  ;;  %6693 = vperm.xlu2 %8857, %v6599_v53   ;;  %v7506_v53 = vor.u32 %v8603_v42, %v7503_v21 }
 0x283   :  { %v1654_v55 = vadd.f32 %v1653_v20, %v9701_v12  ;;  %v7254_v12 = vor.u32 %v8544_v40, %v7253_v60  ;;  %v2499_v50 = vpop.permute.xlu1 %2498  ;;  %v10330_v40 = vpop.permute.xlu0 %2543 }
 0x284   :  { %6688 = vperm.xlu1 %8856, %v6598_v3   ;;  %v6602_v3 = vld [vmem:[%s12781_s7 + $0x90] sm:$0xff] }
 0x285   :  { %6683 = vperm.xlu0 %8855, %v6597_v47   ;;  %v1891_v56 = vmul.f32 0.2, %v1654_v55 }
 0x286   :  { %v4261_v46 = vpop.f32.mrf.mxu2 }
 0x287   :  { %v10301_v5 = vadd.f32 %v4261_v46, %v4093_v24  ;;  %v2019_v47 = vmax.f32 %v1654_v55, %v1891_v56  ;;  %v4096_v55 = vadd.f32 %v9969_v1, %v2499_v50  ;;  %v6604_v24 = vld [vmem:[%s12781_s7 + $0xa0] sm:$0xff]  ;;  %v6603_v1 = vld [vmem:[%s12781_s7 + $0x98] sm:$0xff] }
 0x288   :  { %v10303_v62 = vpop.f32.mrf.mxu1  ;;  %v7789_v46 = vld [vmem:[#allocation3 + $0x4c0] sm:$0xf] }
 0x289   :  { %v10317_v20 = vpack.c.bf16 %v2019_v47, %v2018_v45  ;;  %v6605_v45 = vld [vmem:[%s12781_s7 + $0xa8] sm:$0xff] }
 0x28a   :  { %v10319_v44 = vpop.f32.mrf.mxu0  ;;  %6708 = vperm.xlu2 %8857, %v6602_v3   ;;  %v7535_v3 = vld [vmem:[#allocation3 + $0x2e0] sm:$0xf0]  ;;  %v7285_v47 = vld [vmem:[#allocation3 + $0xc8] sm:$0xf] }
 0x28b   :  { %4174 = vmatmul.bf16.gmra.mxu1 %v7758_v35  ;;  %4303 = vmatmul.bf16.gmra.mxu2 %v7506_v53  ;;  %v8679_v35 = vld [vmem:[#allocation3 + $0x4dc] sm:$0xf0]  ;;  %v8611_v53 = vld [vmem:[#allocation3 + $0x2c4] sm:$0xf] }
 0x28c   :  { %4432 = vmatmul.bf16.gmra.mxu3 %v7254_v12  ;;  %6703 = vperm.xlu1 %8856, %v6601_v16   ;;  %v2504_v12 = vpop.permute.xlu2 %2503  ;;  %v8552_v16 = vld [vmem:[#allocation3 + $0xe4] sm:$0xf0]  ;;  %v7790_v50 = vor.u32 %v8679_v35, %v7789_v46  ;;  %v7538_v49 = vor.u32 %v8611_v53, %v7535_v3  ;;  %v2519_v46 = vpop.permute.xlu0 %2518  ;;  %v4101_v53 = vadd.f32 %v10011_v11, %v2509_v29  ;;  %v7821_v29 = vld [vmem:[#allocation3 + $0x500] sm:$0xf] }
 0x28d   :  { %6698 = vperm.xlu0 %8855, %v6600_v15   ;;  %7151 = vmatmul.msk.bf16.gmra.mxu0 %vm1290_vm0, %v8495_v48  ;;  %v4098_v15 = vadd.f32 %v9992_v58, %v2504_v12  ;;  %v7286_v52 = vor.u32 %v8552_v16, %v7285_v47  ;;  %v6606_v58 = vld [vmem:[%s12781_s7 + $0xb0] sm:$0xff]  ;;  %v6611_v16 = vld [vmem:[%s12781_s7 + $0xd8] sm:$0xff] }
 0x28e   :  { %v4264_v42 = vpop.f32.mrf.mxu2 }
 0x28f   :  { %v10323_v21 = vadd.f32 %v4264_v42, %v4096_v55 }
 0x290   :  { %v10325_v60 = vpop.f32.mrf.mxu1 }
 0x292   :  { %v10338_v56 = vpop.f32.mrf.mxu0  ;;  %6723 = vperm.xlu2 %8857, %v6605_v45   ;;  %v6608_v45 = vld [vmem:[%s12781_s7 + $0xc0] sm:$0xff] }
 0x294   :  { %6718 = vperm.xlu1 %8856, %v6604_v24   ;;  %v6607_v24 = vld [vmem:[%s12781_s7 + $0xb8] sm:$0xff] }
 0x295   :  { %6713 = vperm.xlu0 %8855, %v6603_v1   ;;  %v8496_v1 = vld [vmem:[%s12775_s1 + $0x128] sm:$0xff] }
 0x296   :  { %v4266_v48 = vpop.f32.mrf.mxu2 }
 0x297   :  { %v10341_v55 = vadd.f32 %v4266_v48, %v4098_v15  ;;  %v8687_v15 = vld [vmem:[#allocation3 + $0x51c] sm:$0xf0]  ;;  %v8619_v48 = vld [vmem:[#allocation3 + $0x304] sm:$0xf] }
 0x298   :  { %v10343_v42 = vpop.f32.mrf.mxu1 }
 0x29a   :  { %v10357_v35 = vpop.f32.mrf.mxu0  ;;  %6738 = vperm.xlu2 %8857, %v6608_v45   ;;  %v7567_v45 = vld [vmem:[#allocation3 + $0x320] sm:$0xf0] }
 0x29b   :  { %4179 = vmatmul.bf16.gmra.mxu1 %v7790_v50  ;;  %4308 = vmatmul.bf16.gmra.mxu2 %v7538_v49  ;;  %v6610_v49 = vld [vmem:[%s12781_s7 + $0xd0] sm:$0xff]  ;;  %v2514_v50 = vpop.permute.xlu0 %2513  ;;  %v7570_v18 = vor.u32 %v8619_v48, %v7567_v45 }
 0x29c   :  { %4437 = vmatmul.bf16.gmra.mxu3 %v7286_v52  ;;  %6733 = vperm.xlu1 %8856, %v6607_v24   ;;  %v6609_v52 = vld [vmem:[%s12781_s7 + $0xc8] sm:$0xff] }
 0x29d   :  { %6728 = vperm.xlu0 %8855, %v6606_v58   ;;  %7152 = vmatmul.msk.bf16.gmra.mxu0 %vm1290_vm0, %v8496_v1  ;;  %v7317_v24 = vld [vmem:[#allocation3 + $0x108] sm:$0xf]  ;;  %v4103_v1 = vadd.f32 %v10034_v0, %v2514_v50  ;;  %v6612_v0 = vld [vmem:[%s12781_s7 + $0xe0] sm:$0xff] }
 0x29e   :  { %v4269_v12 = vpop.f32.mrf.mxu2  ;;  %v8560_v58 = vld [vmem:[#allocation3 + $0x124] sm:$0xf0] }
 0x29f   :  { %v10361_v3 = vadd.f32 %v4269_v12, %v4101_v53  ;;  %v7822_v12 = vor.u32 %v8687_v15, %v7821_v29  ;;  %v4106_v15 = vadd.f32 %v10051_v51, %v2519_v46  ;;  %v7599_v51 = vld [vmem:[#allocation3 + $0x360] sm:$0xf0]  ;;  %v7349_v46 = vld [vmem:[#allocation3 + $0x148] sm:$0xf] }
 0x2a0   :  { %v10363_v47 = vpop.f32.mrf.mxu1 }
 0x2a1   :  { %12848 = vst [vmem:[#allocation70_spill] sm:$0xff] %v10363_v47  ;;  %v7318_v47 = vor.u32 %v8560_v58, %v7317_v24  ;;  %v6845_v24 = vld [vmem:[#allocation2] sm:$0x1]  ;;  %v6615_v58 = vld [vmem:[%s12781_s7 + $0xf8] sm:$0xff] }
 0x2a2   :  { %v10374_v11 = vpop.f32.mrf.mxu0  ;;  %6753 = vperm.xlu2 %8857, %v6611_v16   ;;  %v6614_v16 = vld [vmem:[%s12781_s7 + $0xf0] sm:$0xff] }
 0x2a4   :  { %6748 = vperm.xlu1 %8856, %v6610_v49   ;;  %v6613_v49 = vld [vmem:[%s12781_s7 + $0xe8] sm:$0xff] }
 0x2a5   :  { %6743 = vperm.xlu0 %8855, %v6609_v52   ;;  %v8497_v52 = vld [vmem:[%s12775_s1 + $0x130] sm:$0xff] }
 0x2a6   :  { %v4271_v53 = vpop.f32.mrf.mxu2 }
 0x2a7   :  { %v10377_v19 = vadd.f32 %v4271_v53, %v4103_v1  ;;  %v7853_v53 = vld [vmem:[#allocation3 + $0x540] sm:$0xf] }
 0x2a8   :  { %v10379_v32 = vpop.f32.mrf.mxu1 }
 0x2aa   :  { %v1666_v29 = vpop.f32.mrf.mxu0  ;;  %6768 = vperm.xlu2 %8857, %v6614_v16   ;;  %v8568_v16 = vld [vmem:[#allocation3 + $0x164] sm:$0xf0] }
 0x2ab   :  { %4184 = vmatmul.bf16.gmra.mxu1 %v7822_v12  ;;  %4313 = vmatmul.bf16.gmra.mxu2 %v7570_v18  ;;  %v8695_v18 = vld [vmem:[#allocation3 + $0x55c] sm:$0xf0]  ;;  %v10402_v12 = vpop.permute.xlu1 %2633 }
 0x2ac   :  { %4442 = vmatmul.bf16.gmra.mxu3 %v7318_v47  ;;  %6763 = vperm.xlu1 %8856, %v6613_v49   ;;  %v8627_v47 = vld [vmem:[#allocation3 + $0x344] sm:$0xf]  ;;  %12851 = vst [vmem:[#allocation73_spill] sm:$0xff] %v10402_v12  ;;  %v4108_v49 = vadd.f32 %v10070_v6, %v10294_v26  ;;  %v8498_v12 = vld [vmem:[%s12775_s1 + $0x138] sm:$0xff] }
 0x2ad   :  { %6758 = vperm.xlu0 %8855, %v6612_v0   ;;  %7153 = vmatmul.msk.bf16.gmra.mxu0 %vm1290_vm0, %v8497_v52  ;;  %v7854_v52 = vor.u32 %v8695_v18, %v7853_v53 }
 0x2ae   :  { %v4274_v48 = vpop.f32.mrf.mxu2 }
 0x2af   :  { %v10395_v50 = vadd.f32 %v4274_v48, %v4106_v15 }
 0x2b0   :  { %v10397_v45 = vpop.f32.mrf.mxu1 }
 0x2b1   :  { %12849 = vst [vmem:[#allocation71_spill] sm:$0xff] %v10395_v50  ;;  %v7350_v50 = vor.u32 %v8568_v16, %v7349_v46  ;;  %v7885_v16 = vld [vmem:[#allocation3 + $0x580] sm:$0xf] }
 0x2b2   :  { %12850 = vst [vmem:[#allocation72_spill] sm:$0xff] %v10397_v45  ;;  %v1668_v1 = vpop.f32.mrf.mxu0  ;;  %v7602_v45 = vor.u32 %v8627_v47, %v7599_v51 }
 0x2b3   :  { %v10416_v6 = vpop.permute.xlu1 %2608  ;;  %v1669_v51 = vadd.f32 %v1668_v1, %v9613_v13  ;;  %v1664_v1 = vadd.f32 %v10374_v11, %v9649_v2  ;;  %v8499_v2 = vld [vmem:[%s12775_s1 + $0x140] sm:$0xff]  ;;  %v1659_v11 = vadd.f32 %v10338_v56, %v9708_v30 }
 0x2b4   :  { %6848 = vperm.xlu1 %8856, %v6845_v24   ;;  %12853 = vst [vmem:[#allocation75_spill] sm:$0xff] %v10416_v6 }
 0x2b5   :  { %6773 = vperm.xlu0 %8855, %v6615_v58   ;;  %v4111_v58 = vadd.f32 %v10085_v27, %v10262_v41  ;;  %v8635_v41 = vld [vmem:[#allocation3 + $0x384] sm:$0xf]  ;;  %v1893_v30 = vmul.f32 0.2, %v1659_v11 }
 0x2b6   :  { %v4276_v0 = vpop.f32.mrf.mxu2 }
 0x2b7   :  { %v10406_v15 = vadd.f32 %v4276_v0, %v4108_v49  ;;  %v1667_v0 = vadd.f32 %v1666_v29, %v9647_v10 }
 0x2b8   :  { %v10408_v48 = vpop.f32.mrf.mxu1 }
 0x2b9   :  { %12852 = vst [vmem:[#allocation74_spill] sm:$0xff] %v10408_v48 }
 0x2ba   :  { %v1671_v24 = vpop.f32.mrf.mxu0 }
 0x2bb   :  { %4189 = vmatmul.bf16.gmra.mxu1 %v7854_v52  ;;  %4318 = vmatmul.bf16.gmra.mxu2 %v7602_v45  ;;  %v1672_v53 = vadd.f32 %v1671_v24, %v9577_v54  ;;  %v8703_v45 = vld [vmem:[#allocation3 + $0x59c] sm:$0xf0]  ;;  %v7381_v52 = vld [vmem:[#allocation3 + $0x188] sm:$0xf]  ;;  %v10428_v24 = vpop.permute.xlu2 %2618  ;;  %v10438_v6 = vpop.permute.xlu1 %2603 }
 0x2bc   :  { %4447 = vmatmul.bf16.gmra.mxu3 %v7350_v50  ;;  %v10424_v50 = vpop.permute.xlu0 %2628  ;;  %v8576_v54 = vld [vmem:[#allocation3 + $0x1a4] sm:$0xf0]  ;;  %12857 = vst [vmem:[#allocation79_spill] sm:$0xff] %v10428_v24 }
 0x2bd   :  { %7154 = vmatmul.msk.bf16.gmra.mxu0 %vm1290_vm0, %v8498_v12  ;;  %12856 = vst [vmem:[#allocation78_spill] sm:$0xff] %v10424_v50  ;;  %v1898_v49 = vmul.f32 0.2, %v1672_v53  ;;  %v7631_v12 = vld [vmem:[#allocation3 + $0x3a0] sm:$0xf0]  ;;  %v7382_v10 = vor.u32 %v8576_v54, %v7381_v52 }
 0x2be   :  { %v4279_v26 = vpop.f32.mrf.mxu2 }
 0x2bf   :  { %v10419_v18 = vadd.f32 %v4279_v26, %v4111_v58  ;;  %v4113_v58 = vadd.f32 %v10107_v43, %v10286_v25  ;;  %v1897_v26 = vmul.f32 0.2, %v1669_v51  ;;  %v1662_v43 = vadd.f32 %v10357_v35, %v9631_v59 }
 0x2c0   :  { %v10421_v47 = vpop.f32.mrf.mxu1  ;;  %v1896_v25 = vmul.f32 0.2, %v1667_v0 }
 0x2c1   :  { %12854 = vst [vmem:[#allocation76_spill] sm:$0xff] %v10419_v18  ;;  %v7634_v18 = vor.u32 %v8635_v41, %v7631_v12 }
 0x2c2   :  { %12855 = vst [vmem:[#allocation77_spill] sm:$0xff] %v10421_v47  ;;  %v1673_v46 = vpop.f32.mrf.mxu0  ;;  %v7886_v47 = vor.u32 %v8703_v45, %v7885_v16  ;;  %v2025_v45 = vmax.f32 %v1669_v51, %v1897_v26  ;;  %v2024_v59 = vmax.f32 %v1667_v0, %v1896_v25 }
 0x2c3   :  { %v1674_v27 = vadd.f32 %v1673_v46, %v9620_v31  ;;  %v2026_v31 = vmax.f32 %v1672_v53, %v1898_v49  ;;  %v1895_v53 = vmul.f32 0.2, %v1664_v1  ;;  %v1894_v49 = vmul.f32 0.2, %v1662_v43  ;;  %v10454_v51 = vpop.permute.xlu2 %2613  ;;  %v10461_v54 = vpop.permute.xlu1 %2578 }
 0x2c4   :  { %v10449_v35 = vpop.permute.xlu0 %2623  ;;  %v2378_v41 = vpack.c.bf16 %v2025_v45, %v2024_v59 }
 0x2c5   :  { %v1899_v13 = vmul.f32 0.2, %v1674_v27  ;;  %v2022_v0 = vmax.f32 %v1662_v43, %v1894_v49  ;;  %v4118_v43 = vadd.f32 %v10155_v22, %v10330_v40  ;;  %v8500_v22 = vld [vmem:[%s12775_s1 + $0x148] sm:$0xff] }
 0x2c6   :  { %v4281_v50 = vpop.f32.mrf.mxu2 }
 0x2c7   :  { %v10434_v46 = vadd.f32 %v4281_v50, %v4113_v58  ;;  %v2027_v29 = vmax.f32 %v1674_v27, %v1899_v13  ;;  %v1657_v50 = vadd.f32 %v10319_v44, %v9667_v14  ;;  %v4116_v27 = vadd.f32 %v10129_v36, %v10253_v33  ;;  %v7917_v58 = vld [vmem:[#allocation3 + $0x5c0] sm:$0xf] }
 0x2c8   :  { %v10436_v48 = vpop.f32.mrf.mxu1  ;;  %v8711_v13 = vld [vmem:[#allocation3 + $0x5dc] sm:$0xf0] }
 0x2c9   :  { %v2379_v24 = vpack.c.bf16 %v2027_v29, %v2026_v31  ;;  %v1892_v44 = vmul.f32 0.2, %v1657_v50  ;;  %v7663_v29 = vld [vmem:[#allocation3 + $0x3e0] sm:$0xf0]  ;;  %v7918_v59 = vor.u32 %v8711_v13, %v7917_v58 }
 0x2ca   :  { %v1676_v16 = vpop.f32.mrf.mxu0 }
 0x2cb   :  { %4194 = vmatmul.bf16.gmra.mxu1 %v7886_v47  ;;  %4323 = vmatmul.bf16.gmra.mxu2 %v7634_v18  ;;  %v2023_v47 = vmax.f32 %v1664_v1, %v1895_v53  ;;  %v12858_v18 = vld [vmem:[#allocation19_spill] sm:$0xff]  ;;  %v12859_v1 = vld [vmem:[#allocation21_spill] sm:$0xff]  ;;  %v2020_v25 = vmax.f32 %v1657_v50, %v1892_v44 }
 0x2cc   :  { %4452 = vmatmul.bf16.gmra.mxu3 %v7382_v10  ;;  %4583 = vmatpush.bf16.msrb.mxu1 %v2379_v24  ;;  %v1677_v12 = vadd.f32 %v1676_v16, %v12858_v18  ;;  %v2021_v24 = vmax.f32 %v1659_v11, %v1893_v30  ;;  %v8643_v10 = vld [vmem:[#allocation3 + $0x3c4] sm:$0xf]  ;;  %v8584_v53 = vld [vmem:[#allocation3 + $0x1e4] sm:$0xf0]  ;;  %v10466_v11 = vpop.permute.xlu0 %2598  ;;  %v10472_v18 = vpop.permute.xlu2 %2588 }
 0x2cd   :  { %7155 = vmatmul.msk.bf16.gmra.mxu0 %vm1290_vm0, %v8499_v2  ;;  %v2377_v33 = vpack.c.bf16 %v2023_v47, %v2022_v0  ;;  %v7413_v2 = vld [vmem:[#allocation3 + $0x1c8] sm:$0xf]  ;;  %v4121_v0 = vadd.f32 %v10171_v28, %v10299_v37  ;;  %v8651_v28 = vld [vmem:[#allocation3 + $0x404] sm:$0xf] }
 0x2ce   :  { %v4284_v56 = vpop.f32.mrf.mxu2  ;;  %v1900_v26 = vmul.f32 0.2, %v1677_v12  ;;  %v2376_v49 = vpack.c.bf16 %v2021_v24, %v2020_v25  ;;  %v7414_v47 = vor.u32 %v8584_v53, %v7413_v2  ;;  %v8719_v2 = vld [vmem:[#allocation3 + $0x61c] sm:$0xf0]  ;;  %v7695_v37 = vld [vmem:[#allocation3 + $0x420] sm:$0xf0] }
 0x2cf   :  { %v10457_v52 = vadd.f32 %v4284_v56, %v4116_v27  ;;  %v7666_v27 = vor.u32 %v8643_v10, %v7663_v29  ;;  %v12861_v29 = vld [vmem:[#allocation17_spill] sm:$0xff]  ;;  %v7445_v53 = vld [vmem:[#allocation3 + $0x208] sm:$0xf] }
 0x2d0   :  { %v10459_v14 = vpop.f32.mrf.mxu1  ;;  %4584 = vmatpush.bf16.msrb.mxu1 %v2378_v41  ;;  %v2028_v30 = vmax.f32 %v1677_v12, %v1900_v26  ;;  %v10479_v12 = vpop.permute.xlu1 %2573 }
 0x2d2   :  { %v1678_v36 = vpop.f32.mrf.mxu0 }
 0x2d3   :  { %v1679_v31 = vadd.f32 %v1678_v36, %v12859_v1  ;;  %v12860_v36 = vld [vmem:[#allocation20_spill] sm:$0xff] }
 0x2d4   :  { %4585 = vmatpush.bf16.msrb.mxu1 %v2377_v33  ;;  %v10491_v26 = vpop.permute.xlu0 %2593  ;;  %v10493_v10 = vpop.permute.xlu2 %2583 }
 0x2d5   :  { %v1901_v16 = vmul.f32 0.2, %v1679_v31 }
 0x2d6   :  { %v4286_v45 = vpop.f32.mrf.mxu2 }
 0x2d7   :  { %v10468_v56 = vadd.f32 %v4286_v45, %v4118_v43  ;;  %v2029_v50 = vmax.f32 %v1679_v31, %v1901_v16  ;;  %v7949_v31 = vld [vmem:[#allocation3 + $0x600] sm:$0xf]  ;;  %v8592_v43 = vld [vmem:[#allocation3 + $0x224] sm:$0xf0] }
 0x2d8   :  { %v10470_v41 = vpop.f32.mrf.mxu1  ;;  %4586 = vmatpush.bf16.msrb.mxu1 %v2376_v49  ;;  %v2639_v45 = vpop.permute.xlu1 %2638  ;;  %v7950_v49 = vor.u32 %v8719_v2, %v7949_v31 }
 0x2d9   :  { %v10477_v40 = vpack.c.bf16 %v2029_v50, %v2028_v30  ;;  %v7446_v50 = vor.u32 %v8592_v43, %v7445_v53  ;;  %v12864_v43 = vld [vmem:[#allocation18_spill] sm:$0xff] }
 0x2da   :  { %v1681_v44 = vpop.f32.mrf.mxu0 }
 0x2db   :  { %4199 = vmatmul.bf16.gmra.mxu1 %v7918_v59  ;;  %4328 = vmatmul.bf16.gmra.mxu2 %v7666_v27  ;;  %v1682_v33 = vadd.f32 %v1681_v44, %v12860_v36 }
 0x2dc   :  { %4457 = vmatmul.bf16.gmra.mxu3 %v7414_v47  ;;  %4587 = vmatpush.bf16.msrb.mxu1 %v10317_v20  ;;  %v7698_v47 = vor.u32 %v8651_v28, %v7695_v37  ;;  %v7981_v37 = vld [vmem:[#allocation3 + $0x640] sm:$0xf] }
 0x2dd   :  { %7156 = vmatmul.msk.bf16.gmra.mxu0 %vm1290_vm0, %v8500_v22  ;;  %v1902_v20 = vmul.f32 0.2, %v1682_v33 }
 0x2de   :  { %v4289_v24 = vpop.f32.mrf.mxu2 }
 0x2df   :  { %v10488_v13 = vadd.f32 %v4289_v24, %v4121_v0  ;;  %v2030_v59 = vmax.f32 %v1682_v33, %v1902_v20  ;;  %v2559_v33 = vpop.permute.xlu2 %2558 }
 0x2e0   :  { %v10486_v58 = vpop.f32.mrf.mxu1  ;;  %4588 = vmatpush.bf16.msrb.mxu1 %v10273_v8  ;;  %v4123_v8 = vadd.f32 %v10194_v38, %v10235_v17  ;;  %v2569_v17 = vpop.permute.xlu0 %2568  ;;  %v4126_v24 = vadd.f32 %v10212_v34, %v2559_v33  ;;  %v7477_v34 = vld [vmem:[#allocation3 + $0x248] sm:$0xf] }
 0x2e2   :  { %v1683_v1 = vpop.f32.mrf.mxu0 }
 0x2e3   :  { %v1684_v25 = vadd.f32 %v1683_v1, %v12861_v29  ;;  %v12862_v1 = vld [vmem:[#allocation16_spill] sm:$0xff] }
 0x2e4   :  { %4589 = vmatpush.bf16.msrb.mxu1 %v10227_v9  ;;  %v8501_v9 = vld [vmem:[%s12775_s1 + $0x150] sm:$0xff] }
 0x2e5   :  { %v1903_v16 = vmul.f32 0.2, %v1684_v25 }
 0x2e6   :  { %v4291_v27 = vpop.f32.mrf.mxu2 }
 0x2e7   :  { %v2031_v22 = vmax.f32 %v1684_v25, %v1903_v16  ;;  %v10499_v44 = vadd.f32 %v4291_v27, %v4123_v8  ;;  %v8659_v8 = vld [vmem:[#allocation3 + $0x444] sm:$0xf] }
 0x2e8   :  { %v4165_v30 = vpop.f32.mrf.mxu1  ;;  %4590 = vmatpush.bf16.msrb.mxu1 %v10187_v61  ;;  %v2564_v27 = vpop.permute.xlu0 %2563 }
 0x2e9   :  { %v10501_v0 = vadd.f32 %v4165_v30, %v2639_v45  ;;  %v10507_v36 = vpack.c.bf16 %v2031_v22, %v2030_v59  ;;  %v8727_v45 = vld [vmem:[#allocation3 + $0x65c] sm:$0xf0]  ;;  %v8600_v59 = vld [vmem:[#allocation3 + $0x264] sm:$0xf0] }
 0x2ea   :  { %v1686_v38 = vpop.f32.mrf.mxu0  ;;  %v7478_v33 = vor.u32 %v8600_v59, %v7477_v34  ;;  %v8013_v59 = vld [vmem:[#allocation3 + $0x680] sm:$0xf] }
 0x2eb   :  { %4204 = vmatmul.bf16.gmra.mxu1 %v7950_v49  ;;  %4333 = vmatmul.bf16.gmra.mxu2 %v7698_v47  ;;  %v1687_v31 = vadd.f32 %v1686_v38, %v12862_v1  ;;  %v7727_v49 = vld [vmem:[#allocation3 + $0x460] sm:$0xf0]  ;;  %v4128_v47 = vadd.f32 %v10240_v4, %v2564_v27 }
 0x2ec   :  { %4462 = vmatmul.bf16.gmra.mxu3 %v7446_v50  ;;  %v7982_v50 = vor.u32 %v8727_v45, %v7981_v37  ;;  %v7730_v38 = vor.u32 %v8659_v8, %v7727_v49  ;;  %v12866_v37 = vld [vmem:[#allocation13_spill] sm:$0xff] }
 0x2ed   :  { %7157 = vmatmul.msk.bf16.gmra.mxu0 %vm1290_vm0, %v8501_v9  ;;  %v1904_v53 = vmul.f32 0.2, %v1687_v31 }
 0x2ee   :  { %v4294_v20 = vpop.f32.mrf.mxu2 }
 0x2ef   :  { %v4423_v61 = vpop.f32.mrf.mxu3  ;;  %v10512_v29 = vadd.f32 %v4294_v20, %v4126_v24  ;;  %v2032_v22 = vmax.f32 %v1687_v31, %v1904_v53  ;;  %v4131_v31 = vadd.f32 %v10257_v57, %v2569_v17  ;;  %v7509_v57 = vld [vmem:[#allocation3 + $0x288] sm:$0xf] }
 0x2f0   :  { %v10515_v25 = vadd.f32 %v4423_v61, %v10238_v23  ;;  %v10517_v2 = vpop.f32.mrf.mxu1  ;;  %v8608_v17 = vld [vmem:[#allocation3 + $0x2a4] sm:$0xf0] }
 0x2f2   :  { %12863 = vst [vmem:[#allocation19_spill] sm:$0xff] %v10515_v25  ;;  %v1688_v28 = vpop.f32.mrf.mxu0 }
 0x2f3   :  { %v1689_v16 = vadd.f32 %v1688_v28, %v12864_v43  ;;  %v8502_v28 = vld [vmem:[%s12775_s1 + $0x158] sm:$0xff] }
 0x2f5   :  { %v1905_v30 = vmul.f32 0.2, %v1689_v16 }
 0x2f6   :  { %v4296_v23 = vpop.f32.mrf.mxu2 }
 0x2f7   :  { %v4425_v9 = vpop.f32.mrf.mxu3  ;;  %v2033_v24 = vmax.f32 %v1689_v16, %v1905_v30  ;;  %v10521_v1 = vadd.f32 %v4296_v23, %v4128_v47  ;;  %v12868_v30 = vld [vmem:[#allocation15_spill] sm:$0xff]  ;;  %v7759_v23 = vld [vmem:[#allocation3 + $0x4a0] sm:$0xf0] }
 0x2f8   :  { %v10524_v20 = vadd.f32 %v4425_v9, %v10255_v7  ;;  %v10526_v61 = vpop.f32.mrf.mxu1 }
 0x2f9   :  { %v10531_v43 = vpack.c.bf16 %v2033_v24, %v2032_v22  ;;  %v8667_v22 = vld [vmem:[#allocation3 + $0x484] sm:$0xf] }
 0x2fa   :  { %12865 = vst [vmem:[#allocation21_spill] sm:$0xff] %v10524_v20  ;;  %v1691_v4 = vpop.f32.mrf.mxu0  ;;  %v7637_v20 = vld [vmem:[#allocation3 + $0x388] sm:$0xf] }
 0x2fb   :  { %4209 = vmatmul.bf16.gmra.mxu1 %v7982_v50  ;;  %4338 = vmatmul.bf16.gmra.mxu2 %v7730_v38  ;;  %v1692_v53 = vadd.f32 %v1691_v4, %v12866_v37  ;;  %v8735_v50 = vld [vmem:[#allocation3 + $0x69c] sm:$0xf0]  ;;  %v4133_v38 = vadd.f32 %v10281_v39, %v10479_v12  ;;  %v7762_v4 = vor.u32 %v8667_v22, %v7759_v23 }
 0x2fc   :  { %4467 = vmatmul.bf16.gmra.mxu3 %v7478_v33  ;;  %v8014_v33 = vor.u32 %v8735_v50, %v8013_v59  ;;  %v4136_v12 = vadd.f32 %v10303_v62, %v10461_v54  ;;  %v8045_v22 = vld [vmem:[#allocation3 + $0x6c0] sm:$0xf]  ;;  %v4138_v62 = vadd.f32 %v10325_v60, %v10493_v10  ;;  %v4141_v60 = vadd.f32 %v10343_v42, %v10472_v18 }
 0x2fd   :  { %7158 = vmatmul.msk.bf16.gmra.mxu0 %vm1290_vm0, %v8502_v28  ;;  %v1906_v27 = vmul.f32 0.2, %v1692_v53  ;;  %v8743_v23 = vld [vmem:[#allocation3 + $0x6dc] sm:$0xf0] }
 0x2fe   :  { %v4299_v7 = vpop.f32.mrf.mxu2  ;;  %v8046_v54 = vor.u32 %v8743_v23, %v8045_v22  ;;  %v8077_v23 = vld [vmem:[#allocation3 + $0x700] sm:$0xf] }
 0x2ff   :  { %v4428_v16 = vpop.f32.mrf.mxu3  ;;  %v10536_v45 = vadd.f32 %v4299_v7, %v4131_v31  ;;  %v2034_v24 = vmax.f32 %v1692_v53, %v1906_v27  ;;  %v7510_v31 = vor.u32 %v8608_v17, %v7509_v57  ;;  %v8675_v57 = vld [vmem:[#allocation3 + $0x4c4] sm:$0xf] }
 0x300   :  { %v10539_v8 = vadd.f32 %v4428_v16, %v10279_v63  ;;  %v10541_v49 = vpop.f32.mrf.mxu1  ;;  %v7791_v17 = vld [vmem:[#allocation3 + $0x4e0] sm:$0xf0] }
 0x302   :  { %12867 = vst [vmem:[#allocation20_spill] sm:$0xff] %v10539_v8  ;;  %v1693_v34 = vpop.f32.mrf.mxu0 }
 0x303   :  { %v1694_v47 = vadd.f32 %v1693_v34, %v12868_v30  ;;  %v8503_v30 = vld [vmem:[%s12775_s1 + $0x160] sm:$0xff] }
 0x305   :  { %v1907_v9 = vmul.f32 0.2, %v1694_v47 }
 0x306   :  { %v4301_v63 = vpop.f32.mrf.mxu2 }
 0x307   :  { %v4430_v28 = vpop.f32.mrf.mxu3  ;;  %v2035_v37 = vmax.f32 %v1694_v47, %v1907_v9  ;;  %v10546_v7 = vadd.f32 %v4301_v63, %v4133_v38  ;;  %v7541_v9 = vld [vmem:[#allocation3 + $0x2c8] sm:$0xf]  ;;  %v7794_v63 = vor.u32 %v8675_v57, %v7791_v17  ;;  %v8751_v57 = vld [vmem:[#allocation3 + $0x71c] sm:$0xf0]  ;;  %v8683_v17 = vld [vmem:[#allocation3 + $0x504] sm:$0xf] }
 0x308   :  { %v10549_v16 = vadd.f32 %v4430_v28, %v10301_v5  ;;  %v10551_v34 = vpop.f32.mrf.mxu1  ;;  %v8616_v38 = vld [vmem:[#allocation3 + $0x2e4] sm:$0xf0]  ;;  %v8078_v18 = vor.u32 %v8751_v57, %v8077_v23 }
 0x309   :  { %v10556_v8 = vpack.c.bf16 %v2035_v37, %v2034_v24  ;;  %v7542_v28 = vor.u32 %v8616_v38, %v7541_v9  ;;  %v8504_v37 = vld [vmem:[%s12775_s1 + $0x168] sm:$0xff] }
 0x30a   :  { %12869 = vst [vmem:[#allocation17_spill] sm:$0xff] %v10549_v16  ;;  %v10558_v39 = vpop.f32.mrf.mxu0  ;;  %v7823_v9 = vld [vmem:[#allocation3 + $0x520] sm:$0xf0]  ;;  %v7573_v38 = vld [vmem:[#allocation3 + $0x308] sm:$0xf] }
 0x30b   :  { %4214 = vmatmul.bf16.gmra.mxu1 %v8014_v33  ;;  %4343 = vmatmul.bf16.gmra.mxu2 %v7762_v4  ;;  %v8767_v16 = vld [vmem:[#allocation3 + $0x79c] sm:$0xf0] }
 0x30c   :  { %4472 = vmatmul.bf16.gmra.mxu3 %v7510_v31 }
 0x30d   :  { %7159 = vmatmul.msk.bf16.gmra.mxu0 %vm1290_vm0, %v8503_v30 }
 0x30e   :  { %v4304_v5 = vpop.f32.mrf.mxu2 }
 0x30f   :  { %v4433_v53 = vpop.f32.mrf.mxu3  ;;  %v10563_v59 = vadd.f32 %v4304_v5, %v4136_v12 }
 0x310   :  { %v10566_v27 = vadd.f32 %v4433_v53, %v10323_v21  ;;  %v10568_v47 = vpop.f32.mrf.mxu1 }
 0x312   :  { %12870 = vst [vmem:[#allocation16_spill] sm:$0xff] %v10566_v27  ;;  %v10570_v50 = vpop.f32.mrf.mxu0 }
 0x316   :  { %v4306_v33 = vpop.f32.mrf.mxu2 }
 0x317   :  { %v4435_v24 = vpop.f32.mrf.mxu3  ;;  %v10574_v21 = vadd.f32 %v4306_v33, %v4138_v62  ;;  %v8624_v62 = vld [vmem:[#allocation3 + $0x324] sm:$0xf0] }
 0x318   :  { %v10577_v4 = vadd.f32 %v4435_v24, %v10341_v55  ;;  %v10579_v31 = vpop.f32.mrf.mxu1 }
 0x31a   :  { %12871 = vst [vmem:[#allocation18_spill] sm:$0xff] %v10577_v4  ;;  %v10584_v30 = vpop.f32.mrf.mxu0 }
 0x31b   :  { %4219 = vmatmul.bf16.gmra.mxu1 %v8046_v54  ;;  %4348 = vmatmul.bf16.gmra.mxu2 %v7794_v63  ;;  %v12873_v54 = vld [vmem:[#allocation70_spill] sm:$0xff]  ;;  %v7826_v63 = vor.u32 %v8683_v17, %v7823_v9 }
 0x31c   :  { %4477 = vmatmul.bf16.gmra.mxu3 %v7542_v28  ;;  %v4143_v42 = vadd.f32 %v12873_v54, %v10491_v26  ;;  %v7574_v28 = vor.u32 %v8624_v62, %v7573_v38  ;;  %v4146_v26 = vadd.f32 %v10379_v32, %v10466_v11  ;;  %v8109_v54 = vld [vmem:[#allocation3 + $0x740] sm:$0xf] }
 0x31d   :  { %7160 = vmatmul.msk.bf16.gmra.mxu0 %vm1290_vm0, %v8504_v37 }
 0x31e   :  { %v4309_v10 = vpop.f32.mrf.mxu2 }
 0x31f   :  { %v4438_v12 = vpop.f32.mrf.mxu3  ;;  %v10589_v55 = vadd.f32 %v4309_v10, %v4141_v60  ;;  %v8505_v10 = vld [vmem:[%s12775_s1 + $0x170] sm:$0xff] }
 0x320   :  { %v10592_v5 = vadd.f32 %v4438_v12, %v10361_v3  ;;  %v10594_v53 = vpop.f32.mrf.mxu1 }
 0x322   :  { %12872 = vst [vmem:[#allocation13_spill] sm:$0xff] %v10592_v5  ;;  %v10596_v22 = vpop.f32.mrf.mxu0 }
 0x326   :  { %v4311_v33 = vpop.f32.mrf.mxu2 }
 0x327   :  { %v4440_v24 = vpop.f32.mrf.mxu3  ;;  %v10600_v3 = vadd.f32 %v4311_v33, %v4143_v42  ;;  %v8759_v42 = vld [vmem:[#allocation3 + $0x75c] sm:$0xf0]  ;;  %v7855_v33 = vld [vmem:[#allocation3 + $0x560] sm:$0xf0] }
 0x328   :  { %v10603_v37 = vadd.f32 %v4440_v24, %v10377_v19  ;;  %v10605_v60 = vpop.f32.mrf.mxu1  ;;  %v12877_v19 = vld [vmem:[#allocation71_spill] sm:$0xff]  ;;  %v8110_v32 = vor.u32 %v8759_v42, %v8109_v54  ;;  %v12885_v54 = vld [vmem:[#allocation74_spill] sm:$0xff] }
 0x329   :  { %12875 = vst [vmem:[#allocation70_spill] sm:$0xff] %v10605_v60  ;;  %v7605_v24 = vld [vmem:[#allocation3 + $0x348] sm:$0xf] }
 0x32a   :  { %12874 = vst [vmem:[#allocation15_spill] sm:$0xff] %v10603_v37  ;;  %v1706_v12 = vpop.f32.mrf.mxu0 }
 0x32b   :  { %4224 = vmatmul.bf16.gmra.mxu1 %v8078_v18  ;;  %4353 = vmatmul.bf16.gmra.mxu2 %v7826_v63  ;;  %v8691_v18 = vld [vmem:[#allocation3 + $0x544] sm:$0xf]  ;;  %v8632_v63 = vld [vmem:[#allocation3 + $0x364] sm:$0xf0] }
 0x32c   :  { %4482 = vmatmul.bf16.gmra.mxu3 %v7574_v28  ;;  %v12880_v28 = vld [vmem:[#allocation72_spill] sm:$0xff] }
 0x32d   :  { %7161 = vmatmul.msk.bf16.gmra.mxu0 %vm1290_vm0, %v8505_v10  ;;  %v4148_v10 = vadd.f32 %v12880_v28, %v10438_v6  ;;  %v12884_v6 = vld [vmem:[#allocation75_spill] sm:$0xff] }
 0x32e   :  { %v4314_v23 = vpop.f32.mrf.mxu2  ;;  %v4151_v42 = vadd.f32 %v12885_v54, %v12884_v6  ;;  %v8699_v6 = vld [vmem:[#allocation3 + $0x584] sm:$0xf]  ;;  %v12893_v54 = vld [vmem:[#allocation7_spill] sm:$0xff] }
 0x32f   :  { %v4443_v57 = vpop.f32.mrf.mxu3  ;;  %v10613_v17 = vadd.f32 %v4314_v23, %v4146_v26  ;;  %v7858_v26 = vor.u32 %v8691_v18, %v7855_v33  ;;  %v7606_v23 = vor.u32 %v8632_v63, %v7605_v24  ;;  %v12886_v18 = vld [vmem:[#allocation8_spill] sm:$0xff] }
 0x330   :  { %v10616_v9 = vadd.f32 %v4443_v57, %v12877_v19  ;;  %v10618_v38 = vpop.f32.mrf.mxu1  ;;  %v12888_v63 = vld [vmem:[#allocation76_spill] sm:$0xff] }
 0x331   :  { %12876 = vst [vmem:[#allocation80_spill] sm:$0xff] %v10613_v17 }
 0x332   :  { %12878 = vst [vmem:[#allocation71_spill] sm:$0xff] %v10616_v9  ;;  %v1708_v62 = vpop.f32.mrf.mxu0  ;;  %v8506_v9 = vld [vmem:[%s12775_s1 + $0x178] sm:$0xff] }
 0x333   :  { %12879 = vst [vmem:[#allocation81_spill] sm:$0xff] %v10618_v38  ;;  %v12896_v38 = vld [vmem:[#allocation10_spill] sm:$0xff] }
 0x336   :  { %v4316_v11 = vpop.f32.mrf.mxu2 }
 0x337   :  { %v4445_v37 = vpop.f32.mrf.mxu3  ;;  %v10622_v5 = vadd.f32 %v4316_v11, %v4148_v10  ;;  %v12891_v11 = vld [vmem:[#allocation9_spill] sm:$0xff] }
 0x338   :  { %v10625_v57 = vadd.f32 %v4445_v37, %v10406_v15  ;;  %v10627_v19 = vpop.f32.mrf.mxu1 }
 0x339   :  { %12881 = vst [vmem:[#allocation72_spill] sm:$0xff] %v10622_v5 }
 0x33a   :  { %12882 = vst [vmem:[#allocation82_spill] sm:$0xff] %v10625_v57  ;;  %v1711_v4 = vpop.f32.mrf.mxu0 }
 0x33b   :  { %12883 = vst [vmem:[#allocation83_spill] sm:$0xff] %v10627_v19  ;;  %4229 = vmatmul.bf16.gmra.mxu1 %v8110_v32  ;;  %4358 = vmatmul.bf16.gmra.mxu2 %v7858_v26  ;;  %v1712_v33 = vadd.f32 %v1711_v4, %v12886_v18  ;;  %v1709_v32 = vadd.f32 %v1708_v62, %v12891_v11  ;;  %v7887_v18 = vld [vmem:[#allocation3 + $0x5a0] sm:$0xf0] }
 0x33c   :  { %4487 = vmatmul.bf16.gmra.mxu3 %v7606_v23  ;;  %v8141_v23 = vld [vmem:[#allocation3 + $0x780] sm:$0xf]  ;;  %v1707_v4 = vadd.f32 %v1706_v12, %v12893_v54  ;;  %v1702_v12 = vadd.f32 %v10584_v30, %v12896_v38 }
 0x33d   :  { %7162 = vmatmul.msk.bf16.gmra.mxu0 %vm1290_vm0, %v8506_v9  ;;  %v1914_v57 = vmul.f32 0.2, %v1712_v33  ;;  %v12892_v9 = vld [vmem:[#allocation6_spill] sm:$0xff]  ;;  %v1913_v62 = vmul.f32 0.2, %v1709_v32  ;;  %v8142_v11 = vor.u32 %v8767_v16, %v8141_v23 }
 0x33e   :  { %v4319_v24 = vpop.f32.mrf.mxu2  ;;  %v1912_v54 = vmul.f32 0.2, %v1707_v4  ;;  %v8507_v16 = vld [vmem:[%s12775_s1 + $0x180] sm:$0xff] }
 0x33f   :  { %v4448_v15 = vpop.f32.mrf.mxu3  ;;  %v10636_v37 = vadd.f32 %v4319_v24, %v4151_v42  ;;  %v8640_v42 = vld [vmem:[#allocation3 + $0x3a4] sm:$0xf0]  ;;  %v2041_v30 = vmax.f32 %v1709_v32, %v1913_v62  ;;  %v12899_v38 = vld [vmem:[#allocation14_spill] sm:$0xff] }
 0x340   :  { %v10639_v28 = vadd.f32 %v4448_v15, %v12888_v63  ;;  %v10641_v10 = vpop.f32.mrf.mxu1  ;;  %v12894_v15 = vld [vmem:[#allocation77_spill] sm:$0xff] }
 0x341   :  { %12887 = vst [vmem:[#allocation75_spill] sm:$0xff] %v10636_v37  ;;  %v4153_v63 = vadd.f32 %v12894_v15, %v10454_v51 }
 0x342   :  { %12889 = vst [vmem:[#allocation74_spill] sm:$0xff] %v10639_v28  ;;  %v1713_v26 = vpop.f32.mrf.mxu0  ;;  %v12895_v28 = vld [vmem:[#allocation12_spill] sm:$0xff] }
 0x343   :  { %12890 = vst [vmem:[#allocation8_spill] sm:$0xff] %v10641_v10  ;;  %v1714_v27 = vadd.f32 %v1713_v26, %v12892_v9  ;;  %v1704_v25 = vadd.f32 %v10596_v22, %v12895_v28  ;;  %v2042_v10 = vmax.f32 %v1712_v33, %v1914_v57  ;;  %v7890_v26 = vor.u32 %v8699_v6, %v7887_v18  ;;  %v12898_v57 = vld [vmem:[#allocation11_spill] sm:$0xff]  ;;  %v12901_v6 = vld [vmem:[#allocation34_spill] sm:$0xff] }
 0x344   :  { %v7638_v9 = vor.u32 %v8640_v42, %v7637_v20  ;;  %v1699_v20 = vadd.f32 %v10570_v50, %v12898_v57 }
 0x345   :  { %v1915_v24 = vmul.f32 0.2, %v1714_v27 }
 0x346   :  { %v4321_v37 = vpop.f32.mrf.mxu2 }
 0x347   :  { %v4450_v19 = vpop.f32.mrf.mxu3  ;;  %v2043_v5 = vmax.f32 %v1714_v27, %v1915_v24  ;;  %v10652_v17 = vadd.f32 %v4321_v37, %v4153_v63  ;;  %v1911_v27 = vmul.f32 0.2, %v1704_v25  ;;  %v2040_v37 = vmax.f32 %v1707_v4, %v1912_v54 }
 0x348   :  { %v10655_v60 = vadd.f32 %v4450_v19, %v10434_v46  ;;  %v10657_v51 = vpop.f32.mrf.mxu1  ;;  %v1697_v46 = vadd.f32 %v10558_v39, %v12899_v38  ;;  %v1910_v19 = vmul.f32 0.2, %v1702_v12 }
 0x349   :  { %v2387_v22 = vpack.c.bf16 %v2043_v5, %v2042_v10  ;;  %v12900_v5 = vld [vmem:[#allocation79_spill] sm:$0xff]  ;;  %v1909_v10 = vmul.f32 0.2, %v1699_v20  ;;  %v2386_v23 = vpack.c.bf16 %v2041_v30, %v2040_v37  ;;  %v2039_v50 = vmax.f32 %v1704_v25, %v1911_v27  ;;  %v12903_v25 = vld [vmem:[#allocation36_spill] sm:$0xff] }
 0x34a   :  { %12897 = vst [vmem:[#allocation76_spill] sm:$0xff] %v10655_v60  ;;  %v1716_v33 = vpop.f32.mrf.mxu0  ;;  %v4156_v28 = vadd.f32 %v10436_v48, %v12900_v5  ;;  %v1908_v24 = vmul.f32 0.2, %v1697_v46  ;;  %v2038_v15 = vmax.f32 %v1702_v12, %v1910_v19  ;;  %v7919_v12 = vld [vmem:[#allocation3 + $0x5e0] sm:$0xf0]  ;;  %v12947_v60 = vld [vmem:[#allocation8_spill] sm:$0xff] }
 0x34b   :  { %4234 = vmatmul.bf16.gmra.mxu1 %v8142_v11  ;;  %4363 = vmatmul.bf16.gmra.mxu2 %v7890_v26  ;;  %v1717_v18 = vadd.f32 %v1716_v33, %v12901_v6  ;;  %v2037_v48 = vmax.f32 %v1699_v20, %v1909_v10  ;;  %v8173_v26 = vld [vmem:[#allocation3 + $0x7c0] sm:$0xf]  ;;  %v7669_v27 = vld [vmem:[#allocation3 + $0x3c8] sm:$0xf] }
 0x34c   :  { %4492 = vmatmul.bf16.gmra.mxu3 %v7638_v9  ;;  %4752 = vmatpush.bf16.msrb.mxu2 %v2387_v22  ;;  %v2385_v11 = vpack.c.bf16 %v2039_v50, %v2038_v15  ;;  %v8775_v22 = vld [vmem:[#allocation3 + $0x7dc] sm:$0xf0]  ;;  %v2036_v57 = vmax.f32 %v1697_v46, %v1908_v24  ;;  %v8648_v33 = vld [vmem:[#allocation3 + $0x3e4] sm:$0xf0] }
 0x34d   :  { %7163 = vmatmul.msk.bf16.gmra.mxu0 %vm1290_vm0, %v8507_v16  ;;  %v1916_v9 = vmul.f32 0.2, %v1717_v18  ;;  %v8707_v16 = vld [vmem:[#allocation3 + $0x5c4] sm:$0xf]  ;;  %v8174_v19 = vor.u32 %v8775_v22, %v8173_v26  ;;  %v7670_v10 = vor.u32 %v8648_v33, %v7669_v27  ;;  %v8656_v27 = vld [vmem:[#allocation3 + $0x424] sm:$0xf0] }
 0x34e   :  { %v4324_v42 = vpop.f32.mrf.mxu2  ;;  %v2384_v38 = vpack.c.bf16 %v2037_v48, %v2036_v57  ;;  %v7951_v57 = vld [vmem:[#allocation3 + $0x620] sm:$0xf0] }
 0x34f   :  { %v4453_v32 = vpop.f32.mrf.mxu3  ;;  %v10670_v63 = vadd.f32 %v4324_v42, %v4156_v28  ;;  %v2044_v37 = vmax.f32 %v1717_v18, %v1916_v9  ;;  %v7922_v28 = vor.u32 %v8707_v16, %v7919_v12  ;;  %v12905_v42 = vld [vmem:[#allocation78_spill] sm:$0xff]  ;;  %v8524_v16 = vld [vmem:[#allocation3 + $0xc] sm:$0xf]  ;;  %v7701_v12 = vld [vmem:[#allocation3 + $0x408] sm:$0xf] }
 0x350   :  { %v10673_v39 = vadd.f32 %v4453_v32, %v10457_v52  ;;  %v10675_v4 = vpop.f32.mrf.mxu1  ;;  %4753 = vmatpush.bf16.msrb.mxu2 %v2386_v23  ;;  %v4158_v52 = vadd.f32 %v10459_v14, %v10449_v35  ;;  %v8508_v35 = vld [vmem:[%s12775_s1 + $0x188] sm:$0xff]  ;;  %v12906_v32 = vld [vmem:[#allocation33_spill] sm:$0xff] }
 0x352   :  { %12902 = vst [vmem:[#allocation9_spill] sm:$0xff] %v10673_v39  ;;  %v1718_v62 = vpop.f32.mrf.mxu0  ;;  %v8143_v39 = vld [vmem:[#allocation3 + $0x7a0] sm:$0xf0] }
 0x353   :  { %v1719_v54 = vadd.f32 %v1718_v62, %v12903_v25 }
 0x354   :  { %4754 = vmatpush.bf16.msrb.mxu2 %v2385_v11 }
 0x355   :  { %v1917_v30 = vmul.f32 0.2, %v1719_v54 }
 0x356   :  { %v4326_v5 = vpop.f32.mrf.mxu2 }
 0x357   :  { %v4455_v20 = vpop.f32.mrf.mxu3  ;;  %v2045_v23 = vmax.f32 %v1719_v54, %v1917_v30  ;;  %v10680_v50 = vadd.f32 %v4326_v5, %v4158_v52  ;;  %v12908_v54 = vld [vmem:[#allocation38_spill] sm:$0xff]  ;;  %v12909_v30 = vld [vmem:[#allocation73_spill] sm:$0xff]  ;;  %v7702_v5 = vor.u32 %v8656_v27, %v7701_v12  ;;  %v2644_v12 = vpop.permute.xlu2 %2643 }
 0x358   :  { %v10683_v46 = vadd.f32 %v4455_v20, %v10468_v56  ;;  %v10685_v6 = vpop.f32.mrf.mxu1  ;;  %4755 = vmatpush.bf16.msrb.mxu2 %v2384_v38  ;;  %v4161_v56 = vadd.f32 %v10470_v41, %v12905_v42  ;;  %v7191_v41 = vld [vmem:[#allocation3 + $0x28] sm:$0xf0] }
 0x359   :  { %v10690_v14 = vpack.c.bf16 %v2045_v23, %v2044_v37  ;;  %v7194_v52 = vor.u32 %v8524_v16, %v7191_v41  ;;  %v7983_v16 = vld [vmem:[#allocation3 + $0x660] sm:$0xf0]  ;;  %v7733_v41 = vld [vmem:[#allocation3 + $0x448] sm:$0xf] }
 0x35a   :  { %12904 = vst [vmem:[#allocation6_spill] sm:$0xff] %v10683_v46  ;;  %v1721_v18 = vpop.f32.mrf.mxu0  ;;  %v12944_v46 = vld [vmem:[#allocation26_spill] sm:$0xff] }
 0x35b   :  { %4239 = vmatmul.bf16.gmra.mxu1 %v8174_v19  ;;  %4368 = vmatmul.bf16.gmra.mxu2 %v7922_v28  ;;  %v1722_v24 = vadd.f32 %v1721_v18, %v12906_v32  ;;  %v12911_v18 = vld [vmem:[#allocation35_spill] sm:$0xff] }
 0x35c   :  { %4497 = vmatmul.bf16.gmra.mxu3 %v7670_v10  ;;  %4756 = vmatpush.bf16.msrb.mxu2 %v10556_v8  ;;  %v8715_v8 = vld [vmem:[#allocation3 + $0x604] sm:$0xf] }
 0x35d   :  { %7164 = vmatmul.msk.bf16.gmra.mxu0 %vm1290_vm0, %v8508_v35  ;;  %v1918_v25 = vmul.f32 0.2, %v1722_v24  ;;  %v7954_v37 = vor.u32 %v8715_v8, %v7951_v57  ;;  %v12913_v8 = vld [vmem:[#allocation31_spill] sm:$0xff] }
 0x35e   :  { %v4329_v15 = vpop.f32.mrf.mxu2  ;;  %v8664_v57 = vld [vmem:[#allocation3 + $0x464] sm:$0xf0] }
 0x35f   :  { %v4458_v62 = vpop.f32.mrf.mxu3  ;;  %v10697_v11 = vadd.f32 %v4329_v15, %v4161_v56  ;;  %v2046_v38 = vmax.f32 %v1722_v24, %v1918_v25 }
 0x360   :  { %v10700_v48 = vadd.f32 %v4458_v62, %v10488_v13  ;;  %v10702_v26 = vpop.f32.mrf.mxu1  ;;  %4757 = vmatpush.bf16.msrb.mxu2 %v10531_v43  ;;  %v4163_v13 = vadd.f32 %v10486_v58, %v12909_v30  ;;  %v8509_v58 = vld [vmem:[%s12775_s1 + $0x190] sm:$0xff]  ;;  %v8723_v62 = vld [vmem:[#allocation3 + $0x644] sm:$0xf] }
 0x362   :  { %12907 = vst [vmem:[#allocation7_spill] sm:$0xff] %v10700_v48  ;;  %v1723_v9 = vpop.f32.mrf.mxu0 }
 0x363   :  { %v1724_v22 = vadd.f32 %v1723_v9, %v12908_v54  ;;  %v8532_v54 = vld [vmem:[#allocation3 + $0x4c] sm:$0xf] }
 0x364   :  { %4758 = vmatpush.bf16.msrb.mxu2 %v10507_v36 }
 0x365   :  { %v1919_v33 = vmul.f32 0.2, %v1724_v22 }
 0x366   :  { %v4331_v19 = vpop.f32.mrf.mxu2 }
 0x367   :  { %v4460_v43 = vpop.f32.mrf.mxu3  ;;  %v2047_v20 = vmax.f32 %v1724_v22, %v1919_v33  ;;  %v10709_v28 = vadd.f32 %v4331_v19, %v4163_v13  ;;  %v7223_v22 = vld [vmem:[#allocation3 + $0x68] sm:$0xf0] }
 0x368   :  { %v10712_v10 = vadd.f32 %v4460_v43, %v10499_v44  ;;  %v10714_v36 = vpop.f32.mrf.mxu1  ;;  %4759 = vmatpush.bf16.msrb.mxu2 %v10477_v40  ;;  %v7226_v33 = vor.u32 %v8532_v54, %v7223_v22  ;;  %v12917_v22 = vld [vmem:[#allocation30_spill] sm:$0xff] }
 0x369   :  { %v10720_v23 = vpack.c.bf16 %v2047_v20, %v2046_v38  ;;  %v7734_v38 = vor.u32 %v8664_v57, %v7733_v41  ;;  %v8510_v20 = vld [vmem:[%s12775_s1 + $0x198] sm:$0xff]  ;;  %v8540_v41 = vld [vmem:[#allocation3 + $0x8c] sm:$0xf] }
 0x36a   :  { %12910 = vst [vmem:[#allocation77_spill] sm:$0xff] %v10712_v10  ;;  %v1726_v35 = vpop.f32.mrf.mxu0  ;;  %v7255_v57 = vld [vmem:[#allocation3 + $0xa8] sm:$0xf0]  ;;  %v8514_v10 = vld [vmem:[%s12775_s1 + $0x1b8] sm:$0xff] }
 0x36b   :  { %4591 = vmatmul.bf16.vlgmr.msrb.gmra.mxu1 %v7194_v52  ;;  %4373 = vmatmul.bf16.gmra.mxu2 %v7954_v37  ;;  %v1727_v42 = vadd.f32 %v1726_v35, %v12911_v18  ;;  %v7986_v52 = vor.u32 %v8723_v62, %v7983_v16  ;;  %v2649_v35 = vpop.permute.xlu0 %2648 }
 0x36c   :  { %4502 = vmatmul.bf16.gmra.mxu3 %v7702_v5  ;;  %v4171_v18 = vadd.f32 %v10526_v61, %v2649_v35  ;;  %v7765_v61 = vld [vmem:[#allocation3 + $0x488] sm:$0xf] }
 0x36d   :  { %7165 = vmatmul.msk.bf16.gmra.mxu0 %vm1290_vm0, %v8509_v58  ;;  %v1920_v9 = vmul.f32 0.2, %v1727_v42 }
 0x36e   :  { %v4334_v44 = vpop.f32.mrf.mxu2 }
 0x36f   :  { %v4463_v56 = vpop.f32.mrf.mxu3  ;;  %v10725_v32 = vadd.f32 %v4334_v44, %v10501_v0  ;;  %v4168_v0 = vadd.f32 %v10517_v2, %v2644_v12  ;;  %v2048_v30 = vmax.f32 %v1727_v42, %v1920_v9  ;;  %v12915_v42 = vld [vmem:[#allocation28_spill] sm:$0xff]  ;;  %v8015_v12 = vld [vmem:[#allocation3 + $0x6a0] sm:$0xf0] }
 0x370   :  { %v10728_v40 = vadd.f32 %v4463_v56, %v10512_v29  ;;  %v10730_v24 = vpop.f32.mrf.mxu1 }
 0x372   :  { %12912 = vst [vmem:[#allocation12_spill] sm:$0xff] %v10728_v40  ;;  %v1728_v15 = vpop.f32.mrf.mxu0 }
 0x373   :  { %v1729_v25 = vadd.f32 %v1728_v15, %v12913_v8 }
 0x375   :  { %v1921_v27 = vmul.f32 0.2, %v1729_v25 }
 0x376   :  { %v4336_v29 = vpop.f32.mrf.mxu2 }
 0x377   :  { %v4465_v13 = vpop.f32.mrf.mxu3  ;;  %v2049_v19 = vmax.f32 %v1729_v25, %v1921_v27  ;;  %v10734_v43 = vadd.f32 %v4336_v29, %v4168_v0  ;;  %v8731_v25 = vld [vmem:[#allocation3 + $0x684] sm:$0xf]  ;;  %v8672_v27 = vld [vmem:[#allocation3 + $0x4a4] sm:$0xf0]  ;;  %v2654_v0 = vpop.permute.xlu1 %2653  ;;  %v7258_v29 = vor.u32 %v8540_v41, %v7255_v57  ;;  %v8548_v57 = vld [vmem:[#allocation3 + $0xcc] sm:$0xf] }
 0x378   :  { %v10737_v37 = vadd.f32 %v4465_v13, %v10521_v1  ;;  %v10739_v5 = vpop.f32.mrf.mxu1  ;;  %v8739_v41 = vld [vmem:[#allocation3 + $0x6c4] sm:$0xf] }
 0x379   :  { %v10744_v58 = vpack.c.bf16 %v2049_v19, %v2048_v30  ;;  %v4173_v30 = vadd.f32 %v10541_v49, %v2654_v0  ;;  %v7766_v19 = vor.u32 %v8672_v27, %v7765_v61  ;;  %v8047_v61 = vld [vmem:[#allocation3 + $0x6e0] sm:$0xf0]  ;;  %v7797_v27 = vld [vmem:[#allocation3 + $0x4c8] sm:$0xf] }
 0x37a   :  { %12914 = vst [vmem:[#allocation10_spill] sm:$0xff] %v10737_v37  ;;  %v1731_v2 = vpop.f32.mrf.mxu0  ;;  %v8680_v0 = vld [vmem:[#allocation3 + $0x4e4] sm:$0xf0] }
 0x37b   :  { %4596 = vmatmul.bf16.gmra.mxu1 %v7226_v33  ;;  %4378 = vmatmul.bf16.gmra.mxu2 %v7986_v52  ;;  %v1732_v1 = vadd.f32 %v1731_v2, %v12915_v42  ;;  %v8511_v42 = vld [vmem:[%s12775_s1 + $0x1a0] sm:$0xff] }
 0x37c   :  { %4507 = vmatmul.bf16.gmra.mxu3 %v7734_v38  ;;  %v8018_v38 = vor.u32 %v8731_v25, %v8015_v12  ;;  %v7287_v12 = vld [vmem:[#allocation3 + $0xe8] sm:$0xf0] }
 0x37d   :  { %7166 = vmatmul.msk.bf16.gmra.mxu0 %vm1290_vm0, %v8510_v20  ;;  %v1922_v54 = vmul.f32 0.2, %v1732_v1 }
 0x37e   :  { %v4339_v44 = vpop.f32.mrf.mxu2 }
 0x37f   :  { %v4468_v56 = vpop.f32.mrf.mxu3  ;;  %v10749_v15 = vadd.f32 %v4339_v44, %v4171_v18  ;;  %v2050_v13 = vmax.f32 %v1732_v1, %v1922_v54  ;;  %v2659_v1 = vpop.permute.xlu2 %2658 }
 0x380   :  { %v10752_v62 = vadd.f32 %v4468_v56, %v10536_v45  ;;  %v10754_v9 = vpop.f32.mrf.mxu1  ;;  %v4176_v56 = vadd.f32 %v10551_v34, %v2659_v1 }
 0x382   :  { %12916 = vst [vmem:[#allocation11_spill] sm:$0xff] %v10752_v62  ;;  %v1733_v8 = vpop.f32.mrf.mxu0 }
 0x383   :  { %v1734_v16 = vadd.f32 %v1733_v8, %v12917_v22 }
 0x385   :  { %v1923_v33 = vmul.f32 0.2, %v1734_v16 }
 0x386   :  { %v4341_v45 = vpop.f32.mrf.mxu2 }
 0x387   :  { %v4470_v52 = vpop.f32.mrf.mxu3  ;;  %v2051_v20 = vmax.f32 %v1734_v16, %v1923_v33  ;;  %v10758_v2 = vadd.f32 %v4341_v45, %v4173_v30  ;;  %v2664_v33 = vpop.permute.xlu0 %2663  ;;  %v7290_v30 = vor.u32 %v8548_v57, %v7287_v12  ;;  %v8050_v45 = vor.u32 %v8739_v41, %v8047_v61  ;;  %v8747_v12 = vld [vmem:[#allocation3 + $0x704] sm:$0xf]  ;;  %v8556_v61 = vld [vmem:[#allocation3 + $0x10c] sm:$0xf] }
 0x388   :  { %v10761_v35 = vadd.f32 %v4470_v52, %v10546_v7  ;;  %v10763_v18 = vpop.f32.mrf.mxu1  ;;  %v4178_v34 = vadd.f32 %v10568_v47, %v2664_v33  ;;  %v7798_v52 = vor.u32 %v8680_v0, %v7797_v27  ;;  %v2669_v47 = vpop.permute.xlu1 %2668  ;;  %v7319_v27 = vld [vmem:[#allocation3 + $0x128] sm:$0xf0]  ;;  %v8079_v33 = vld [vmem:[#allocation3 + $0x720] sm:$0xf0] }
 0x389   :  { %v10768_v44 = vpack.c.bf16 %v2051_v20, %v2050_v13  ;;  %v8512_v20 = vld [vmem:[%s12775_s1 + $0x1a8] sm:$0xff]  ;;  %v4181_v1 = vadd.f32 %v10579_v31, %v2669_v47  ;;  %v2674_v0 = vpop.permute.xlu2 %2673 }
 0x38a   :  { %12918 = vst [vmem:[#allocation14_spill] sm:$0xff] %v10761_v35  ;;  %v10770_v49 = vpop.f32.mrf.mxu0  ;;  %v4183_v31 = vadd.f32 %v10594_v53, %v2674_v0 }
 0x38b   :  { %4601 = vmatmul.bf16.gmra.mxu1 %v7258_v29  ;;  %4383 = vmatmul.bf16.gmra.mxu2 %v8018_v38 }
 0x38c   :  { %4512 = vmatmul.bf16.gmra.mxu3 %v7766_v19 }
 0x38d   :  { %7167 = vmatmul.msk.bf16.gmra.mxu0 %vm1290_vm0, %v8511_v42 }
 0x38e   :  { %v4344_v7 = vpop.f32.mrf.mxu2 }
 0x38f   :  { %v4473_v8 = vpop.f32.mrf.mxu3  ;;  %v10774_v25 = vadd.f32 %v4344_v7, %v4176_v56  ;;  %v2679_v53 = vpop.permute.xlu0 %2678 }
 0x390   :  { %v10777_v54 = vadd.f32 %v4473_v8, %v10563_v59  ;;  %v10779_v22 = vpop.f32.mrf.mxu1 }
 0x392   :  { %12919 = vst [vmem:[#allocation79_spill] sm:$0xff] %v10777_v54  ;;  %v10781_v16 = vpop.f32.mrf.mxu0  ;;  %v12931_v54 = vld [vmem:[#allocation81_spill] sm:$0xff] }
 0x396   :  { %v4346_v29 = vpop.f32.mrf.mxu2 }
 0x397   :  { %v4475_v13 = vpop.f32.mrf.mxu3  ;;  %v10784_v59 = vadd.f32 %v4346_v29, %v4178_v34  ;;  %v7829_v34 = vld [vmem:[#allocation3 + $0x508] sm:$0xf]  ;;  %v2684_v29 = vpop.permute.xlu1 %2683 }
 0x398   :  { %v10787_v38 = vadd.f32 %v4475_v13, %v10574_v21  ;;  %v10789_v19 = vpop.f32.mrf.mxu1  ;;  %v7322_v13 = vor.u32 %v8556_v61, %v7319_v27  ;;  %v12926_v61 = vld [vmem:[#allocation70_spill] sm:$0xff] }
 0x399   :  { %v4186_v27 = vadd.f32 %v12926_v61, %v2679_v53  ;;  %v4188_v53 = vadd.f32 %v12931_v54, %v2684_v29  ;;  %v12937_v29 = vld [vmem:[#allocation22_spill] sm:$0xff] }
 0x39a   :  { %12920 = vst [vmem:[#allocation34_spill] sm:$0xff] %v10787_v38  ;;  %v10794_v42 = vpop.f32.mrf.mxu0  ;;  %v8696_v38 = vld [vmem:[#allocation3 + $0x564] sm:$0xf0] }
 0x39b   :  { %4606 = vmatmul.bf16.gmra.mxu1 %v7290_v30  ;;  %4388 = vmatmul.bf16.gmra.mxu2 %v8050_v45  ;;  %v8688_v30 = vld [vmem:[#allocation3 + $0x524] sm:$0xf0] }
 0x39c   :  { %4517 = vmatmul.bf16.gmra.mxu3 %v7798_v52 }
 0x39d   :  { %7168 = vmatmul.msk.bf16.gmra.mxu0 %vm1290_vm0, %v8512_v20  ;;  %v8082_v20 = vor.u32 %v8747_v12, %v8079_v33  ;;  %v2689_v12 = vpop.permute.xlu2 %2688 }
 0x39e   :  { %v4349_v56 = vpop.f32.mrf.mxu2 }
 0x39f   :  { %v4478_v7 = vpop.f32.mrf.mxu3  ;;  %v10798_v21 = vadd.f32 %v4349_v56, %v4181_v1 }
 0x3a0   :  { %v10801_v8 = vadd.f32 %v4478_v7, %v10589_v55  ;;  %v10803_v41 = vpop.f32.mrf.mxu1  ;;  %v7830_v55 = vor.u32 %v8688_v30, %v7829_v34  ;;  %v8513_v7 = vld [vmem:[%s12775_s1 + $0x1b0] sm:$0xff] }
 0x3a1   :  { %12922 = vst [vmem:[#allocation78_spill] sm:$0xff] %v10803_v41  ;;  %v12928_v30 = vld [vmem:[#allocation80_spill] sm:$0xff] }
 0x3a2   :  { %12921 = vst [vmem:[#allocation36_spill] sm:$0xff] %v10801_v8  ;;  %v10805_v57 = vpop.f32.mrf.mxu0 }
 0x3a6   :  { %v4351_v45 = vpop.f32.mrf.mxu2 }
 0x3a7   :  { %v4480_v52 = vpop.f32.mrf.mxu3  ;;  %v10808_v47 = vadd.f32 %v4351_v45, %v4183_v31 }
 0x3a8   :  { %v10811_v1 = vadd.f32 %v4480_v52, %v10600_v3  ;;  %v10813_v56 = vpop.f32.mrf.mxu1  ;;  %v10820_v3 = vpop.permute.xlu1 %2698  ;;  %v8755_v52 = vld [vmem:[#allocation3 + $0x744] sm:$0xf] }
 0x3a9   :  { %12923 = vst [vmem:[#allocation33_spill] sm:$0xff] %v10808_v47 }
 0x3aa   :  { %12924 = vst [vmem:[#allocation38_spill] sm:$0xff] %v10811_v1  ;;  %v1746_v8 = vpop.f32.mrf.mxu0  ;;  %v8111_v1 = vld [vmem:[#allocation3 + $0x760] sm:$0xf0] }
 0x3ab   :  { %12925 = vst [vmem:[#allocation73_spill] sm:$0xff] %v10813_v56  ;;  %4611 = vmatmul.bf16.gmra.mxu1 %v7322_v13  ;;  %4393 = vmatmul.bf16.gmra.mxu2 %v8082_v20  ;;  %v8564_v20 = vld [vmem:[#allocation3 + $0x14c] sm:$0xf]  ;;  %v8114_v37 = vor.u32 %v8755_v52, %v8111_v1  ;;  %v12949_v56 = vld [vmem:[#allocation29_spill] sm:$0xff] }
 0x3ac   :  { %4522 = vmatmul.bf16.gmra.mxu3 %v7830_v55  ;;  %v7351_v55 = vld [vmem:[#allocation3 + $0x168] sm:$0xf0] }
 0x3ad   :  { %7169 = vmatmul.msk.bf16.gmra.mxu0 %vm1290_vm0, %v8513_v7  ;;  %v7861_v7 = vld [vmem:[#allocation3 + $0x548] sm:$0xf]  ;;  %v7354_v61 = vor.u32 %v8564_v20, %v7351_v55 }
 0x3ae   :  { %v4354_v0 = vpop.f32.mrf.mxu2  ;;  %v12939_v55 = vld [vmem:[#allocation75_spill] sm:$0xff] }
 0x3af   :  { %v4483_v33 = vpop.f32.mrf.mxu3  ;;  %v10822_v34 = vadd.f32 %v4354_v0, %v4186_v27  ;;  %v7862_v27 = vor.u32 %v8696_v38, %v7861_v7  ;;  %v10830_v0 = vpop.permute.xlu2 %2703  ;;  %v12936_v38 = vld [vmem:[#allocation83_spill] sm:$0xff] }
 0x3b0   :  { %v10825_v31 = vadd.f32 %v4483_v33, %v12928_v30  ;;  %v10827_v45 = vpop.f32.mrf.mxu1  ;;  %v12933_v30 = vld [vmem:[#allocation72_spill] sm:$0xff]  ;;  %v10842_v48 = vpop.permute.xlu1 %2713 }
 0x3b1   :  { %12927 = vst [vmem:[#allocation35_spill] sm:$0xff] %v10822_v34 }
 0x3b2   :  { %12929 = vst [vmem:[#allocation31_spill] sm:$0xff] %v10825_v31  ;;  %v1748_v13 = vpop.f32.mrf.mxu0 }
 0x3b3   :  { %12930 = vst [vmem:[#allocation28_spill] sm:$0xff] %v10827_v45 }
 0x3b6   :  { %v4356_v35 = vpop.f32.mrf.mxu2 }
 0x3b7   :  { %v4485_v62 = vpop.f32.mrf.mxu3  ;;  %v10832_v33 = vadd.f32 %v4356_v35, %v4188_v53  ;;  %v4191_v35 = vadd.f32 %v12936_v38, %v2689_v12  ;;  %v8572_v38 = vld [vmem:[#allocation3 + $0x18c] sm:$0xf] }
 0x3b8   :  { %v10835_v31 = vadd.f32 %v4485_v62, %v12933_v30  ;;  %v10837_v40 = vpop.f32.mrf.mxu1  ;;  %v10854_v30 = vpop.permute.xlu2 %2788 }
 0x3b9   :  { %12932 = vst [vmem:[#allocation30_spill] sm:$0xff] %v10832_v33 }
 0x3ba   :  { %12934 = vst [vmem:[#allocation70_spill] sm:$0xff] %v10835_v31  ;;  %v1751_v54 = vpop.f32.mrf.mxu0  ;;  %v8763_v31 = vld [vmem:[#allocation3 + $0x784] sm:$0xf] }
 0x3bb   :  { %12935 = vst [vmem:[#allocation80_spill] sm:$0xff] %v10837_v40  ;;  %4616 = vmatmul.bf16.gmra.mxu1 %v7354_v61  ;;  %4398 = vmatmul.bf16.gmra.mxu2 %v8114_v37  ;;  %v1752_v1 = vadd.f32 %v1751_v54, %v12937_v29  ;;  %v12943_v61 = vld [vmem:[#allocation24_spill] sm:$0xff]  ;;  %v7383_v54 = vld [vmem:[#allocation3 + $0x1a8] sm:$0xf0]  ;;  %v10858_v29 = vpop.permute.xlu1 %2778  ;;  %v8146_v45 = vor.u32 %v8763_v31, %v8143_v39 }
 0x3bc   :  { %4527 = vmatmul.bf16.gmra.mxu3 %v7862_v27  ;;  %12942 = vst [vmem:[#allocation22_spill] sm:$0xff] %v10854_v30  ;;  %v1749_v37 = vadd.f32 %v1748_v13, %v12943_v61  ;;  %v7386_v40 = vor.u32 %v8572_v38, %v7383_v54 }
 0x3bd   :  { %7170 = vmatmul.msk.bf16.gmra.mxu0 %vm1290_vm0, %v8514_v10  ;;  %v1930_v10 = vmul.f32 0.2, %v1752_v1  ;;  %12945 = vst [vmem:[#allocation75_spill] sm:$0xff] %v10858_v29 }
 0x3be   :  { %v4359_v62 = vpop.f32.mrf.mxu2  ;;  %v1929_v61 = vmul.f32 0.2, %v1749_v37 }
 0x3bf   :  { %v4488_v52 = vpop.f32.mrf.mxu3  ;;  %v10847_v20 = vadd.f32 %v4359_v62, %v4191_v35  ;;  %v12946_v35 = vld [vmem:[#allocation23_spill] sm:$0xff]  ;;  %v2058_v33 = vmax.f32 %v1752_v1, %v1930_v10  ;;  %v8515_v1 = vld [vmem:[%s12775_s1 + $0x1c0] sm:$0xff] }
 0x3c0   :  { %v10850_v7 = vadd.f32 %v4488_v52, %v12939_v55  ;;  %v10852_v53 = vpop.f32.mrf.mxu1  ;;  %v1747_v62 = vadd.f32 %v1746_v8, %v12946_v35  ;;  %v7893_v52 = vld [vmem:[#allocation3 + $0x588] sm:$0xf]  ;;  %v1742_v8 = vadd.f32 %v10794_v42, %v12949_v56  ;;  %v2057_v42 = vmax.f32 %v1749_v37, %v1929_v61  ;;  %v10878_v56 = vpop.permute.xlu2 %2783 }
 0x3c1   :  { %12938 = vst [vmem:[#allocation81_spill] sm:$0xff] %v10847_v20  ;;  %v8704_v55 = vld [vmem:[#allocation3 + $0x5a4] sm:$0xf0]  ;;  %v12948_v20 = vld [vmem:[#allocation25_spill] sm:$0xff] }
 0x3c2   :  { %12940 = vst [vmem:[#allocation72_spill] sm:$0xff] %v10850_v7  ;;  %v1753_v27 = vpop.f32.mrf.mxu0  ;;  %v2694_v7 = vpop.permute.xlu0 %2693  ;;  %v1744_v13 = vadd.f32 %v10805_v57, %v12948_v20  ;;  %v7894_v34 = vor.u32 %v8704_v55, %v7893_v52  ;;  %v1928_v35 = vmul.f32 0.2, %v1747_v62  ;;  %v12951_v20 = vld [vmem:[#allocation32_spill] sm:$0xff] }
 0x3c3   :  { %12941 = vst [vmem:[#allocation83_spill] sm:$0xff] %v10852_v53  ;;  %v1754_v12 = vadd.f32 %v1753_v27, %v12944_v46  ;;  %v4193_v30 = vadd.f32 %v12947_v60, %v2694_v7  ;;  %v1739_v39 = vadd.f32 %v10781_v16, %v12951_v20  ;;  %v10883_v10 = vpop.permute.xlu1 %2773  ;;  %v4196_v16 = vadd.f32 %v10657_v51, %v10820_v3  ;;  %v7415_v20 = vld [vmem:[#allocation3 + $0x1e8] sm:$0xf0] }
 0x3c4   :  { %v1927_v31 = vmul.f32 0.2, %v1744_v13 }
 0x3c5   :  { %v1931_v53 = vmul.f32 0.2, %v1754_v12 }
 0x3c6   :  { %v4361_v46 = vpop.f32.mrf.mxu2  ;;  %v2055_v37 = vmax.f32 %v1744_v13, %v1927_v31 }
 0x3c7   :  { %v4490_v27 = vpop.f32.mrf.mxu3  ;;  %v2059_v29 = vmax.f32 %v1754_v12, %v1931_v53  ;;  %v10866_v47 = vadd.f32 %v4361_v46, %v4193_v30  ;;  %v1926_v30 = vmul.f32 0.2, %v1742_v8  ;;  %v1925_v12 = vmul.f32 0.2, %v1739_v39 }
 0x3c8   :  { %v10869_v41 = vadd.f32 %v4490_v27, %v10652_v17  ;;  %v10871_v60 = vpop.f32.mrf.mxu1  ;;  %v12952_v17 = vld [vmem:[#allocation27_spill] sm:$0xff]  ;;  %v8771_v27 = vld [vmem:[#allocation3 + $0x7c4] sm:$0xf] }
 0x3c9   :  { %v2395_v57 = vpack.c.bf16 %v2059_v29, %v2058_v33  ;;  %v1737_v53 = vadd.f32 %v10770_v49, %v12952_v17  ;;  %v2056_v33 = vmax.f32 %v1747_v62, %v1928_v35  ;;  %v2054_v52 = vmax.f32 %v1742_v8, %v1926_v30  ;;  %v12955_v35 = vld [vmem:[#allocation67_spill] sm:$0xff]  ;;  %v8175_v8 = vld [vmem:[#allocation3 + $0x7e0] sm:$0xf0]  ;;  %v10896_v17 = vpop.permute.xlu2 %2758 }
 0x3ca   :  { %12950 = vst [vmem:[#allocation24_spill] sm:$0xff] %v10869_v41  ;;  %v1756_v7 = vpop.f32.mrf.mxu0  ;;  %v2709_v61 = vpop.permute.xlu0 %2708  ;;  %v2053_v3 = vmax.f32 %v1739_v39, %v1925_v12  ;;  %v4198_v30 = vadd.f32 %v10675_v4, %v10830_v0  ;;  %v8516_v4 = vld [vmem:[%s12775_s1 + $0x1c8] sm:$0xff] }
 0x3cb   :  { %4621 = vmatmul.bf16.gmra.mxu1 %v7386_v40  ;;  %4403 = vmatmul.bf16.gmra.mxu2 %v8146_v45  ;;  %v2394_v40 = vpack.c.bf16 %v2057_v42, %v2056_v33  ;;  %v12953_v45 = vld [vmem:[#allocation69_spill] sm:$0xff]  ;;  %v1924_v29 = vmul.f32 0.2, %v1737_v53  ;;  %v2393_v51 = vpack.c.bf16 %v2055_v37, %v2054_v52  ;;  %v8712_v42 = vld [vmem:[#allocation3 + $0x5e4] sm:$0xf0]  ;;  %v10907_v52 = vpop.permute.xlu1 %2748 }
 0x3cc   :  { %4532 = vmatmul.bf16.gmra.mxu3 %v7894_v34  ;;  %v1757_v34 = vadd.f32 %v1756_v7, %v12953_v45  ;;  %v7925_v7 = vld [vmem:[#allocation3 + $0x5c8] sm:$0xf]  ;;  %v8178_v45 = vor.u32 %v8771_v27, %v8175_v8 }
 0x3cd   :  { %4921 = vmatpush.bf16.msrb.mxu3 %v2395_v57  ;;  %7171 = vmatmul.msk.bf16.gmra.mxu0 %vm1290_vm0, %v8515_v1  ;;  %v8580_v1 = vld [vmem:[#allocation3 + $0x1cc] sm:$0xf]  ;;  %v2052_v31 = vmax.f32 %v1737_v53, %v1924_v29 }
 0x3ce   :  { %v4364_v38 = vpop.f32.mrf.mxu2  ;;  %v1932_v13 = vmul.f32 0.2, %v1757_v34 }
 0x3cf   :  { %v4493_v54 = vpop.f32.mrf.mxu3  ;;  %v10888_v49 = vadd.f32 %v4364_v38, %v4196_v16  ;;  %v2392_v33 = vpack.c.bf16 %v2053_v3, %v2052_v31  ;;  %v7418_v16 = vor.u32 %v8580_v1, %v7415_v20  ;;  %v7926_v38 = vor.u32 %v8712_v42, %v7925_v7  ;;  %v7957_v31 = vld [vmem:[#allocation3 + $0x608] sm:$0xf]  ;;  %v8588_v42 = vld [vmem:[#allocation3 + $0x20c] sm:$0xf] }
 0x3d0   :  { %v10891_v62 = vadd.f32 %v4493_v54, %v10670_v63  ;;  %v10893_v55 = vpop.f32.mrf.mxu1  ;;  %v2060_v39 = vmax.f32 %v1757_v34, %v1932_v13 }
 0x3d1   :  { %4922 = vmatpush.bf16.msrb.mxu3 %v2394_v40  ;;  %v10928_v20 = vpop.permute.xlu2 %2753 }
 0x3d2   :  { %12954 = vst [vmem:[#allocation26_spill] sm:$0xff] %v10891_v62  ;;  %v1758_v46 = vpop.f32.mrf.mxu0  ;;  %v8522_v62 = vld [vmem:[%s12775_s1 + $0x1f8] sm:$0xff] }
 0x3d3   :  { %v1759_v57 = vadd.f32 %v1758_v46, %v12955_v35  ;;  %v10914_v46 = vpop.permute.xlu0 %2793  ;;  %v10930_v8 = vpop.permute.xlu1 %2743 }
 0x3d5   :  { %4923 = vmatpush.bf16.msrb.mxu3 %v2393_v51  ;;  %v1933_v63 = vmul.f32 0.2, %v1759_v57  ;;  %v12957_v51 = vld [vmem:[#allocation63_spill] sm:$0xff] }
 0x3d6   :  { %v4366_v40 = vpop.f32.mrf.mxu2 }
 0x3d7   :  { %v2061_v12 = vmax.f32 %v1759_v57, %v1933_v63  ;;  %v4495_v37 = vpop.f32.mrf.mxu3  ;;  %v10900_v54 = vadd.f32 %v4366_v40, %v4198_v30  ;;  %v7447_v63 = vld [vmem:[#allocation3 + $0x228] sm:$0xf0]  ;;  %v8720_v30 = vld [vmem:[#allocation3 + $0x624] sm:$0xf0] }
 0x3d8   :  { %v10903_v53 = vadd.f32 %v4495_v37, %v10680_v50  ;;  %v10905_v29 = vpop.f32.mrf.mxu1  ;;  %v4201_v50 = vadd.f32 %v10685_v6, %v2709_v61  ;;  %v12959_v61 = vld [vmem:[#allocation68_spill] sm:$0xff] }
 0x3d9   :  { %4924 = vmatpush.bf16.msrb.mxu3 %v2392_v33  ;;  %v10912_v0 = vpack.c.bf16 %v2061_v12, %v2060_v39  ;;  %v8529_v33 = vld [vmem:[#allocation3 + $0x2c] sm:$0xf0]  ;;  %v7450_v12 = vor.u32 %v8588_v42, %v7447_v63 }
 0x3da   :  { %12956 = vst [vmem:[#allocation23_spill] sm:$0xff] %v10903_v53  ;;  %v1761_v34 = vpop.f32.mrf.mxu0 }
 0x3db   :  { %4626 = vmatmul.bf16.gmra.mxu1 %v7418_v16  ;;  %4408 = vmatmul.bf16.gmra.mxu2 %v8178_v45  ;;  %v1762_v3 = vadd.f32 %v1761_v34, %v12957_v51  ;;  %v10934_v39 = vpop.permute.xlu0 %2768 }
 0x3dc   :  { %4537 = vmatmul.bf16.gmra.mxu3 %v7926_v38 }
 0x3dd   :  { %4925 = vmatpush.bf16.msrb.mxu3 %v10768_v44  ;;  %7172 = vmatmul.msk.bf16.gmra.mxu0 %vm1290_vm0, %v8516_v4  ;;  %v1934_v6 = vmul.f32 0.2, %v1762_v3  ;;  %v7958_v4 = vor.u32 %v8720_v30, %v7957_v31  ;;  %v2719_v31 = vpop.permute.xlu1 %2718 }
 0x3de   :  { %v4369_v27 = vpop.f32.mrf.mxu2 }
 0x3df   :  { %v4498_v13 = vpop.f32.mrf.mxu3  ;;  %v10920_v35 = vadd.f32 %v4369_v27, %v4201_v50  ;;  %v2062_v40 = vmax.f32 %v1762_v3, %v1934_v6  ;;  %v12961_v27 = vld [vmem:[#allocation19_spill] sm:$0xff] }
 0x3e0   :  { %v10923_v57 = vadd.f32 %v4498_v13, %v10697_v11  ;;  %v10925_v1 = vpop.f32.mrf.mxu1  ;;  %v7197_v11 = vld [vmem:[#allocation3 + $0x10] sm:$0xf] }
 0x3e1   :  { %4926 = vmatpush.bf16.msrb.mxu3 %v10744_v58  ;;  %v4203_v58 = vadd.f32 %v10702_v26, %v10842_v48  ;;  %v7198_v34 = vor.u32 %v8529_v33, %v7197_v11  ;;  %v8517_v48 = vld [vmem:[%s12775_s1 + $0x1d0] sm:$0xff]  ;;  %v12964_v33 = vld [vmem:[#allocation21_spill] sm:$0xff] }
 0x3e2   :  { %12958 = vst [vmem:[#allocation8_spill] sm:$0xff] %v10923_v57  ;;  %v1763_v44 = vpop.f32.mrf.mxu0 }
 0x3e3   :  { %v1764_v7 = vadd.f32 %v1763_v44, %v12959_v61  ;;  %v2729_v44 = vpop.permute.xlu2 %2728  ;;  %v10960_v11 = vpop.permute.xlu0 %2763 }
 0x3e5   :  { %4927 = vmatpush.bf16.msrb.mxu3 %v10720_v23  ;;  %v1935_v16 = vmul.f32 0.2, %v1764_v7 }
 0x3e6   :  { %v4371_v45 = vpop.f32.mrf.mxu2 }
 0x3e7   :  { %v2063_v37 = vmax.f32 %v1764_v7, %v1935_v16  ;;  %v4500_v38 = vpop.f32.mrf.mxu3  ;;  %v10938_v50 = vadd.f32 %v4371_v45, %v4203_v58  ;;  %v8596_v45 = vld [vmem:[#allocation3 + $0x24c] sm:$0xf] }
 0x3e8   :  { %v10941_v23 = vadd.f32 %v4500_v38, %v10709_v28  ;;  %v4592_v51 = vpop.f32.mrf.mxu1  ;;  %v4206_v28 = vadd.f32 %v10714_v36, %v2719_v31  ;;  %v7479_v38 = vld [vmem:[#allocation3 + $0x268] sm:$0xf0] }
 0x3e9   :  { %4928 = vmatpush.bf16.msrb.mxu3 %v10690_v14  ;;  %v10945_v13 = vadd.f32 %v4592_v51, %v12961_v27  ;;  %v10950_v26 = vpack.c.bf16 %v2063_v37, %v2062_v40  ;;  %v12962_v14 = vld [vmem:[#allocation58_spill] sm:$0xff]  ;;  %v12965_v37 = vld [vmem:[#allocation60_spill] sm:$0xff] }
 0x3ea   :  { %12960 = vst [vmem:[#allocation25_spill] sm:$0xff] %v10941_v23  ;;  %v1766_v3 = vpop.f32.mrf.mxu0  ;;  %v8537_v51 = vld [vmem:[#allocation3 + $0x6c] sm:$0xf0] }
 0x3eb   :  { %4631 = vmatmul.bf16.gmra.mxu1 %v7450_v12  ;;  %4760 = vmatmul.bf16.vlgmr.msrb.gmra.mxu2 %v7198_v34  ;;  %v1767_v6 = vadd.f32 %v1766_v3, %v12962_v14  ;;  %v7989_v12 = vld [vmem:[#allocation3 + $0x648] sm:$0xf]  ;;  %v7229_v34 = vld [vmem:[#allocation3 + $0x50] sm:$0xf]  ;;  %v2724_v27 = vpop.permute.xlu2 %2723  ;;  %v7482_v3 = vor.u32 %v8596_v45, %v7479_v38 }
 0x3ec   :  { %4542 = vmatmul.bf16.gmra.mxu3 %v7958_v4  ;;  %v8728_v4 = vld [vmem:[#allocation3 + $0x664] sm:$0xf0] }
 0x3ed   :  { %7173 = vmatmul.msk.bf16.gmra.mxu0 %vm1290_vm0, %v8517_v48  ;;  %v1936_v40 = vmul.f32 0.2, %v1767_v6 }
 0x3ee   :  { %v4374_v61 = vpop.f32.mrf.mxu2 }
 0x3ef   :  { %v4503_v7 = vpop.f32.mrf.mxu3  ;;  %v10955_v42 = vadd.f32 %v4374_v61, %v4206_v28  ;;  %v2064_v31 = vmax.f32 %v1767_v6, %v1936_v40  ;;  %v2739_v40 = vpop.permute.xlu0 %2738 }
 0x3f0   :  { %v10958_v63 = vadd.f32 %v4503_v7, %v10725_v32  ;;  %v4594_v30 = vpop.f32.mrf.mxu1  ;;  %v4208_v32 = vadd.f32 %v10730_v24, %v2724_v27  ;;  %v7990_v7 = vor.u32 %v8728_v4, %v7989_v12  ;;  %v8518_v24 = vld [vmem:[%s12775_s1 + $0x1d8] sm:$0xff]  ;;  %v12968_v12 = vld [vmem:[#allocation59_spill] sm:$0xff] }
 0x3f1   :  { %v10963_v16 = vadd.f32 %v4594_v30, %v12964_v33  ;;  %v7230_v30 = vor.u32 %v8537_v51, %v7229_v34  ;;  %v12970_v27 = vld [vmem:[#allocation17_spill] sm:$0xff] }
 0x3f2   :  { %12963 = vst [vmem:[#allocation29_spill] sm:$0xff] %v10958_v63  ;;  %v1768_v58 = vpop.f32.mrf.mxu0  ;;  %v12967_v63 = vld [vmem:[#allocation20_spill] sm:$0xff] }
 0x3f3   :  { %v1769_v36 = vadd.f32 %v1768_v58, %v12965_v37 }
 0x3f5   :  { %v1937_v48 = vmul.f32 0.2, %v1769_v36 }
 0x3f6   :  { %v4376_v14 = vpop.f32.mrf.mxu2 }
 0x3f7   :  { %v2065_v28 = vmax.f32 %v1769_v36, %v1937_v48  ;;  %v4505_v61 = vpop.f32.mrf.mxu3  ;;  %v10967_v33 = vadd.f32 %v4376_v14, %v4208_v32 }
 0x3f8   :  { %v10970_v58 = vadd.f32 %v4505_v61, %v10734_v43  ;;  %v4597_v37 = vpop.f32.mrf.mxu1  ;;  %v4211_v43 = vadd.f32 %v10739_v5, %v2729_v44  ;;  %v8604_v61 = vld [vmem:[#allocation3 + $0x28c] sm:$0xf]  ;;  %v8736_v44 = vld [vmem:[#allocation3 + $0x6a4] sm:$0xf0] }
 0x3f9   :  { %v10973_v23 = vadd.f32 %v4597_v37, %v12967_v63  ;;  %v10978_v45 = vpack.c.bf16 %v2065_v28, %v2064_v31  ;;  %v12971_v28 = vld [vmem:[#allocation55_spill] sm:$0xff]  ;;  %v2734_v37 = vpop.permute.xlu0 %2733 }
 0x3fa   :  { %12966 = vst [vmem:[#allocation32_spill] sm:$0xff] %v10970_v58  ;;  %v1771_v6 = vpop.f32.mrf.mxu0  ;;  %v7511_v5 = vld [vmem:[#allocation3 + $0x2a8] sm:$0xf0]  ;;  %v12973_v58 = vld [vmem:[#allocation16_spill] sm:$0xff] }
 0x3fb   :  { %4636 = vmatmul.bf16.gmra.mxu1 %v7482_v3  ;;  %4765 = vmatmul.bf16.gmra.mxu2 %v7230_v30  ;;  %v1772_v36 = vadd.f32 %v1771_v6, %v12968_v12  ;;  %v8021_v3 = vld [vmem:[#allocation3 + $0x688] sm:$0xf]  ;;  %v8545_v30 = vld [vmem:[#allocation3 + $0xac] sm:$0xf0]  ;;  %v4213_v6 = vadd.f32 %v10754_v9, %v2734_v37  ;;  %v8519_v9 = vld [vmem:[%s12775_s1 + $0x1e0] sm:$0xff] }
 0x3fc   :  { %4547 = vmatmul.bf16.gmra.mxu3 %v7990_v7  ;;  %v7261_v7 = vld [vmem:[#allocation3 + $0x90] sm:$0xf]  ;;  %v8053_v37 = vld [vmem:[#allocation3 + $0x6c8] sm:$0xf] }
 0x3fd   :  { %7174 = vmatmul.msk.bf16.gmra.mxu0 %vm1290_vm0, %v8518_v24  ;;  %v1938_v31 = vmul.f32 0.2, %v1772_v36 }
 0x3fe   :  { %v4379_v38 = vpop.f32.mrf.mxu2 }
 0x3ff   :  { %v4508_v63 = vpop.f32.mrf.mxu3  ;;  %v10983_v4 = vadd.f32 %v4379_v38, %v4211_v43  ;;  %v2066_v43 = vmax.f32 %v1772_v36, %v1938_v31 }
 0x400   :  { %v10986_v34 = vadd.f32 %v4508_v63, %v10749_v15  ;;  %v4599_v51 = vpop.f32.mrf.mxu1  ;;  %v7514_v15 = vor.u32 %v8604_v61, %v7511_v5 }
 0x401   :  { %v10989_v48 = vadd.f32 %v4599_v51, %v12970_v27  ;;  %v8022_v51 = vor.u32 %v8736_v44, %v8021_v3  ;;  %v7262_v27 = vor.u32 %v8545_v30, %v7261_v7  ;;  %v12975_v44 = vld [vmem:[#allocation18_spill] sm:$0xff] }
 0x402   :  { %12969 = vst [vmem:[#allocation27_spill] sm:$0xff] %v10986_v34  ;;  %v1773_v32 = vpop.f32.mrf.mxu0 }
 0x403   :  { %v1774_v14 = vadd.f32 %v1773_v32, %v12971_v28 }
 0x405   :  { %v1939_v24 = vmul.f32 0.2, %v1774_v14 }
 0x406   :  { %v4381_v38 = vpop.f32.mrf.mxu2 }
 0x407   :  { %v2067_v12 = vmax.f32 %v1774_v14, %v1939_v24  ;;  %v4510_v63 = vpop.f32.mrf.mxu3  ;;  %v10993_v34 = vadd.f32 %v4381_v38, %v4213_v6  ;;  %v8612_v24 = vld [vmem:[#allocation3 + $0x2cc] sm:$0xf] }
 0x408   :  { %v10996_v32 = vadd.f32 %v4510_v63, %v10758_v2  ;;  %v4602_v28 = vpop.f32.mrf.mxu1  ;;  %v4216_v2 = vadd.f32 %v10763_v18, %v2739_v40  ;;  %v7543_v6 = vld [vmem:[#allocation3 + $0x2e8] sm:$0xf0]  ;;  %v4218_v18 = vadd.f32 %v10779_v22, %v10930_v8  ;;  %v4221_v22 = vadd.f32 %v10789_v19, %v10907_v52  ;;  %v12981_v19 = vld [vmem:[#allocation78_spill] sm:$0xff] }
 0x409   :  { %v10999_v57 = vadd.f32 %v4602_v28, %v12973_v58  ;;  %v11004_v61 = vpack.c.bf16 %v2067_v12, %v2066_v43  ;;  %v7293_v43 = vld [vmem:[#allocation3 + $0xd0] sm:$0xf]  ;;  %v7546_v40 = vor.u32 %v8612_v24, %v7543_v6  ;;  %v12979_v6 = vld [vmem:[#allocation15_spill] sm:$0xff]  ;;  %v4223_v52 = vadd.f32 %v12981_v19, %v10928_v20  ;;  %v12986_v20 = vld [vmem:[#allocation73_spill] sm:$0xff] }
 0x40a   :  { %12972 = vst [vmem:[#allocation69_spill] sm:$0xff] %v10996_v32  ;;  %v11006_v36 = vpop.f32.mrf.mxu0  ;;  %v8553_v12 = vld [vmem:[#allocation3 + $0xec] sm:$0xf0]  ;;  %v12996_v32 = vld [vmem:[#allocation74_spill] sm:$0xff] }
 0x40b   :  { %4641 = vmatmul.bf16.gmra.mxu1 %v7514_v15  ;;  %4770 = vmatmul.bf16.gmra.mxu2 %v7262_v27  ;;  %v8744_v15 = vld [vmem:[#allocation3 + $0x6e4] sm:$0xf0] }
 0x40c   :  { %4552 = vmatmul.bf16.gmra.mxu3 %v8022_v51  ;;  %v7294_v51 = vor.u32 %v8553_v12, %v7293_v43  ;;  %v8085_v12 = vld [vmem:[#allocation3 + $0x708] sm:$0xf] }
 0x40d   :  { %7175 = vmatmul.msk.bf16.gmra.mxu0 %vm1290_vm0, %v8519_v9 }
 0x40e   :  { %v4384_v3 = vpop.f32.mrf.mxu2 }
 0x40f   :  { %v4513_v31 = vpop.f32.mrf.mxu3  ;;  %v11010_v14 = vadd.f32 %v4384_v3, %v4216_v2  ;;  %v12977_v2 = vld [vmem:[#allocation13_spill] sm:$0xff] }
 0x410   :  { %v11013_v58 = vadd.f32 %v4513_v31, %v10774_v25  ;;  %v4604_v5 = vpop.f32.mrf.mxu1  ;;  %v8054_v25 = vor.u32 %v8744_v15, %v8053_v37  ;;  %v8520_v31 = vld [vmem:[%s12775_s1 + $0x1e8] sm:$0xff] }
 0x411   :  { %v11016_v7 = vadd.f32 %v4604_v5, %v12975_v44 }
 0x412   :  { %12974 = vst [vmem:[#allocation67_spill] sm:$0xff] %v11013_v58  ;;  %v11018_v30 = vpop.f32.mrf.mxu0 }
 0x416   :  { %v4386_v38 = vpop.f32.mrf.mxu2 }
 0x417   :  { %v4515_v63 = vpop.f32.mrf.mxu3  ;;  %v11022_v27 = vadd.f32 %v4386_v38, %v4218_v18  ;;  %v8620_v18 = vld [vmem:[#allocation3 + $0x30c] sm:$0xf]  ;;  %v8752_v38 = vld [vmem:[#allocation3 + $0x724] sm:$0xf0] }
 0x418   :  { %v11025_v28 = vadd.f32 %v4515_v63, %v10784_v59  ;;  %v4607_v9 = vpop.f32.mrf.mxu1  ;;  %v7325_v63 = vld [vmem:[#allocation3 + $0x110] sm:$0xf] }
 0x419   :  { %v11028_v3 = vadd.f32 %v4607_v9, %v12977_v2 }
 0x41a   :  { %12976 = vst [vmem:[#allocation63_spill] sm:$0xff] %v11025_v28  ;;  %v11033_v5 = vpop.f32.mrf.mxu0  ;;  %v8521_v28 = vld [vmem:[%s12775_s1 + $0x1f0] sm:$0xff] }
 0x41b   :  { %4646 = vmatmul.bf16.gmra.mxu1 %v7546_v40  ;;  %4775 = vmatmul.bf16.gmra.mxu2 %v7294_v51  ;;  %v7575_v40 = vld [vmem:[#allocation3 + $0x328] sm:$0xf0] }
 0x41c   :  { %4557 = vmatmul.bf16.gmra.mxu3 %v8054_v25  ;;  %v8561_v25 = vld [vmem:[#allocation3 + $0x12c] sm:$0xf0]  ;;  %v7578_v51 = vor.u32 %v8620_v18, %v7575_v40 }
 0x41d   :  { %7176 = vmatmul.msk.bf16.gmra.mxu0 %vm1290_vm0, %v8520_v31  ;;  %v7326_v31 = vor.u32 %v8561_v25, %v7325_v63  ;;  %v12988_v63 = vld [vmem:[#allocation35_spill] sm:$0xff] }
 0x41e   :  { %v4389_v59 = vpop.f32.mrf.mxu2 }
 0x41f   :  { %v4518_v8 = vpop.f32.mrf.mxu3  ;;  %v11038_v44 = vadd.f32 %v4389_v59, %v4221_v22  ;;  %v12982_v59 = vld [vmem:[#allocation33_spill] sm:$0xff] }
 0x420   :  { %v11041_v37 = vadd.f32 %v4518_v8, %v10798_v21  ;;  %v4609_v24 = vpop.f32.mrf.mxu1  ;;  %v8086_v21 = vor.u32 %v8752_v38, %v8085_v12  ;;  %v4226_v12 = vadd.f32 %v12986_v20, %v10896_v17  ;;  %v12992_v17 = vld [vmem:[#allocation28_spill] sm:$0xff] }
 0x421   :  { %v11044_v15 = vadd.f32 %v4609_v24, %v12979_v6  ;;  %v12984_v6 = vld [vmem:[#allocation71_spill] sm:$0xff] }
 0x422   :  { %12978 = vst [vmem:[#allocation68_spill] sm:$0xff] %v11041_v37  ;;  %v11046_v43 = vpop.f32.mrf.mxu0 }
 0x423   :  { %12980 = vst [vmem:[#allocation19_spill] sm:$0xff] %v11044_v15 }
 0x426   :  { %v4391_v9 = vpop.f32.mrf.mxu2 }
 0x427   :  { %v4520_v2 = vpop.f32.mrf.mxu3  ;;  %v11050_v22 = vadd.f32 %v4391_v9, %v4223_v52  ;;  %v12990_v52 = vld [vmem:[#allocation82_spill] sm:$0xff] }
 0x428   :  { %v11053_v8 = vadd.f32 %v4520_v2, %v12982_v59  ;;  %v4612_v24 = vpop.f32.mrf.mxu1  ;;  %v8760_v59 = vld [vmem:[#allocation3 + $0x764] sm:$0xf0] }
 0x429   :  { %v11056_v37 = vadd.f32 %v4612_v24, %v12984_v6  ;;  %v8569_v24 = vld [vmem:[#allocation3 + $0x16c] sm:$0xf0]  ;;  %v4228_v6 = vadd.f32 %v12992_v17, %v10960_v11 }
 0x42a   :  { %12983 = vst [vmem:[#allocation58_spill] sm:$0xff] %v11053_v8  ;;  %v1786_v58 = vpop.f32.mrf.mxu0  ;;  %v12998_v11 = vld [vmem:[#allocation80_spill] sm:$0xff] }
 0x42b   :  { %12985 = vst [vmem:[#allocation21_spill] sm:$0xff] %v11056_v37  ;;  %4651 = vmatmul.bf16.gmra.mxu1 %v7578_v51  ;;  %4780 = vmatmul.bf16.gmra.mxu2 %v7326_v31  ;;  %v8117_v51 = vld [vmem:[#allocation3 + $0x748] sm:$0xf]  ;;  %v7607_v31 = vld [vmem:[#allocation3 + $0x368] sm:$0xf0]  ;;  %v13010_v37 = vld [vmem:[#allocation46_spill] sm:$0xff] }
 0x42c   :  { %4562 = vmatmul.bf16.gmra.mxu3 %v8086_v21  ;;  %v8628_v21 = vld [vmem:[#allocation3 + $0x34c] sm:$0xf]  ;;  %v8118_v8 = vor.u32 %v8760_v59, %v8117_v51  ;;  %v4231_v51 = vadd.f32 %v12998_v11, %v10934_v39 }
 0x42d   :  { %7177 = vmatmul.msk.bf16.gmra.mxu0 %vm1290_vm0, %v8521_v28  ;;  %v7357_v28 = vld [vmem:[#allocation3 + $0x150] sm:$0xf]  ;;  %v7610_v20 = vor.u32 %v8628_v21, %v7607_v31  ;;  %v12999_v21 = vld [vmem:[#allocation39_spill] sm:$0xff] }
 0x42e   :  { %v4394_v18 = vpop.f32.mrf.mxu2  ;;  %v8636_v11 = vld [vmem:[#allocation3 + $0x38c] sm:$0xf] }
 0x42f   :  { %v4523_v40 = vpop.f32.mrf.mxu3  ;;  %v11064_v38 = vadd.f32 %v4394_v18, %v4226_v12 }
 0x430   :  { %v11067_v25 = vadd.f32 %v4523_v40, %v12988_v63  ;;  %v4614_v19 = vpop.f32.mrf.mxu1  ;;  %v7358_v40 = vor.u32 %v8569_v24, %v7357_v28 }
 0x431   :  { %12987 = vst [vmem:[#allocation60_spill] sm:$0xff] %v11064_v38  ;;  %v11070_v9 = vadd.f32 %v4614_v19, %v12990_v52 }
 0x432   :  { %12989 = vst [vmem:[#allocation20_spill] sm:$0xff] %v11067_v25  ;;  %v1788_v2 = vpop.f32.mrf.mxu0  ;;  %v12994_v25 = vld [vmem:[#allocation30_spill] sm:$0xff] }
 0x433   :  { %12991 = vst [vmem:[#allocation59_spill] sm:$0xff] %v11070_v9 }
 0x436   :  { %v4396_v12 = vpop.f32.mrf.mxu2 }
 0x437   :  { %v4525_v18 = vpop.f32.mrf.mxu3  ;;  %v11074_v63 = vadd.f32 %v4396_v12, %v4228_v6  ;;  %v13003_v6 = vld [vmem:[#allocation76_spill] sm:$0xff] }
 0x438   :  { %v11077_v19 = vadd.f32 %v4525_v18, %v12994_v25  ;;  %v4617_v52 = vpop.f32.mrf.mxu1 }
 0x439   :  { %12993 = vst [vmem:[#allocation17_spill] sm:$0xff] %v11074_v63  ;;  %v11080_v53 = vadd.f32 %v4617_v52, %v12996_v32  ;;  %v13001_v32 = vld [vmem:[#allocation81_spill] sm:$0xff]  ;;  %v13006_v52 = vld [vmem:[#allocation44_spill] sm:$0xff] }
 0x43a   :  { %12995 = vst [vmem:[#allocation55_spill] sm:$0xff] %v11077_v19  ;;  %v1791_v41 = vpop.f32.mrf.mxu0 }
 0x43b   :  { %12997 = vst [vmem:[#allocation16_spill] sm:$0xff] %v11080_v53  ;;  %4656 = vmatmul.bf16.gmra.mxu1 %v7610_v20  ;;  %4785 = vmatmul.bf16.gmra.mxu2 %v7358_v40  ;;  %v1792_v25 = vadd.f32 %v1791_v41, %v12999_v21  ;;  %v7639_v41 = vld [vmem:[#allocation3 + $0x3a8] sm:$0xf0]  ;;  %v8577_v53 = vld [vmem:[#allocation3 + $0x1ac] sm:$0xf0] }
 0x43c   :  { %4567 = vmatmul.bf16.gmra.mxu3 %v8118_v8  ;;  %v13005_v8 = vld [vmem:[#allocation43_spill] sm:$0xff] }
 0x43d   :  { %7178 = vmatmul.msk.bf16.gmra.mxu0 %vm1290_vm0, %v8522_v62  ;;  %v1789_v20 = vadd.f32 %v1788_v2, %v13005_v8  ;;  %v8149_v62 = vld [vmem:[#allocation3 + $0x788] sm:$0xf]  ;;  %v1946_v40 = vmul.f32 0.2, %v1792_v25  ;;  %v7642_v8 = vor.u32 %v8636_v11, %v7639_v41 }
 0x43e   :  { %v4399_v31 = vpop.f32.mrf.mxu2  ;;  %v13007_v21 = vld [vmem:[#allocation47_spill] sm:$0xff] }
 0x43f   :  { %v4528_v59 = vpop.f32.mrf.mxu3  ;;  %v11089_v28 = vadd.f32 %v4399_v31, %v4231_v51  ;;  %v1787_v19 = vadd.f32 %v1786_v58, %v13007_v21  ;;  %v8768_v51 = vld [vmem:[#allocation3 + $0x7a4] sm:$0xf0]  ;;  %v7389_v31 = vld [vmem:[#allocation3 + $0x190] sm:$0xf]  ;;  %v1945_v2 = vmul.f32 0.2, %v1789_v20  ;;  %v1782_v58 = vadd.f32 %v11033_v5, %v13010_v37 }
 0x440   :  { %v11092_v24 = vadd.f32 %v4528_v59, %v13001_v32  ;;  %v4619_v17 = vpop.f32.mrf.mxu1  ;;  %v13008_v32 = vld [vmem:[#allocation83_spill] sm:$0xff]  ;;  %v7390_v63 = vor.u32 %v8577_v53, %v7389_v31 }
 0x441   :  { %13000 = vst [vmem:[#allocation18_spill] sm:$0xff] %v11089_v28  ;;  %v11095_v12 = vadd.f32 %v4619_v17, %v13003_v6  ;;  %v13009_v17 = vld [vmem:[#allocation48_spill] sm:$0xff]  ;;  %v1944_v21 = vmul.f32 0.2, %v1787_v19  ;;  %v13014_v5 = vld [vmem:[#allocation51_spill] sm:$0xff] }
 0x442   :  { %13002 = vst [vmem:[#allocation13_spill] sm:$0xff] %v11092_v24  ;;  %v1793_v18 = vpop.f32.mrf.mxu0  ;;  %v4233_v24 = vadd.f32 %v13008_v32, %v10883_v10  ;;  %v1784_v6 = vadd.f32 %v11046_v43, %v13009_v17  ;;  %v13012_v43 = vld [vmem:[#allocation9_spill] sm:$0xff]  ;;  %v1777_v37 = vadd.f32 %v11006_v36, %v13014_v5  ;;  %v13017_v36 = vld [vmem:[#allocation6_spill] sm:$0xff] }
 0x443   :  { %13004 = vst [vmem:[#allocation15_spill] sm:$0xff] %v11095_v12  ;;  %v1794_v39 = vadd.f32 %v1793_v18, %v13006_v52  ;;  %v2074_v12 = vmax.f32 %v1792_v25, %v1946_v40  ;;  %v8150_v52 = vor.u32 %v8768_v51, %v8149_v62  ;;  %v13013_v25 = vld [vmem:[#allocation56_spill] sm:$0xff]  ;;  %v2073_v62 = vmax.f32 %v1789_v20, %v1945_v2 }
 0x444   :  { %v1779_v40 = vadd.f32 %v11018_v30, %v13013_v25  ;;  %v1940_v20 = vmul.f32 0.2, %v1777_v37 }
 0x445   :  { %v1947_v59 = vmul.f32 0.2, %v1794_v39 }
 0x446   :  { %v4401_v9 = vpop.f32.mrf.mxu2 }
 0x447   :  { %v2075_v28 = vmax.f32 %v1794_v39, %v1947_v59  ;;  %v4530_v18 = vpop.f32.mrf.mxu3  ;;  %v11106_v38 = vadd.f32 %v4401_v9, %v4233_v24  ;;  %v1943_v39 = vmul.f32 0.2, %v1784_v6  ;;  %v2072_v9 = vmax.f32 %v1787_v19, %v1944_v21  ;;  %v7671_v21 = vld [vmem:[#allocation3 + $0x3e8] sm:$0xf0] }
 0x448   :  { %v11109_v15 = vadd.f32 %v4530_v18, %v10866_v47  ;;  %v4622_v10 = vpop.f32.mrf.mxu1  ;;  %v1942_v47 = vmul.f32 0.2, %v1782_v58 }
 0x449   :  { %v2403_v32 = vpack.c.bf16 %v2075_v28, %v2074_v12  ;;  %v11112_v17 = vadd.f32 %v4622_v10, %v13012_v43  ;;  %v13015_v28 = vld [vmem:[#allocation75_spill] sm:$0xff]  ;;  %v1941_v12 = vmul.f32 0.2, %v1779_v40  ;;  %v2071_v11 = vmax.f32 %v1784_v6, %v1943_v39  ;;  %v8585_v43 = vld [vmem:[#allocation3 + $0x1ec] sm:$0xf0] }
 0x44a   :  { %13011 = vst [vmem:[#allocation78_spill] sm:$0xff] %v11109_v15  ;;  %v11116_v53 = vpop.f32.mrf.mxu0  ;;  %v4236_v24 = vadd.f32 %v10871_v60, %v13015_v28  ;;  %v2402_v41 = vpack.c.bf16 %v2073_v62, %v2072_v9  ;;  %v2070_v31 = vmax.f32 %v1782_v58, %v1942_v47  ;;  %v8181_v6 = vld [vmem:[#allocation3 + $0x7c8] sm:$0xf]  ;;  %v2068_v10 = vmax.f32 %v1777_v37, %v1940_v20  ;;  %v13066_v15 = vld [vmem:[#allocation40_spill] sm:$0xff] }
 0x44b   :  { %4661 = vmatmul.bf16.gmra.mxu1 %v7642_v8  ;;  %4790 = vmatmul.bf16.gmra.mxu2 %v7390_v63  ;;  %v2069_v8 = vmax.f32 %v1779_v40, %v1941_v12  ;;  %v8776_v58 = vld [vmem:[#allocation3 + $0x7e4] sm:$0xf0] }
 0x44c   :  { %4572 = vmatmul.bf16.gmra.mxu3 %v8150_v52  ;;  %5090 = vmatpush.bf16.msra.mxu1 %v2403_v32  ;;  %v2401_v60 = vpack.c.bf16 %v2071_v11, %v2070_v31  ;;  %v8644_v52 = vld [vmem:[#allocation3 + $0x3cc] sm:$0xf]  ;;  %v7421_v32 = vld [vmem:[#allocation3 + $0x1d0] sm:$0xf]  ;;  %v8182_v47 = vor.u32 %v8776_v58, %v8181_v6  ;;  %v13022_v31 = vld [vmem:[#allocation77_spill] sm:$0xff] }
 0x44d   :  { %v2400_v25 = vpack.c.bf16 %v2069_v8, %v2068_v10  ;;  %v7674_v39 = vor.u32 %v8644_v52, %v7671_v21  ;;  %v7422_v40 = vor.u32 %v8585_v43, %v7421_v32  ;;  %v13019_v37 = vld [vmem:[#allocation7_spill] sm:$0xff]  ;;  %v8525_v6 = vld [vmem:[#allocation3 + $0x14] sm:$0xf] }
 0x44e   :  { %v4404_v30 = vpop.f32.mrf.mxu2  ;;  %v8652_v8 = vld [vmem:[#allocation3 + $0x40c] sm:$0xf]  ;;  %v7199_v52 = vld [vmem:[#allocation3 + $0x30] sm:$0xf0] }
 0x44f   :  { %v4533_v51 = vpop.f32.mrf.mxu3  ;;  %v11122_v59 = vadd.f32 %v4404_v30, %v4236_v24  ;;  %v7202_v32 = vor.u32 %v8525_v6, %v7199_v52  ;;  %v13028_v52 = vld [vmem:[#allocation11_spill] sm:$0xff] }
 0x450   :  { %v11125_v63 = vadd.f32 %v4533_v51, %v10888_v49  ;;  %v4624_v2 = vpop.f32.mrf.mxu1  ;;  %5091 = vmatpush.bf16.msra.mxu1 %v2402_v41  ;;  %v4238_v49 = vadd.f32 %v10893_v55, %v10878_v56  ;;  %v13020_v56 = vld [vmem:[#allocation22_spill] sm:$0xff] }
 0x451   :  { %v11128_v19 = vadd.f32 %v4624_v2, %v13017_v36  ;;  %v4241_v55 = vadd.f32 %v10905_v29, %v13020_v56  ;;  %v8593_v29 = vld [vmem:[#allocation3 + $0x22c] sm:$0xf0]  ;;  %v7735_v56 = vld [vmem:[#allocation3 + $0x468] sm:$0xf0] }
 0x452   :  { %13016 = vst [vmem:[#allocation33_spill] sm:$0xff] %v11125_v63  ;;  %v11130_v18 = vpop.f32.mrf.mxu0 }
 0x454   :  { %5092 = vmatpush.bf16.msra.mxu1 %v2401_v60  ;;  %v7453_v60 = vld [vmem:[#allocation3 + $0x210] sm:$0xf] }
 0x456   :  { %v4406_v62 = vpop.f32.mrf.mxu2 }
 0x457   :  { %v4535_v5 = vpop.f32.mrf.mxu3  ;;  %v11134_v9 = vadd.f32 %v4406_v62, %v4238_v49 }
 0x458   :  { %v11137_v28 = vadd.f32 %v4535_v5, %v10900_v54  ;;  %v4627_v24 = vpop.f32.mrf.mxu1  ;;  %5093 = vmatpush.bf16.msra.mxu1 %v2400_v25 }
 0x459   :  { %v11140_v12 = vadd.f32 %v4627_v24, %v13019_v37  ;;  %v8660_v37 = vld [vmem:[#allocation3 + $0x44c] sm:$0xf] }
 0x45a   :  { %13018 = vst [vmem:[#allocation71_spill] sm:$0xff] %v11137_v28  ;;  %v11142_v11 = vpop.f32.mrf.mxu0  ;;  %v13057_v28 = vld [vmem:[#allocation41_spill] sm:$0xff] }
 0x45b   :  { %4666 = vmatmul.bf16.gmra.mxu1 %v7674_v39  ;;  %4795 = vmatmul.bf16.gmra.mxu2 %v7422_v40  ;;  %v13026_v40 = vld [vmem:[#allocation10_spill] sm:$0xff] }
 0x45c   :  { %4577 = vmatmul.bf16.gmra.mxu3 %v8182_v47  ;;  %5094 = vmatpush.bf16.msra.mxu1 %v11004_v61  ;;  %v7703_v61 = vld [vmem:[#allocation3 + $0x428] sm:$0xf0] }
 0x45d   :  { %v7706_v21 = vor.u32 %v8652_v8, %v7703_v61 }
 0x45e   :  { %v4409_v41 = vpop.f32.mrf.mxu2 }
 0x45f   :  { %v4538_v30 = vpop.f32.mrf.mxu3  ;;  %v11147_v51 = vadd.f32 %v4409_v41, %v4241_v55  ;;  %v7485_v55 = vld [vmem:[#allocation3 + $0x250] sm:$0xf] }
 0x460   :  { %v11150_v54 = vadd.f32 %v4538_v30, %v10920_v35  ;;  %v4629_v20 = vpop.f32.mrf.mxu1  ;;  %5095 = vmatpush.bf16.msra.mxu1 %v10978_v45  ;;  %v4243_v35 = vadd.f32 %v10925_v1, %v10914_v46  ;;  %v7454_v45 = vor.u32 %v8593_v29, %v7453_v60  ;;  %v8601_v41 = vld [vmem:[#allocation3 + $0x26c] sm:$0xf0]  ;;  %v8533_v30 = vld [vmem:[#allocation3 + $0x54] sm:$0xf] }
 0x461   :  { %v11154_v2 = vadd.f32 %v4629_v20, %v13022_v31  ;;  %v7231_v20 = vld [vmem:[#allocation3 + $0x70] sm:$0xf0]  ;;  %v7738_v31 = vor.u32 %v8660_v37, %v7735_v56 }
 0x462   :  { %13021 = vst [vmem:[#allocation73_spill] sm:$0xff] %v11150_v54  ;;  %v11156_v36 = vpop.f32.mrf.mxu0  ;;  %v7234_v60 = vor.u32 %v8533_v30, %v7231_v20  ;;  %v8541_v37 = vld [vmem:[#allocation3 + $0x94] sm:$0xf] }
 0x463   :  { %v7263_v56 = vld [vmem:[#allocation3 + $0xb0] sm:$0xf0] }
 0x464   :  { %5096 = vmatpush.bf16.msra.mxu1 %v10950_v26  ;;  %v13024_v26 = vld [vmem:[#allocation12_spill] sm:$0xff]  ;;  %v7266_v20 = vor.u32 %v8541_v37, %v7263_v56 }
 0x465   :  { %v8549_v37 = vld [vmem:[#allocation3 + $0xd4] sm:$0xf] }
 0x466   :  { %v4411_v10 = vpop.f32.mrf.mxu2  ;;  %v7295_v56 = vld [vmem:[#allocation3 + $0xf0] sm:$0xf0] }
 0x467   :  { %v4540_v58 = vpop.f32.mrf.mxu3  ;;  %v11161_v43 = vadd.f32 %v4411_v10, %v4243_v35 }
 0x468   :  { %v11164_v49 = vadd.f32 %v4540_v58, %v10938_v50  ;;  %v4632_v25 = vpop.f32.mrf.mxu1  ;;  %5097 = vmatpush.bf16.msra.mxu1 %v10912_v0 }
 0x469   :  { %v11168_v39 = vadd.f32 %v4632_v25, %v13024_v26 }
 0x46a   :  { %13023 = vst [vmem:[#allocation35_spill] sm:$0xff] %v11164_v49  ;;  %v11170_v62 = vpop.f32.mrf.mxu0 }
 0x46b   :  { %4671 = vmatmul.bf16.gmra.mxu1 %v7706_v21  ;;  %4800 = vmatmul.bf16.gmra.mxu2 %v7454_v45 }
 0x46c   :  { %4929 = vmatmul.bf16.vlgmr.msrb.gmra.mxu3 %v7202_v32 }
 0x46e   :  { %v4761_v1 = vpop.f32.mrf.mxu2 }
 0x46f   :  { %v4543_v46 = vpop.f32.mrf.mxu3  ;;  %v11176_v47 = vadd.f32 %v4761_v1, %v10945_v13  ;;  %v7767_v1 = vld [vmem:[#allocation3 + $0x4a8] sm:$0xf0] }
 0x470   :  { %v11173_v5 = vadd.f32 %v4543_v46, %v10955_v42  ;;  %v4634_v50 = vpop.f32.mrf.mxu1  ;;  %v7486_v42 = vor.u32 %v8601_v41, %v7485_v55  ;;  %v8668_v46 = vld [vmem:[#allocation3 + $0x48c] sm:$0xf] }
 0x471   :  { %v11179_v24 = vadd.f32 %v4634_v50, %v13026_v40  ;;  %v7517_v50 = vld [vmem:[#allocation3 + $0x290] sm:$0xf]  ;;  %v7770_v55 = vor.u32 %v8668_v46, %v7767_v1  ;;  %v8676_v46 = vld [vmem:[#allocation3 + $0x4cc] sm:$0xf] }
 0x472   :  { %13025 = vst [vmem:[#allocation82_spill] sm:$0xff] %v11173_v5  ;;  %v11181_v0 = vpop.f32.mrf.mxu0  ;;  %v8609_v40 = vld [vmem:[#allocation3 + $0x2ac] sm:$0xf0]  ;;  %v7799_v1 = vld [vmem:[#allocation3 + $0x4e8] sm:$0xf0] }
 0x476   :  { %v4763_v61 = vpop.f32.mrf.mxu2 }
 0x477   :  { %v4545_v8 = vpop.f32.mrf.mxu3  ;;  %v11187_v29 = vadd.f32 %v4763_v61, %v10963_v16  ;;  %v13030_v16 = vld [vmem:[#allocation14_spill] sm:$0xff]  ;;  %v13032_v61 = vld [vmem:[#allocation79_spill] sm:$0xff] }
 0x478   :  { %v11184_v13 = vadd.f32 %v4545_v8, %v10967_v33  ;;  %v4637_v6 = vpop.f32.mrf.mxu1 }
 0x479   :  { %v11190_v35 = vadd.f32 %v4637_v6, %v13028_v52 }
 0x47a   :  { %13027 = vst [vmem:[#allocation28_spill] sm:$0xff] %v11184_v13  ;;  %v11192_v21 = vpop.f32.mrf.mxu0 }
 0x47b   :  { %4676 = vmatmul.bf16.gmra.mxu1 %v7738_v31  ;;  %4805 = vmatmul.bf16.gmra.mxu2 %v7486_v42 }
 0x47c   :  { %4934 = vmatmul.bf16.gmra.mxu3 %v7234_v60 }
 0x47e   :  { %v4766_v58 = vpop.f32.mrf.mxu2 }
 0x47f   :  { %v4548_v10 = vpop.f32.mrf.mxu3  ;;  %v11198_v33 = vadd.f32 %v4766_v58, %v10973_v23 }
 0x480   :  { %v11195_v45 = vadd.f32 %v4548_v10, %v10983_v4  ;;  %v4639_v32 = vpop.f32.mrf.mxu1  ;;  %v7518_v4 = vor.u32 %v8609_v40, %v7517_v50  ;;  %v7549_v50 = vld [vmem:[#allocation3 + $0x2d0] sm:$0xf] }
 0x481   :  { %v11201_v25 = vadd.f32 %v4639_v32, %v13030_v16  ;;  %v8617_v40 = vld [vmem:[#allocation3 + $0x2ec] sm:$0xf0] }
 0x482   :  { %13029 = vst [vmem:[#allocation30_spill] sm:$0xff] %v11195_v45  ;;  %v11203_v26 = vpop.f32.mrf.mxu0 }
 0x486   :  { %v4768_v30 = vpop.f32.mrf.mxu2 }
 0x487   :  { %v4550_v41 = vpop.f32.mrf.mxu3  ;;  %v11209_v31 = vadd.f32 %v4768_v30, %v10989_v48  ;;  %v13034_v48 = vld [vmem:[#allocation34_spill] sm:$0xff] }
 0x488   :  { %v11206_v23 = vadd.f32 %v4550_v41, %v10993_v34  ;;  %v4642_v8 = vpop.f32.mrf.mxu1 }
 0x489   :  { %v11212_v42 = vadd.f32 %v4642_v8, %v13032_v61  ;;  %v13036_v61 = vld [vmem:[#allocation36_spill] sm:$0xff] }
 0x48a   :  { %13031 = vst [vmem:[#allocation74_spill] sm:$0xff] %v11206_v23  ;;  %v11214_v60 = vpop.f32.mrf.mxu0 }
 0x48b   :  { %4681 = vmatmul.bf16.gmra.mxu1 %v7770_v55  ;;  %4810 = vmatmul.bf16.gmra.mxu2 %v7518_v4  ;;  %v7802_v55 = vor.u32 %v8676_v46, %v7799_v1  ;;  %v7298_v4 = vor.u32 %v8549_v37, %v7295_v56  ;;  %v8684_v37 = vld [vmem:[#allocation3 + $0x50c] sm:$0xf] }
 0x48c   :  { %4939 = vmatmul.bf16.gmra.mxu3 %v7266_v20  ;;  %v7831_v56 = vld [vmem:[#allocation3 + $0x528] sm:$0xf0] }
 0x48e   :  { %v4771_v52 = vpop.f32.mrf.mxu2 }
 0x48f   :  { %v4553_v6 = vpop.f32.mrf.mxu3  ;;  %v11220_v34 = vadd.f32 %v4771_v52, %v10999_v57 }
 0x490   :  { %v11217_v10 = vadd.f32 %v4553_v6, %v11010_v14  ;;  %v4644_v58 = vpop.f32.mrf.mxu1  ;;  %v7550_v14 = vor.u32 %v8617_v40, %v7549_v50 }
 0x491   :  { %v11223_v32 = vadd.f32 %v4644_v58, %v13034_v48 }
 0x492   :  { %13033 = vst [vmem:[#allocation80_spill] sm:$0xff] %v11217_v10  ;;  %v11225_v16 = vpop.f32.mrf.mxu0 }
 0x496   :  { %v4773_v30 = vpop.f32.mrf.mxu2 }
 0x497   :  { %v4555_v41 = vpop.f32.mrf.mxu3  ;;  %v11231_v20 = vadd.f32 %v4773_v30, %v11016_v7  ;;  %v13038_v7 = vld [vmem:[#allocation38_spill] sm:$0xff]  ;;  %v8557_v30 = vld [vmem:[#allocation3 + $0x114] sm:$0xf] }
 0x498   :  { %v11228_v57 = vadd.f32 %v4555_v41, %v11022_v27  ;;  %v4647_v8 = vpop.f32.mrf.mxu1  ;;  %v7581_v41 = vld [vmem:[#allocation3 + $0x310] sm:$0xf] }
 0x499   :  { %v11234_v6 = vadd.f32 %v4647_v8, %v13036_v61 }
 0x49a   :  { %13035 = vst [vmem:[#allocation39_spill] sm:$0xff] %v11228_v57  ;;  %v11236_v52 = vpop.f32.mrf.mxu0 }
 0x49b   :  { %4686 = vmatmul.bf16.gmra.mxu1 %v7802_v55  ;;  %4815 = vmatmul.bf16.gmra.mxu2 %v7550_v14  ;;  %v8625_v55 = vld [vmem:[#allocation3 + $0x32c] sm:$0xf0]  ;;  %v7327_v14 = vld [vmem:[#allocation3 + $0x130] sm:$0xf0] }
 0x49c   :  { %4944 = vmatmul.bf16.gmra.mxu3 %v7298_v4  ;;  %v7834_v4 = vor.u32 %v8684_v37, %v7831_v56  ;;  %v13045_v56 = vld [vmem:[#allocation60_spill] sm:$0xff] }
 0x49e   :  { %v4776_v48 = vpop.f32.mrf.mxu2 }
 0x49f   :  { %v4558_v58 = vpop.f32.mrf.mxu3  ;;  %v11242_v27 = vadd.f32 %v4776_v48, %v11028_v3  ;;  %v13041_v48 = vld [vmem:[#allocation19_spill] sm:$0xff] }
 0x4a0   :  { %v11239_v46 = vadd.f32 %v4558_v58, %v11038_v44  ;;  %v4649_v1 = vpop.f32.mrf.mxu1  ;;  %v7582_v44 = vor.u32 %v8625_v55, %v7581_v41  ;;  %v7330_v58 = vor.u32 %v8557_v30, %v7327_v14  ;;  %v13047_v41 = vld [vmem:[#allocation21_spill] sm:$0xff]  ;;  %v13049_v30 = vld [vmem:[#allocation70_spill] sm:$0xff] }
 0x4a1   :  { %v11245_v50 = vadd.f32 %v4649_v1, %v13038_v7  ;;  %v13043_v7 = vld [vmem:[#allocation31_spill] sm:$0xff] }
 0x4a2   :  { %13037 = vst [vmem:[#allocation81_spill] sm:$0xff] %v11239_v46  ;;  %v11247_v40 = vpop.f32.mrf.mxu0 }
 0x4a3   :  { %13039 = vst [vmem:[#allocation76_spill] sm:$0xff] %v11245_v50 }
 0x4a6   :  { %v4778_v61 = vpop.f32.mrf.mxu2 }
 0x4a7   :  { %v4560_v8 = vpop.f32.mrf.mxu3  ;;  %v11253_v46 = vadd.f32 %v4778_v61, %v13041_v48  ;;  %v8692_v61 = vld [vmem:[#allocation3 + $0x54c] sm:$0xf] }
 0x4a8   :  { %v11250_v3 = vadd.f32 %v4560_v8, %v11050_v22  ;;  %v4652_v1 = vpop.f32.mrf.mxu1  ;;  %v7863_v48 = vld [vmem:[#allocation3 + $0x568] sm:$0xf0] }
 0x4a9   :  { %13042 = vst [vmem:[#allocation44_spill] sm:$0xff] %v11253_v46  ;;  %v11256_v57 = vadd.f32 %v4652_v1, %v13043_v7  ;;  %v7613_v1 = vld [vmem:[#allocation3 + $0x350] sm:$0xf] }
 0x4aa   :  { %13040 = vst [vmem:[#allocation43_spill] sm:$0xff] %v11250_v3  ;;  %v1826_v10 = vpop.f32.mrf.mxu0  ;;  %v8633_v7 = vld [vmem:[#allocation3 + $0x36c] sm:$0xf0] }
 0x4ab   :  { %13044 = vst [vmem:[#allocation47_spill] sm:$0xff] %v11256_v57  ;;  %4691 = vmatmul.bf16.gmra.mxu1 %v7834_v4  ;;  %4820 = vmatmul.bf16.gmra.mxu2 %v7582_v44  ;;  %v8565_v4 = vld [vmem:[#allocation3 + $0x154] sm:$0xf]  ;;  %v7614_v5 = vor.u32 %v8633_v7, %v7613_v1  ;;  %v13058_v1 = vld [vmem:[#allocation18_spill] sm:$0xff] }
 0x4ac   :  { %4949 = vmatmul.bf16.gmra.mxu3 %v7330_v58  ;;  %v7359_v44 = vld [vmem:[#allocation3 + $0x170] sm:$0xf0]  ;;  %v7866_v58 = vor.u32 %v8692_v61, %v7863_v48 }
 0x4ae   :  { %v4781_v37 = vpop.f32.mrf.mxu2 }
 0x4af   :  { %v4563_v23 = vpop.f32.mrf.mxu3  ;;  %v11262_v55 = vadd.f32 %v4781_v37, %v13047_v41  ;;  %v13053_v37 = vld [vmem:[#allocation59_spill] sm:$0xff] }
 0x4b0   :  { %v11259_v45 = vadd.f32 %v4563_v23, %v13045_v56  ;;  %v4654_v22 = vpop.f32.mrf.mxu1  ;;  %v7362_v23 = vor.u32 %v8565_v4, %v7359_v44  ;;  %v13051_v56 = vld [vmem:[#allocation17_spill] sm:$0xff]  ;;  %v13062_v44 = vld [vmem:[#allocation24_spill] sm:$0xff] }
 0x4b1   :  { %13048 = vst [vmem:[#allocation48_spill] sm:$0xff] %v11262_v55  ;;  %v11265_v14 = vadd.f32 %v4654_v22, %v13049_v30  ;;  %v13055_v30 = vld [vmem:[#allocation72_spill] sm:$0xff] }
 0x4b2   :  { %13046 = vst [vmem:[#allocation83_spill] sm:$0xff] %v11259_v45  ;;  %v1828_v8 = vpop.f32.mrf.mxu0 }
 0x4b3   :  { %13050 = vst [vmem:[#allocation46_spill] sm:$0xff] %v11265_v14 }
 0x4b6   :  { %v4783_v13 = vpop.f32.mrf.mxu2 }
 0x4b7   :  { %v4565_v3 = vpop.f32.mrf.mxu3  ;;  %v11271_v41 = vadd.f32 %v4783_v13, %v13053_v37  ;;  %v13064_v37 = vld [vmem:[#allocation42_spill] sm:$0xff] }
 0x4b8   :  { %v11268_v45 = vadd.f32 %v4565_v3, %v13051_v56  ;;  %v4657_v22 = vpop.f32.mrf.mxu1  ;;  %v13060_v3 = vld [vmem:[#allocation16_spill] sm:$0xff] }
 0x4b9   :  { %13054 = vst [vmem:[#allocation56_spill] sm:$0xff] %v11271_v41  ;;  %v11274_v49 = vadd.f32 %v4657_v22, %v13055_v30  ;;  %v1829_v22 = vadd.f32 %v1828_v8, %v13064_v37 }
 0x4ba   :  { %13052 = vst [vmem:[#allocation9_spill] sm:$0xff] %v11268_v45  ;;  %v1831_v54 = vpop.f32.mrf.mxu0 }
 0x4bb   :  { %13056 = vst [vmem:[#allocation51_spill] sm:$0xff] %v11274_v49  ;;  %4696 = vmatmul.bf16.gmra.mxu1 %v7866_v58  ;;  %4825 = vmatmul.bf16.gmra.mxu2 %v7614_v5  ;;  %v1832_v61 = vadd.f32 %v1831_v54, %v13057_v28  ;;  %v8700_v58 = vld [vmem:[#allocation3 + $0x58c] sm:$0xf]  ;;  %v7645_v54 = vld [vmem:[#allocation3 + $0x390] sm:$0xf]  ;;  %v1827_v49 = vadd.f32 %v1826_v10, %v13066_v15 }
 0x4bc   :  { %4954 = vmatmul.bf16.gmra.mxu3 %v7362_v23  ;;  %v13065_v23 = vld [vmem:[#allocation37_spill] sm:$0xff]  ;;  %v7895_v28 = vld [vmem:[#allocation3 + $0x5a8] sm:$0xf0] }
 0x4bd   :  { %v1962_v5 = vmul.f32 0.2, %v1832_v61  ;;  %v1960_v57 = vmul.f32 0.2, %v1827_v49  ;;  %v13069_v10 = vld [vmem:[#allocation15_spill] sm:$0xff] }
 0x4be   :  { %v4786_v63 = vpop.f32.mrf.mxu2 }
 0x4bf   :  { %v4568_v48 = vpop.f32.mrf.mxu3  ;;  %v11281_v4 = vadd.f32 %v4786_v63, %v13060_v3  ;;  %v13067_v3 = vld [vmem:[#allocation50_spill] sm:$0xff] }
 0x4c0   :  { %v11278_v7 = vadd.f32 %v4568_v48, %v13058_v1  ;;  %v4659_v13 = vpop.f32.mrf.mxu1  ;;  %v8641_v48 = vld [vmem:[#allocation3 + $0x3ac] sm:$0xf0]  ;;  %v8573_v1 = vld [vmem:[#allocation3 + $0x194] sm:$0xf] }
 0x4c1   :  { %13061 = vst [vmem:[#allocation6_spill] sm:$0xff] %v11281_v4  ;;  %v11284_v56 = vadd.f32 %v4659_v13, %v13062_v44  ;;  %v1824_v4 = vadd.f32 %v11247_v40, %v13067_v3  ;;  %v1961_v13 = vmul.f32 0.2, %v1829_v22  ;;  %v7898_v44 = vor.u32 %v8700_v58, %v7895_v28  ;;  %v13070_v3 = vld [vmem:[#allocation26_spill] sm:$0xff] }
 0x4c2   :  { %13059 = vst [vmem:[#allocation75_spill] sm:$0xff] %v11278_v7  ;;  %v1833_v30 = vpop.f32.mrf.mxu0  ;;  %v7391_v7 = vld [vmem:[#allocation3 + $0x1b0] sm:$0xf0]  ;;  %v7646_v14 = vor.u32 %v8641_v48, %v7645_v54  ;;  %v2088_v54 = vmax.f32 %v1827_v49, %v1960_v57  ;;  %v13074_v48 = vld [vmem:[#allocation54_spill] sm:$0xff] }
 0x4c3   :  { %13063 = vst [vmem:[#allocation7_spill] sm:$0xff] %v11284_v56  ;;  %v1834_v45 = vadd.f32 %v1833_v30, %v13065_v23  ;;  %v2090_v56 = vmax.f32 %v1832_v61, %v1962_v5  ;;  %v7394_v55 = vor.u32 %v8573_v1, %v7391_v7  ;;  %v13068_v30 = vld [vmem:[#allocation45_spill] sm:$0xff]  ;;  %v1959_v5 = vmul.f32 0.2, %v1824_v4  ;;  %v13075_v57 = vld [vmem:[#allocation62_spill] sm:$0xff] }
 0x4c4   :  { %v1822_v23 = vadd.f32 %v11236_v52, %v13068_v30  ;;  %v2089_v7 = vmax.f32 %v1829_v22, %v1961_v13  ;;  %v13072_v52 = vld [vmem:[#allocation53_spill] sm:$0xff] }
 0x4c5   :  { %v1963_v63 = vmul.f32 0.2, %v1834_v45 }
 0x4c6   :  { %v4788_v41 = vpop.f32.mrf.mxu2  ;;  %v1958_v28 = vmul.f32 0.2, %v1822_v23 }
 0x4c7   :  { %v2091_v8 = vmax.f32 %v1834_v45, %v1963_v63  ;;  %v4570_v37 = vpop.f32.mrf.mxu3  ;;  %v11297_v46 = vadd.f32 %v4788_v41, %v13069_v10  ;;  %v13071_v45 = vld [vmem:[#allocation49_spill] sm:$0xff]  ;;  %v13073_v41 = vld [vmem:[#allocation52_spill] sm:$0xff]  ;;  %v2087_v63 = vmax.f32 %v1824_v4, %v1959_v5 }
 0x4c8   :  { %v11294_v15 = vadd.f32 %v4570_v37, %v11106_v38  ;;  %v4662_v50 = vpop.f32.mrf.mxu1  ;;  %v1819_v61 = vadd.f32 %v11225_v16, %v13071_v45  ;;  %v1817_v38 = vadd.f32 %v11214_v60, %v13072_v52  ;;  %v2410_v16 = vpack.c.bf16 %v2089_v7, %v2088_v54  ;;  %v8649_v5 = vld [vmem:[#allocation3 + $0x3ec] sm:$0xf0]  ;;  %v8581_v7 = vld [vmem:[#allocation3 + $0x1d4] sm:$0xf] }
 0x4c9   :  { %v2411_v40 = vpack.c.bf16 %v2091_v8, %v2090_v56  ;;  %v11300_v58 = vadd.f32 %v4662_v50, %v13070_v3  ;;  %v1812_v56 = vadd.f32 %v11192_v21, %v13073_v41  ;;  %v1814_v50 = vadd.f32 %v11203_v26, %v13074_v48  ;;  %v7677_v3 = vld [vmem:[#allocation3 + $0x3d0] sm:$0xf]  ;;  %v7423_v52 = vld [vmem:[#allocation3 + $0x1f0] sm:$0xf0] }
 0x4ca   :  { %v1957_v1 = vmul.f32 0.2, %v1819_v61  ;;  %v1956_v13 = vmul.f32 0.2, %v1817_v38  ;;  %v1809_v21 = vadd.f32 %v11181_v0, %v13075_v57 }
 0x4cb   :  { %4701 = vmatmul.bf16.gmra.mxu1 %v7898_v44  ;;  %4830 = vmatmul.bf16.gmra.mxu2 %v7646_v14  ;;  %v2086_v14 = vmax.f32 %v1822_v23, %v1958_v28  ;;  %v13076_v44 = vld [vmem:[#allocation23_spill] sm:$0xff]  ;;  %v1954_v4 = vmul.f32 0.2, %v1812_v56  ;;  %v1955_v37 = vmul.f32 0.2, %v1814_v50  ;;  %v13078_v28 = vld [vmem:[#allocation61_spill] sm:$0xff] }
 0x4cc   :  { %4959 = vmatmul.bf16.gmra.mxu3 %v7394_v55  ;;  %5259 = vmatpush.bf16.msra.mxu2 %v2411_v40  ;;  %v2085_v30 = vmax.f32 %v1819_v61, %v1957_v1  ;;  %v8708_v40 = vld [vmem:[#allocation3 + $0x5cc] sm:$0xf]  ;;  %v1804_v0 = vadd.f32 %v11156_v36, %v13078_v28  ;;  %v1953_v54 = vmul.f32 0.2, %v1809_v21  ;;  %v13079_v61 = vld [vmem:[#allocation65_spill] sm:$0xff] }
 0x4cd   :  { %v2409_v10 = vpack.c.bf16 %v2087_v63, %v2086_v14  ;;  %v7927_v23 = vld [vmem:[#allocation3 + $0x5e8] sm:$0xf0]  ;;  %v2083_v41 = vmax.f32 %v1814_v50, %v1955_v37  ;;  %v1802_v1 = vadd.f32 %v11142_v11, %v13079_v61  ;;  %v7426_v14 = vor.u32 %v8581_v7, %v7423_v52  ;;  %v13080_v50 = vld [vmem:[#allocation8_spill] sm:$0xff]  ;;  %v13083_v28 = vld [vmem:[#allocation25_spill] sm:$0xff] }
 0x4ce   :  { %v4791_v22 = vpop.f32.mrf.mxu2  ;;  %v1951_v37 = vmul.f32 0.2, %v1804_v0  ;;  %v8657_v61 = vld [vmem:[#allocation3 + $0x42c] sm:$0xf0] }
 0x4cf   :  { %v4573_v8 = vpop.f32.mrf.mxu3  ;;  %v11314_v60 = vadd.f32 %v4791_v22, %v11112_v17  ;;  %v2084_v17 = vmax.f32 %v1817_v38, %v1956_v13  ;;  %v7678_v22 = vor.u32 %v8649_v5, %v7677_v3  ;;  %v2082_v38 = vmax.f32 %v1812_v56, %v1954_v4  ;;  %v13082_v56 = vld [vmem:[#allocation64_spill] sm:$0xff] }
 0x4d0   :  { %v11311_v55 = vadd.f32 %v4573_v8, %v11122_v59  ;;  %v4664_v49 = vpop.f32.mrf.mxu1  ;;  %5260 = vmatpush.bf16.msra.mxu2 %v2410_v16  ;;  %v13077_v59 = vld [vmem:[#allocation57_spill] sm:$0xff]  ;;  %v7930_v16 = vor.u32 %v8708_v40, %v7927_v23  ;;  %v1950_v4 = vmul.f32 0.2, %v1802_v1  ;;  %v2079_v23 = vmax.f32 %v1804_v0, %v1951_v37  ;;  %v7959_v0 = vld [vmem:[#allocation3 + $0x628] sm:$0xf0] }
 0x4d1   :  { %v11319_v26 = vadd.f32 %v4664_v49, %v13076_v44  ;;  %v1807_v45 = vadd.f32 %v11170_v62, %v13077_v59  ;;  %v2408_v48 = vpack.c.bf16 %v2085_v30, %v2084_v17  ;;  %v13081_v44 = vld [vmem:[#allocation66_spill] sm:$0xff]  ;;  %v2081_v30 = vmax.f32 %v1809_v21, %v1953_v54 }
 0x4d2   :  { %v1799_v11 = vadd.f32 %v11130_v18, %v13081_v44  ;;  %v2078_v7 = vmax.f32 %v1802_v1, %v1950_v4  ;;  %v8589_v1 = vld [vmem:[#allocation3 + $0x214] sm:$0xf]  ;;  %v13084_v44 = vld [vmem:[#allocation29_spill] sm:$0xff]  ;;  %v8724_v4 = vld [vmem:[#allocation3 + $0x64c] sm:$0xf] }
 0x4d3   :  { %v1952_v62 = vmul.f32 0.2, %v1807_v45 }
 0x4d4   :  { %5261 = vmatpush.bf16.msra.mxu2 %v2409_v10  ;;  %v2407_v10 = vpack.c.bf16 %v2083_v41, %v2082_v38  ;;  %v1949_v40 = vmul.f32 0.2, %v1799_v11  ;;  %v2405_v54 = vpack.c.bf16 %v2079_v23, %v2078_v7  ;;  %v8716_v41 = vld [vmem:[#allocation3 + $0x60c] sm:$0xf]  ;;  %v8665_v23 = vld [vmem:[#allocation3 + $0x46c] sm:$0xf0] }
 0x4d6   :  { %v4793_v8 = vpop.f32.mrf.mxu2 }
 0x4d7   :  { %v4575_v63 = vpop.f32.mrf.mxu3  ;;  %v11331_v49 = vadd.f32 %v4793_v8, %v11128_v19  ;;  %v2080_v19 = vmax.f32 %v1807_v45, %v1952_v62  ;;  %v2077_v45 = vmax.f32 %v1799_v11, %v1949_v40  ;;  %v7962_v8 = vor.u32 %v8716_v41, %v7959_v0  ;;  %v7741_v40 = vld [vmem:[#allocation3 + $0x450] sm:$0xf] }
 0x4d8   :  { %v11328_v13 = vadd.f32 %v4575_v63, %v11134_v9  ;;  %v4667_v36 = vpop.f32.mrf.mxu1  ;;  %5262 = vmatpush.bf16.msra.mxu2 %v2408_v48  ;;  %v1797_v9 = vadd.f32 %v11116_v53, %v13082_v56  ;;  %v7709_v48 = vld [vmem:[#allocation3 + $0x410] sm:$0xf]  ;;  %v7455_v63 = vld [vmem:[#allocation3 + $0x230] sm:$0xf0] }
 0x4d9   :  { %v11334_v57 = vadd.f32 %v4667_v36, %v13080_v50  ;;  %v2406_v3 = vpack.c.bf16 %v2081_v30, %v2080_v19  ;;  %v7458_v62 = vor.u32 %v8589_v1, %v7455_v63  ;;  %v7991_v19 = vld [vmem:[#allocation3 + $0x668] sm:$0xf0]  ;;  %v13087_v1 = vld [vmem:[#allocation69_spill] sm:$0xff] }
 0x4da   :  { %v1948_v5 = vmul.f32 0.2, %v1797_v9 }
 0x4db   :  { %4706 = vmatmul.bf16.gmra.mxu1 %v7930_v16  ;;  %4835 = vmatmul.bf16.gmra.mxu2 %v7678_v22 }
 0x4dc   :  { %4964 = vmatmul.bf16.gmra.mxu3 %v7426_v14  ;;  %5263 = vmatpush.bf16.msra.mxu2 %v2407_v10  ;;  %v2076_v16 = vmax.f32 %v1797_v9, %v1948_v5  ;;  %v7710_v14 = vor.u32 %v8657_v61, %v7709_v48  ;;  %v13085_v9 = vld [vmem:[#allocation32_spill] sm:$0xff] }
 0x4de   :  { %v4796_v17 = vpop.f32.mrf.mxu2 }
 0x4df   :  { %v4578_v59 = vpop.f32.mrf.mxu3  ;;  %v11344_v21 = vadd.f32 %v4796_v17, %v11140_v12  ;;  %v7994_v17 = vor.u32 %v8724_v4, %v7991_v19 }
 0x4e0   :  { %v11341_v18 = vadd.f32 %v4578_v59, %v11147_v51  ;;  %v4669_v52 = vpop.f32.mrf.mxu1  ;;  %5264 = vmatpush.bf16.msra.mxu2 %v2406_v3  ;;  %v2404_v51 = vpack.c.bf16 %v2077_v45, %v2076_v16  ;;  %v8597_v3 = vld [vmem:[#allocation3 + $0x254] sm:$0xf] }
 0x4e1   :  { %v11347_v53 = vadd.f32 %v4669_v52, %v13083_v28  ;;  %v7487_v59 = vld [vmem:[#allocation3 + $0x270] sm:$0xf0]  ;;  %v7742_v52 = vor.u32 %v8665_v23, %v7741_v40 }
 0x4e2   :  { %v7490_v28 = vor.u32 %v8597_v3, %v7487_v59  ;;  %v13089_v59 = vld [vmem:[#allocation63_spill] sm:$0xff] }
 0x4e4   :  { %5265 = vmatpush.bf16.msra.mxu2 %v2405_v54  ;;  %v13086_v54 = vld [vmem:[#allocation27_spill] sm:$0xff] }
 0x4e6   :  { %v4798_v12 = vpop.f32.mrf.mxu2 }
 0x4e7   :  { %v4580_v22 = vpop.f32.mrf.mxu3  ;;  %v11353_v36 = vadd.f32 %v4798_v12, %v11154_v2  ;;  %v8605_v12 = vld [vmem:[#allocation3 + $0x294] sm:$0xf] }
 0x4e8   :  { %v11350_v38 = vadd.f32 %v4580_v22, %v11161_v43  ;;  %v4672_v50 = vpop.f32.mrf.mxu1  ;;  %5266 = vmatpush.bf16.msra.mxu2 %v2404_v51  ;;  %v8023_v51 = vld [vmem:[#allocation3 + $0x6a8] sm:$0xf0]  ;;  %v8673_v22 = vld [vmem:[#allocation3 + $0x4ac] sm:$0xf0] }
 0x4e9   :  { %v11356_v11 = vadd.f32 %v4672_v50, %v13084_v44 }
 0x4eb   :  { %4711 = vmatmul.bf16.gmra.mxu1 %v7962_v8  ;;  %4840 = vmatmul.bf16.gmra.mxu2 %v7710_v14  ;;  %v7773_v8 = vld [vmem:[#allocation3 + $0x490] sm:$0xf]  ;;  %v7519_v14 = vld [vmem:[#allocation3 + $0x2b0] sm:$0xf0] }
 0x4ec   :  { %4969 = vmatmul.bf16.gmra.mxu3 %v7458_v62 }
 0x4ee   :  { %v4801_v37 = vpop.f32.mrf.mxu2 }
 0x4ef   :  { %v4930_v30 = vpop.f32.mrf.mxu3  ;;  %v11359_v10 = vadd.f32 %v4801_v37, %v11168_v39  ;;  %v7774_v37 = vor.u32 %v8673_v22, %v7773_v8 }
 0x4f0   :  { %v11362_v56 = vadd.f32 %v4930_v30, %v11176_v47  ;;  %v4674_v43 = vpop.f32.mrf.mxu1  ;;  %v7522_v30 = vor.u32 %v8605_v12, %v7519_v14 }
 0x4f1   :  { %v11365_v2 = vadd.f32 %v4674_v43, %v13085_v9  ;;  %v13088_v9 = vld [vmem:[#allocation67_spill] sm:$0xff] }
 0x4f6   :  { %v4803_v5 = vpop.f32.mrf.mxu2 }
 0x4f7   :  { %v4932_v7 = vpop.f32.mrf.mxu3  ;;  %v11368_v39 = vadd.f32 %v4803_v5, %v11179_v24  ;;  %v8055_v5 = vld [vmem:[#allocation3 + $0x6e8] sm:$0xf0] }
 0x4f8   :  { %v11371_v47 = vadd.f32 %v4932_v7, %v11187_v29  ;;  %v4677_v45 = vpop.f32.mrf.mxu1  ;;  %v8732_v29 = vld [vmem:[#allocation3 + $0x68c] sm:$0xf]  ;;  %v7805_v7 = vld [vmem:[#allocation3 + $0x4d0] sm:$0xf] }
 0x4f9   :  { %v11374_v41 = vadd.f32 %v4677_v45, %v13086_v54  ;;  %v8026_v62 = vor.u32 %v8732_v29, %v8023_v51  ;;  %v7551_v45 = vld [vmem:[#allocation3 + $0x2f0] sm:$0xf0] }
 0x4fa   :  { %v13090_v51 = vld [vmem:[#allocation68_spill] sm:$0xff] }
 0x4fb   :  { %4716 = vmatmul.bf16.gmra.mxu1 %v7994_v17  ;;  %4845 = vmatmul.bf16.gmra.mxu2 %v7742_v52  ;;  %v8681_v52 = vld [vmem:[#allocation3 + $0x4ec] sm:$0xf0] }
 0x4fc   :  { %4974 = vmatmul.bf16.gmra.mxu3 %v7490_v28  ;;  %v8613_v28 = vld [vmem:[#allocation3 + $0x2d4] sm:$0xf] }
 0x4fe   :  { %v4806_v0 = vpop.f32.mrf.mxu2 }
 0x4ff   :  { %v4935_v48 = vpop.f32.mrf.mxu3  ;;  %v11377_v16 = vadd.f32 %v4806_v0, %v11190_v35 }
 0x500   :  { %v11380_v61 = vadd.f32 %v4935_v48, %v11198_v33  ;;  %v4679_v24 = vpop.f32.mrf.mxu1 }
 0x501   :  { %v11383_v63 = vadd.f32 %v4679_v24, %v13087_v1  ;;  %v7806_v24 = vor.u32 %v8681_v52, %v7805_v7  ;;  %v7554_v1 = vor.u32 %v8613_v28, %v7551_v45  ;;  %v13094_v45 = vld [vmem:[#allocation20_spill] sm:$0xff] }
 0x506   :  { %v4808_v50 = vpop.f32.mrf.mxu2 }
 0x507   :  { %v4937_v44 = vpop.f32.mrf.mxu3  ;;  %v11386_v35 = vadd.f32 %v4808_v50, %v11201_v25  ;;  %v13091_v50 = vld [vmem:[#allocation58_spill] sm:$0xff] }
 0x508   :  { %v11389_v33 = vadd.f32 %v4937_v44, %v11209_v31  ;;  %v4682_v43 = vpop.f32.mrf.mxu1  ;;  %v8740_v31 = vld [vmem:[#allocation3 + $0x6cc] sm:$0xf] }
 0x509   :  { %v11392_v4 = vadd.f32 %v4682_v43, %v13088_v9  ;;  %v8058_v54 = vor.u32 %v8740_v31, %v8055_v5  ;;  %v8689_v43 = vld [vmem:[#allocation3 + $0x52c] sm:$0xf0]  ;;  %v8621_v9 = vld [vmem:[#allocation3 + $0x314] sm:$0xf] }
 0x50b   :  { %4721 = vmatmul.bf16.gmra.mxu1 %v8026_v62  ;;  %4850 = vmatmul.bf16.gmra.mxu2 %v7774_v37  ;;  %v8087_v37 = vld [vmem:[#allocation3 + $0x728] sm:$0xf0] }
 0x50c   :  { %4979 = vmatmul.bf16.gmra.mxu3 %v7522_v30  ;;  %v7837_v30 = vld [vmem:[#allocation3 + $0x510] sm:$0xf] }
 0x50d   :  { %v7838_v31 = vor.u32 %v8689_v43, %v7837_v30  ;;  %v8697_v30 = vld [vmem:[#allocation3 + $0x56c] sm:$0xf0]  ;;  %v8629_v43 = vld [vmem:[#allocation3 + $0x354] sm:$0xf] }
 0x50e   :  { %v4811_v19 = vpop.f32.mrf.mxu2 }
 0x50f   :  { %v4940_v40 = vpop.f32.mrf.mxu3  ;;  %v11395_v23 = vadd.f32 %v4811_v19, %v11212_v42  ;;  %v7583_v19 = vld [vmem:[#allocation3 + $0x330] sm:$0xf0] }
 0x510   :  { %v11398_v3 = vadd.f32 %v4940_v40, %v11220_v34  ;;  %v4684_v25 = vpop.f32.mrf.mxu1  ;;  %v7586_v5 = vor.u32 %v8621_v9, %v7583_v19  ;;  %v7615_v9 = vld [vmem:[#allocation3 + $0x370] sm:$0xf0] }
 0x511   :  { %v11401_v17 = vadd.f32 %v4684_v25, %v13089_v59 }
 0x516   :  { %v4813_v0 = vpop.f32.mrf.mxu2 }
 0x517   :  { %v4942_v48 = vpop.f32.mrf.mxu3  ;;  %v11404_v42 = vadd.f32 %v4813_v0, %v11223_v32 }
 0x518   :  { %v11407_v34 = vadd.f32 %v4942_v48, %v11231_v20  ;;  %v4687_v29 = vpop.f32.mrf.mxu1  ;;  %v8748_v20 = vld [vmem:[#allocation3 + $0x70c] sm:$0xf] }
 0x519   :  { %v11410_v8 = vadd.f32 %v4687_v29, %v13090_v51  ;;  %v8090_v40 = vor.u32 %v8748_v20, %v8087_v37  ;;  %v13096_v29 = vld [vmem:[#allocation48_spill] sm:$0xff]  ;;  %v8119_v20 = vld [vmem:[#allocation3 + $0x768] sm:$0xf0] }
 0x51a   :  { %v7869_v37 = vld [vmem:[#allocation3 + $0x550] sm:$0xf] }
 0x51b   :  { %4726 = vmatmul.bf16.gmra.mxu1 %v8058_v54  ;;  %4855 = vmatmul.bf16.gmra.mxu2 %v7806_v24  ;;  %v13095_v24 = vld [vmem:[#allocation47_spill] sm:$0xff] }
 0x51c   :  { %4984 = vmatmul.bf16.gmra.mxu3 %v7554_v1 }
 0x51e   :  { %v4816_v22 = vpop.f32.mrf.mxu2 }
 0x51f   :  { %v4945_v12 = vpop.f32.mrf.mxu3  ;;  %v11413_v14 = vadd.f32 %v4816_v22, %v11234_v6  ;;  %v13092_v6 = vld [vmem:[#allocation76_spill] sm:$0xff] }
 0x520   :  { %v11416_v62 = vadd.f32 %v4945_v12, %v11242_v27  ;;  %v4689_v32 = vpop.f32.mrf.mxu1  ;;  %v13093_v27 = vld [vmem:[#allocation44_spill] sm:$0xff]  ;;  %v13098_v12 = vld [vmem:[#allocation55_spill] sm:$0xff] }
 0x521   :  { %v11419_v44 = vadd.f32 %v4689_v32, %v13091_v50  ;;  %v8756_v50 = vld [vmem:[#allocation3 + $0x74c] sm:$0xf] }
 0x522   :  { %v8122_v19 = vor.u32 %v8756_v50, %v8119_v20  ;;  %v13104_v50 = vld [vmem:[#allocation6_spill] sm:$0xff] }
 0x526   :  { %v4818_v25 = vpop.f32.mrf.mxu2 }
 0x527   :  { %v4947_v59 = vpop.f32.mrf.mxu3  ;;  %v11422_v7 = vadd.f32 %v4818_v25, %v13092_v6 }
 0x528   :  { %v11425_v52 = vadd.f32 %v4947_v59, %v13093_v27  ;;  %v4692_v28 = vpop.f32.mrf.mxu1  ;;  %v7870_v59 = vor.u32 %v8697_v30, %v7869_v37  ;;  %v13100_v27 = vld [vmem:[#allocation56_spill] sm:$0xff]  ;;  %v13106_v30 = vld [vmem:[#allocation78_spill] sm:$0xff] }
 0x529   :  { %v11428_v54 = vadd.f32 %v4692_v28, %v13094_v45 }
 0x52b   :  { %4731 = vmatmul.bf16.gmra.mxu1 %v8090_v40  ;;  %4860 = vmatmul.bf16.gmra.mxu2 %v7838_v31  ;;  %v7618_v31 = vor.u32 %v8629_v43, %v7615_v9  ;;  %v8764_v9 = vld [vmem:[#allocation3 + $0x78c] sm:$0xf] }
 0x52c   :  { %4989 = vmatmul.bf16.gmra.mxu3 %v7586_v5  ;;  %v13099_v5 = vld [vmem:[#allocation46_spill] sm:$0xff] }
 0x52e   :  { %v4821_v0 = vpop.f32.mrf.mxu2 }
 0x52f   :  { %v4950_v48 = vpop.f32.mrf.mxu3  ;;  %v11431_v1 = vadd.f32 %v4821_v0, %v13095_v24  ;;  %v13102_v0 = vld [vmem:[#allocation13_spill] sm:$0xff] }
 0x530   :  { %v11434_v51 = vadd.f32 %v4950_v48, %v13096_v29  ;;  %v4694_v22 = vpop.f32.mrf.mxu1 }
 0x531   :  { %v11437_v32 = vadd.f32 %v4694_v22, %v13098_v12  ;;  %v13103_v22 = vld [vmem:[#allocation51_spill] sm:$0xff] }
 0x532   :  { %13097 = vst [vmem:[#allocation22_spill] sm:$0xff] %v11434_v51 }
 0x536   :  { %v4823_v40 = vpop.f32.mrf.mxu2 }
 0x537   :  { %v4952_v25 = vpop.f32.mrf.mxu3  ;;  %v11440_v6 = vadd.f32 %v4823_v40, %v13099_v5  ;;  %v8151_v40 = vld [vmem:[#allocation3 + $0x7a8] sm:$0xf0]  ;;  %v8705_v5 = vld [vmem:[#allocation3 + $0x5ac] sm:$0xf0] }
 0x538   :  { %v11443_v28 = vadd.f32 %v4952_v25, %v13100_v27  ;;  %v4697_v45 = vpop.f32.mrf.mxu1  ;;  %v7901_v25 = vld [vmem:[#allocation3 + $0x590] sm:$0xf]  ;;  %v8637_v27 = vld [vmem:[#allocation3 + $0x394] sm:$0xf] }
 0x539   :  { %v11446_v48 = vadd.f32 %v4697_v45, %v13102_v0  ;;  %v7902_v0 = vor.u32 %v8705_v5, %v7901_v25  ;;  %v13111_v5 = vld [vmem:[#allocation71_spill] sm:$0xff] }
 0x53a   :  { %13101 = vst [vmem:[#allocation77_spill] sm:$0xff] %v11443_v28 }
 0x53b   :  { %4736 = vmatmul.bf16.gmra.mxu1 %v8122_v19  ;;  %4865 = vmatmul.bf16.gmra.mxu2 %v7870_v59  ;;  %v7647_v19 = vld [vmem:[#allocation3 + $0x3b0] sm:$0xf0]  ;;  %v8154_v59 = vor.u32 %v8764_v9, %v8151_v40 }
 0x53c   :  { %4994 = vmatmul.bf16.gmra.mxu3 %v7618_v31  ;;  %v7650_v28 = vor.u32 %v8637_v27, %v7647_v19  ;;  %v8183_v19 = vld [vmem:[#allocation3 + $0x7e8] sm:$0xf0] }
 0x53e   :  { %v4826_v24 = vpop.f32.mrf.mxu2 }
 0x53f   :  { %v4955_v29 = vpop.f32.mrf.mxu3  ;;  %v11449_v12 = vadd.f32 %v4826_v24, %v13103_v22  ;;  %v13107_v24 = vld [vmem:[#allocation7_spill] sm:$0xff] }
 0x540   :  { %v11452_v20 = vadd.f32 %v4955_v29, %v13104_v50  ;;  %v4699_v37 = vpop.f32.mrf.mxu1 }
 0x541   :  { %v11455_v43 = vadd.f32 %v4699_v37, %v13106_v30  ;;  %v13109_v37 = vld [vmem:[#allocation33_spill] sm:$0xff] }
 0x542   :  { %13105 = vst [vmem:[#allocation12_spill] sm:$0xff] %v11452_v20 }
 0x546   :  { %v4828_v31 = vpop.f32.mrf.mxu2 }
 0x547   :  { %v4957_v45 = vpop.f32.mrf.mxu3  ;;  %v11458_v22 = vadd.f32 %v4828_v31, %v13107_v24  ;;  %v7933_v31 = vld [vmem:[#allocation3 + $0x5d0] sm:$0xf]  ;;  %v8645_v24 = vld [vmem:[#allocation3 + $0x3d4] sm:$0xf] }
 0x548   :  { %v11461_v29 = vadd.f32 %v4957_v45, %v11297_v46  ;;  %v4702_v50 = vpop.f32.mrf.mxu1  ;;  %v8772_v46 = vld [vmem:[#allocation3 + $0x7cc] sm:$0xf]  ;;  %v8713_v45 = vld [vmem:[#allocation3 + $0x5ec] sm:$0xf0] }
 0x549   :  { %v11464_v30 = vadd.f32 %v4702_v50, %v13109_v37  ;;  %v7934_v37 = vor.u32 %v8713_v45, %v7933_v31  ;;  %v13115_v31 = vld [vmem:[#allocation35_spill] sm:$0xff] }
 0x54a   :  { %13108 = vst [vmem:[#allocation10_spill] sm:$0xff] %v11461_v29 }
 0x54b   :  { %4741 = vmatmul.bf16.gmra.mxu1 %v8154_v59  ;;  %4870 = vmatmul.bf16.gmra.mxu2 %v7902_v0  ;;  %v7679_v59 = vld [vmem:[#allocation3 + $0x3f0] sm:$0xf0]  ;;  %v8186_v0 = vor.u32 %v8772_v46, %v8183_v19 }
 0x54c   :  { %4999 = vmatmul.bf16.gmra.mxu3 %v7650_v28  ;;  %v7682_v29 = vor.u32 %v8645_v24, %v7679_v59  ;;  %v7205_v24 = vld [vmem:[#allocation3 + $0x18] sm:$0xf] }
 0x54d   :  { %v8530_v59 = vld [vmem:[#allocation3 + $0x34] sm:$0xf0] }
 0x54e   :  { %v4831_v20 = vpop.f32.mrf.mxu2 }
 0x54f   :  { %v4960_v51 = vpop.f32.mrf.mxu3  ;;  %v11467_v9 = vadd.f32 %v4831_v20, %v11300_v58  ;;  %v13113_v20 = vld [vmem:[#allocation73_spill] sm:$0xff] }
 0x550   :  { %v11470_v40 = vadd.f32 %v4960_v51, %v11314_v60  ;;  %v4704_v25 = vpop.f32.mrf.mxu1 }
 0x551   :  { %v11473_v27 = vadd.f32 %v4704_v25, %v13111_v5 }
 0x552   :  { %13110 = vst [vmem:[#allocation11_spill] sm:$0xff] %v11470_v40 }
 0x556   :  { %v4833_v28 = vpop.f32.mrf.mxu2 }
 0x557   :  { %v4962_v50 = vpop.f32.mrf.mxu3  ;;  %v11476_v58 = vadd.f32 %v4833_v28, %v11319_v26  ;;  %v8721_v28 = vld [vmem:[#allocation3 + $0x62c] sm:$0xf0] }
 0x558   :  { %v11479_v60 = vadd.f32 %v4962_v50, %v11331_v49  ;;  %v4707_v51 = vpop.f32.mrf.mxu1  ;;  %v7965_v49 = vld [vmem:[#allocation3 + $0x610] sm:$0xf]  ;;  %v8653_v50 = vld [vmem:[#allocation3 + $0x414] sm:$0xf] }
 0x559   :  { %v11482_v25 = vadd.f32 %v4707_v51, %v13113_v20  ;;  %v7966_v20 = vor.u32 %v8721_v28, %v7965_v49 }
 0x55a   :  { %13112 = vst [vmem:[#allocation14_spill] sm:$0xff] %v11479_v60 }
 0x55b   :  { %4746 = vmatmul.bf16.gmra.mxu1 %v8186_v0  ;;  %4875 = vmatmul.bf16.gmra.mxu2 %v7934_v37  ;;  %v7711_v0 = vld [vmem:[#allocation3 + $0x430] sm:$0xf0]  ;;  %v7206_v37 = vor.u32 %v8530_v59, %v7205_v24 }
 0x55c   :  { %5004 = vmatmul.bf16.gmra.mxu3 %v7682_v29  ;;  %v7714_v60 = vor.u32 %v8653_v50, %v7711_v0  ;;  %v13119_v59 = vld [vmem:[#allocation28_spill] sm:$0xff]  ;;  %v7237_v50 = vld [vmem:[#allocation3 + $0x58] sm:$0xf] }
 0x55d   :  { %v8538_v0 = vld [vmem:[#allocation3 + $0x74] sm:$0xf0] }
 0x55e   :  { %v4836_v5 = vpop.f32.mrf.mxu2 }
 0x55f   :  { %v4965_v40 = vpop.f32.mrf.mxu3  ;;  %v11485_v46 = vadd.f32 %v4836_v5, %v11334_v57  ;;  %v13117_v5 = vld [vmem:[#allocation82_spill] sm:$0xff] }
 0x560   :  { %v11488_v19 = vadd.f32 %v4965_v40, %v11344_v21  ;;  %v4709_v26 = vpop.f32.mrf.mxu1 }
 0x561   :  { %v11491_v45 = vadd.f32 %v4709_v26, %v13115_v31 }
 0x562   :  { %13114 = vst [vmem:[#allocation79_spill] sm:$0xff] %v11488_v19 }
 0x566   :  { %v4838_v29 = vpop.f32.mrf.mxu2 }
 0x567   :  { %v4967_v51 = vpop.f32.mrf.mxu3  ;;  %v11494_v57 = vadd.f32 %v4838_v29, %v11347_v53  ;;  %v8729_v29 = vld [vmem:[#allocation3 + $0x66c] sm:$0xf0] }
 0x568   :  { %v11497_v21 = vadd.f32 %v4967_v51, %v11353_v36  ;;  %v4712_v40 = vpop.f32.mrf.mxu1  ;;  %v7997_v36 = vld [vmem:[#allocation3 + $0x650] sm:$0xf]  ;;  %v8661_v51 = vld [vmem:[#allocation3 + $0x454] sm:$0xf] }
 0x569   :  { %v11500_v26 = vadd.f32 %v4712_v40, %v13117_v5  ;;  %v7998_v5 = vor.u32 %v8729_v29, %v7997_v36 }
 0x56a   :  { %13116 = vst [vmem:[#allocation34_spill] sm:$0xff] %v11497_v21 }
 0x56b   :  { %5098 = vmatmul.bf16.vlgmr.msra.gmra.mxu1 %v7206_v37  ;;  %4880 = vmatmul.bf16.gmra.mxu2 %v7966_v20  ;;  %v7743_v37 = vld [vmem:[#allocation3 + $0x470] sm:$0xf0]  ;;  %v7238_v20 = vor.u32 %v8538_v0, %v7237_v50  ;;  %v13123_v0 = vld [vmem:[#allocation74_spill] sm:$0xff] }
 0x56c   :  { %5009 = vmatmul.bf16.gmra.mxu3 %v7714_v60  ;;  %v7746_v21 = vor.u32 %v8661_v51, %v7743_v37  ;;  %v7269_v51 = vld [vmem:[#allocation3 + $0x98] sm:$0xf] }
 0x56d   :  { %v8546_v37 = vld [vmem:[#allocation3 + $0xb4] sm:$0xf0] }
 0x56e   :  { %v4841_v31 = vpop.f32.mrf.mxu2 }
 0x56f   :  { %v4970_v19 = vpop.f32.mrf.mxu3  ;;  %v11503_v24 = vadd.f32 %v4841_v31, %v11356_v11  ;;  %v13121_v31 = vld [vmem:[#allocation30_spill] sm:$0xff] }
 0x570   :  { %v11506_v49 = vadd.f32 %v4970_v19, %v11359_v10  ;;  %v4714_v53 = vpop.f32.mrf.mxu1 }
 0x571   :  { %v11509_v28 = vadd.f32 %v4714_v53, %v13119_v59 }
 0x572   :  { %13118 = vst [vmem:[#allocation36_spill] sm:$0xff] %v11506_v49 }
 0x576   :  { %v4843_v60 = vpop.f32.mrf.mxu2 }
 0x577   :  { %v4972_v40 = vpop.f32.mrf.mxu3  ;;  %v11512_v11 = vadd.f32 %v4843_v60, %v11365_v2  ;;  %v8737_v60 = vld [vmem:[#allocation3 + $0x6ac] sm:$0xf0] }
 0x578   :  { %v11515_v10 = vadd.f32 %v4972_v40, %v11368_v39  ;;  %v4717_v19 = vpop.f32.mrf.mxu1  ;;  %v8029_v39 = vld [vmem:[#allocation3 + $0x690] sm:$0xf]  ;;  %v8669_v40 = vld [vmem:[#allocation3 + $0x494] sm:$0xf] }
 0x579   :  { %v11518_v53 = vadd.f32 %v4717_v19, %v13121_v31  ;;  %v8030_v31 = vor.u32 %v8737_v60, %v8029_v39 }
 0x57a   :  { %13120 = vst [vmem:[#allocation38_spill] sm:$0xff] %v11515_v10 }
 0x57b   :  { %5103 = vmatmul.bf16.gmra.mxu1 %v7238_v20  ;;  %4885 = vmatmul.bf16.gmra.mxu2 %v7998_v5  ;;  %v7775_v20 = vld [vmem:[#allocation3 + $0x4b0] sm:$0xf0]  ;;  %v7270_v5 = vor.u32 %v8546_v37, %v7269_v51  ;;  %v13127_v37 = vld [vmem:[#allocation39_spill] sm:$0xff] }
 0x57c   :  { %5014 = vmatmul.bf16.gmra.mxu3 %v7746_v21  ;;  %v7778_v10 = vor.u32 %v8669_v40, %v7775_v20  ;;  %v7301_v40 = vld [vmem:[#allocation3 + $0xd8] sm:$0xf] }
 0x57d   :  { %v8554_v20 = vld [vmem:[#allocation3 + $0xf4] sm:$0xf0] }
 0x57e   :  { %v4846_v59 = vpop.f32.mrf.mxu2 }
 0x57f   :  { %v4975_v49 = vpop.f32.mrf.mxu3  ;;  %v11521_v50 = vadd.f32 %v4846_v59, %v11374_v41  ;;  %v13125_v59 = vld [vmem:[#allocation80_spill] sm:$0xff] }
 0x580   :  { %v11524_v36 = vadd.f32 %v4975_v49, %v11377_v16  ;;  %v4719_v2 = vpop.f32.mrf.mxu1 }
 0x581   :  { %v11527_v29 = vadd.f32 %v4719_v2, %v13123_v0 }
 0x582   :  { %13122 = vst [vmem:[#allocation19_spill] sm:$0xff] %v11524_v36 }
 0x586   :  { %v4848_v21 = vpop.f32.mrf.mxu2 }
 0x587   :  { %v4977_v19 = vpop.f32.mrf.mxu3  ;;  %v11530_v41 = vadd.f32 %v4848_v21, %v11383_v63  ;;  %v8745_v21 = vld [vmem:[#allocation3 + $0x6ec] sm:$0xf0] }
 0x588   :  { %v11533_v16 = vadd.f32 %v4977_v19, %v11386_v35  ;;  %v4722_v49 = vpop.f32.mrf.mxu1  ;;  %v8061_v35 = vld [vmem:[#allocation3 + $0x6d0] sm:$0xf]  ;;  %v8677_v19 = vld [vmem:[#allocation3 + $0x4d4] sm:$0xf] }
 0x589   :  { %v11536_v2 = vadd.f32 %v4722_v49, %v13125_v59  ;;  %v8062_v59 = vor.u32 %v8745_v21, %v8061_v35 }
 0x58a   :  { %13124 = vst [vmem:[#allocation31_spill] sm:$0xff] %v11533_v16 }
 0x58b   :  { %5108 = vmatmul.bf16.gmra.mxu1 %v7270_v5  ;;  %4890 = vmatmul.bf16.gmra.mxu2 %v8030_v31  ;;  %v7807_v5 = vld [vmem:[#allocation3 + $0x4f0] sm:$0xf0]  ;;  %v7302_v31 = vor.u32 %v8554_v20, %v7301_v40  ;;  %v13131_v20 = vld [vmem:[#allocation43_spill] sm:$0xff] }
 0x58c   :  { %5019 = vmatmul.bf16.gmra.mxu3 %v7778_v10  ;;  %v7810_v16 = vor.u32 %v8677_v19, %v7807_v5  ;;  %v7333_v19 = vld [vmem:[#allocation3 + $0x118] sm:$0xf] }
 0x58d   :  { %v8562_v5 = vld [vmem:[#allocation3 + $0x134] sm:$0xf0] }
 0x58e   :  { %v4851_v0 = vpop.f32.mrf.mxu2 }
 0x58f   :  { %v4980_v36 = vpop.f32.mrf.mxu3  ;;  %v11539_v51 = vadd.f32 %v4851_v0, %v11392_v4  ;;  %v13129_v0 = vld [vmem:[#allocation81_spill] sm:$0xff] }
 0x590   :  { %v11542_v39 = vadd.f32 %v4980_v36, %v11395_v23  ;;  %v4724_v63 = vpop.f32.mrf.mxu1 }
 0x591   :  { %v11545_v60 = vadd.f32 %v4724_v63, %v13127_v37 }
 0x592   :  { %13126 = vst [vmem:[#allocation60_spill] sm:$0xff] %v11542_v39 }
 0x596   :  { %v4853_v10 = vpop.f32.mrf.mxu2 }
 0x597   :  { %v4982_v49 = vpop.f32.mrf.mxu3  ;;  %v11548_v4 = vadd.f32 %v4853_v10, %v11401_v17  ;;  %v8753_v10 = vld [vmem:[#allocation3 + $0x72c] sm:$0xf0] }
 0x598   :  { %v11551_v23 = vadd.f32 %v4982_v49, %v11404_v42  ;;  %v4727_v36 = vpop.f32.mrf.mxu1  ;;  %v8093_v42 = vld [vmem:[#allocation3 + $0x710] sm:$0xf]  ;;  %v8685_v49 = vld [vmem:[#allocation3 + $0x514] sm:$0xf] }
 0x599   :  { %v11554_v63 = vadd.f32 %v4727_v36, %v13129_v0  ;;  %v8094_v0 = vor.u32 %v8753_v10, %v8093_v42 }
 0x59a   :  { %13128 = vst [vmem:[#allocation21_spill] sm:$0xff] %v11551_v23 }
 0x59b   :  { %5113 = vmatmul.bf16.gmra.mxu1 %v7302_v31  ;;  %4895 = vmatmul.bf16.gmra.mxu2 %v8062_v59  ;;  %v7839_v31 = vld [vmem:[#allocation3 + $0x530] sm:$0xf0]  ;;  %v7334_v59 = vor.u32 %v8562_v5, %v7333_v19  ;;  %v13135_v5 = vld [vmem:[#allocation9_spill] sm:$0xff] }
 0x59c   :  { %5024 = vmatmul.bf16.gmra.mxu3 %v7810_v16  ;;  %v7842_v23 = vor.u32 %v8685_v49, %v7839_v31  ;;  %v7365_v49 = vld [vmem:[#allocation3 + $0x158] sm:$0xf] }
 0x59d   :  { %v8570_v31 = vld [vmem:[#allocation3 + $0x174] sm:$0xf0] }
 0x59e   :  { %v4856_v37 = vpop.f32.mrf.mxu2 }
 0x59f   :  { %v4985_v39 = vpop.f32.mrf.mxu3  ;;  %v11557_v40 = vadd.f32 %v4856_v37, %v11410_v8  ;;  %v13133_v37 = vld [vmem:[#allocation83_spill] sm:$0xff] }
 0x5a0   :  { %v11560_v35 = vadd.f32 %v4985_v39, %v11413_v14  ;;  %v4729_v17 = vpop.f32.mrf.mxu1 }
 0x5a1   :  { %v11563_v21 = vadd.f32 %v4729_v17, %v13131_v20 }
 0x5a2   :  { %13130 = vst [vmem:[#allocation70_spill] sm:$0xff] %v11560_v35 }
 0x5a6   :  { %v4858_v16 = vpop.f32.mrf.mxu2 }
 0x5a7   :  { %v4987_v36 = vpop.f32.mrf.mxu3  ;;  %v11566_v8 = vadd.f32 %v4858_v16, %v11419_v44  ;;  %v8761_v16 = vld [vmem:[#allocation3 + $0x76c] sm:$0xf0] }
 0x5a8   :  { %v11569_v14 = vadd.f32 %v4987_v36, %v11422_v7  ;;  %v4732_v39 = vpop.f32.mrf.mxu1  ;;  %v8125_v7 = vld [vmem:[#allocation3 + $0x750] sm:$0xf]  ;;  %v8693_v36 = vld [vmem:[#allocation3 + $0x554] sm:$0xf] }
 0x5a9   :  { %v11572_v17 = vadd.f32 %v4732_v39, %v13133_v37  ;;  %v8126_v37 = vor.u32 %v8761_v16, %v8125_v7  ;;  %v7397_v16 = vld [vmem:[#allocation3 + $0x198] sm:$0xf] }
 0x5aa   :  { %13132 = vst [vmem:[#allocation17_spill] sm:$0xff] %v11569_v14 }
 0x5ab   :  { %5118 = vmatmul.bf16.gmra.mxu1 %v7334_v59  ;;  %4900 = vmatmul.bf16.gmra.mxu2 %v8094_v0  ;;  %v7871_v59 = vld [vmem:[#allocation3 + $0x570] sm:$0xf0]  ;;  %v7366_v0 = vor.u32 %v8570_v31, %v7365_v49 }
 0x5ac   :  { %5029 = vmatmul.bf16.gmra.mxu3 %v7842_v23  ;;  %v7874_v14 = vor.u32 %v8693_v36, %v7871_v59  ;;  %v8578_v36 = vld [vmem:[#allocation3 + $0x1b4] sm:$0xf0]  ;;  %v8769_v59 = vld [vmem:[#allocation3 + $0x7ac] sm:$0xf0] }
 0x5ae   :  { %v4861_v20 = vpop.f32.mrf.mxu2 }
 0x5af   :  { %v4990_v35 = vpop.f32.mrf.mxu3  ;;  %v11575_v19 = vadd.f32 %v4861_v20, %v11428_v54  ;;  %v13137_v20 = vld [vmem:[#allocation75_spill] sm:$0xff] }
 0x5b0   :  { %v11578_v42 = vadd.f32 %v4990_v35, %v11431_v1  ;;  %v4734_v44 = vpop.f32.mrf.mxu1 }
 0x5b1   :  { %v11581_v10 = vadd.f32 %v4734_v44, %v13135_v5 }
 0x5b2   :  { %13134 = vst [vmem:[#allocation59_spill] sm:$0xff] %v11578_v42 }
 0x5b6   :  { %v4863_v23 = vpop.f32.mrf.mxu2 }
 0x5b7   :  { %v4992_v39 = vpop.f32.mrf.mxu3  ;;  %v11584_v54 = vadd.f32 %v4863_v23, %v11437_v32  ;;  %v8701_v23 = vld [vmem:[#allocation3 + $0x594] sm:$0xf] }
 0x5b8   :  { %v11587_v1 = vadd.f32 %v4992_v39, %v11440_v6  ;;  %v4737_v35 = vpop.f32.mrf.mxu1  ;;  %v8157_v6 = vld [vmem:[#allocation3 + $0x790] sm:$0xf]  ;;  %v7398_v39 = vor.u32 %v8578_v36, %v7397_v16 }
 0x5b9   :  { %13136 = vst [vmem:[#allocation72_spill] sm:$0xff] %v11584_v54  ;;  %v11590_v44 = vadd.f32 %v4737_v35, %v13137_v20  ;;  %v8158_v35 = vor.u32 %v8769_v59, %v8157_v6  ;;  %v7429_v59 = vld [vmem:[#allocation3 + $0x1d8] sm:$0xf] }
 0x5bb   :  { %5123 = vmatmul.bf16.gmra.mxu1 %v7366_v0  ;;  %4905 = vmatmul.bf16.gmra.mxu2 %v8126_v37  ;;  %v7903_v0 = vld [vmem:[#allocation3 + $0x5b0] sm:$0xf0] }
 0x5bc   :  { %5034 = vmatmul.bf16.gmra.mxu3 %v7874_v14  ;;  %v7906_v20 = vor.u32 %v8701_v23, %v7903_v0  ;;  %v8586_v23 = vld [vmem:[#allocation3 + $0x1f4] sm:$0xf0]  ;;  %v8709_v0 = vld [vmem:[#allocation3 + $0x5d4] sm:$0xf] }
 0x5be   :  { %v4866_v5 = vpop.f32.mrf.mxu2 }
 0x5bf   :  { %v4995_v42 = vpop.f32.mrf.mxu3  ;;  %v11593_v49 = vadd.f32 %v4866_v5, %v11446_v48 }
 0x5c0   :  { %v11596_v7 = vadd.f32 %v4995_v42, %v11449_v12  ;;  %v4739_v32 = vpop.f32.mrf.mxu1 }
 0x5c1   :  { %v11599_v31 = vadd.f32 %v4739_v32, %v11294_v15 }
 0x5c6   :  { %v4868_v14 = vpop.f32.mrf.mxu2 }
 0x5c7   :  { %v4997_v37 = vpop.f32.mrf.mxu3  ;;  %v11602_v48 = vadd.f32 %v4868_v14, %v11455_v43  ;;  %v7430_v14 = vor.u32 %v8586_v23, %v7429_v59 }
 0x5c8   :  { %v11605_v12 = vadd.f32 %v4997_v37, %v11458_v22  ;;  %v4742_v42 = vpop.f32.mrf.mxu1  ;;  %v8189_v22 = vld [vmem:[#allocation3 + $0x7d0] sm:$0xf] }
 0x5c9   :  { %13138 = vst [vmem:[#allocation41_spill] sm:$0xff] %v11602_v48  ;;  %v11608_v15 = vadd.f32 %v4742_v42, %v11311_v55  ;;  %v8777_v55 = vld [vmem:[#allocation3 + $0x7ec] sm:$0xf0] }
 0x5cb   :  { %5128 = vmatmul.bf16.gmra.mxu1 %v7398_v39  ;;  %4910 = vmatmul.bf16.gmra.mxu2 %v8158_v35  ;;  %v7935_v39 = vld [vmem:[#allocation3 + $0x5f0] sm:$0xf0] }
 0x5cc   :  { %5039 = vmatmul.bf16.gmra.mxu3 %v7906_v20  ;;  %v8190_v20 = vor.u32 %v8777_v55, %v8189_v22  ;;  %v7938_v42 = vor.u32 %v8709_v0, %v7935_v39  ;;  %v7461_v55 = vld [vmem:[#allocation3 + $0x218] sm:$0xf]  ;;  %v8526_v39 = vld [vmem:[#allocation3 + $0x1c] sm:$0xf] }
 0x5cd   :  { %v8594_v0 = vld [vmem:[#allocation3 + $0x234] sm:$0xf0] }
 0x5ce   :  { %v4871_v5 = vpop.f32.mrf.mxu2 }
 0x5cf   :  { %v5000_v32 = vpop.f32.mrf.mxu3  ;;  %v11611_v16 = vadd.f32 %v4871_v5, %v11464_v30 }
 0x5d0   :  { %v11614_v6 = vadd.f32 %v5000_v32, %v11467_v9  ;;  %v4744_v43 = vpop.f32.mrf.mxu1 }
 0x5d1   :  { %v11617_v36 = vadd.f32 %v4744_v43, %v11328_v13 }
 0x5d6   :  { %v4873_v37 = vpop.f32.mrf.mxu2 }
 0x5d7   :  { %v5002_v35 = vpop.f32.mrf.mxu3  ;;  %v11620_v30 = vadd.f32 %v4873_v37, %v11473_v27  ;;  %v7462_v37 = vor.u32 %v8594_v0, %v7461_v55 }
 0x5d8   :  { %v11623_v9 = vadd.f32 %v5002_v35, %v11476_v58  ;;  %v4747_v5 = vpop.f32.mrf.mxu1  ;;  %v8717_v58 = vld [vmem:[#allocation3 + $0x614] sm:$0xf] }
 0x5d9   :  { %13139 = vst [vmem:[#allocation18_spill] sm:$0xff] %v11620_v30  ;;  %v11626_v13 = vadd.f32 %v4747_v5, %v11341_v18  ;;  %v7967_v18 = vld [vmem:[#allocation3 + $0x630] sm:$0xf0] }
 0x5db   :  { %5133 = vmatmul.bf16.gmra.mxu1 %v7430_v14  ;;  %4915 = vmatmul.bf16.gmra.mxu2 %v8190_v20  ;;  %v7207_v14 = vld [vmem:[#allocation3 + $0x38] sm:$0xf0] }
 0x5dc   :  { %5044 = vmatmul.bf16.gmra.mxu3 %v7938_v42  ;;  %v7970_v42 = vor.u32 %v8717_v58, %v7967_v18  ;;  %v7210_v5 = vor.u32 %v8526_v39, %v7207_v14  ;;  %v7493_v18 = vld [vmem:[#allocation3 + $0x258] sm:$0xf]  ;;  %v8534_v14 = vld [vmem:[#allocation3 + $0x5c] sm:$0xf] }
 0x5dd   :  { %v8602_v39 = vld [vmem:[#allocation3 + $0x274] sm:$0xf0] }
 0x5de   :  { %v4876_v32 = vpop.f32.mrf.mxu2 }
 0x5df   :  { %v5005_v43 = vpop.f32.mrf.mxu3  ;;  %v11629_v59 = vadd.f32 %v4876_v32, %v11482_v25 }
 0x5e0   :  { %v11632_v22 = vadd.f32 %v5005_v43, %v11485_v46  ;;  %v4749_v27 = vpop.f32.mrf.mxu1 }
 0x5e1   :  { %v11635_v23 = vadd.f32 %v4749_v27, %v11350_v38 }
 0x5e6   :  { %v4878_v35 = vpop.f32.mrf.mxu2 }
 0x5e7   :  { %v5007_v20 = vpop.f32.mrf.mxu3  ;;  %v11638_v25 = vadd.f32 %v4878_v35, %v11491_v45  ;;  %v7494_v35 = vor.u32 %v8602_v39, %v7493_v18 }
 0x5e8   :  { %v11641_v46 = vadd.f32 %v5007_v20, %v11494_v57  ;;  %v5099_v32 = vpop.f32.mrf.mxu1  ;;  %v8725_v57 = vld [vmem:[#allocation3 + $0x654] sm:$0xf] }
 0x5e9   :  { %13140 = vst [vmem:[#allocation16_spill] sm:$0xff] %v11638_v25  ;;  %v11644_v38 = vadd.f32 %v5099_v32, %v11362_v56  ;;  %v7999_v56 = vld [vmem:[#allocation3 + $0x670] sm:$0xf0] }
 0x5eb   :  { %5138 = vmatmul.bf16.gmra.mxu1 %v7462_v37  ;;  %5267 = vmatmul.bf16.vlgmr.msra.gmra.mxu2 %v7210_v5  ;;  %v7239_v37 = vld [vmem:[#allocation3 + $0x78] sm:$0xf0]  ;;  %v8002_v5 = vor.u32 %v8725_v57, %v7999_v56  ;;  %v7525_v56 = vld [vmem:[#allocation3 + $0x298] sm:$0xf] }
 0x5ec   :  { %5049 = vmatmul.bf16.gmra.mxu3 %v7970_v42  ;;  %v7242_v32 = vor.u32 %v8534_v14, %v7239_v37  ;;  %v8610_v14 = vld [vmem:[#allocation3 + $0x2b4] sm:$0xf0]  ;;  %v8542_v37 = vld [vmem:[#allocation3 + $0x9c] sm:$0xf] }
 0x5ee   :  { %v4881_v43 = vpop.f32.mrf.mxu2 }
 0x5ef   :  { %v5010_v27 = vpop.f32.mrf.mxu3  ;;  %v11647_v55 = vadd.f32 %v4881_v43, %v11500_v26 }
 0x5f0   :  { %v11650_v58 = vadd.f32 %v5010_v27, %v11503_v24  ;;  %v5101_v45 = vpop.f32.mrf.mxu1 }
 0x5f1   :  { %v11653_v0 = vadd.f32 %v5101_v45, %v11371_v47 }
 0x5f6   :  { %v4883_v20 = vpop.f32.mrf.mxu2 }
 0x5f7   :  { %v5012_v42 = vpop.f32.mrf.mxu3  ;;  %v11656_v26 = vadd.f32 %v4883_v20, %v11509_v28  ;;  %v7526_v20 = vor.u32 %v8610_v14, %v7525_v56 }
 0x5f8   :  { %v11659_v24 = vadd.f32 %v5012_v42, %v11512_v11  ;;  %v5104_v43 = vpop.f32.mrf.mxu1  ;;  %v8733_v11 = vld [vmem:[#allocation3 + $0x694] sm:$0xf] }
 0x5f9   :  { %v11662_v47 = vadd.f32 %v5104_v43, %v11380_v61  ;;  %v8031_v61 = vld [vmem:[#allocation3 + $0x6b0] sm:$0xf0] }
 0x5fb   :  { %5143 = vmatmul.bf16.gmra.mxu1 %v7494_v35  ;;  %5272 = vmatmul.bf16.gmra.mxu2 %v7242_v32  ;;  %v7271_v35 = vld [vmem:[#allocation3 + $0xb8] sm:$0xf0]  ;;  %v8034_v32 = vor.u32 %v8733_v11, %v8031_v61  ;;  %v7557_v61 = vld [vmem:[#allocation3 + $0x2d8] sm:$0xf] }
 0x5fc   :  { %5054 = vmatmul.bf16.gmra.mxu3 %v8002_v5  ;;  %v7274_v43 = vor.u32 %v8542_v37, %v7271_v35  ;;  %v8618_v37 = vld [vmem:[#allocation3 + $0x2f4] sm:$0xf0]  ;;  %v8550_v35 = vld [vmem:[#allocation3 + $0xdc] sm:$0xf] }
 0x5fe   :  { %v4886_v27 = vpop.f32.mrf.mxu2 }
 0x5ff   :  { %v5015_v45 = vpop.f32.mrf.mxu3  ;;  %v11665_v18 = vadd.f32 %v4886_v27, %v11518_v53 }
 0x600   :  { %v11668_v57 = vadd.f32 %v5015_v45, %v11521_v50  ;;  %v5106_v28 = vpop.f32.mrf.mxu1 }
 0x601   :  { %v11671_v39 = vadd.f32 %v5106_v28, %v11389_v33 }
 0x606   :  { %v4888_v42 = vpop.f32.mrf.mxu2 }
 0x607   :  { %v5017_v5 = vpop.f32.mrf.mxu3  ;;  %v11674_v53 = vadd.f32 %v4888_v42, %v11527_v29  ;;  %v7558_v42 = vor.u32 %v8618_v37, %v7557_v61 }
 0x608   :  { %v11677_v50 = vadd.f32 %v5017_v5, %v11530_v41  ;;  %v5109_v27 = vpop.f32.mrf.mxu1  ;;  %v8741_v41 = vld [vmem:[#allocation3 + $0x6d4] sm:$0xf] }
 0x609   :  { %v11680_v33 = vadd.f32 %v5109_v27, %v11398_v3  ;;  %v8063_v3 = vld [vmem:[#allocation3 + $0x6f0] sm:$0xf0] }
 0x60b   :  { %5148 = vmatmul.bf16.gmra.mxu1 %v7526_v20  ;;  %5277 = vmatmul.bf16.gmra.mxu2 %v7274_v43  ;;  %v7303_v20 = vld [vmem:[#allocation3 + $0xf8] sm:$0xf0]  ;;  %v8066_v43 = vor.u32 %v8741_v41, %v8063_v3  ;;  %v7589_v3 = vld [vmem:[#allocation3 + $0x318] sm:$0xf] }
 0x60c   :  { %5059 = vmatmul.bf16.gmra.mxu3 %v8034_v32  ;;  %v7306_v27 = vor.u32 %v8550_v35, %v7303_v20  ;;  %v8626_v35 = vld [vmem:[#allocation3 + $0x334] sm:$0xf0]  ;;  %v8558_v20 = vld [vmem:[#allocation3 + $0x11c] sm:$0xf] }
 0x60e   :  { %v4891_v45 = vpop.f32.mrf.mxu2 }
 0x60f   :  { %v5020_v28 = vpop.f32.mrf.mxu3  ;;  %v11683_v56 = vadd.f32 %v4891_v45, %v11536_v2 }
 0x610   :  { %v11686_v11 = vadd.f32 %v5020_v28, %v11539_v51  ;;  %v5111_v29 = vpop.f32.mrf.mxu1 }
 0x611   :  { %v11689_v14 = vadd.f32 %v5111_v29, %v11407_v34 }
 0x616   :  { %v4893_v5 = vpop.f32.mrf.mxu2 }
 0x617   :  { %v5022_v32 = vpop.f32.mrf.mxu3  ;;  %v11692_v2 = vadd.f32 %v4893_v5, %v11545_v60  ;;  %v7590_v5 = vor.u32 %v8626_v35, %v7589_v3  ;;  %v13144_v35 = vld [vmem:[#allocation77_spill] sm:$0xff] }
 0x618   :  { %v11695_v51 = vadd.f32 %v5022_v32, %v11548_v4  ;;  %v5114_v45 = vpop.f32.mrf.mxu1  ;;  %v8749_v4 = vld [vmem:[#allocation3 + $0x714] sm:$0xf] }
 0x619   :  { %13141 = vst [vmem:[#allocation24_spill] sm:$0xff] %v11692_v2  ;;  %v11698_v34 = vadd.f32 %v5114_v45, %v11416_v62  ;;  %v8095_v62 = vld [vmem:[#allocation3 + $0x730] sm:$0xf0] }
 0x61b   :  { %5153 = vmatmul.bf16.gmra.mxu1 %v7558_v42  ;;  %5282 = vmatmul.bf16.gmra.mxu2 %v7306_v27  ;;  %v7335_v42 = vld [vmem:[#allocation3 + $0x138] sm:$0xf0]  ;;  %v8098_v27 = vor.u32 %v8749_v4, %v8095_v62 }
 0x61c   :  { %5064 = vmatmul.bf16.gmra.mxu3 %v8066_v43  ;;  %v7338_v45 = vor.u32 %v8558_v20, %v7335_v42  ;;  %v7621_v20 = vld [vmem:[#allocation3 + $0x358] sm:$0xf] }
 0x61d   :  { %v8634_v42 = vld [vmem:[#allocation3 + $0x374] sm:$0xf0] }
 0x61e   :  { %v4896_v28 = vpop.f32.mrf.mxu2 }
 0x61f   :  { %v5025_v29 = vpop.f32.mrf.mxu3  ;;  %v11701_v61 = vadd.f32 %v4896_v28, %v11554_v63 }
 0x620   :  { %v11704_v41 = vadd.f32 %v5025_v29, %v11557_v40  ;;  %v5116_v60 = vpop.f32.mrf.mxu1 }
 0x621   :  { %v11707_v37 = vadd.f32 %v5116_v60, %v11425_v52  ;;  %v13143_v52 = vld [vmem:[#allocation22_spill] sm:$0xff] }
 0x626   :  { %v4898_v32 = vpop.f32.mrf.mxu2 }
 0x627   :  { %v5027_v43 = vpop.f32.mrf.mxu3  ;;  %v11710_v63 = vadd.f32 %v4898_v32, %v11563_v21  ;;  %v8127_v32 = vld [vmem:[#allocation3 + $0x770] sm:$0xf0] }
 0x628   :  { %v11713_v40 = vadd.f32 %v5027_v43, %v11566_v8  ;;  %v5119_v28 = vpop.f32.mrf.mxu1  ;;  %v8757_v8 = vld [vmem:[#allocation3 + $0x754] sm:$0xf]  ;;  %v8566_v43 = vld [vmem:[#allocation3 + $0x15c] sm:$0xf] }
 0x629   :  { %13142 = vst [vmem:[#allocation42_spill] sm:$0xff] %v11710_v63  ;;  %v11716_v29 = vadd.f32 %v5119_v28, %v13143_v52  ;;  %v8130_v52 = vor.u32 %v8757_v8, %v8127_v32  ;;  %v8606_v63 = vld [vmem:[#allocation3 + $0x29c] sm:$0xf] }
 0x62b   :  { %5158 = vmatmul.bf16.gmra.mxu1 %v7590_v5  ;;  %5287 = vmatmul.bf16.gmra.mxu2 %v7338_v45  ;;  %v7367_v5 = vld [vmem:[#allocation3 + $0x178] sm:$0xf0] }
 0x62c   :  { %5069 = vmatmul.bf16.gmra.mxu3 %v8098_v27  ;;  %v7622_v27 = vor.u32 %v8634_v42, %v7621_v20  ;;  %v13149_v42 = vld [vmem:[#allocation10_spill] sm:$0xff] }
 0x62e   :  { %v4901_v60 = vpop.f32.mrf.mxu2 }
 0x62f   :  { %v5030_v25 = vpop.f32.mrf.mxu3  ;;  %v11719_v3 = vadd.f32 %v4901_v60, %v11572_v17  ;;  %v7370_v17 = vor.u32 %v8566_v43, %v7367_v5  ;;  %v7653_v43 = vld [vmem:[#allocation3 + $0x398] sm:$0xf] }
 0x630   :  { %v11722_v4 = vadd.f32 %v5030_v25, %v11575_v19  ;;  %v5121_v21 = vpop.f32.mrf.mxu1  ;;  %v13147_v25 = vld [vmem:[#allocation12_spill] sm:$0xff]  ;;  %v8642_v5 = vld [vmem:[#allocation3 + $0x3b4] sm:$0xf0] }
 0x631   :  { %v11725_v62 = vadd.f32 %v5121_v21, %v13144_v35 }
 0x636   :  { %v4903_v45 = vpop.f32.mrf.mxu2 }
 0x637   :  { %v11727_v28 = vpop.f32.mrf.mxu3  ;;  %v11730_v60 = vadd.f32 %v4903_v45, %v11581_v10  ;;  %v8765_v10 = vld [vmem:[#allocation3 + $0x794] sm:$0xf] }
 0x638   :  { %13145 = vst [vmem:[#allocation37_spill] sm:$0xff] %v11727_v28  ;;  %v5124_v19 = vpop.f32.mrf.mxu1  ;;  %v8159_v45 = vld [vmem:[#allocation3 + $0x7b0] sm:$0xf0] }
 0x639   :  { %13146 = vst [vmem:[#allocation40_spill] sm:$0xff] %v11730_v60  ;;  %v11733_v30 = vadd.f32 %v5124_v19, %v13147_v25  ;;  %v8574_v19 = vld [vmem:[#allocation3 + $0x19c] sm:$0xf]  ;;  %v8162_v60 = vor.u32 %v8765_v10, %v8159_v45 }
 0x63b   :  { %5163 = vmatmul.bf16.gmra.mxu1 %v7622_v27  ;;  %5292 = vmatmul.bf16.gmra.mxu2 %v7370_v17  ;;  %v7399_v27 = vld [vmem:[#allocation3 + $0x1b8] sm:$0xf0] }
 0x63c   :  { %5074 = vmatmul.bf16.gmra.mxu3 %v8130_v52  ;;  %v7654_v52 = vor.u32 %v8642_v5, %v7653_v43  ;;  %v13154_v5 = vld [vmem:[#allocation14_spill] sm:$0xff] }
 0x63e   :  { %v4906_v21 = vpop.f32.mrf.mxu2 }
 0x63f   :  { %v5035_v35 = vpop.f32.mrf.mxu3  ;;  %v11736_v48 = vadd.f32 %v4906_v21, %v11590_v44  ;;  %v7402_v44 = vor.u32 %v8574_v19, %v7399_v27  ;;  %v7685_v19 = vld [vmem:[#allocation3 + $0x3d8] sm:$0xf] }
 0x640   :  { %v11739_v20 = vadd.f32 %v5035_v35, %v11593_v49  ;;  %v5126_v8 = vpop.f32.mrf.mxu1  ;;  %v13152_v35 = vld [vmem:[#allocation11_spill] sm:$0xff]  ;;  %v8650_v27 = vld [vmem:[#allocation3 + $0x3f4] sm:$0xf0] }
 0x641   :  { %v11742_v32 = vadd.f32 %v5126_v8, %v13149_v42 }
 0x642   :  { %13148 = vst [vmem:[#allocation50_spill] sm:$0xff] %v11739_v20 }
 0x646   :  { %v4908_v17 = vpop.f32.mrf.mxu2 }
 0x647   :  { %v11744_v25 = vpop.f32.mrf.mxu3  ;;  %v11747_v21 = vadd.f32 %v4908_v17, %v11599_v31  ;;  %v8773_v31 = vld [vmem:[#allocation3 + $0x7d4] sm:$0xf] }
 0x648   :  { %13150 = vst [vmem:[#allocation45_spill] sm:$0xff] %v11744_v25  ;;  %v5129_v49 = vpop.f32.mrf.mxu1  ;;  %v8191_v17 = vld [vmem:[#allocation3 + $0x7f0] sm:$0xf0] }
 0x649   :  { %13151 = vst [vmem:[#allocation15_spill] sm:$0xff] %v11747_v21  ;;  %v11750_v20 = vadd.f32 %v5129_v49, %v13152_v35  ;;  %v8582_v49 = vld [vmem:[#allocation3 + $0x1dc] sm:$0xf]  ;;  %v8194_v21 = vor.u32 %v8773_v31, %v8191_v17 }
 0x64b   :  { %5168 = vmatmul.bf16.gmra.mxu1 %v7654_v52  ;;  %5297 = vmatmul.bf16.gmra.mxu2 %v7402_v44  ;;  %v7431_v52 = vld [vmem:[#allocation3 + $0x1f8] sm:$0xf0] }
 0x64c   :  { %5079 = vmatmul.bf16.gmra.mxu3 %v8162_v60  ;;  %v7686_v60 = vor.u32 %v8650_v27, %v7685_v19  ;;  %v13159_v27 = vld [vmem:[#allocation34_spill] sm:$0xff] }
 0x64e   :  { %v4911_v8 = vpop.f32.mrf.mxu2 }
 0x64f   :  { %v5040_v42 = vpop.f32.mrf.mxu3  ;;  %v11753_v28 = vadd.f32 %v4911_v8, %v11608_v15  ;;  %v7434_v15 = vor.u32 %v8582_v49, %v7431_v52  ;;  %v8658_v49 = vld [vmem:[#allocation3 + $0x434] sm:$0xf0]  ;;  %v8590_v52 = vld [vmem:[#allocation3 + $0x21c] sm:$0xf] }
 0x650   :  { %v11756_v43 = vadd.f32 %v5040_v42, %v11611_v16  ;;  %v5131_v10 = vpop.f32.mrf.mxu1  ;;  %v13157_v42 = vld [vmem:[#allocation79_spill] sm:$0xff] }
 0x651   :  { %v11759_v45 = vadd.f32 %v5131_v10, %v13154_v5 }
 0x652   :  { %13153 = vst [vmem:[#allocation26_spill] sm:$0xff] %v11756_v43 }
 0x656   :  { %v4913_v44 = vpop.f32.mrf.mxu2 }
 0x657   :  { %v11761_v35 = vpop.f32.mrf.mxu3  ;;  %v11764_v8 = vadd.f32 %v4913_v44, %v11617_v36  ;;  %v7717_v36 = vld [vmem:[#allocation3 + $0x418] sm:$0xf]  ;;  %v7463_v44 = vld [vmem:[#allocation3 + $0x238] sm:$0xf0] }
 0x658   :  { %13155 = vst [vmem:[#allocation49_spill] sm:$0xff] %v11761_v35  ;;  %v5134_v16 = vpop.f32.mrf.mxu1 }
 0x659   :  { %13156 = vst [vmem:[#allocation53_spill] sm:$0xff] %v11764_v8  ;;  %v11767_v43 = vadd.f32 %v5134_v16, %v13157_v42  ;;  %v7718_v16 = vor.u32 %v8658_v49, %v7717_v36  ;;  %v13163_v8 = vld [vmem:[#allocation38_spill] sm:$0xff] }
 0x65b   :  { %5173 = vmatmul.bf16.gmra.mxu1 %v7686_v60  ;;  %5302 = vmatmul.bf16.gmra.mxu2 %v7434_v15  ;;  %v7466_v15 = vor.u32 %v8590_v52, %v7463_v44  ;;  %v7749_v52 = vld [vmem:[#allocation3 + $0x458] sm:$0xf]  ;;  %v8598_v44 = vld [vmem:[#allocation3 + $0x25c] sm:$0xf] }
 0x65c   :  { %5084 = vmatmul.bf16.gmra.mxu3 %v8194_v21 }
 0x65e   :  { %v4916_v10 = vpop.f32.mrf.mxu2 }
 0x65f   :  { %v5045_v5 = vpop.f32.mrf.mxu3  ;;  %v11770_v25 = vadd.f32 %v4916_v10, %v11626_v13  ;;  %v13162_v10 = vld [vmem:[#allocation36_spill] sm:$0xff] }
 0x660   :  { %v11773_v19 = vadd.f32 %v5045_v5, %v11629_v59  ;;  %v5136_v31 = vpop.f32.mrf.mxu1 }
 0x661   :  { %v11776_v17 = vadd.f32 %v5136_v31, %v13159_v27 }
 0x662   :  { %13158 = vst [vmem:[#allocation52_spill] sm:$0xff] %v11773_v19 }
 0x666   :  { %v4918_v60 = vpop.f32.mrf.mxu2 }
 0x667   :  { %v11778_v21 = vpop.f32.mrf.mxu3  ;;  %v11781_v42 = vadd.f32 %v4918_v60, %v11635_v23  ;;  %v8666_v23 = vld [vmem:[#allocation3 + $0x474] sm:$0xf0]  ;;  %v7495_v60 = vld [vmem:[#allocation3 + $0x278] sm:$0xf0] }
 0x668   :  { %13160 = vst [vmem:[#allocation54_spill] sm:$0xff] %v11778_v21  ;;  %v5139_v13 = vpop.f32.mrf.mxu1 }
 0x669   :  { %13161 = vst [vmem:[#allocation62_spill] sm:$0xff] %v11781_v42  ;;  %v11784_v59 = vadd.f32 %v5139_v13, %v13162_v10  ;;  %v7750_v42 = vor.u32 %v8666_v23, %v7749_v52 }
 0x66b   :  { %5178 = vmatmul.bf16.gmra.mxu1 %v7718_v16  ;;  %5307 = vmatmul.bf16.gmra.mxu2 %v7466_v15  ;;  %v7498_v15 = vor.u32 %v8598_v44, %v7495_v60 }
 0x66e   :  { %v5268_v31 = vpop.f32.mrf.mxu2 }
 0x66f   :  { %v5050_v5 = vpop.f32.mrf.mxu3  ;;  %v5269_v36 = vadd.f32 %v5268_v31, %v11644_v38 }
 0x670   :  { %v11787_v27 = vadd.f32 %v5050_v5, %v11647_v55  ;;  %v5141_v49 = vpop.f32.mrf.mxu1  ;;  %v13164_v5 = vld [vmem:[#allocation19_spill] sm:$0xff] }
 0x671   :  { %v11791_v21 = vadd.f32 %v5141_v49, %v13163_v8  ;;  %v5428_v10 = vmul.f32 0.2, %v5269_v36 }
 0x673   :  { %v5492_v8 = vmax.f32 %v5269_v36, %v5428_v10 }
 0x676   :  { %v5270_v16 = vpop.f32.mrf.mxu2 }
 0x677   :  { %v11793_v13 = vpop.f32.mrf.mxu3  ;;  %v5271_v19 = vadd.f32 %v5270_v16, %v11653_v0  ;;  %v13165_v0 = vld [vmem:[#allocation31_spill] sm:$0xff] }
 0x678   :  { %v5144_v55 = vpop.f32.mrf.mxu1 }
 0x679   :  { %v11797_v35 = vadd.f32 %v5144_v55, %v13164_v5  ;;  %v5429_v38 = vmul.f32 0.2, %v5271_v19  ;;  %v7781_v55 = vld [vmem:[#allocation3 + $0x498] sm:$0xf] }
 0x67a   :  { %v8674_v5 = vld [vmem:[#allocation3 + $0x4b4] sm:$0xf0] }
 0x67b   :  { %5183 = vmatmul.bf16.gmra.mxu1 %v7750_v42  ;;  %5312 = vmatmul.bf16.gmra.mxu2 %v7498_v15  ;;  %v5493_v31 = vmax.f32 %v5271_v19, %v5429_v38  ;;  %v7527_v42 = vld [vmem:[#allocation3 + $0x2b8] sm:$0xf0]  ;;  %v7782_v15 = vor.u32 %v8674_v5, %v7781_v55 }
 0x67c   :  { %v7530_v10 = vor.u32 %v8606_v63, %v7527_v42 }
 0x67d   :  { %v11799_v49 = vpack.c.bf16 %v5493_v31, %v5492_v8 }
 0x67e   :  { %v5273_v52 = vpop.f32.mrf.mxu2 }
 0x67f   :  { %v5055_v54 = vpop.f32.mrf.mxu3  ;;  %v5274_v44 = vadd.f32 %v5273_v52, %v11662_v47 }
 0x680   :  { %v11802_v23 = vadd.f32 %v5055_v54, %v11665_v18  ;;  %v5146_v60 = vpop.f32.mrf.mxu1  ;;  %v13167_v18 = vld [vmem:[#allocation60_spill] sm:$0xff] }
 0x681   :  { %v11806_v16 = vadd.f32 %v5146_v60, %v13165_v0  ;;  %v5430_v38 = vmul.f32 0.2, %v5274_v44 }
 0x683   :  { %v5494_v52 = vmax.f32 %v5274_v44, %v5430_v38 }
 0x686   :  { %v5275_v19 = vpop.f32.mrf.mxu2 }
 0x687   :  { %v11808_v36 = vpop.f32.mrf.mxu3  ;;  %v5276_v8 = vadd.f32 %v5275_v19, %v11671_v39  ;;  %v13169_v39 = vld [vmem:[#allocation21_spill] sm:$0xff] }
 0x688   :  { %13166 = vst [vmem:[#allocation23_spill] sm:$0xff] %v11808_v36  ;;  %v5149_v54 = vpop.f32.mrf.mxu1  ;;  %v8614_v36 = vld [vmem:[#allocation3 + $0x2dc] sm:$0xf] }
 0x689   :  { %v11812_v31 = vadd.f32 %v5149_v54, %v13167_v18  ;;  %v5431_v47 = vmul.f32 0.2, %v5276_v8  ;;  %v7813_v54 = vld [vmem:[#allocation3 + $0x4d8] sm:$0xf] }
 0x68a   :  { %v8682_v18 = vld [vmem:[#allocation3 + $0x4f4] sm:$0xf0] }
 0x68b   :  { %5188 = vmatmul.bf16.gmra.mxu1 %v7782_v15  ;;  %5317 = vmatmul.bf16.gmra.mxu2 %v7530_v10  ;;  %v5495_v60 = vmax.f32 %v5276_v8, %v5431_v47  ;;  %v7559_v15 = vld [vmem:[#allocation3 + $0x2f8] sm:$0xf0]  ;;  %v7814_v10 = vor.u32 %v8682_v18, %v7813_v54 }
 0x68c   :  { %v7562_v8 = vor.u32 %v8614_v36, %v7559_v15 }
 0x68d   :  { %v11814_v0 = vpack.c.bf16 %v5495_v60, %v5494_v52 }
 0x68e   :  { %v5278_v55 = vpop.f32.mrf.mxu2 }
 0x68f   :  { %v5060_v2 = vpop.f32.mrf.mxu3  ;;  %v5279_v63 = vadd.f32 %v5278_v55, %v11680_v33 }
 0x690   :  { %v11817_v5 = vadd.f32 %v5060_v2, %v11683_v56  ;;  %v5151_v42 = vpop.f32.mrf.mxu1  ;;  %v13171_v2 = vld [vmem:[#allocation70_spill] sm:$0xff] }
 0x691   :  { %v11821_v19 = vadd.f32 %v5151_v42, %v13169_v39  ;;  %v5432_v47 = vmul.f32 0.2, %v5279_v63 }
 0x692   :  { %13168 = vst [vmem:[#allocation57_spill] sm:$0xff] %v11817_v5 }
 0x693   :  { %v5496_v55 = vmax.f32 %v5279_v63, %v5432_v47 }
 0x696   :  { %v5280_v38 = vpop.f32.mrf.mxu2 }
 0x697   :  { %v11823_v44 = vpop.f32.mrf.mxu3  ;;  %v5281_v52 = vadd.f32 %v5280_v38, %v11689_v14  ;;  %v13173_v14 = vld [vmem:[#allocation17_spill] sm:$0xff] }
 0x698   :  { %13170 = vst [vmem:[#allocation61_spill] sm:$0xff] %v11823_v44  ;;  %v5154_v56 = vpop.f32.mrf.mxu1  ;;  %v8622_v44 = vld [vmem:[#allocation3 + $0x31c] sm:$0xf] }
 0x699   :  { %v11827_v60 = vadd.f32 %v5154_v56, %v13171_v2  ;;  %v5433_v33 = vmul.f32 0.2, %v5281_v52  ;;  %v7845_v56 = vld [vmem:[#allocation3 + $0x518] sm:$0xf] }
 0x69a   :  { %v8690_v2 = vld [vmem:[#allocation3 + $0x534] sm:$0xf0] }
 0x69b   :  { %5193 = vmatmul.bf16.gmra.mxu1 %v7814_v10  ;;  %5322 = vmatmul.bf16.gmra.mxu2 %v7562_v8  ;;  %v5497_v42 = vmax.f32 %v5281_v52, %v5433_v33  ;;  %v7591_v10 = vld [vmem:[#allocation3 + $0x338] sm:$0xf0]  ;;  %v7846_v8 = vor.u32 %v8690_v2, %v7845_v56 }
 0x69c   :  { %v7594_v52 = vor.u32 %v8622_v44, %v7591_v10 }
 0x69d   :  { %v11829_v39 = vpack.c.bf16 %v5497_v42, %v5496_v55 }
 0x69e   :  { %v5283_v54 = vpop.f32.mrf.mxu2 }
 0x69f   :  { %v5065_v5 = vpop.f32.mrf.mxu3  ;;  %v5284_v36 = vadd.f32 %v5283_v54, %v11698_v34 }
 0x6a0   :  { %v11832_v18 = vadd.f32 %v5065_v5, %v11701_v61  ;;  %v5156_v15 = vpop.f32.mrf.mxu1  ;;  %v13174_v5 = vld [vmem:[#allocation59_spill] sm:$0xff] }
 0x6a1   :  { %v11836_v38 = vadd.f32 %v5156_v15, %v13173_v14  ;;  %v5434_v33 = vmul.f32 0.2, %v5284_v36 }
 0x6a2   :  { %13172 = vst [vmem:[#allocation65_spill] sm:$0xff] %v11832_v18 }
 0x6a3   :  { %v5498_v54 = vmax.f32 %v5284_v36, %v5434_v33 }
 0x6a6   :  { %v5285_v47 = vpop.f32.mrf.mxu2 }
 0x6a7   :  { %v11838_v63 = vpop.f32.mrf.mxu3  ;;  %v5286_v55 = vadd.f32 %v5285_v47, %v11707_v37  ;;  %v7877_v47 = vld [vmem:[#allocation3 + $0x558] sm:$0xf] }
 0x6a8   :  { %v5159_v61 = vpop.f32.mrf.mxu1 }
 0x6a9   :  { %v11842_v42 = vadd.f32 %v5159_v61, %v13174_v5  ;;  %v5435_v34 = vmul.f32 0.2, %v5286_v55  ;;  %v8698_v61 = vld [vmem:[#allocation3 + $0x574] sm:$0xf0]  ;;  %v8630_v5 = vld [vmem:[#allocation3 + $0x35c] sm:$0xf] }
 0x6ab   :  { %5198 = vmatmul.bf16.gmra.mxu1 %v7846_v8  ;;  %5327 = vmatmul.bf16.gmra.mxu2 %v7594_v52  ;;  %v5499_v15 = vmax.f32 %v5286_v55, %v5435_v34  ;;  %v7623_v8 = vld [vmem:[#allocation3 + $0x378] sm:$0xf0]  ;;  %v7878_v52 = vor.u32 %v8698_v61, %v7877_v47 }
 0x6ac   :  { %v7626_v55 = vor.u32 %v8630_v5, %v7623_v8 }
 0x6ad   :  { %v11844_v14 = vpack.c.bf16 %v5499_v15, %v5498_v54 }
 0x6ae   :  { %v5288_v56 = vpop.f32.mrf.mxu2 }
 0x6af   :  { %v5070_v18 = vpop.f32.mrf.mxu3  ;;  %v5289_v44 = vadd.f32 %v5288_v56, %v11716_v29 }
 0x6b0   :  { %v11847_v2 = vadd.f32 %v5070_v18, %v11719_v3  ;;  %v5161_v10 = vpop.f32.mrf.mxu1 }
 0x6b1   :  { %v11851_v37 = vadd.f32 %v5161_v10, %v11587_v1  ;;  %v5436_v34 = vmul.f32 0.2, %v5289_v44 }
 0x6b3   :  { %v5500_v1 = vmax.f32 %v5289_v44, %v5436_v34 }
 0x6b6   :  { %v5290_v33 = vpop.f32.mrf.mxu2 }
 0x6b7   :  { %v11853_v36 = vpop.f32.mrf.mxu3  ;;  %v5291_v54 = vadd.f32 %v5290_v33, %v11725_v62  ;;  %v7909_v62 = vld [vmem:[#allocation3 + $0x598] sm:$0xf] }
 0x6b8   :  { %v5164_v3 = vpop.f32.mrf.mxu1  ;;  %v8706_v33 = vld [vmem:[#allocation3 + $0x5b4] sm:$0xf0] }
 0x6b9   :  { %v11857_v18 = vadd.f32 %v5164_v3, %v11596_v7  ;;  %v5437_v29 = vmul.f32 0.2, %v5291_v54  ;;  %v8638_v3 = vld [vmem:[#allocation3 + $0x39c] sm:$0xf] }
 0x6bb   :  { %5203 = vmatmul.bf16.gmra.mxu1 %v7878_v52  ;;  %5332 = vmatmul.bf16.gmra.mxu2 %v7626_v55  ;;  %v5501_v15 = vmax.f32 %v5291_v54, %v5437_v29  ;;  %v7655_v52 = vld [vmem:[#allocation3 + $0x3b8] sm:$0xf0]  ;;  %v7910_v55 = vor.u32 %v8706_v33, %v7909_v62 }
 0x6bc   :  { %v7658_v54 = vor.u32 %v8638_v3, %v7655_v52 }
 0x6bd   :  { %v11859_v56 = vpack.c.bf16 %v5501_v15, %v5500_v1 }
 0x6be   :  { %v5293_v47 = vpop.f32.mrf.mxu2 }
 0x6bf   :  { %v5075_v10 = vpop.f32.mrf.mxu3  ;;  %v5294_v7 = vadd.f32 %v5293_v47, %v11733_v30 }
 0x6c0   :  { %v11862_v61 = vadd.f32 %v5075_v10, %v11736_v48  ;;  %v5166_v5 = vpop.f32.mrf.mxu1 }
 0x6c1   :  { %v11865_v8 = vadd.f32 %v5166_v5, %v11605_v12  ;;  %v5438_v29 = vmul.f32 0.2, %v5294_v7 }
 0x6c3   :  { %v5502_v10 = vmax.f32 %v5294_v7, %v5438_v29 }
 0x6c6   :  { %v5295_v34 = vpop.f32.mrf.mxu2 }
 0x6c7   :  { %v11868_v44 = vpop.f32.mrf.mxu3  ;;  %v5296_v1 = vadd.f32 %v5295_v34, %v11742_v32  ;;  %v7941_v32 = vld [vmem:[#allocation3 + $0x5d8] sm:$0xf] }
 0x6c8   :  { %v5169_v48 = vpop.f32.mrf.mxu1  ;;  %v8714_v34 = vld [vmem:[#allocation3 + $0x5f4] sm:$0xf0] }
 0x6c9   :  { %v11872_v15 = vadd.f32 %v5169_v48, %v11614_v6  ;;  %v5439_v12 = vmul.f32 0.2, %v5296_v1  ;;  %v8646_v48 = vld [vmem:[#allocation3 + $0x3dc] sm:$0xf] }
 0x6cb   :  { %5208 = vmatmul.bf16.gmra.mxu1 %v7910_v55  ;;  %5337 = vmatmul.bf16.gmra.mxu2 %v7658_v54  ;;  %v5503_v5 = vmax.f32 %v5296_v1, %v5439_v12  ;;  %v7687_v55 = vld [vmem:[#allocation3 + $0x3f8] sm:$0xf0]  ;;  %v7942_v54 = vor.u32 %v8714_v34, %v7941_v32 }
 0x6cc   :  { %v7690_v1 = vor.u32 %v8646_v48, %v7687_v55  ;;  %v8722_v55 = vld [vmem:[#allocation3 + $0x634] sm:$0xf0] }
 0x6cd   :  { %v11874_v30 = vpack.c.bf16 %v5503_v5, %v5502_v10 }
 0x6ce   :  { %v5298_v62 = vpop.f32.mrf.mxu2 }
 0x6cf   :  { %v5080_v47 = vpop.f32.mrf.mxu3  ;;  %v5299_v6 = vadd.f32 %v5298_v62, %v11750_v20 }
 0x6d0   :  { %v11877_v33 = vadd.f32 %v5080_v47, %v11753_v28  ;;  %v5171_v3 = vpop.f32.mrf.mxu1 }
 0x6d1   :  { %v11880_v52 = vadd.f32 %v5171_v3, %v11623_v9  ;;  %v5440_v12 = vmul.f32 0.2, %v5299_v6 }
 0x6d2   :  { %13175 = vst [vmem:[#allocation8_spill] sm:$0xff] %v11877_v33 }
 0x6d3   :  { %v5504_v47 = vmax.f32 %v5299_v6, %v5440_v12 }
 0x6d6   :  { %v5300_v29 = vpop.f32.mrf.mxu2 }
 0x6d7   :  { %v11883_v7 = vpop.f32.mrf.mxu3  ;;  %v5301_v10 = vadd.f32 %v5300_v29, %v11759_v45  ;;  %v7973_v45 = vld [vmem:[#allocation3 + $0x618] sm:$0xf]  ;;  %v8654_v29 = vld [vmem:[#allocation3 + $0x41c] sm:$0xf] }
 0x6d8   :  { %v5174_v28 = vpop.f32.mrf.mxu1 }
 0x6d9   :  { %v11887_v5 = vadd.f32 %v5174_v28, %v11632_v22  ;;  %v5441_v9 = vmul.f32 0.2, %v5301_v10  ;;  %v7719_v28 = vld [vmem:[#allocation3 + $0x438] sm:$0xf0] }
 0x6da   :  { %v7722_v6 = vor.u32 %v8654_v29, %v7719_v28  ;;  %v8662_v29 = vld [vmem:[#allocation3 + $0x45c] sm:$0xf] }
 0x6db   :  { %5213 = vmatmul.bf16.gmra.mxu1 %v7942_v54  ;;  %5342 = vmatmul.bf16.gmra.mxu2 %v7690_v1  ;;  %v5505_v3 = vmax.f32 %v5301_v10, %v5441_v9  ;;  %v7974_v54 = vor.u32 %v8722_v55, %v7973_v45  ;;  %v8005_v55 = vld [vmem:[#allocation3 + $0x658] sm:$0xf] }
 0x6dd   :  { %v5626_v20 = vpack.c.bf16 %v5505_v3, %v5504_v47 }
 0x6de   :  { %v5303_v33 = vpop.f32.mrf.mxu2 }
 0x6df   :  { %v5085_v62 = vpop.f32.mrf.mxu3  ;;  %v5304_v22 = vadd.f32 %v5303_v33, %v11767_v43 }
 0x6e0   :  { %v11890_v32 = vadd.f32 %v5085_v62, %v11770_v25  ;;  %v5176_v34 = vpop.f32.mrf.mxu1 }
 0x6e1   :  { %v11893_v48 = vadd.f32 %v5176_v34, %v11641_v46  ;;  %v5442_v12 = vmul.f32 0.2, %v5304_v22 }
 0x6e3   :  { %v5506_v46 = vmax.f32 %v5304_v22, %v5442_v12 }
 0x6e6   :  { %v5305_v1 = vpop.f32.mrf.mxu2 }
 0x6e7   :  { %v5306_v10 = vadd.f32 %v5305_v1, %v11776_v17  ;;  %v8730_v17 = vld [vmem:[#allocation3 + $0x674] sm:$0xf0] }
 0x6e8   :  { %v5179_v9 = vpop.f32.mrf.mxu1  ;;  %v8006_v28 = vor.u32 %v8730_v17, %v8005_v55 }
 0x6e9   :  { %v11898_v25 = vadd.f32 %v5179_v9, %v11650_v58  ;;  %v5443_v47 = vmul.f32 0.2, %v5306_v10  ;;  %v7751_v58 = vld [vmem:[#allocation3 + $0x478] sm:$0xf0] }
 0x6eb   :  { %5218 = vmatmul.bf16.gmra.mxu1 %v7974_v54  ;;  %5347 = vmatmul.bf16.gmra.mxu2 %v7722_v6  ;;  %v5507_v3 = vmax.f32 %v5306_v10, %v5443_v47  ;;  %v7754_v54 = vor.u32 %v8662_v29, %v7751_v58 }
 0x6ed   :  { %v5627_v62 = vpack.c.bf16 %v5507_v3, %v5506_v46  ;;  %v8738_v3 = vld [vmem:[#allocation3 + $0x6b4] sm:$0xf0] }
 0x6ee   :  { %v5308_v34 = vpop.f32.mrf.mxu2 }
 0x6ef   :  { %v5309_v43 = vadd.f32 %v5308_v34, %v11784_v59  ;;  %6164 = vmatpush.bf16.msra.mxu3 %v5627_v62  ;;  %v8670_v62 = vld [vmem:[#allocation3 + $0x49c] sm:$0xf] }
 0x6f0   :  { %v5181_v33 = vpop.f32.mrf.mxu1  ;;  %v7783_v34 = vld [vmem:[#allocation3 + $0x4b8] sm:$0xf0] }
 0x6f1   :  { %v11902_v45 = vadd.f32 %v5181_v33, %v11659_v24  ;;  %v5444_v6 = vmul.f32 0.2, %v5309_v43  ;;  %v7786_v33 = vor.u32 %v8670_v62, %v7783_v34 }
 0x6f3   :  { %6165 = vmatpush.bf16.msra.mxu3 %v5626_v20  ;;  %v5508_v24 = vmax.f32 %v5309_v43, %v5444_v6 }
 0x6f6   :  { %v5310_v1 = vpop.f32.mrf.mxu2 }
 0x6f7   :  { %v5311_v22 = vadd.f32 %v5310_v1, %v11791_v21  ;;  %6166 = vmatpush.bf16.msra.mxu3 %v11874_v30 }
 0x6f8   :  { %v5184_v12 = vpop.f32.mrf.mxu1 }
 0x6f9   :  { %v11907_v59 = vadd.f32 %v5184_v12, %v11668_v57  ;;  %v5445_v10 = vmul.f32 0.2, %v5311_v22  ;;  %v8037_v57 = vld [vmem:[#allocation3 + $0x698] sm:$0xf] }
 0x6fa   :  { %v8038_v43 = vor.u32 %v8738_v3, %v8037_v57  ;;  %v8746_v12 = vld [vmem:[#allocation3 + $0x6f4] sm:$0xf0]  ;;  %v8221_v3 = vld [vmem:[%s12779_s5 + $0x20] sm:$0xf] }
 0x6fb   :  { %5223 = vmatmul.bf16.gmra.mxu1 %v8006_v28  ;;  %5352 = vmatmul.bf16.gmra.mxu2 %v7754_v54  ;;  %v5509_v20 = vmax.f32 %v5311_v22, %v5445_v10  ;;  %v8678_v10 = vld [vmem:[#allocation3 + $0x4dc] sm:$0xf] }
 0x6fc   :  { %6167 = vmatpush.bf16.msra.mxu3 %v11859_v56 }
 0x6fd   :  { %v11910_v9 = vpack.c.bf16 %v5509_v20, %v5508_v24  ;;  %v7815_v24 = vld [vmem:[#allocation3 + $0x4f8] sm:$0xf0] }
 0x6fe   :  { %v5313_v47 = vpop.f32.mrf.mxu2 }
 0x6ff   :  { %v5314_v46 = vadd.f32 %v5313_v47, %v11797_v35 }
 0x700   :  { %6168 = vmatpush.bf16.msra.mxu3 %v11844_v14  ;;  %v5186_v21 = vpop.f32.mrf.mxu1  ;;  %v8781_v14 = vld [vmem:[%s12779_s5 + $0xc] sm:$0xf0] }
 0x701   :  { %v11915_v30 = vadd.f32 %v5186_v21, %v11677_v50  ;;  %v5446_v55 = vmul.f32 0.2, %v5314_v46  ;;  %v8205_v50 = vld [vmem:[%s12779_s5] sm:$0xf] }
 0x702   :  { %v8206_v58 = vor.u32 %v8781_v14, %v8205_v50  ;;  %v8101_v50 = vld [vmem:[#allocation3 + $0x718] sm:$0xf] }
 0x703   :  { %v5510_v28 = vmax.f32 %v5314_v46, %v5446_v55  ;;  %v7818_v46 = vor.u32 %v8678_v10, %v7815_v24  ;;  %v8754_v14 = vld [vmem:[#allocation3 + $0x734] sm:$0xf0] }
 0x704   :  { %6169 = vmatpush.bf16.msra.mxu3 %v11829_v39 }
 0x706   :  { %v5315_v56 = vpop.f32.mrf.mxu2 }
 0x707   :  { %v5316_v17 = vadd.f32 %v5315_v56, %v11806_v16 }
 0x708   :  { %6170 = vmatpush.bf16.msra.mxu3 %v11814_v0  ;;  %v5189_v35 = vpop.f32.mrf.mxu1 }
 0x709   :  { %v11927_v39 = vadd.f32 %v5189_v35, %v11686_v11  ;;  %v5447_v29 = vmul.f32 0.2, %v5316_v17  ;;  %v8069_v11 = vld [vmem:[#allocation3 + $0x6d8] sm:$0xf] }
 0x70a   :  { %v8070_v20 = vor.u32 %v8746_v12, %v8069_v11  ;;  %v8237_v11 = vld [vmem:[%s12779_s5 + $0x40] sm:$0xf] }
 0x70b   :  { %5228 = vmatmul.bf16.gmra.mxu1 %v8038_v43  ;;  %5357 = vmatmul.bf16.gmra.mxu2 %v7786_v33  ;;  %v5511_v16 = vmax.f32 %v5316_v17, %v5447_v29  ;;  %v7847_v29 = vld [vmem:[#allocation3 + $0x538] sm:$0xf0] }
 0x70c   :  { %6171 = vmatpush.bf16.msra.mxu3 %v11799_v49 }
 0x70d   :  { %v11930_v0 = vpack.c.bf16 %v5511_v16, %v5510_v28 }
 0x70e   :  { %v5318_v1 = vpop.f32.mrf.mxu2 }
 0x70f   :  { %6172 = vmatmul.bf16.vlgmr.msra.gmra.mxu3 %v8206_v58  ;;  %v5319_v54 = vadd.f32 %v5318_v1, %v11812_v31  ;;  %v8102_v58 = vor.u32 %v8754_v14, %v8101_v50 }
 0x710   :  { %v5191_v6 = vpop.f32.mrf.mxu1 }
 0x711   :  { %v11934_v22 = vadd.f32 %v5191_v6, %v11695_v51  ;;  %v5448_v21 = vmul.f32 0.2, %v5319_v54  ;;  %v8785_v51 = vld [vmem:[%s12779_s5 + $0x2c] sm:$0xf0] }
 0x712   :  { %v8222_v34 = vor.u32 %v8785_v51, %v8221_v3  ;;  %v8694_v3 = vld [vmem:[#allocation3 + $0x55c] sm:$0xf] }
 0x713   :  { %v5512_v43 = vmax.f32 %v5319_v54, %v5448_v21  ;;  %v7879_v51 = vld [vmem:[#allocation3 + $0x578] sm:$0xf0] }
 0x716   :  { %v5320_v47 = vpop.f32.mrf.mxu2 }
 0x717   :  { %v5321_v49 = vadd.f32 %v5320_v47, %v11821_v19 }
 0x718   :  { %v5194_v57 = vpop.f32.mrf.mxu1 }
 0x719   :  { %v11944_v31 = vadd.f32 %v5194_v57, %v11704_v41  ;;  %v5449_v62 = vmul.f32 0.2, %v5321_v49  ;;  %v8686_v41 = vld [vmem:[#allocation3 + $0x51c] sm:$0xf]  ;;  %v8762_v57 = vld [vmem:[#allocation3 + $0x774] sm:$0xf0] }
 0x71a   :  { %v7850_v16 = vor.u32 %v8686_v41, %v7847_v29 }
 0x71b   :  { %5233 = vmatmul.bf16.gmra.mxu1 %v8070_v20  ;;  %5362 = vmatmul.bf16.gmra.mxu2 %v7818_v46  ;;  %v5513_v56 = vmax.f32 %v5321_v49, %v5449_v62  ;;  %v8133_v49 = vld [vmem:[#allocation3 + $0x758] sm:$0xf] }
 0x71d   :  { %v11946_v33 = vpack.c.bf16 %v5513_v56, %v5512_v43 }
 0x71e   :  { %v5323_v19 = vpop.f32.mrf.mxu2 }
 0x71f   :  { %6177 = vmatmul.bf16.gmra.mxu3 %v8222_v34  ;;  %v5324_v55 = vadd.f32 %v5323_v19, %v11827_v60  ;;  %v7882_v34 = vor.u32 %v8694_v3, %v7879_v51 }
 0x720   :  { %v5196_v17 = vpop.f32.mrf.mxu1 }
 0x721   :  { %v11950_v35 = vadd.f32 %v5196_v17, %v11713_v40  ;;  %v5450_v1 = vmul.f32 0.2, %v5324_v55  ;;  %v8789_v40 = vld [vmem:[%s12779_s5 + $0x4c] sm:$0xf0] }
 0x722   :  { %v8238_v10 = vor.u32 %v8789_v40, %v8237_v11 }
 0x723   :  { %v5514_v24 = vmax.f32 %v5324_v55, %v5450_v1  ;;  %v8253_v55 = vld [vmem:[%s12779_s5 + $0x60] sm:$0xf] }
 0x726   :  { %v5325_v28 = vpop.f32.mrf.mxu2 }
 0x727   :  { %v5326_v54 = vadd.f32 %v5325_v28, %v11836_v38  ;;  %v8165_v28 = vld [vmem:[#allocation3 + $0x798] sm:$0xf] }
 0x728   :  { %v5199_v6 = vpop.f32.mrf.mxu1 }
 0x729   :  { %v11960_v60 = vadd.f32 %v5199_v6, %v11722_v4  ;;  %v5451_v12 = vmul.f32 0.2, %v5326_v54  ;;  %v8134_v4 = vor.u32 %v8762_v57, %v8133_v49  ;;  %v7911_v6 = vld [vmem:[#allocation3 + $0x5b8] sm:$0xf0] }
 0x72b   :  { %5238 = vmatmul.bf16.gmra.mxu1 %v8102_v58  ;;  %5367 = vmatmul.bf16.gmra.mxu2 %v7850_v16  ;;  %v5515_v20 = vmax.f32 %v5326_v54, %v5451_v12  ;;  %v8770_v16 = vld [vmem:[#allocation3 + $0x7b4] sm:$0xf0]  ;;  %v8702_v54 = vld [vmem:[#allocation3 + $0x59c] sm:$0xf] }
 0x72c   :  { %v8166_v11 = vor.u32 %v8770_v16, %v8165_v28  ;;  %v7914_v12 = vor.u32 %v8702_v54, %v7911_v6  ;;  %v8285_v28 = vld [vmem:[%s12779_s5 + $0xa0] sm:$0xf]  ;;  %v8801_v16 = vld [vmem:[%s12779_s5 + $0xac] sm:$0xf0] }
 0x72d   :  { %v11962_v47 = vpack.c.bf16 %v5515_v20, %v5514_v24 }
 0x72e   :  { %v5328_v38 = vpop.f32.mrf.mxu2 }
 0x72f   :  { %6182 = vmatmul.bf16.gmra.mxu3 %v8238_v10  ;;  %v5329_v46 = vadd.f32 %v5328_v38, %v11842_v42  ;;  %v8793_v42 = vld [vmem:[%s12779_s5 + $0x6c] sm:$0xf0]  ;;  %v8269_v38 = vld [vmem:[%s12779_s5 + $0x80] sm:$0xf] }
 0x730   :  { %v11965_v21 = vpop.f32.mrf.mxu1  ;;  %v8254_v50 = vor.u32 %v8793_v42, %v8253_v55  ;;  %v7943_v55 = vld [vmem:[#allocation3 + $0x5f8] sm:$0xf0] }
 0x731   :  { %v5452_v43 = vmul.f32 0.2, %v5329_v46 }
 0x733   :  { %v5516_v14 = vmax.f32 %v5329_v46, %v5452_v43  ;;  %v8797_v46 = vld [vmem:[%s12779_s5 + $0x8c] sm:$0xf0] }
 0x736   :  { %v5330_v62 = vpop.f32.mrf.mxu2 }
 0x737   :  { %v5331_v56 = vadd.f32 %v5330_v62, %v11851_v37  ;;  %v8197_v62 = vld [vmem:[#allocation3 + $0x7d8] sm:$0xf] }
 0x738   :  { %v11968_v19 = vpop.f32.mrf.mxu1 }
 0x739   :  { %v5453_v17 = vmul.f32 0.2, %v5331_v56 }
 0x73b   :  { %5243 = vmatmul.bf16.gmra.mxu1 %v8134_v4  ;;  %5372 = vmatmul.bf16.gmra.mxu2 %v7882_v34  ;;  %v5517_v41 = vmax.f32 %v5331_v56, %v5453_v17  ;;  %v8778_v34 = vld [vmem:[#allocation3 + $0x7f4] sm:$0xf0]  ;;  %v8710_v56 = vld [vmem:[#allocation3 + $0x5dc] sm:$0xf] }
 0x73c   :  { %v8198_v42 = vor.u32 %v8778_v34, %v8197_v62 }
 0x73d   :  { %v11976_v29 = vpack.c.bf16 %v5517_v41, %v5516_v14 }
 0x73e   :  { %v5333_v58 = vpop.f32.mrf.mxu2 }
 0x73f   :  { %6187 = vmatmul.bf16.gmra.mxu3 %v8254_v50  ;;  %v5334_v1 = vadd.f32 %v5333_v58, %v11857_v18  ;;  %v8270_v18 = vor.u32 %v8797_v46, %v8269_v38  ;;  %v7946_v50 = vor.u32 %v8710_v56, %v7943_v55 }
 0x740   :  { %v11978_v37 = vpop.f32.mrf.mxu1 }
 0x741   :  { %v5454_v10 = vmul.f32 0.2, %v5334_v1 }
 0x743   :  { %v5518_v57 = vmax.f32 %v5334_v1, %v5454_v10  ;;  %v8718_v10 = vld [vmem:[#allocation3 + $0x61c] sm:$0xf] }
 0x746   :  { %v5335_v40 = vpop.f32.mrf.mxu2 }
 0x747   :  { %v5336_v24 = vadd.f32 %v5335_v40, %v11865_v8 }
 0x748   :  { %v11982_v20 = vpop.f32.mrf.mxu1 }
 0x749   :  { %v5455_v49 = vmul.f32 0.2, %v5336_v24 }
 0x74b   :  { %5248 = vmatmul.bf16.gmra.mxu1 %v8166_v11  ;;  %5377 = vmatmul.bf16.gmra.mxu2 %v7914_v12  ;;  %v5519_v3 = vmax.f32 %v5336_v24, %v5455_v49  ;;  %v7975_v24 = vld [vmem:[#allocation3 + $0x638] sm:$0xf0] }
 0x74c   :  { %v7978_v46 = vor.u32 %v8718_v10, %v7975_v24 }
 0x74d   :  { %v5633_v51 = vpack.c.bf16 %v5519_v3, %v5518_v57  ;;  %v8301_v3 = vld [vmem:[%s12779_s5 + $0xc0] sm:$0xf] }
 0x74e   :  { %v5338_v4 = vpop.f32.mrf.mxu2 }
 0x74f   :  { %6192 = vmatmul.bf16.gmra.mxu3 %v8270_v18  ;;  %v5339_v43 = vadd.f32 %v5338_v4, %v11872_v15  ;;  %v8286_v15 = vor.u32 %v8801_v16, %v8285_v28  ;;  %v8805_v4 = vld [vmem:[%s12779_s5 + $0xcc] sm:$0xf0] }
 0x750   :  { %v11990_v8 = vpop.f32.mrf.mxu1  ;;  %v8302_v34 = vor.u32 %v8805_v4, %v8301_v3  ;;  %v8779_v4 = vld [vmem:[%s12779_s5 + $0x4] sm:$0xf] }
 0x751   :  { %v5456_v14 = vmul.f32 0.2, %v5339_v43 }
 0x753   :  { %v5520_v54 = vmax.f32 %v5339_v43, %v5456_v14 }
 0x756   :  { %v5340_v17 = vpop.f32.mrf.mxu2 }
 0x757   :  { %v5341_v41 = vadd.f32 %v5340_v17, %v11880_v52 }
 0x758   :  { %v11994_v58 = vpop.f32.mrf.mxu1 }
 0x759   :  { %v5457_v1 = vmul.f32 0.2, %v5341_v41 }
 0x75b   :  { %5253 = vmatmul.bf16.gmra.mxu1 %v8198_v42  ;;  %5382 = vmatmul.bf16.gmra.mxu2 %v7946_v50  ;;  %v5521_v6 = vmax.f32 %v5341_v41, %v5457_v1  ;;  %v8007_v41 = vld [vmem:[#allocation3 + $0x678] sm:$0xf0] }
 0x75d   :  { %v5634_v11 = vpack.c.bf16 %v5521_v6, %v5520_v54 }
 0x75e   :  { %v5343_v40 = vpop.f32.mrf.mxu2 }
 0x75f   :  { %6197 = vmatmul.bf16.gmra.mxu3 %v8286_v15  ;;  %v5344_v12 = vadd.f32 %v5343_v40, %v11887_v5 }
 0x760   :  { %v12002_v52 = vpop.f32.mrf.mxu1 }
 0x761   :  { %v5458_v49 = vmul.f32 0.2, %v5344_v12 }
 0x763   :  { %v5522_v43 = vmax.f32 %v5344_v12, %v5458_v49  ;;  %v8039_v49 = vld [vmem:[#allocation3 + $0x6b8] sm:$0xf0] }
 0x766   :  { %v5345_v38 = vpop.f32.mrf.mxu2 }
 0x767   :  { %v5346_v18 = vadd.f32 %v5345_v38, %v11893_v48  ;;  %v5053_v48 = vadd.f32 %v11793_v13, %v11656_v26  ;;  %v8317_v13 = vld [vmem:[%s12779_s5 + $0xe0] sm:$0xf] }
 0x768   :  { %v5219_v57 = vpop.f32.mrf.mxu1 }
 0x769   :  { %v12013_v62 = vadd.f32 %v5219_v57, %v11787_v27  ;;  %v5459_v5 = vmul.f32 0.2, %v5346_v18  ;;  %v8726_v27 = vld [vmem:[#allocation3 + $0x65c] sm:$0xf] }
 0x76a   :  { %v8010_v16 = vor.u32 %v8726_v27, %v8007_v41  ;;  %v13179_v27 = vld [vmem:[#allocation61_spill] sm:$0xff] }
 0x76b   :  { %5387 = vmatmul.bf16.gmra.mxu2 %v7978_v46  ;;  %v5523_v56 = vmax.f32 %v5346_v18, %v5459_v5  ;;  %v8207_v5 = vld [vmem:[%s12779_s5 + $0x10] sm:$0xf0] }
 0x76d   :  { %v5635_v55 = vpack.c.bf16 %v5523_v56, %v5522_v43  ;;  %v12061_v56 = vpop.f32.mrf.mxu3 }
 0x76e   :  { %v5348_v42 = vpop.f32.mrf.mxu2 }
 0x76f   :  { %6202 = vmatmul.bf16.gmra.mxu3 %v8302_v34  ;;  %v5349_v17 = vadd.f32 %v5348_v42, %v11898_v25  ;;  %6253 = vmatpush.bf16.msrb.mxu0 %v5635_v55  ;;  %v8809_v25 = vld [vmem:[%s12779_s5 + $0xec] sm:$0xf0]  ;;  %v13177_v34 = vld [vmem:[#allocation57_spill] sm:$0xff] }
 0x770   :  { %8843 = vmatpush.bf16.msrb.mxu1 %v5635_v55  ;;  %v5221_v50 = vpop.f32.mrf.mxu1 }
 0x771   :  { %v12018_v14 = vadd.f32 %v5221_v50, %v5053_v48  ;;  %v5460_v1 = vmul.f32 0.2, %v5349_v17  ;;  %v8210_v48 = vor.u32 %v8779_v4, %v8207_v5  ;;  %v13178_v50 = vld [vmem:[#allocation24_spill] sm:$0xff] }
 0x772   :  { %v5063_v41 = vadd.f32 %v13179_v27, %v13178_v50  ;;  %v8365_v50 = vld [vmem:[%s12779_s5 + $0x140] sm:$0xf] }
 0x773   :  { %6254 = vmatpush.bf16.msrb.mxu0 %v5634_v11  ;;  %v5524_v40 = vmax.f32 %v5349_v17, %v5460_v1 }
 0x774   :  { %8844 = vmatpush.bf16.msrb.mxu1 %v5634_v11  ;;  %v8318_v11 = vor.u32 %v8809_v25, %v8317_v13  ;;  %v8742_v13 = vld [vmem:[#allocation3 + $0x6dc] sm:$0xf] }
 0x775   :  { %v8071_v25 = vld [vmem:[#allocation3 + $0x6f8] sm:$0xf0] }
 0x776   :  { %v5350_v28 = vpop.f32.mrf.mxu2 }
 0x777   :  { %v5351_v15 = vadd.f32 %v5350_v28, %v11902_v45  ;;  %6255 = vmatpush.bf16.msrb.mxu0 %v5633_v51 }
 0x778   :  { %8845 = vmatpush.bf16.msrb.mxu1 %v5633_v51  ;;  %v5224_v26 = vpop.f32.mrf.mxu1  ;;  %v13176_v51 = vld [vmem:[#allocation23_spill] sm:$0xff] }
 0x779   :  { %v12028_v54 = vadd.f32 %v5224_v26, %v11802_v23  ;;  %v5461_v6 = vmul.f32 0.2, %v5351_v15  ;;  %v5058_v10 = vadd.f32 %v13176_v51, %v11674_v53  ;;  %v8333_v53 = vld [vmem:[%s12779_s5 + $0x100] sm:$0xf] }
 0x77b   :  { %5392 = vmatmul.bf16.gmra.mxu2 %v8010_v16  ;;  %v5525_v12 = vmax.f32 %v5351_v15, %v5461_v6  ;;  %6256 = vmatpush.bf16.msrb.mxu0 %v11976_v29 }
 0x77c   :  { %8846 = vmatpush.bf16.msrb.mxu1 %v11976_v29  ;;  %v8734_v29 = vld [vmem:[#allocation3 + $0x69c] sm:$0xf] }
 0x77d   :  { %v12032_v45 = vpack.c.bf16 %v5525_v12, %v5524_v40  ;;  %v8042_v57 = vor.u32 %v8734_v29, %v8039_v49  ;;  %v8817_v40 = vld [vmem:[%s12779_s5 + $0x12c] sm:$0xf0] }
 0x77e   :  { %v5353_v24 = vpop.f32.mrf.mxu2 }
 0x77f   :  { %6207 = vmatmul.bf16.gmra.mxu3 %v8318_v11  ;;  %v5354_v38 = vadd.f32 %v5353_v24, %v11907_v59  ;;  %6257 = vmatpush.bf16.msrb.mxu0 %v11962_v47  ;;  %v8813_v59 = vld [vmem:[%s12779_s5 + $0x10c] sm:$0xf0]  ;;  %v8074_v11 = vor.u32 %v8742_v13, %v8071_v25  ;;  %v8223_v24 = vld [vmem:[%s12779_s5 + $0x30] sm:$0xf0] }
 0x780   :  { %8847 = vmatpush.bf16.msrb.mxu1 %v11962_v47  ;;  %v5226_v23 = vpop.f32.mrf.mxu1 }
 0x781   :  { %v12039_v46 = vadd.f32 %v5226_v23, %v5058_v10  ;;  %v5462_v47 = vmul.f32 0.2, %v5354_v38  ;;  %v8783_v10 = vld [vmem:[%s12779_s5 + $0x24] sm:$0xf] }
 0x783   :  { %6258 = vmatpush.bf16.msrb.mxu0 %v11946_v33  ;;  %v5526_v42 = vmax.f32 %v5354_v38, %v5462_v47  ;;  %v13180_v38 = vld [vmem:[#allocation65_spill] sm:$0xff]  ;;  %v13181_v47 = vld [vmem:[#allocation42_spill] sm:$0xff] }
 0x784   :  { %8848 = vmatpush.bf16.msrb.mxu1 %v11946_v33 }
 0x786   :  { %v5355_v18 = vpop.f32.mrf.mxu2 }
 0x787   :  { %v5356_v3 = vadd.f32 %v5355_v18, %v11915_v30  ;;  %6259 = vmatpush.bf16.msrb.mxu0 %v11930_v0  ;;  %v8334_v30 = vor.u32 %v8813_v59, %v8333_v53 }
 0x788   :  { %8849 = vmatpush.bf16.msrb.mxu1 %v11930_v0  ;;  %v5229_v33 = vpop.f32.mrf.mxu1 }
 0x789   :  { %v12059_v43 = vadd.f32 %v5229_v33, %v13177_v34  ;;  %v5463_v55 = vmul.f32 0.2, %v5356_v3 }
 0x78b   :  { %5397 = vmatmul.bf16.gmra.mxu2 %v8042_v57  ;;  %v5527_v0 = vmax.f32 %v5356_v3, %v5463_v55  ;;  %6260 = vmatpush.bf16.msrb.mxu0 %v11910_v9  ;;  %v8226_v57 = vor.u32 %v8783_v10, %v8223_v24  ;;  %v5068_v3 = vadd.f32 %v11838_v63, %v13181_v47  ;;  %v8821_v63 = vld [vmem:[%s12779_s5 + $0x14c] sm:$0xf0] }
 0x78c   :  { %8850 = vmatpush.bf16.msrb.mxu1 %v11910_v9  ;;  %v8349_v9 = vld [vmem:[%s12779_s5 + $0x120] sm:$0xf]  ;;  %v13182_v10 = vld [vmem:[#allocation72_spill] sm:$0xff] }
 0x78d   :  { %v12065_v17 = vpack.c.bf16 %v5527_v0, %v5526_v42  ;;  %v8350_v18 = vor.u32 %v8817_v40, %v8349_v9  ;;  %v8825_v47 = vld [vmem:[%s12779_s5 + $0x16c] sm:$0xf0] }
 0x78e   :  { %v5358_v28 = vpop.f32.mrf.mxu2  ;;  %6261 = vmatmul.bf16.vlgmr.msrb.gmra.mxu0 %v8210_v48  ;;  %v8103_v48 = vld [vmem:[#allocation3 + $0x738] sm:$0xf0] }
 0x78f   :  { %6212 = vmatmul.bf16.gmra.mxu3 %v8334_v30  ;;  %v5359_v16 = vadd.f32 %v5358_v28, %v11927_v39  ;;  %v8750_v30 = vld [vmem:[#allocation3 + $0x71c] sm:$0xf]  ;;  %v8787_v28 = vld [vmem:[%s12779_s5 + $0x44] sm:$0xf] }
 0x790   :  { %v5231_v1 = vpop.f32.mrf.mxu1  ;;  %v8106_v0 = vor.u32 %v8750_v30, %v8103_v48 }
 0x791   :  { %v12070_v15 = vadd.f32 %v5231_v1, %v5063_v41  ;;  %v5464_v12 = vmul.f32 0.2, %v5359_v16 }
 0x792   :  { %v12072_v26 = vpop.f32.mrf.mxu3 }
 0x793   :  { %v5528_v53 = vmax.f32 %v5359_v16, %v5464_v12  ;;  %v8239_v16 = vld [vmem:[%s12779_s5 + $0x50] sm:$0xf0] }
 0x796   :  { %v5360_v6 = vpop.f32.mrf.mxu2 }
 0x797   :  { %v5361_v39 = vadd.f32 %v5360_v6, %v11934_v22  ;;  %v8366_v6 = vor.u32 %v8821_v63, %v8365_v50 }
 0x798   :  { %v5234_v51 = vpop.f32.mrf.mxu1 }
 0x799   :  { %v12088_v23 = vadd.f32 %v5234_v51, %v13180_v38  ;;  %v5465_v29 = vmul.f32 0.2, %v5361_v39  ;;  %v8758_v38 = vld [vmem:[#allocation3 + $0x75c] sm:$0xf] }
 0x79a   :  { %v12090_v49 = vpop.f32.mrf.mxu3 }
 0x79b   :  { %5402 = vmatmul.bf16.gmra.mxu2 %v8074_v11  ;;  %v5529_v22 = vmax.f32 %v5361_v39, %v5465_v29  ;;  %v8242_v11 = vor.u32 %v8787_v28, %v8239_v16  ;;  %v8135_v29 = vld [vmem:[#allocation3 + $0x778] sm:$0xf0] }
 0x79c   :  { %v13185_v28 = vld [vmem:[#allocation41_spill] sm:$0xff] }
 0x79d   :  { %v12092_v59 = vpack.c.bf16 %v5529_v22, %v5528_v53  ;;  %v8138_v53 = vor.u32 %v8758_v38, %v8135_v29  ;;  %v8381_v22 = vld [vmem:[%s12779_s5 + $0x160] sm:$0xf]  ;;  %v8795_v38 = vld [vmem:[%s12779_s5 + $0x84] sm:$0xf] }
 0x79e   :  { %v5363_v33 = vpop.f32.mrf.mxu2  ;;  %6266 = vmatmul.bf16.gmra.mxu0 %v8226_v57  ;;  %v8382_v30 = vor.u32 %v8825_v47, %v8381_v22  ;;  %v13186_v16 = vld [vmem:[#allocation45_spill] sm:$0xff] }
 0x79f   :  { %6217 = vmatmul.bf16.gmra.mxu3 %v8350_v18  ;;  %v5364_v4 = vadd.f32 %v5363_v33, %v11944_v31  ;;  %v8791_v33 = vld [vmem:[%s12779_s5 + $0x64] sm:$0xf] }
 0x7a0   :  { %v5236_v5 = vpop.f32.mrf.mxu1 }
 0x7a1   :  { %v12097_v34 = vadd.f32 %v5236_v5, %v5068_v3  ;;  %v5466_v27 = vmul.f32 0.2, %v5364_v4 }
 0x7a2   :  { %v12099_v55 = vpop.f32.mrf.mxu3 }
 0x7a3   :  { %v5530_v9 = vmax.f32 %v5364_v4, %v5466_v27  ;;  %v13184_v27 = vld [vmem:[#allocation50_spill] sm:$0xff] }
 0x7a6   :  { %v5365_v42 = vpop.f32.mrf.mxu2 }
 0x7a7   :  { %v5366_v31 = vadd.f32 %v5365_v42, %v11950_v35 }
 0x7a8   :  { %v5239_v41 = vpop.f32.mrf.mxu1 }
 0x7a9   :  { %v12115_v1 = vadd.f32 %v5239_v41, %v11847_v2  ;;  %v5467_v13 = vmul.f32 0.2, %v5366_v31  ;;  %v13183_v2 = vld [vmem:[#allocation37_spill] sm:$0xff] }
 0x7aa   :  { %v12117_v25 = vpop.f32.mrf.mxu3  ;;  %v5033_v24 = vadd.f32 %v13183_v2, %v13182_v10  ;;  %v8397_v10 = vld [vmem:[%s12779_s5 + $0x180] sm:$0xf] }
 0x7ab   :  { %5407 = vmatmul.bf16.gmra.mxu2 %v8106_v0  ;;  %v5531_v35 = vmax.f32 %v5366_v31, %v5467_v13  ;;  %v5205_v31 = vadd.f32 %v11968_v19, %v13184_v27  ;;  %v5038_v13 = vadd.f32 %v13186_v16, %v13185_v28  ;;  %v8829_v19 = vld [vmem:[%s12779_s5 + $0x18c] sm:$0xf0]  ;;  %v8199_v27 = vld [vmem:[#allocation3 + $0x7f8] sm:$0xf0] }
 0x7ac   :  { %v5202_v18 = vadd.f32 %v11965_v21, %v5033_v24  ;;  %v8255_v21 = vld [vmem:[%s12779_s5 + $0x70] sm:$0xf0] }
 0x7ad   :  { %v12119_v40 = vpack.c.bf16 %v5531_v35, %v5530_v9  ;;  %v8258_v48 = vor.u32 %v8791_v33, %v8255_v21  ;;  %v8167_v9 = vld [vmem:[#allocation3 + $0x7b8] sm:$0xf0]  ;;  %v5207_v35 = vadd.f32 %v11978_v37, %v5038_v13  ;;  %v8271_v37 = vld [vmem:[%s12779_s5 + $0x90] sm:$0xf0]  ;;  %v13187_v33 = vld [vmem:[#allocation26_spill] sm:$0xff] }
 0x7ae   :  { %v5368_v12 = vpop.f32.mrf.mxu2  ;;  %6271 = vmatmul.bf16.gmra.mxu0 %v8242_v11  ;;  %v8766_v11 = vld [vmem:[#allocation3 + $0x79c] sm:$0xf]  ;;  %v5210_v21 = vadd.f32 %v11982_v20, %v13187_v33  ;;  %v8833_v20 = vld [vmem:[%s12779_s5 + $0x1ac] sm:$0xf0]  ;;  %v8839_v33 = vld [vmem:[%s12779_s5 + $0x1e4] sm:$0xf] }
 0x7af   :  { %6222 = vmatmul.bf16.gmra.mxu3 %v8366_v6  ;;  %v5369_v39 = vadd.f32 %v5368_v12, %v11960_v60  ;;  %v8413_v13 = vld [vmem:[%s12779_s5 + $0x1a0] sm:$0xf] }
 0x7b1   :  { %v5468_v60 = vmul.f32 0.2, %v5369_v39 }
 0x7b2   :  { %v12122_v51 = vpop.f32.mrf.mxu3 }
 0x7b3   :  { %v5532_v42 = vmax.f32 %v5369_v39, %v5468_v60  ;;  %v8170_v39 = vor.u32 %v8766_v11, %v8167_v9  ;;  %v8799_v9 = vld [vmem:[%s12779_s5 + $0xa4] sm:$0xf] }
 0x7b6   :  { %v5370_v57 = vpop.f32.mrf.mxu2 }
 0x7b7   :  { %v5371_v3 = vadd.f32 %v5370_v57, %v5202_v18  ;;  %v8398_v57 = vor.u32 %v8829_v19, %v8397_v10 }
 0x7b9   :  { %v5469_v4 = vmul.f32 0.2, %v5371_v3 }
 0x7ba   :  { %v12139_v5 = vpop.f32.mrf.mxu3 }
 0x7bb   :  { %5412 = vmatmul.bf16.gmra.mxu2 %v8138_v53  ;;  %v5533_v0 = vmax.f32 %v5371_v3, %v5469_v4  ;;  %v8274_v53 = vor.u32 %v8795_v38, %v8271_v37  ;;  %v13190_v37 = vld [vmem:[#allocation52_spill] sm:$0xff] }
 0x7bd   :  { %v12141_v50 = vpack.c.bf16 %v5533_v0, %v5532_v42 }
 0x7be   :  { %v5373_v63 = vpop.f32.mrf.mxu2  ;;  %6276 = vmatmul.bf16.gmra.mxu0 %v8258_v48  ;;  %v13189_v48 = vld [vmem:[#allocation49_spill] sm:$0xff] }
 0x7bf   :  { %6227 = vmatmul.bf16.gmra.mxu3 %v8382_v30  ;;  %v5374_v6 = vadd.f32 %v5373_v63, %v5205_v31  ;;  %v13188_v30 = vld [vmem:[#allocation18_spill] sm:$0xff]  ;;  %v8774_v63 = vld [vmem:[#allocation3 + $0x7dc] sm:$0xf] }
 0x7c0   :  { %v5043_v42 = vadd.f32 %v13189_v48, %v13188_v30  ;;  %v8202_v16 = vor.u32 %v8774_v63, %v8199_v27 }
 0x7c1   :  { %v5470_v2 = vmul.f32 0.2, %v5374_v6 }
 0x7c2   :  { %v12145_v41 = vpop.f32.mrf.mxu3  ;;  %v5212_v31 = vadd.f32 %v11990_v8, %v5043_v42  ;;  %v8287_v8 = vld [vmem:[%s12779_s5 + $0xb0] sm:$0xf0] }
 0x7c3   :  { %v5534_v22 = vmax.f32 %v5374_v6, %v5470_v2  ;;  %v8290_v10 = vor.u32 %v8799_v9, %v8287_v8 }
 0x7c6   :  { %v5375_v12 = vpop.f32.mrf.mxu2 }
 0x7c7   :  { %v5376_v24 = vadd.f32 %v5375_v12, %v5207_v35 }
 0x7c9   :  { %v5471_v29 = vmul.f32 0.2, %v5376_v24 }
 0x7ca   :  { %v12162_v18 = vpop.f32.mrf.mxu3 }
 0x7cb   :  { %5417 = vmatmul.bf16.gmra.mxu2 %v8170_v39  ;;  %v5535_v47 = vmax.f32 %v5376_v24, %v5471_v29  ;;  %v8414_v39 = vor.u32 %v8833_v20, %v8413_v13  ;;  %v5215_v29 = vadd.f32 %v11994_v58, %v13190_v37  ;;  %v8429_v58 = vld [vmem:[%s12779_s5 + $0x1c0] sm:$0xf] }
 0x7cd   :  { %v12164_v60 = vpack.c.bf16 %v5535_v47, %v5534_v22  ;;  %v13192_v22 = vld [vmem:[#allocation54_spill] sm:$0xff] }
 0x7ce   :  { %v5378_v3 = vpop.f32.mrf.mxu2  ;;  %6281 = vmatmul.bf16.gmra.mxu0 %v8274_v53  ;;  %v13191_v53 = vld [vmem:[#allocation16_spill] sm:$0xff] }
 0x7cf   :  { %6232 = vmatmul.bf16.gmra.mxu3 %v8398_v57  ;;  %v5379_v0 = vadd.f32 %v5378_v3, %v5210_v21  ;;  %v5048_v47 = vadd.f32 %v13192_v22, %v13191_v53  ;;  %v8447_v21 = vld [vmem:[%s12779_s5 + $0x1f0] sm:$0xf0] }
 0x7d0   :  { %v8450_v30 = vor.u32 %v8839_v33, %v8447_v21 }
 0x7d1   :  { %v5472_v6 = vmul.f32 0.2, %v5379_v0  ;;  %v5217_v48 = vadd.f32 %v12002_v52, %v5048_v47  ;;  %v8303_v52 = vld [vmem:[%s12779_s5 + $0xd0] sm:$0xf0] }
 0x7d2   :  { %v12168_v4 = vpop.f32.mrf.mxu3  ;;  %6336 = vmatmul.bf16.vlgmr.msrb.gmra.mxu1 %v8450_v30 }
 0x7d3   :  { %v5536_v19 = vmax.f32 %v5379_v0, %v5472_v6  ;;  %v8837_v0 = vld [vmem:[%s12779_s5 + $0x1cc] sm:$0xf0] }
 0x7d4   :  { %v8430_v13 = vor.u32 %v8837_v0, %v8429_v58 }
 0x7d6   :  { %v5380_v28 = vpop.f32.mrf.mxu2 }
 0x7d7   :  { %v5381_v11 = vadd.f32 %v5380_v28, %v5212_v31  ;;  %v8803_v31 = vld [vmem:[%s12779_s5 + $0xc4] sm:$0xf] }
 0x7d8   :  { %v8306_v20 = vor.u32 %v8803_v31, %v8303_v52 }
 0x7d9   :  { %v5473_v35 = vmul.f32 0.2, %v5381_v11 }
 0x7da   :  { %v12185_v12 = vpop.f32.mrf.mxu3 }
 0x7db   :  { %5422 = vmatmul.bf16.gmra.mxu2 %v8202_v16  ;;  %v5537_v2 = vmax.f32 %v5381_v11, %v5473_v35 }
 0x7dd   :  { %v5642_v24 = vpack.c.bf16 %v5537_v2, %v5536_v19  ;;  %v8445_v19 = vld [vmem:[%s12779_s5 + $0x1e0] sm:$0xf]  ;;  %v8841_v2 = vld [vmem:[%s12779_s5 + $0x1ec] sm:$0xf0] }
 0x7de   :  { %v5383_v38 = vpop.f32.mrf.mxu2  ;;  %6286 = vmatmul.bf16.gmra.mxu0 %v8290_v10  ;;  %v8446_v22 = vor.u32 %v8841_v2, %v8445_v19 }
 0x7df   :  { %6237 = vmatmul.bf16.gmra.mxu3 %v8414_v39  ;;  %v5384_v3 = vadd.f32 %v5383_v38, %v5215_v29 }
 0x7e1   :  { %v5474_v63 = vmul.f32 0.2, %v5384_v3 }
 0x7e2   :  { %v12189_v57 = vpop.f32.mrf.mxu3 }
 0x7e3   :  { %v5538_v6 = vmax.f32 %v5384_v3, %v5474_v63 }
 0x7e6   :  { %v5385_v42 = vpop.f32.mrf.mxu2 }
 0x7e7   :  { %v5386_v27 = vadd.f32 %v5385_v42, %v5217_v48  ;;  %v8811_v42 = vld [vmem:[%s12779_s5 + $0x104] sm:$0xf] }
 0x7e9   :  { %v5475_v28 = vmul.f32 0.2, %v5386_v27 }
 0x7ea   :  { %v12212_v16 = vpop.f32.mrf.mxu3 }
 0x7eb   :  { %v5539_v11 = vmax.f32 %v5386_v27, %v5475_v28 }
 0x7ed   :  { %v5643_v9 = vpack.c.bf16 %v5539_v11, %v5538_v6 }
 0x7ee   :  { %v5388_v8 = vpop.f32.mrf.mxu2  ;;  %6291 = vmatmul.bf16.gmra.mxu0 %v8306_v20 }
 0x7ef   :  { %6242 = vmatmul.bf16.gmra.mxu3 %v8430_v13  ;;  %v5389_v35 = vadd.f32 %v5388_v8, %v12013_v62  ;;  %v8807_v62 = vld [vmem:[%s12779_s5 + $0xe4] sm:$0xf]  ;;  %v5692_v8 = vpop.permute.xlu1 %5691 }
 0x7f0   :  { %6342 = vmatpush.bf16.msrb.mxu3 %v5643_v9 }
 0x7f1   :  { %v5476_v38 = vmul.f32 0.2, %v5389_v35 }
 0x7f2   :  { %v12215_v39 = vpop.f32.mrf.mxu3 }
 0x7f3   :  { %v5540_v3 = vmax.f32 %v5389_v35, %v5476_v38  ;;  %v8351_v38 = vld [vmem:[%s12779_s5 + $0x130] sm:$0xf0] }
 0x7f4   :  { %6343 = vmatpush.bf16.msrb.mxu3 %v5642_v24  ;;  %v8319_v24 = vld [vmem:[%s12779_s5 + $0xf0] sm:$0xf0] }
 0x7f5   :  { %v8322_v47 = vor.u32 %v8807_v62, %v8319_v24  ;;  %v8229_v62 = vld [vmem:[%s12779_s5 + $0x28] sm:$0xf]  ;;  %v5697_v24 = vpop.permute.xlu2 %5696 }
 0x7f6   :  { %v5390_v10 = vpop.f32.mrf.mxu2 }
 0x7f7   :  { %v5391_v37 = vadd.f32 %v5390_v10, %v12018_v14 }
 0x7f8   :  { %6344 = vmatpush.bf16.msrb.mxu3 %v12164_v60 }
 0x7f9   :  { %v5477_v29 = vmul.f32 0.2, %v5391_v37 }
 0x7fa   :  { %v12231_v53 = vpop.f32.mrf.mxu3 }
 0x7fb   :  { %v5541_v33 = vmax.f32 %v5391_v37, %v5477_v29 }
 0x7fc   :  { %6345 = vmatpush.bf16.msrb.mxu3 %v12141_v50  ;;  %v8335_v50 = vld [vmem:[%s12779_s5 + $0x110] sm:$0xf0] }
 0x7fd   :  { %v12234_v14 = vpack.c.bf16 %v5541_v33, %v5540_v3  ;;  %v8338_v52 = vor.u32 %v8811_v42, %v8335_v50 }
 0x7fe   :  { %v5393_v60 = vpop.f32.mrf.mxu2  ;;  %6296 = vmatmul.bf16.gmra.mxu0 %v8322_v47  ;;  %v6179_v47 = vadd.f32 %v12099_v55, %v5697_v24  ;;  %v5712_v24 = vpop.permute.xlu2 %5711 }
 0x7ff   :  { %6247 = vmatmul.bf16.gmra.mxu3 %v8446_v22  ;;  %v5394_v21 = vadd.f32 %v5393_v60, %v12028_v54  ;;  %v8213_v54 = vld [vmem:[%s12779_s5 + $0x8] sm:$0xf] }
 0x800   :  { %6346 = vmatpush.bf16.msrb.mxu3 %v12119_v40  ;;  %v5687_v40 = vpop.permute.xlu0 %5686 }
 0x801   :  { %v5478_v58 = vmul.f32 0.2, %v5394_v21  ;;  %v6174_v31 = vadd.f32 %v12072_v26, %v5687_v40  ;;  %v6176_v26 = vadd.f32 %v12090_v49, %v5692_v8  ;;  %v8786_v49 = vld [vmem:[%s12779_s5 + $0x34] sm:$0xf0] }
 0x802   :  { %v12238_v30 = vpop.f32.mrf.mxu3  ;;  %v8230_v33 = vor.u32 %v8786_v49, %v8229_v62 }
 0x803   :  { %v5542_v13 = vmax.f32 %v5394_v21, %v5478_v58 }
 0x804   :  { %6347 = vmatpush.bf16.msrb.mxu3 %v12092_v59  ;;  %v8782_v59 = vld [vmem:[%s12779_s5 + $0x14] sm:$0xf0] }
 0x805   :  { %v8214_v28 = vor.u32 %v8782_v59, %v8213_v54 }
 0x806   :  { %v5395_v48 = vpop.f32.mrf.mxu2 }
 0x807   :  { %v5396_v0 = vadd.f32 %v5395_v48, %v12039_v46 }
 0x808   :  { %6348 = vmatpush.bf16.msrb.mxu3 %v12065_v17 }
 0x809   :  { %v5479_v63 = vmul.f32 0.2, %v5396_v0 }
 0x80a   :  { %v12255_v27 = vpop.f32.mrf.mxu3 }
 0x80b   :  { %v5543_v46 = vmax.f32 %v5396_v0, %v5479_v63  ;;  %v6262_v20 = vpop.f32.mrf.mxu0  ;;  %v5702_v0 = vpop.permute.xlu0 %5701 }
 0x80c   :  { %6349 = vmatpush.bf16.msrb.mxu3 %v12032_v45  ;;  %v12259_v17 = vadd.f32 %v6262_v20, %v6174_v31  ;;  %v8815_v45 = vld [vmem:[%s12779_s5 + $0x124] sm:$0xf]  ;;  %v6181_v59 = vadd.f32 %v12117_v25, %v5702_v0  ;;  %v5241_v63 = vpop.f32.mrf.mxu1  ;;  %v8245_v25 = vld [vmem:[%s12779_s5 + $0x48] sm:$0xf]  ;;  %v5707_v20 = vpop.permute.xlu1 %5706 }
 0x80d   :  { %v12261_v6 = vpack.c.bf16 %v5543_v46, %v5542_v13  ;;  %v8354_v3 = vor.u32 %v8815_v45, %v8351_v38  ;;  %v8790_v46 = vld [vmem:[%s12779_s5 + $0x54] sm:$0xf0]  ;;  %v6184_v8 = vadd.f32 %v12122_v51, %v5707_v20  ;;  %v6186_v51 = vadd.f32 %v12139_v5, %v5712_v24  ;;  %v8261_v5 = vld [vmem:[%s12779_s5 + $0x68] sm:$0xf] }
 0x80e   :  { %v5398_v11 = vpop.f32.mrf.mxu2  ;;  %6301 = vmatmul.bf16.gmra.mxu0 %v8338_v52  ;;  %v8819_v52 = vld [vmem:[%s12779_s5 + $0x144] sm:$0xf] }
 0x80f   :  { %6350 = vmatmul.bf16.vlgmr.msrb.gmra.mxu3 %v8214_v28  ;;  %v5399_v9 = vadd.f32 %v5398_v11, %v12059_v43  ;;  %v8367_v28 = vld [vmem:[%s12779_s5 + $0x150] sm:$0xf0] }
 0x811   :  { %v5480_v37 = vmul.f32 0.2, %v5399_v9 }
 0x812   :  { %v12264_v35 = vpop.f32.mrf.mxu3 }
 0x813   :  { %v6264_v10 = vpop.f32.mrf.mxu0  ;;  %v5544_v60 = vmax.f32 %v5399_v9, %v5480_v37 }
 0x814   :  { %v12267_v19 = vadd.f32 %v6264_v10, %v6176_v26  ;;  %v8370_v26 = vor.u32 %v8819_v52, %v8367_v28  ;;  %v8246_v10 = vor.u32 %v8790_v46, %v8245_v25  ;;  %v5244_v49 = vpop.f32.mrf.mxu1 }
 0x816   :  { %v5400_v2 = vpop.f32.mrf.mxu2 }
 0x817   :  { %v5401_v43 = vadd.f32 %v5400_v2, %v12070_v15 }
 0x819   :  { %v5481_v29 = vmul.f32 0.2, %v5401_v43 }
 0x81a   :  { %v12282_v22 = vpop.f32.mrf.mxu3 }
 0x81b   :  { %v5545_v21 = vmax.f32 %v5401_v43, %v5481_v29  ;;  %v6267_v48 = vpop.f32.mrf.mxu0 }
 0x81c   :  { %v12285_v15 = vadd.f32 %v6267_v48, %v6179_v47  ;;  %v13193_v47 = vld [vmem:[#allocation40_spill] sm:$0xff] }
 0x81d   :  { %v12287_v42 = vpack.c.bf16 %v5545_v21, %v5544_v60 }
 0x81e   :  { %v5403_v50 = vpop.f32.mrf.mxu2  ;;  %6306 = vmatmul.bf16.gmra.mxu0 %v8354_v3  ;;  %v5073_v3 = vadd.f32 %v11853_v36, %v13193_v47  ;;  %v8794_v36 = vld [vmem:[%s12779_s5 + $0x74] sm:$0xf0]  ;;  %v8399_v47 = vld [vmem:[%s12779_s5 + $0x190] sm:$0xf0] }
 0x81f   :  { %6355 = vmatmul.bf16.gmra.mxu3 %v8230_v33  ;;  %v5404_v58 = vadd.f32 %v5403_v50, %v12088_v23  ;;  %v8823_v50 = vld [vmem:[%s12779_s5 + $0x164] sm:$0xf] }
 0x820   :  { %v5242_v21 = vadd.f32 %v5241_v63, %v5073_v3  ;;  %v8798_v3 = vld [vmem:[%s12779_s5 + $0x94] sm:$0xf0] }
 0x821   :  { %v5482_v13 = vmul.f32 0.2, %v5404_v58 }
 0x822   :  { %v12290_v54 = vpop.f32.mrf.mxu3 }
 0x823   :  { %v6269_v55 = vpop.f32.mrf.mxu0  ;;  %v5546_v2 = vmax.f32 %v5404_v58, %v5482_v13  ;;  %v8262_v13 = vor.u32 %v8794_v36, %v8261_v5 }
 0x824   :  { %v12293_v40 = vadd.f32 %v6269_v55, %v6181_v59  ;;  %v5717_v59 = vpop.permute.xlu0 %5716 }
 0x825   :  { %v6189_v52 = vadd.f32 %v12145_v41, %v5717_v59 }
 0x826   :  { %v5405_v31 = vpop.f32.mrf.mxu2 }
 0x827   :  { %v5406_v23 = vadd.f32 %v5405_v31, %v12097_v34  ;;  %v5246_v31 = vpop.f32.mrf.mxu1 }
 0x829   :  { %v5483_v11 = vmul.f32 0.2, %v5406_v23 }
 0x82a   :  { %v12308_v9 = vpop.f32.mrf.mxu3 }
 0x82b   :  { %v5547_v45 = vmax.f32 %v5406_v23, %v5483_v11  ;;  %v6272_v38 = vpop.f32.mrf.mxu0 }
 0x82c   :  { %v12311_v34 = vadd.f32 %v6272_v38, %v6184_v8 }
 0x82d   :  { %v12313_v37 = vpack.c.bf16 %v5547_v45, %v5546_v2  ;;  %v13194_v2 = vld [vmem:[#allocation15_spill] sm:$0xff] }
 0x82e   :  { %v5408_v43 = vpop.f32.mrf.mxu2  ;;  %6311 = vmatmul.bf16.gmra.mxu0 %v8370_v26  ;;  %v5245_v26 = vadd.f32 %v5244_v49, %v11862_v61  ;;  %v5078_v45 = vadd.f32 %v11868_v44, %v13194_v2  ;;  %v8277_v44 = vld [vmem:[%s12779_s5 + $0x88] sm:$0xf] }
 0x82f   :  { %6360 = vmatmul.bf16.gmra.mxu3 %v8246_v10  ;;  %v5409_v62 = vadd.f32 %v5408_v43, %v12115_v1  ;;  %v8383_v1 = vld [vmem:[%s12779_s5 + $0x170] sm:$0xf0]  ;;  %v5249_v43 = vpop.f32.mrf.mxu1 }
 0x830   :  { %v8386_v28 = vor.u32 %v8823_v50, %v8383_v1 }
 0x831   :  { %v5484_v58 = vmul.f32 0.2, %v5409_v62 }
 0x832   :  { %v12316_v29 = vpop.f32.mrf.mxu3 }
 0x833   :  { %v6274_v33 = vpop.f32.mrf.mxu0  ;;  %v5548_v23 = vmax.f32 %v5409_v62, %v5484_v58  ;;  %v5247_v62 = vadd.f32 %v5246_v31, %v5078_v45  ;;  %v8278_v58 = vor.u32 %v8798_v3, %v8277_v44 }
 0x834   :  { %v12321_v60 = vadd.f32 %v6274_v33, %v6186_v51  ;;  %v8827_v51 = vld [vmem:[%s12779_s5 + $0x184] sm:$0xf]  ;;  %v5727_v33 = vpop.permute.xlu2 %5726 }
 0x835   :  { %v6194_v50 = vadd.f32 %v12168_v4, %v5727_v33  ;;  %v8402_v1 = vor.u32 %v8827_v51, %v8399_v47  ;;  %v13196_v4 = vld [vmem:[#allocation53_spill] sm:$0xff]  ;;  %v8293_v51 = vld [vmem:[%s12779_s5 + $0xa8] sm:$0xf] }
 0x836   :  { %v5410_v48 = vpop.f32.mrf.mxu2 }
 0x837   :  { %v5411_v0 = vadd.f32 %v5410_v48, %v5242_v21  ;;  %v5251_v31 = vpop.f32.mrf.mxu1 }
 0x839   :  { %v5485_v55 = vmul.f32 0.2, %v5411_v0 }
 0x83a   :  { %v12335_v63 = vpop.f32.mrf.mxu3 }
 0x83b   :  { %v5549_v25 = vmax.f32 %v5411_v0, %v5485_v55  ;;  %v6277_v46 = vpop.f32.mrf.mxu0 }
 0x83c   :  { %v12338_v20 = vadd.f32 %v6277_v46, %v6189_v52  ;;  %v5083_v46 = vadd.f32 %v11883_v7, %v13196_v4  ;;  %v8802_v7 = vld [vmem:[%s12779_s5 + $0xb4] sm:$0xf0]  ;;  %v13197_v4 = vld [vmem:[#allocation62_spill] sm:$0xff] }
 0x83d   :  { %v12340_v11 = vpack.c.bf16 %v5549_v25, %v5548_v23 }
 0x83e   :  { %v5413_v8 = vpop.f32.mrf.mxu2  ;;  %6316 = vmatmul.bf16.gmra.mxu0 %v8386_v28  ;;  %v12368_v28 = vpop.permute.xlu1 %5721  ;;  %v5252_v2 = vadd.f32 %v5251_v31, %v5083_v46 }
 0x83f   :  { %6365 = vmatmul.bf16.gmra.mxu3 %v8262_v13  ;;  %v5414_v41 = vadd.f32 %v5413_v8, %v5245_v26  ;;  %v13195_v13 = vld [vmem:[#allocation8_spill] sm:$0xff]  ;;  %v5254_v47 = vpop.f32.mrf.mxu1  ;;  %v12394_v31 = vpop.permute.xlu0 %5731 }
 0x840   :  { %v5250_v23 = vadd.f32 %v5249_v43, %v13195_v13 }
 0x841   :  { %v5486_v61 = vmul.f32 0.2, %v5414_v41 }
 0x842   :  { %v12343_v10 = vpop.f32.mrf.mxu3 }
 0x843   :  { %v12347_v38 = vpop.f32.mrf.mxu0  ;;  %v5550_v0 = vmax.f32 %v5414_v41, %v5486_v61  ;;  %v8831_v41 = vld [vmem:[%s12779_s5 + $0x1a4] sm:$0xf] }
 0x846   :  { %v5415_v24 = vpop.f32.mrf.mxu2  ;;  %v5737_v61 = vpop.permute.xlu1 %5736 }
 0x847   :  { %v5416_v49 = vadd.f32 %v5415_v24, %v5247_v62  ;;  %v8415_v62 = vld [vmem:[%s12779_s5 + $0x1b0] sm:$0xf0]  ;;  %v6199_v3 = vadd.f32 %v12189_v57, %v5737_v61  ;;  %v5088_v57 = vadd.f32 %v12061_v56, %v13197_v4  ;;  %v8806_v56 = vld [vmem:[%s12779_s5 + $0xd4] sm:$0xf0] }
 0x848   :  { %v8418_v33 = vor.u32 %v8831_v41, %v8415_v62  ;;  %v8835_v41 = vld [vmem:[%s12779_s5 + $0x1c4] sm:$0xf]  ;;  %v8431_v62 = vld [vmem:[%s12779_s5 + $0x1d0] sm:$0xf0]  ;;  %v8810_v4 = vld [vmem:[%s12779_s5 + $0xf4] sm:$0xf0] }
 0x849   :  { %v5487_v21 = vmul.f32 0.2, %v5416_v49 }
 0x84a   :  { %v12361_v48 = vpop.f32.mrf.mxu3 }
 0x84b   :  { %v5551_v5 = vmax.f32 %v5416_v49, %v5487_v21  ;;  %v6282_v36 = vpop.f32.mrf.mxu0  ;;  %v8294_v21 = vor.u32 %v8802_v7, %v8293_v51  ;;  %v5747_v51 = vpop.permute.xlu0 %5746 }
 0x84c   :  { %v12364_v59 = vadd.f32 %v6282_v36, %v6194_v50  ;;  %v6204_v61 = vadd.f32 %v12215_v39, %v5747_v51  ;;  %v8325_v39 = vld [vmem:[%s12779_s5 + $0xe8] sm:$0xf] }
 0x84d   :  { %v12366_v55 = vpack.c.bf16 %v5551_v5, %v5550_v0 }
 0x84e   :  { %v5418_v52 = vpop.f32.mrf.mxu2  ;;  %6321 = vmatmul.bf16.gmra.mxu0 %v8402_v1 }
 0x84f   :  { %6370 = vmatmul.bf16.gmra.mxu3 %v8278_v58  ;;  %v5419_v8 = vadd.f32 %v5418_v52, %v5250_v23  ;;  %v5255_v52 = vadd.f32 %v5254_v47, %v11890_v32  ;;  %v5256_v23 = vpop.f32.mrf.mxu1 }
 0x851   :  { %v5488_v24 = vmul.f32 0.2, %v5419_v8 }
 0x852   :  { %v12371_v25 = vpop.f32.mrf.mxu3 }
 0x853   :  { %v12375_v26 = vpop.f32.mrf.mxu0  ;;  %v5552_v50 = vmax.f32 %v5419_v8, %v5488_v24 }
 0x856   :  { %v5420_v45 = vpop.f32.mrf.mxu2 }
 0x857   :  { %v5421_v43 = vadd.f32 %v5420_v45, %v5252_v2  ;;  %v5257_v2 = vadd.f32 %v5256_v23, %v5088_v57 }
 0x859   :  { %v5489_v49 = vmul.f32 0.2, %v5421_v43 }
 0x85a   :  { %v12389_v44 = vpop.f32.mrf.mxu3 }
 0x85b   :  { %v5553_v1 = vmax.f32 %v5421_v43, %v5489_v49  ;;  %v6287_v58 = vpop.f32.mrf.mxu0  ;;  %v8309_v43 = vld [vmem:[%s12779_s5 + $0xc8] sm:$0xf]  ;;  %v8434_v49 = vor.u32 %v8835_v41, %v8431_v62 }
 0x85c   :  { %v12392_v0 = vadd.f32 %v6287_v58, %v6199_v3  ;;  %v8310_v3 = vor.u32 %v8806_v56, %v8309_v43 }
 0x85d   :  { %v5650_v5 = vpack.c.bf16 %v5553_v1, %v5552_v50 }
 0x85e   :  { %v5423_v36 = vpop.f32.mrf.mxu2  ;;  %6326 = vmatmul.bf16.gmra.mxu0 %v8418_v33 }
 0x85f   :  { %6375 = vmatmul.bf16.gmra.mxu3 %v8294_v21  ;;  %v5424_v46 = vadd.f32 %v5423_v36, %v5255_v52  ;;  %v12420_v36 = vpop.permute.xlu2 %5741 }
 0x861   :  { %v5490_v32 = vmul.f32 0.2, %v5424_v46 }
 0x862   :  { %v12397_v13 = vpop.f32.mrf.mxu3 }
 0x863   :  { %v12401_v8 = vpop.f32.mrf.mxu0  ;;  %v5554_v33 = vmax.f32 %v5424_v46, %v5490_v32 }
 0x866   :  { %v5425_v45 = vpop.f32.mrf.mxu2 }
 0x867   :  { %v5426_v24 = vadd.f32 %v5425_v45, %v5257_v2  ;;  %v5757_v57 = vpop.permute.xlu2 %5756  ;;  %v8326_v45 = vor.u32 %v8810_v4, %v8325_v39 }
 0x868   :  { %v6209_v2 = vadd.f32 %v12238_v30, %v5757_v57  ;;  %v8341_v30 = vld [vmem:[%s12779_s5 + $0x108] sm:$0xf] }
 0x869   :  { %v5491_v7 = vmul.f32 0.2, %v5426_v24 }
 0x86a   :  { %v12415_v47 = vpop.f32.mrf.mxu3 }
 0x86b   :  { %v5555_v21 = vmax.f32 %v5426_v24, %v5491_v7  ;;  %v6292_v50 = vpop.f32.mrf.mxu0  ;;  %v8215_v24 = vld [vmem:[%s12779_s5 + $0x18] sm:$0xf0] }
 0x86c   :  { %v12418_v1 = vadd.f32 %v6292_v50, %v6204_v61  ;;  %v8784_v50 = vld [vmem:[%s12779_s5 + $0x2c] sm:$0xf] }
 0x86d   :  { %v5651_v58 = vpack.c.bf16 %v5555_v21, %v5554_v33 }
 0x86e   :  { %6331 = vmatmul.bf16.gmra.mxu0 %v8434_v49  ;;  %v12466_v49 = vpop.permute.xlu0 %5761 }
 0x86f   :  { %6380 = vmatmul.bf16.gmra.mxu3 %v8310_v3  ;;  %6431 = vmatpush.bf16.msra.mxu0 %v5651_v58  ;;  %v8231_v58 = vld [vmem:[%s12779_s5 + $0x38] sm:$0xf0] }
 0x872   :  { %v12422_v52 = vpop.f32.mrf.mxu3 }
 0x873   :  { %v12424_v23 = vpop.f32.mrf.mxu0  ;;  %6432 = vmatpush.bf16.msra.mxu0 %v5650_v5 }
 0x877   :  { %6433 = vmatpush.bf16.msra.mxu0 %v12366_v55  ;;  %v12439_v55 = vpop.permute.xlu1 %5751 }
 0x87a   :  { %v12433_v46 = vpop.f32.mrf.mxu3 }
 0x87b   :  { %v6297_v41 = vpop.f32.mrf.mxu0  ;;  %6434 = vmatpush.bf16.msra.mxu0 %v12340_v11  ;;  %v8814_v11 = vld [vmem:[%s12779_s5 + $0x114] sm:$0xf0] }
 0x87c   :  { %v12437_v5 = vadd.f32 %v6297_v41, %v6209_v2  ;;  %v8342_v51 = vor.u32 %v8814_v11, %v8341_v30  ;;  %v12491_v11 = vpop.permute.xlu2 %5771 }
 0x87f   :  { %6385 = vmatmul.bf16.gmra.mxu3 %v8326_v45  ;;  %6435 = vmatpush.bf16.msra.mxu0 %v12313_v37  ;;  %v8780_v37 = vld [vmem:[%s12779_s5 + $0xc] sm:$0xf]  ;;  %v5767_v43 = vpop.permute.xlu1 %5766  ;;  %v8234_v45 = vor.u32 %v8784_v50, %v8231_v58 }
 0x880   :  { %v6214_v56 = vadd.f32 %v12264_v35, %v5767_v43  ;;  %v8218_v7 = vor.u32 %v8780_v37, %v8215_v24  ;;  %v8357_v35 = vld [vmem:[%s12779_s5 + $0x128] sm:$0xf] }
 0x882   :  { %v12442_v62 = vpop.f32.mrf.mxu3 }
 0x883   :  { %13198 = vst [vmem:[#allocation66_spill] sm:$0xff] %v12442_v62  ;;  %v12444_v32 = vpop.f32.mrf.mxu0  ;;  %6436 = vmatpush.bf16.msra.mxu0 %v12287_v42 }
 0x887   :  { %6437 = vmatpush.bf16.msra.mxu0 %v12261_v6 }
 0x88a   :  { %v12460_v42 = vpop.f32.mrf.mxu3 }
 0x88b   :  { %13199 = vst [vmem:[#allocation64_spill] sm:$0xff] %v12460_v42  ;;  %v6302_v6 = vpop.f32.mrf.mxu0  ;;  %6438 = vmatpush.bf16.msra.mxu0 %v12234_v14  ;;  %v8818_v14 = vld [vmem:[%s12779_s5 + $0x134] sm:$0xf0] }
 0x88c   :  { %v12464_v61 = vadd.f32 %v6302_v6, %v6214_v56  ;;  %v8358_v2 = vor.u32 %v8818_v14, %v8357_v35  ;;  %v8788_v56 = vld [vmem:[%s12779_s5 + $0x4c] sm:$0xf] }
 0x88e   :  { %6439 = vmatmul.bf16.vlgmr.msra.gmra.mxu0 %v8218_v7 }
 0x88f   :  { %6390 = vmatmul.bf16.gmra.mxu3 %v8342_v51  ;;  %v8247_v51 = vld [vmem:[%s12779_s5 + $0x58] sm:$0xf0] }
 0x890   :  { %v8250_v14 = vor.u32 %v8788_v56, %v8247_v51 }
 0x892   :  { %v6351_v3 = vpop.f32.mrf.mxu3 }
 0x893   :  { %v12469_v33 = vadd.f32 %v6351_v3, %v12259_v17  ;;  %v12471_v21 = vpop.f32.mrf.mxu0  ;;  %v5777_v17 = vpop.permute.xlu0 %5776 }
 0x894   :  { %v6219_v4 = vadd.f32 %v12290_v54, %v5777_v17  ;;  %v8822_v54 = vld [vmem:[%s12779_s5 + $0x154] sm:$0xf0]  ;;  %v12516_v17 = vpop.permute.xlu1 %5781 }
 0x89a   :  { %v6353_v39 = vpop.f32.mrf.mxu3 }
 0x89b   :  { %v12487_v57 = vadd.f32 %v6353_v39, %v12267_v19  ;;  %v6307_v41 = vpop.f32.mrf.mxu0  ;;  %v8373_v19 = vld [vmem:[%s12779_s5 + $0x148] sm:$0xf] }
 0x89c   :  { %v12489_v30 = vadd.f32 %v6307_v41, %v6219_v4  ;;  %v8374_v35 = vor.u32 %v8822_v54, %v8373_v19  ;;  %v8263_v41 = vld [vmem:[%s12779_s5 + $0x78] sm:$0xf0] }
 0x89e   :  { %6444 = vmatmul.bf16.gmra.mxu0 %v8234_v45  ;;  %v8792_v45 = vld [vmem:[%s12779_s5 + $0x6c] sm:$0xf] }
 0x89f   :  { %6395 = vmatmul.bf16.gmra.mxu3 %v8358_v2  ;;  %v8266_v51 = vor.u32 %v8792_v45, %v8263_v41 }
 0x8a2   :  { %v6356_v37 = vpop.f32.mrf.mxu3 }
 0x8a3   :  { %v12494_v24 = vadd.f32 %v6356_v37, %v12285_v15  ;;  %v12496_v43 = vpop.f32.mrf.mxu0  ;;  %v5787_v15 = vpop.permute.xlu2 %5786 }
 0x8a4   :  { %v6224_v6 = vadd.f32 %v12316_v29, %v5787_v15  ;;  %v8826_v29 = vld [vmem:[%s12779_s5 + $0x174] sm:$0xf0] }
 0x8aa   :  { %v6358_v7 = vpop.f32.mrf.mxu3 }
 0x8ab   :  { %v12512_v3 = vadd.f32 %v6358_v7, %v12293_v40  ;;  %v6312_v50 = vpop.f32.mrf.mxu0  ;;  %v8389_v40 = vld [vmem:[%s12779_s5 + $0x168] sm:$0xf] }
 0x8ac   :  { %v12514_v58 = vadd.f32 %v6312_v50, %v6224_v6  ;;  %v8390_v56 = vor.u32 %v8826_v29, %v8389_v40  ;;  %v12541_v6 = vpop.permute.xlu0 %5791  ;;  %v8796_v40 = vld [vmem:[%s12779_s5 + $0x8c] sm:$0xf] }
 0x8ae   :  { %6449 = vmatmul.bf16.gmra.mxu0 %v8250_v14 }
 0x8af   :  { %6400 = vmatmul.bf16.gmra.mxu3 %v8374_v35 }
 0x8b2   :  { %v6361_v39 = vpop.f32.mrf.mxu3 }
 0x8b3   :  { %v12519_v4 = vadd.f32 %v6361_v39, %v12311_v34  ;;  %v12521_v2 = vpop.f32.mrf.mxu0  ;;  %v5797_v34 = vpop.permute.xlu1 %5796  ;;  %v8830_v39 = vld [vmem:[%s12779_s5 + $0x194] sm:$0xf0] }
 0x8b4   :  { %v6229_v19 = vadd.f32 %v12343_v10, %v5797_v34  ;;  %v6191_v10 = vadd.f32 %v12162_v18, %v12368_v28  ;;  %v5807_v45 = vpop.permute.xlu0 %5806 }
 0x8b5   :  { %v6234_v28 = vadd.f32 %v12371_v25, %v5807_v45  ;;  %v6196_v25 = vadd.f32 %v12185_v12, %v12394_v31 }
 0x8b6   :  { %v6280_v29 = vadd.f32 %v12347_v38, %v6191_v10  ;;  %v8421_v10 = vld [vmem:[%s12779_s5 + $0x1a8] sm:$0xf] }
 0x8ba   :  { %v6363_v37 = vpop.f32.mrf.mxu3 }
 0x8bb   :  { %v12537_v54 = vadd.f32 %v6363_v37, %v12321_v60  ;;  %v6317_v15 = vpop.f32.mrf.mxu0  ;;  %v8405_v60 = vld [vmem:[%s12779_s5 + $0x188] sm:$0xf] }
 0x8bc   :  { %v12539_v7 = vadd.f32 %v6317_v15, %v6229_v19  ;;  %v8406_v34 = vor.u32 %v8830_v39, %v8405_v60  ;;  %v8834_v60 = vld [vmem:[%s12779_s5 + $0x1b4] sm:$0xf0]  ;;  %v8800_v39 = vld [vmem:[%s12779_s5 + $0xac] sm:$0xf] }
 0x8bd   :  { %v8422_v45 = vor.u32 %v8834_v60, %v8421_v10  ;;  %v8838_v10 = vld [vmem:[%s12779_s5 + $0x1d4] sm:$0xf0]  ;;  %v8804_v60 = vld [vmem:[%s12779_s5 + $0xcc] sm:$0xf] }
 0x8be   :  { %6454 = vmatmul.bf16.gmra.mxu0 %v8266_v51  ;;  %v12568_v51 = vpop.permute.xlu2 %5801 }
 0x8bf   :  { %6405 = vmatmul.bf16.gmra.mxu3 %v8390_v56 }
 0x8c2   :  { %v6366_v35 = vpop.f32.mrf.mxu3 }
 0x8c3   :  { %v12544_v14 = vadd.f32 %v6366_v35, %v12338_v20  ;;  %v12546_v50 = vpop.f32.mrf.mxu0  ;;  %v8279_v20 = vld [vmem:[%s12779_s5 + $0x98] sm:$0xf0] }
 0x8c4   :  { %v8282_v37 = vor.u32 %v8796_v40, %v8279_v20  ;;  %v6285_v40 = vadd.f32 %v12375_v26, %v6196_v25  ;;  %v8437_v25 = vld [vmem:[%s12779_s5 + $0x1c8] sm:$0xf] }
 0x8c6   :  { %v5817_v20 = vpop.permute.xlu2 %5816 }
 0x8c7   :  { %v6239_v31 = vadd.f32 %v12397_v13, %v5817_v20  ;;  %v6201_v13 = vadd.f32 %v12212_v16, %v12420_v36  ;;  %v8438_v20 = vor.u32 %v8838_v10, %v8437_v25 }
 0x8ca   :  { %v6368_v18 = vpop.f32.mrf.mxu3 }
 0x8cb   :  { %v12564_v41 = vadd.f32 %v6368_v18, %v6280_v29  ;;  %v6322_v19 = vpop.f32.mrf.mxu0 }
 0x8cc   :  { %v12566_v56 = vadd.f32 %v6322_v19, %v6234_v28 }
 0x8ce   :  { %6459 = vmatmul.bf16.gmra.mxu0 %v8282_v37  ;;  %v12595_v37 = vpop.permute.xlu1 %5811 }
 0x8cf   :  { %6410 = vmatmul.bf16.gmra.mxu3 %v8406_v34 }
 0x8d2   :  { %v6371_v15 = vpop.f32.mrf.mxu3 }
 0x8d3   :  { %v12571_v35 = vadd.f32 %v6371_v15, %v12364_v59  ;;  %v12573_v38 = vpop.f32.mrf.mxu0  ;;  %v8295_v59 = vld [vmem:[%s12779_s5 + $0xb8] sm:$0xf0] }
 0x8d4   :  { %v8298_v18 = vor.u32 %v8800_v39, %v8295_v59  ;;  %v6290_v39 = vadd.f32 %v12401_v8, %v6201_v13  ;;  %v6206_v8 = vadd.f32 %v12231_v53, %v12439_v55  ;;  %v8808_v13 = vld [vmem:[%s12779_s5 + $0xec] sm:$0xf] }
 0x8d6   :  { %v5827_v59 = vpop.permute.xlu1 %5826  ;;  %v6295_v25 = vadd.f32 %v12424_v23, %v6206_v8  ;;  %v8812_v23 = vld [vmem:[%s12779_s5 + $0x10c] sm:$0xf] }
 0x8d7   :  { %v6244_v36 = vadd.f32 %v12422_v52, %v5827_v59  ;;  %v8453_v52 = vld [vmem:[%s12779_s5 + $0x1e8] sm:$0xf] }
 0x8da   :  { %v6373_v12 = vpop.f32.mrf.mxu3 }
 0x8db   :  { %v12591_v29 = vadd.f32 %v6373_v12, %v6285_v40  ;;  %v6327_v28 = vpop.f32.mrf.mxu0 }
 0x8dc   :  { %v12593_v34 = vadd.f32 %v6327_v28, %v6239_v31 }
 0x8de   :  { %6464 = vmatmul.bf16.gmra.mxu0 %v8298_v18 }
 0x8df   :  { %6415 = vmatmul.bf16.gmra.mxu3 %v8422_v45 }
 0x8e2   :  { %v6376_v19 = vpop.f32.mrf.mxu3 }
 0x8e3   :  { %v12598_v15 = vadd.f32 %v6376_v19, %v12392_v0  ;;  %v12600_v26 = vpop.f32.mrf.mxu0  ;;  %v8311_v0 = vld [vmem:[%s12779_s5 + $0xd8] sm:$0xf0]  ;;  %v8842_v19 = vld [vmem:[%s12779_s5 + $0x1f4] sm:$0xf0] }
 0x8e4   :  { %v8314_v12 = vor.u32 %v8804_v60, %v8311_v0  ;;  %v8454_v55 = vor.u32 %v8842_v19, %v8453_v52  ;;  %v12661_v19 = vpop.permute.xlu2 %5831 }
 0x8ea   :  { %v6378_v16 = vpop.f32.mrf.mxu3 }
 0x8eb   :  { %v12618_v40 = vadd.f32 %v6378_v16, %v6290_v39  ;;  %v6332_v31 = vpop.f32.mrf.mxu0  ;;  %v12647_v16 = vpop.permute.xlu0 %5821 }
 0x8ec   :  { %v12620_v45 = vadd.f32 %v6332_v31, %v6244_v36  ;;  %v6211_v36 = vadd.f32 %v12255_v27, %v12466_v49 }
 0x8ee   :  { %6469 = vmatmul.bf16.gmra.mxu0 %v8314_v12  ;;  %v6300_v12 = vadd.f32 %v12444_v32, %v6211_v36  ;;  %v8359_v36 = vld [vmem:[%s12779_s5 + $0x138] sm:$0xf0] }
 0x8ef   :  { %6420 = vmatmul.bf16.gmra.mxu3 %v8438_v20  ;;  %v8343_v20 = vld [vmem:[%s12779_s5 + $0x118] sm:$0xf0] }
 0x8f2   :  { %v6381_v18 = vpop.f32.mrf.mxu3 }
 0x8f3   :  { %v12623_v28 = vadd.f32 %v6381_v18, %v12418_v1  ;;  %v8327_v1 = vld [vmem:[%s12779_s5 + $0xf8] sm:$0xf0]  ;;  %v12645_v59 = vpop.f32.mrf.mxu0  ;;  %v8346_v18 = vor.u32 %v8812_v23, %v8343_v20  ;;  %v12663_v27 = vpop.permute.xlu0 %5836 }
 0x8f4   :  { %v8330_v60 = vor.u32 %v8808_v13, %v8327_v1 }
 0x8fa   :  { %v6383_v10 = vpop.f32.mrf.mxu3 }
 0x8fb   :  { %v12640_v53 = vadd.f32 %v6383_v10, %v6295_v25  ;;  %v6216_v10 = vadd.f32 %v12282_v22, %v12491_v11 }
 0x8fd   :  { %v6305_v23 = vadd.f32 %v12471_v21, %v6216_v10 }
 0x8fe   :  { %6474 = vmatmul.bf16.gmra.mxu0 %v8330_v60 }
 0x8ff   :  { %6425 = vmatmul.bf16.gmra.mxu3 %v8454_v55 }
 0x902   :  { %v6386_v0 = vpop.f32.mrf.mxu3 }
 0x903   :  { %v12643_v39 = vadd.f32 %v6386_v0, %v12437_v5  ;;  %v12671_v0 = vpop.permute.xlu1 %5841 }
 0x904   :  { %13200 = vst [vmem:[#allocation25_spill] sm:$0xff] %v12671_v0 }
 0x90a   :  { %v6388_v31 = vpop.f32.mrf.mxu3 }
 0x90b   :  { %v12658_v5 = vadd.f32 %v6388_v31, %v6300_v12  ;;  %v6440_v8 = vpop.f32.mrf.mxu0  ;;  %v6629_v42 = vpop.permute.xlu1 %6628 }
 0x90c   :  { %v6441_v52 = vadd.f32 %v6440_v8, %v12469_v33  ;;  %v8816_v33 = vld [vmem:[%s12779_s5 + $0x12c] sm:$0xf] }
 0x90e   :  { %6479 = vmatmul.bf16.gmra.mxu0 %v8346_v18  ;;  %v6520_v13 = vmul.f32 0.2, %v6441_v52  ;;  %v8362_v18 = vor.u32 %v8816_v33, %v8359_v36  ;;  %v8375_v36 = vld [vmem:[%s12779_s5 + $0x158] sm:$0xf0] }
 0x910   :  { %v6552_v55 = vmax.f32 %v6441_v52, %v6520_v13 }
 0x912   :  { %v6391_v49 = vpop.f32.mrf.mxu3 }
 0x913   :  { %v12666_v1 = vadd.f32 %v6391_v49, %v12464_v61  ;;  %v6442_v25 = vpop.f32.mrf.mxu0  ;;  %v6619_v61 = vpop.permute.xlu2 %6618 }
 0x914   :  { %v6443_v32 = vadd.f32 %v6442_v25, %v12487_v57  ;;  %v6624_v57 = vpop.permute.xlu0 %6623  ;;  %v6776_v31 = vmul.f32 %v6619_v61, %v6552_v55 }
 0x916   :  { %v6521_v60 = vmul.f32 0.2, %v6443_v32 }
 0x918   :  { %v6553_v20 = vmax.f32 %v6443_v32, %v6521_v60  ;;  %v6221_v60 = vadd.f32 %v12308_v9, %v12516_v17 }
 0x91a   :  { %v6393_v12 = vpop.f32.mrf.mxu3  ;;  %v6777_v22 = vmul.f32 %v6624_v57, %v6553_v20 }
 0x91b   :  { %v12680_v11 = vadd.f32 %v6393_v12, %v6305_v23  ;;  %v6445_v8 = vpop.f32.mrf.mxu0 }
 0x91c   :  { %v6808_v52 = vadd.f32 %v6777_v22, %v6776_v31  ;;  %v6446_v49 = vadd.f32 %v6445_v8, %v12494_v24  ;;  %v8820_v24 = vld [vmem:[%s12779_s5 + $0x14c] sm:$0xf]  ;;  %v6639_v31 = vpop.permute.xlu0 %6638 }
 0x91e   :  { %v6522_v13 = vmul.f32 0.2, %v6446_v49  ;;  %6484 = vmatmul.bf16.gmra.mxu0 %v8362_v18 }
 0x920   :  { %v6554_v25 = vmax.f32 %v6446_v49, %v6522_v13 }
 0x922   :  { %v6396_v0 = vpop.f32.mrf.mxu3  ;;  %v6778_v62 = vmul.f32 %v6629_v42, %v6554_v25  ;;  %v6310_v42 = vadd.f32 %v12496_v43, %v6221_v60  ;;  %v8824_v25 = vld [vmem:[%s12779_s5 + $0x16c] sm:$0xf] }
 0x923   :  { %v12684_v21 = vadd.f32 %v6396_v0, %v12489_v30  ;;  %v6447_v32 = vpop.f32.mrf.mxu0  ;;  %v6634_v0 = vpop.permute.xlu2 %6633 }
 0x924   :  { %v6809_v10 = vadd.f32 %v6808_v52, %v6778_v62  ;;  %v6448_v55 = vadd.f32 %v6447_v32, %v12512_v3  ;;  %v8378_v3 = vor.u32 %v8820_v24, %v8375_v36 }
 0x926   :  { %v6523_v33 = vmul.f32 0.2, %v6448_v55 }
 0x928   :  { %v6555_v30 = vmax.f32 %v6448_v55, %v6523_v33 }
 0x92a   :  { %v6398_v61 = vpop.f32.mrf.mxu3  ;;  %v6779_v62 = vmul.f32 %v6634_v0, %v6555_v30 }
 0x92b   :  { %v12696_v23 = vadd.f32 %v6398_v61, %v6310_v42  ;;  %v6450_v20 = vpop.f32.mrf.mxu0  ;;  %v6649_v42 = vpop.permute.xlu2 %6648 }
 0x92c   :  { %v6810_v9 = vadd.f32 %v6809_v10, %v6779_v62  ;;  %v6451_v17 = vadd.f32 %v6450_v20, %v12519_v4  ;;  %v8391_v4 = vld [vmem:[%s12779_s5 + $0x178] sm:$0xf0]  ;;  %v6644_v10 = vpop.permute.xlu1 %6643  ;;  %v8828_v20 = vld [vmem:[%s12779_s5 + $0x18c] sm:$0xf] }
 0x92d   :  { %v8394_v60 = vor.u32 %v8824_v25, %v8391_v4 }
 0x92e   :  { %v6524_v57 = vmul.f32 0.2, %v6451_v17  ;;  %6489 = vmatmul.bf16.gmra.mxu0 %v8378_v3 }
 0x930   :  { %v6556_v12 = vmax.f32 %v6451_v17, %v6524_v57 }
 0x932   :  { %v6401_v22 = vpop.f32.mrf.mxu3  ;;  %v6780_v18 = vmul.f32 %v6639_v31, %v6556_v12 }
 0x933   :  { %v12700_v8 = vadd.f32 %v6401_v22, %v12514_v58  ;;  %v6452_v43 = vpop.f32.mrf.mxu0 }
 0x934   :  { %v6811_v52 = vadd.f32 %v6810_v9, %v6780_v18  ;;  %v6453_v49 = vadd.f32 %v6452_v43, %v12537_v54  ;;  %v8407_v9 = vld [vmem:[%s12779_s5 + $0x198] sm:$0xf0] }
 0x935   :  { %v8410_v12 = vor.u32 %v8828_v20, %v8407_v9  ;;  %v8836_v9 = vld [vmem:[%s12779_s5 + $0x1cc] sm:$0xf] }
 0x936   :  { %v6525_v13 = vmul.f32 0.2, %v6453_v49 }
 0x938   :  { %v6557_v32 = vmax.f32 %v6453_v49, %v6525_v13 }
 0x93a   :  { %v6781_v55 = vmul.f32 %v6644_v10, %v6557_v32  ;;  %v8832_v10 = vld [vmem:[%s12779_s5 + $0x1ac] sm:$0xf] }
 0x93b   :  { %v6455_v33 = vpop.f32.mrf.mxu0 }
 0x93c   :  { %v6812_v58 = vadd.f32 %v6811_v52, %v6781_v55  ;;  %v6456_v24 = vadd.f32 %v6455_v33, %v12544_v14  ;;  %v6654_v14 = vpop.permute.xlu0 %6653  ;;  %v6659_v52 = vpop.permute.xlu1 %6658  ;;  %v8423_v55 = vld [vmem:[%s12779_s5 + $0x1b8] sm:$0xf0] }
 0x93e   :  { %v6526_v36 = vmul.f32 0.2, %v6456_v24  ;;  %6494 = vmatmul.bf16.gmra.mxu0 %v8394_v60 }
 0x940   :  { %v6558_v54 = vmax.f32 %v6456_v24, %v6526_v36 }
 0x942   :  { %v6782_v30 = vmul.f32 %v6649_v42, %v6558_v54 }
 0x943   :  { %v6457_v0 = vpop.f32.mrf.mxu0 }
 0x944   :  { %v6813_v61 = vadd.f32 %v6812_v58, %v6782_v30  ;;  %v6458_v62 = vadd.f32 %v6457_v0, %v12564_v41  ;;  %v8426_v58 = vor.u32 %v8832_v10, %v8423_v55  ;;  %v6669_v30 = vpop.permute.xlu0 %6668  ;;  %v8455_v10 = vld [vmem:[%s12779_s5 + $0x1f8] sm:$0xf0] }
 0x946   :  { %v6527_v3 = vmul.f32 0.2, %v6458_v62 }
 0x948   :  { %v6559_v17 = vmax.f32 %v6458_v62, %v6527_v3 }
 0x94a   :  { %v6783_v57 = vmul.f32 %v6654_v14, %v6559_v17  ;;  %v8439_v17 = vld [vmem:[%s12779_s5 + $0x1d8] sm:$0xf0] }
 0x94b   :  { %v6460_v31 = vpop.f32.mrf.mxu0 }
 0x94c   :  { %v6814_v22 = vadd.f32 %v6813_v61, %v6783_v57  ;;  %v6461_v18 = vadd.f32 %v6460_v31, %v12571_v35  ;;  %v6664_v35 = vpop.permute.xlu2 %6663 }
 0x94e   :  { %v6528_v43 = vmul.f32 0.2, %v6461_v18  ;;  %6499 = vmatmul.bf16.gmra.mxu0 %v8410_v12  ;;  %v8442_v12 = vor.u32 %v8836_v9, %v8439_v17 }
 0x950   :  { %v6560_v41 = vmax.f32 %v6461_v18, %v6528_v43 }
 0x952   :  { %v6784_v49 = vmul.f32 %v6659_v52, %v6560_v41 }
 0x953   :  { %v6462_v13 = vpop.f32.mrf.mxu0 }
 0x954   :  { %v6815_v25 = vadd.f32 %v6814_v22, %v6784_v49  ;;  %v6463_v4 = vadd.f32 %v6462_v13, %v12591_v29  ;;  %v6679_v41 = vpop.permute.xlu2 %6678 }
 0x956   :  { %v6529_v32 = vmul.f32 0.2, %v6463_v4 }
 0x958   :  { %v6561_v60 = vmax.f32 %v6463_v4, %v6529_v32  ;;  %v8840_v32 = vld [vmem:[%s12779_s5 + $0x1ec] sm:$0xf] }
 0x95a   :  { %v6785_v33 = vmul.f32 %v6664_v35, %v6561_v60  ;;  %v8458_v35 = vor.u32 %v8840_v32, %v8455_v10 }
 0x95b   :  { %v6465_v24 = vpop.f32.mrf.mxu0 }
 0x95c   :  { %v6816_v36 = vadd.f32 %v6815_v25, %v6785_v33  ;;  %v6466_v54 = vadd.f32 %v6465_v24, %v12598_v15  ;;  %v6674_v15 = vpop.permute.xlu1 %6673 }
 0x95e   :  { %v6530_v42 = vmul.f32 0.2, %v6466_v54  ;;  %6504 = vmatmul.bf16.gmra.mxu0 %v8426_v58 }
 0x960   :  { %v6562_v29 = vmax.f32 %v6466_v54, %v6530_v42 }
 0x962   :  { %v6786_v0 = vmul.f32 %v6669_v30, %v6562_v29 }
 0x963   :  { %v6467_v61 = vpop.f32.mrf.mxu0 }
 0x964   :  { %v6817_v62 = vadd.f32 %v6816_v36, %v6786_v0  ;;  %v6468_v3 = vadd.f32 %v6467_v61, %v12618_v40  ;;  %v6689_v54 = vpop.permute.xlu1 %6688 }
 0x966   :  { %v6531_v20 = vmul.f32 0.2, %v6468_v3 }
 0x968   :  { %v6563_v14 = vmax.f32 %v6468_v3, %v6531_v20  ;;  %v6694_v3 = vpop.permute.xlu2 %6693 }
 0x96a   :  { %v6787_v57 = vmul.f32 %v6674_v15, %v6563_v14 }
 0x96b   :  { %v6470_v31 = vpop.f32.mrf.mxu0 }
 0x96c   :  { %v6818_v22 = vadd.f32 %v6817_v62, %v6787_v57  ;;  %v6471_v18 = vadd.f32 %v6470_v31, %v12623_v28  ;;  %v6684_v28 = vpop.permute.xlu0 %6683 }
 0x96e   :  { %v6532_v43 = vmul.f32 0.2, %v6471_v18  ;;  %6509 = vmatmul.bf16.gmra.mxu0 %v8442_v12 }
 0x970   :  { %v6564_v40 = vmax.f32 %v6471_v18, %v6532_v43 }
 0x972   :  { %v6788_v52 = vmul.f32 %v6679_v41, %v6564_v40  ;;  %v6704_v41 = vpop.permute.xlu1 %6703 }
 0x973   :  { %v6472_v49 = vpop.f32.mrf.mxu0 }
 0x974   :  { %v6819_v13 = vadd.f32 %v6818_v22, %v6788_v52  ;;  %v6473_v25 = vadd.f32 %v6472_v49, %v12640_v53  ;;  %v6403_v52 = vpop.f32.mrf.mxu3 }
 0x976   :  { %v6533_v4 = vmul.f32 0.2, %v6473_v25 }
 0x978   :  { %v6565_v55 = vmax.f32 %v6473_v25, %v6533_v4 }
 0x97a   :  { %v6789_v60 = vmul.f32 %v6684_v28, %v6565_v55 }
 0x97b   :  { %v6475_v33 = vpop.f32.mrf.mxu0 }
 0x97c   :  { %v6820_v58 = vadd.f32 %v6819_v13, %v6789_v60  ;;  %v6476_v24 = vadd.f32 %v6475_v33, %v12643_v39  ;;  %v6699_v39 = vpop.permute.xlu0 %6698 }
 0x97e   :  { %v6534_v36 = vmul.f32 0.2, %v6476_v24  ;;  %6514 = vmatmul.bf16.gmra.mxu0 %v8458_v35  ;;  %v6406_v35 = vpop.f32.mrf.mxu3 }
 0x980   :  { %v6566_v53 = vmax.f32 %v6476_v24, %v6534_v36 }
 0x982   :  { %v6790_v42 = vmul.f32 %v6689_v54, %v6566_v53 }
 0x983   :  { %v6477_v29 = vpop.f32.mrf.mxu0 }
 0x984   :  { %v6821_v30 = vadd.f32 %v6820_v58, %v6790_v42  ;;  %v6478_v0 = vadd.f32 %v6477_v29, %v12658_v5  ;;  %v6714_v58 = vpop.permute.xlu0 %6713 }
 0x986   :  { %v6535_v61 = vmul.f32 0.2, %v6478_v0  ;;  %v6408_v29 = vpop.f32.mrf.mxu3 }
 0x988   :  { %v6567_v62 = vmax.f32 %v6478_v0, %v6535_v61  ;;  %v6719_v61 = vpop.permute.xlu1 %6718 }
 0x98a   :  { %v6791_v20 = vmul.f32 %v6694_v3, %v6567_v62 }
 0x98b   :  { %v6480_v9 = vpop.f32.mrf.mxu0 }
 0x98c   :  { %v6822_v17 = vadd.f32 %v6821_v30, %v6791_v20  ;;  %v6481_v14 = vadd.f32 %v6480_v9, %v12666_v1  ;;  %v6709_v1 = vpop.permute.xlu2 %6708 }
 0x98e   :  { %v6536_v15 = vmul.f32 0.2, %v6481_v14 }
 0x990   :  { %v6568_v57 = vmax.f32 %v6481_v14, %v6536_v15 }
 0x992   :  { %v6792_v12 = vmul.f32 %v6699_v39, %v6568_v57  ;;  %v6411_v57 = vpop.f32.mrf.mxu3 }
 0x993   :  { %v6482_v31 = vpop.f32.mrf.mxu0 }
 0x994   :  { %v6823_v22 = vadd.f32 %v6822_v17, %v6792_v12  ;;  %v6483_v18 = vadd.f32 %v6482_v31, %v12680_v11  ;;  %v6724_v15 = vpop.permute.xlu2 %6723 }
 0x996   :  { %v6537_v43 = vmul.f32 0.2, %v6483_v18 }
 0x998   :  { %v6569_v40 = vmax.f32 %v6483_v18, %v6537_v43  ;;  %v6729_v43 = vpop.permute.xlu0 %6728 }
 0x99a   :  { %v6793_v5 = vmul.f32 %v6704_v41, %v6569_v40 }
 0x99b   :  { %v6485_v49 = vpop.f32.mrf.mxu0 }
 0x99c   :  { %v6824_v13 = vadd.f32 %v6823_v22, %v6793_v5  ;;  %v6486_v25 = vadd.f32 %v6485_v49, %v12684_v21  ;;  %v6226_v21 = vadd.f32 %v12335_v63, %v12541_v6  ;;  %v6413_v5 = vpop.f32.mrf.mxu3 }
 0x99e   :  { %v6538_v4 = vmul.f32 0.2, %v6486_v25  ;;  %v6315_v30 = vadd.f32 %v12521_v2, %v6226_v21  ;;  %v6231_v2 = vadd.f32 %v12361_v48, %v12568_v51 }
 0x9a0   :  { %v6570_v32 = vmax.f32 %v6486_v25, %v6538_v4  ;;  %v6404_v62 = vadd.f32 %v6403_v52, %v6315_v30  ;;  %v6320_v22 = vadd.f32 %v12546_v50, %v6231_v2  ;;  %v6734_v4 = vpop.permute.xlu1 %6733  ;;  %v6236_v50 = vadd.f32 %v12389_v44, %v12595_v37 }
 0x9a2   :  { %v6794_v10 = vmul.f32 %v6709_v1, %v6570_v32  ;;  %v6409_v40 = vadd.f32 %v6408_v29, %v6320_v22  ;;  %v6412_v32 = vadd.f32 %v6411_v57, %v12566_v56 }
 0x9a3   :  { %v6487_v55 = vpop.f32.mrf.mxu0 }
 0x9a4   :  { %v6825_v28 = vadd.f32 %v6824_v13, %v6794_v10  ;;  %v6488_v60 = vadd.f32 %v6487_v55, %v12696_v23  ;;  %v6416_v51 = vpop.f32.mrf.mxu3 }
 0x9a5   :  { %v6417_v29 = vadd.f32 %v6416_v51, %v12593_v34 }
 0x9a6   :  { %v6539_v33 = vmul.f32 0.2, %v6488_v60 }
 0x9a8   :  { %v6571_v11 = vmax.f32 %v6488_v60, %v6539_v33  ;;  %v6325_v60 = vadd.f32 %v12573_v38, %v6236_v50  ;;  %v6739_v33 = vpop.permute.xlu2 %6738  ;;  %v6241_v38 = vadd.f32 %v12415_v47, %v12647_v16 }
 0x9aa   :  { %v6795_v24 = vmul.f32 %v6714_v58, %v6571_v11  ;;  %v6414_v11 = vadd.f32 %v6413_v5, %v6325_v60  ;;  %v6337_v5 = vpop.f32.mrf.mxu1 }
 0x9ab   :  { %v6490_v36 = vpop.f32.mrf.mxu0 }
 0x9ac   :  { %v6826_v53 = vadd.f32 %v6825_v28, %v6795_v24  ;;  %v6491_v54 = vadd.f32 %v6490_v36, %v12700_v8  ;;  %v6407_v8 = vadd.f32 %v6406_v35, %v12539_v7  ;;  %v6418_v56 = vpop.f32.mrf.mxu3 }
 0x9ae   :  { %v6540_v42 = vmul.f32 0.2, %v6491_v54 }
 0x9b0   :  { %v6572_v0 = vmax.f32 %v6491_v54, %v6540_v42  ;;  %v6744_v42 = vpop.permute.xlu0 %6743 }
 0x9b2   :  { %v6796_v23 = vmul.f32 %v6719_v61, %v6572_v0  ;;  %v6339_v60 = vpop.f32.mrf.mxu1 }
 0x9b3   :  { %v6492_v3 = vpop.f32.mrf.mxu0 }
 0x9b4   :  { %v6827_v20 = vadd.f32 %v6826_v53, %v6796_v23  ;;  %v6493_v9 = vadd.f32 %v6492_v3, %v6404_v62  ;;  %v6330_v62 = vadd.f32 %v12600_v26, %v6241_v38  ;;  %v6749_v3 = vpop.permute.xlu1 %6748  ;;  %v6246_v26 = vadd.f32 %v12433_v46, %v12661_v19 }
 0x9b6   :  { %v6541_v17 = vmul.f32 0.2, %v6493_v9  ;;  %v6335_v22 = vadd.f32 %v12645_v59, %v6246_v26  ;;  %v13202_v59 = vld [vmem:[#allocation25_spill] sm:$0xff] }
 0x9b8   :  { %v6573_v14 = vmax.f32 %v6493_v9, %v6541_v17  ;;  %v6419_v9 = vadd.f32 %v6418_v56, %v6330_v62 }
 0x9ba   :  { %v6797_v39 = vmul.f32 %v6724_v15, %v6573_v14 }
 0x9bb   :  { %v6495_v12 = vpop.f32.mrf.mxu0 }
 0x9bc   :  { %v6828_v63 = vadd.f32 %v6827_v20, %v6797_v39  ;;  %v6496_v6 = vadd.f32 %v6495_v12, %v6407_v8  ;;  %v6421_v20 = vpop.f32.mrf.mxu3  ;;  %v6754_v39 = vpop.permute.xlu2 %6753 }
 0x9bd   :  { %v6422_v12 = vadd.f32 %v6421_v20, %v12620_v45 }
 0x9be   :  { %v6542_v31 = vmul.f32 0.2, %v6496_v6 }
 0x9c0   :  { %v6574_v18 = vmax.f32 %v6496_v6, %v6542_v31 }
 0x9c2   :  { %v6798_v41 = vmul.f32 %v6729_v43, %v6574_v18  ;;  %v6759_v43 = vpop.permute.xlu0 %6758 }
 0x9c3   :  { %v6497_v52 = vpop.f32.mrf.mxu0 }
 0x9c4   :  { %v6829_v49 = vadd.f32 %v6828_v63, %v6798_v41  ;;  %v6498_v13 = vadd.f32 %v6497_v52, %v6409_v40  ;;  %v6423_v6 = vpop.f32.mrf.mxu3 }
 0x9c5   :  { %v6424_v40 = vadd.f32 %v6423_v6, %v6335_v22 }
 0x9c6   :  { %v6543_v25 = vmul.f32 0.2, %v6498_v13 }
 0x9c8   :  { %v6575_v7 = vmax.f32 %v6498_v13, %v6543_v25 }
 0x9ca   :  { %v6799_v1 = vmul.f32 %v6734_v4, %v6575_v7 }
 0x9cb   :  { %v6500_v10 = vpop.f32.mrf.mxu0 }
 0x9cc   :  { %v6830_v55 = vadd.f32 %v6829_v49, %v6799_v1  ;;  %v6501_v48 = vadd.f32 %v6500_v10, %v6412_v32  ;;  %v13201_v49 = vld [vmem:[#allocation66_spill] sm:$0xff]  ;;  %v6426_v7 = vpop.f32.mrf.mxu3  ;;  %v6764_v10 = vpop.permute.xlu1 %6763 }
 0x9cd   :  { %v6249_v45 = vadd.f32 %v13201_v49, %v12663_v27 }
 0x9ce   :  { %v6544_v28 = vmul.f32 0.2, %v6501_v48 }
 0x9cf   :  { %v6338_v32 = vadd.f32 %v6337_v5, %v6249_v45 }
 0x9d0   :  { %v6576_v35 = vmax.f32 %v6501_v48, %v6544_v28  ;;  %v13203_v48 = vld [vmem:[#allocation64_spill] sm:$0xff] }
 0x9d1   :  { %v6427_v46 = vadd.f32 %v6426_v7, %v6338_v32  ;;  %v6251_v51 = vadd.f32 %v13203_v48, %v13202_v59 }
 0x9d2   :  { %v6800_v58 = vmul.f32 %v6739_v33, %v6576_v35 }
 0x9d3   :  { %v6502_v24 = vpop.f32.mrf.mxu0 }
 0x9d4   :  { %v6831_v36 = vadd.f32 %v6830_v55, %v6800_v58  ;;  %v6503_v53 = vadd.f32 %v6502_v24, %v6414_v11  ;;  %v6428_v33 = vpop.f32.mrf.mxu3  ;;  %v6340_v11 = vadd.f32 %v6339_v60, %v6251_v51  ;;  %v6769_v58 = vpop.permute.xlu2 %6768 }
 0x9d5   :  { %v6849_v62 = vpop.permute.xlu1 %6848 }
 0x9d6   :  { %v6545_v54 = vmul.f32 0.2, %v6503_v53  ;;  %v6429_v24 = vadd.f32 %v6428_v33, %v6340_v11 }
 0x9d8   :  { %v6577_v21 = vmax.f32 %v6503_v53, %v6545_v54 }
 0x9da   :  { %v6801_v30 = vmul.f32 %v6744_v42, %v6577_v21 }
 0x9db   :  { %v6505_v0 = vpop.f32.mrf.mxu0 }
 0x9dc   :  { %v6832_v61 = vadd.f32 %v6831_v36, %v6801_v30  ;;  %v6506_v44 = vadd.f32 %v6505_v0, %v6417_v29  ;;  %v6774_v29 = vpop.permute.xlu0 %6773 }
 0x9de   :  { %v6546_v37 = vmul.f32 0.2, %v6506_v44 }
 0x9e0   :  { %v6578_v23 = vmax.f32 %v6506_v44, %v6546_v37 }
 0x9e2   :  { %v6802_v17 = vmul.f32 %v6749_v3, %v6578_v23  ;;  %v6851_v3 = vperm.slane %v6849_v62, 0 }
 0x9e3   :  { %v6507_v14 = vpop.f32.mrf.mxu0 }
 0x9e4   :  { %v6833_v15 = vadd.f32 %v6832_v61, %v6802_v17  ;;  %v6508_v57 = vadd.f32 %v6507_v14, %v6419_v9 }
 0x9e6   :  { %v6547_v8 = vmul.f32 0.2, %v6508_v57 }
 0x9e8   :  { %v6579_v34 = vmax.f32 %v6508_v57, %v6547_v8 }
 0x9ea   :  { %v6803_v63 = vmul.f32 %v6754_v39, %v6579_v34 }
 0x9eb   :  { %v6510_v2 = vpop.f32.mrf.mxu0 }
 0x9ec   :  { %v6834_v47 = vadd.f32 %v6833_v15, %v6803_v63  ;;  %v6511_v16 = vadd.f32 %v6510_v2, %v6422_v12 }
 0x9ee   :  { %v6548_v31 = vmul.f32 0.2, %v6511_v16 }
 0x9f0   :  { %v6580_v18 = vmax.f32 %v6511_v16, %v6548_v31 }
 0x9f2   :  { %v6804_v41 = vmul.f32 %v6759_v43, %v6580_v18 }
 0x9f3   :  { %v6512_v52 = vpop.f32.mrf.mxu0 }
 0x9f4   :  { %v6835_v13 = vadd.f32 %v6834_v47, %v6804_v41  ;;  %v6513_v25 = vadd.f32 %v6512_v52, %v6424_v40 }
 0x9f6   :  { %v6549_v4 = vmul.f32 0.2, %v6513_v25 }
 0x9f8   :  { %v6581_v1 = vmax.f32 %v6513_v25, %v6549_v4 }
 0x9fa   :  { %v6805_v19 = vmul.f32 %v6764_v10, %v6581_v1 }
 0x9fb   :  { %v6515_v55 = vpop.f32.mrf.mxu0 }
 0x9fc   :  { %v6836_v50 = vadd.f32 %v6835_v13, %v6805_v19  ;;  %v6516_v28 = vadd.f32 %v6515_v55, %v6427_v46 }
 0x9fe   :  { %v6550_v35 = vmul.f32 0.2, %v6516_v28 }
 0xa00   :  { %v6582_v27 = vmax.f32 %v6516_v28, %v6550_v35 }
 0xa02   :  { %v6806_v36 = vmul.f32 %v6769_v58, %v6582_v27 }
 0xa03   :  { %v6517_v53 = vpop.f32.mrf.mxu0 }
 0xa04   :  { %v6837_v54 = vadd.f32 %v6836_v50, %v6806_v36  ;;  %v6518_v56 = vadd.f32 %v6517_v53, %v6429_v24 }
 0xa06   :  { %v6551_v21 = vmul.f32 0.2, %v6518_v56 }
 0xa08   :  { %v6583_v42 = vmax.f32 %v6518_v56, %v6551_v21 }
 0xa0a   :  { %v6807_v30 = vmul.f32 %v6774_v29, %v6583_v42 }
 0xa0c   :  { %v6838_v0 = vadd.f32 %v6837_v54, %v6807_v30 }
 0xa0e   :  { %v6839_v61 = vrot.slane %v6838_v0, 4 }
 0xa10   :  { %v6840_v44 = vadd.f32 %v6839_v61, %v6838_v0 }
 0xa12   :  { %v6841_v38 = vrot.slane %v6840_v44, 2 }
 0xa14   :  { %v6842_v37 = vadd.f32 %v6841_v38, %v6840_v44 }
 0xa16   :  { %v6843_v23 = vrot.slane %v6842_v37, 1 }
 0xa18   :  { %v6844_v20 = vadd.f32 %v6843_v23, %v6842_v37 }
 0xa1a   :  { %v6852_v9 = vadd.f32 %v6851_v3, %v6844_v20 }
 0xa1c   :  { %6853 = vst [vmem:[%s12783_s9] sm:$0x1] %v6852_v9 }
 0xa1d   :  { %6858 = vsyncpa [#allocation4], 1 }

</bundles_post_ra>
